<compile_context>
chip_gen: v6e
topology: v6e:2x2x1
jax: 0.10.0
libtpu: 0.0.40
codegen_flags: <defaults>
</compile_context>

<pallas_src>
import math

import jax
import jax.numpy as jnp
from jax.experimental import pallas as pl
from jax.experimental.pallas import tpu as pltpu


PARAM_ORDER = (
    "emb_w", "emb_b",
    "e_qkv_w", "e_qkv_b", "e_ao_w", "e_ao_b",
    "e_ln1_g", "e_ln1_b",
    "e_ff1_w", "e_ff1_b", "e_ff2_w", "e_ff2_b",
    "e_ln2_g", "e_ln2_b",
    "e_norm_g", "e_norm_b",
    "d_sa_qkv_w", "d_sa_qkv_b", "d_sa_o_w", "d_sa_o_b",
    "d_ca_q_w", "d_ca_q_b", "d_ca_kv_w", "d_ca_kv_b", "d_ca_o_w", "d_ca_o_b",
    "d_ln1_g", "d_ln1_b", "d_ln2_g", "d_ln2_b", "d_ln3_g", "d_ln3_b",
    "d_ff1_w", "d_ff1_b", "d_ff2_w", "d_ff2_b",
    "d_norm_g", "d_norm_b",
    "fc_w", "fc_b",
)


# ----------------------------------------------------------------------------
# Fused forward: one pallas_call for the whole model
# ----------------------------------------------------------------------------
def transformer_forward(packed, x, *, nhead, num_layers):
    """x: (B, S, input_dim).  Returns (B, output_dim)."""
    B, S, In = x.shape
    D = packed["emb_w"].shape[1]
    Out = packed["fc_w"].shape[1]
    H = nhead
    Dh = D // H
    L = num_layers
    BS = B * S

    if x.dtype != jnp.float32:          # inputs.float() in the PyTorch module
        x = x.astype(jnp.float32)

    weights = [packed[name] for name in PARAM_ORDER]

    def kernel(*refs):
        x_ref = refs[0]
        o_ref = refs[-1]
        p = dict(zip(PARAM_ORDER, refs[1:-1]))

        def mm(a, w, b=None):
            # MXU matmul: cast the f32 activation to the (possibly bf16) weight
            # dtype at the MXU input only; accumulate in f32.
            r = jnp.dot(a.astype(w.dtype), w, preferred_element_type=jnp.float32)
            return r if b is None else r + b

        def layer_norm(v, g, b):
            mu = jnp.mean(v, axis=-1, keepdims=True)
            var = jnp.mean(jnp.square(v - mu), axis=-1, keepdims=True)
            return (v - mu) * jax.lax.rsqrt(var + 1e-5) * g + b

        def split_heads(y2d):
            # (B*S, D) -> (B*H, S, Dh) via static sublane/lane slices.
            return jnp.stack(
                [y2d[b * S:(b + 1) * S, h * Dh:(h + 1) * Dh]
                 for b in range(B) for h in range(H)], axis=0)

        def merge_heads(ctx):
            # (B*H, S, Dh) -> (B*S, D); heads concatenated head-major along
            # lanes, matching PyTorch MHA's concat layout.
            return jnp.concatenate(
                [jnp.concatenate([ctx[b * H + h] for h in range(H)], axis=-1)
                 for b in range(B)], axis=0)

        def attend(q2d, k2d, v2d, ow, ob):
            # q2d already carries 1/sqrt(Dh) (folded into packed Q weights/bias).
            q = split_heads(q2d)
            k = split_heads(k2d)
            v = split_heads(v2d)
            s = jnp.einsum("gqe,gke->gqk", q, k,
                           preferred_element_type=jnp.float32)
            s = s - jnp.max(s, axis=-1, keepdims=True)
            e = jnp.exp(s)
            inv = pl.reciprocal(jnp.sum(e, axis=-1, keepdims=True), approx=True)
            ctx = jnp.einsum("gqk,gke->gqe", e * inv, v,
                             preferred_element_type=jnp.float32)
            # Fused head-sum: one lane-dense (B*S, D) @ (D, D) output projection.
            return mm(merge_heads(ctx), ow, ob)

        def ffn(v, w1, b1, w2, b2):
            h1 = jnp.maximum(mm(v, w1, b1), 0.0)
            return mm(h1, w2, b2)

        # Fold batch into the row dim -> every projection is one matmul.
        x2d = jnp.concatenate([x_ref[b] for b in range(B)], axis=0)   # (B*S, In)
        emb = mm(x2d, p["emb_w"][...], p["emb_b"][...])               # (B*S, D)

        # ---------------- encoder stack ----------------
        mem = emb
        for l in range(L):
            qkv = mm(mem, p["e_qkv_w"][l], p["e_qkv_b"][l:l + 1])    # (B*S, 3D)
            att = attend(qkv[:, :D], qkv[:, D:2 * D], qkv[:, 2 * D:],
                         p["e_ao_w"][l], p["e_ao_b"][l:l + 1])
            mem = layer_norm(mem + att,
                             p["e_ln1_g"][l:l + 1], p["e_ln1_b"][l:l + 1])
            f = ffn(mem, p["e_ff1_w"][l], p["e_ff1_b"][l:l + 1],
                    p["e_ff2_w"][l], p["e_ff2_b"][l:l + 1])
            mem = layer_norm(mem + f,
                             p["e_ln2_g"][l:l + 1], p["e_ln2_b"][l:l + 1])
        mem = layer_norm(mem, p["e_norm_g"][...], p["e_norm_b"][...])

        # ---------------- decoder stack ----------------
        out = emb                       # transformer(src=embedded, tgt=embedded)
        for l in range(L):
            qkv = mm(out, p["d_sa_qkv_w"][l], p["d_sa_qkv_b"][l:l + 1])
            att = attend(qkv[:, :D], qkv[:, D:2 * D], qkv[:, 2 * D:],
                         p["d_sa_o_w"][l], p["d_sa_o_b"][l:l + 1])
            out = layer_norm(out + att,
                             p["d_ln1_g"][l:l + 1], p["d_ln1_b"][l:l + 1])

            q2d = mm(out, p["d_ca_q_w"][l], p["d_ca_q_b"][l:l + 1])   # (B*S, D)
            kv = mm(mem, p["d_ca_kv_w"][l], p["d_ca_kv_b"][l:l + 1])  # (B*S, 2D)
            att = attend(q2d, kv[:, :D], kv[:, D:],
                         p["d_ca_o_w"][l], p["d_ca_o_b"][l:l + 1])
            out = layer_norm(out + att,
                             p["d_ln2_g"][l:l + 1], p["d_ln2_b"][l:l + 1])

            f = ffn(out, p["d_ff1_w"][l], p["d_ff1_b"][l:l + 1],
                    p["d_ff2_w"][l], p["d_ff2_b"][l:l + 1])
            out = layer_norm(out + f,
                             p["d_ln3_g"][l:l + 1], p["d_ln3_b"][l:l + 1])
        out = layer_norm(out, p["d_norm_g"][...], p["d_norm_b"][...])

        # Last time step per batch element + fc head, fused into the same kernel.
        last = jnp.concatenate(
            [out[b * S + S - 1:b * S + S, :] for b in range(B)], axis=0)  # (B, D)
        logits = mm(last, p["fc_w"][...], p["fc_b"][...])                 # (B, Out)
        o_ref[...] = logits.astype(o_ref.dtype)

    # Whole batch in one grid step (grid=(1,)); at these sizes everything is
    # resident in VMEM.  (On v7x one could split B over a 2-step "parallel"
    # grid to use both TensorCores -- irrelevant at toy sizes.)
    in_specs = [pl.BlockSpec((B, S, In), lambda i: (0, 0, 0))]
    for w in weights:
        in_specs.append(pl.BlockSpec(w.shape, lambda i, _n=w.ndim: (0,) * _n))

    out = pl.pallas_call(
        kernel,
        out_shape=jax.ShapeDtypeStruct((B, Out), jnp.float32),
        grid=(1,),
        in_specs=in_specs,
        out_specs=pl.BlockSpec((B, Out), lambda i: (0, 0)),
        compiler_params=pltpu.CompilerParams(
            dimension_semantics=("arbitrary",)),
    )(x, *weights)
    return out


# ----------------------------------------------------------------------------
# One-time re-layout of PyTorch-convention weights into the kernel layout
# (pre-transposed, lane-dense (D, nD) projections, layer-stacked, scale folded
# into Q, optional bf16 for the matmul operands) -- done once at init.
# ----------------------------------------------------------------------------
def pack_params(params, nhead, weight_dtype=jnp.float32):
    D = params["embed_w"].shape[0]
    H = nhead
    Dh = D // H
    scale = 1.0 / math.sqrt(Dh)
    wd = weight_dtype

    def qkv_w(in_w):        # (3D, D) -> (D, 3D); Q columns pre-scaled
        return jnp.concatenate([in_w[:D].T * scale, in_w[D:].T], axis=1).astype(wd)

    def qkv_b(in_b):        # (3D,); Q part pre-scaled
        return jnp.concatenate([in_b[:D] * scale, in_b[D:]], axis=0)

    def q_w(in_w):          # cross-attn query: (D, D), pre-scaled
        return (in_w[:D].T * scale).astype(wd)

    def q_b(in_b):
        return in_b[:D] * scale

    def kv_w(in_w):         # cross-attn key/value: (D, 2D)
        return in_w[D:].T.astype(wd)

    def kv_b(in_b):
        return in_b[D:]

    def o_w(out_w):         # (D, D), rows in head-major (h, e) order
        return out_w.T.astype(wd)

    enc = params["enc_layers"]
    dec = params["dec_layers"]
    stk = lambda xs: jnp.stack(xs, axis=0)

    return {
        "emb_w": params["embed_w"].T.astype(wd),
        "emb_b": params["embed_b"].reshape(1, -1),
        "e_qkv_w": stk([qkv_w(l["sa_in_w"]) for l in enc]),
        "e_qkv_b": stk([qkv_b(l["sa_in_b"]) for l in enc]),
        "e_ao_w": stk([o_w(l["sa_out_w"]) for l in enc]),
        "e_ao_b": stk([l["sa_out_b"] for l in enc]),
        "e_ln1_g": stk([l["ln1_g"] for l in enc]),
        "e_ln1_b": stk([l["ln1_b"] for l in enc]),
        "e_ff1_w": stk([l["ff_w1"].T.astype(wd) for l in enc]),
        "e_ff1_b": stk([l["ff_b1"] for l in enc]),
        "e_ff2_w": stk([l["ff_w2"].T.astype(wd) for l in enc]),
        "e_ff2_b": stk([l["ff_b2"] for l in enc]),
        "e_ln2_g": stk([l["ln2_g"] for l in enc]),
        "e_ln2_b": stk([l["ln2_b"] for l in enc]),
        "e_norm_g": params["enc_norm_g"].reshape(1, -1),
        "e_norm_b": params["enc_norm_b"].reshape(1, -1),
        "d_sa_qkv_w": stk([qkv_w(l["sa_in_w"]) for l in dec]),
        "d_sa_qkv_b": stk([qkv_b(l["sa_in_b"]) for l in dec]),
        "d_sa_o_w": stk([o_w(l["sa_out_w"]) for l in dec]),
        "d_sa_o_b": stk([l["sa_out_b"] for l in dec]),
        "d_ca_q_w": stk([q_w(l["ca_in_w"]) for l in dec]),
        "d_ca_q_b": stk([q_b(l["ca_in_b"]) for l in dec]),
        "d_ca_kv_w": stk([kv_w(l["ca_in_w"]) for l in dec]),
        "d_ca_kv_b": stk([kv_b(l["ca_in_b"]) for l in dec]),
        "d_ca_o_w": stk([o_w(l["ca_out_w"]) for l in dec]),
        "d_ca_o_b": stk([l["ca_out_b"] for l in dec]),
        "d_ln1_g": stk([l["ln1_g"] for l in dec]),
        "d_ln1_b": stk([l["ln1_b"] for l in dec]),
        "d_ln2_g": stk([l["ln2_g"] for l in dec]),
        "d_ln2_b": stk([l["ln2_b"] for l in dec]),
        "d_ln3_g": stk([l["ln3_g"] for l in dec]),
        "d_ln3_b": stk([l["ln3_b"] for l in dec]),
        "d_ff1_w": stk([l["ff_w1"].T.astype(wd) for l in dec]),
        "d_ff1_b": stk([l["ff_b1"] for l in dec]),
        "d_ff2_w": stk([l["ff_w2"].T.astype(wd) for l in dec]),
        "d_ff2_b": stk([l["ff_b2"] for l in dec]),
        "d_norm_g": params["dec_norm_g"].reshape(1, -1),
        "d_norm_b": params["dec_norm_b"].reshape(1, -1),
        "fc_w": params["fc_w"].T.astype(wd),
        "fc_b": params["fc_b"].reshape(1, -1),
    }


# ----------------------------------------------------------------------------
# Deterministic parameter init (PyTorch-convention shapes)
# ----------------------------------------------------------------------------
def init_params(key, input_dim, output_dim, d_model, num_layers, dff):
    keys = iter(jax.random.split(key, 4096))

    def lin(out_d, in_d):
        w = jax.random.normal(next(keys), (out_d, in_d), jnp.float32) * (1.0 / math.sqrt(in_d))
        b = jax.random.normal(next(keys), (out_d,), jnp.float32) * 0.01
        return w, b

    def mha_params(prefix):
        in_w, in_b = lin(3 * d_model, d_model)
        out_w, out_b = lin(d_model, d_model)
        return {f"{prefix}_in_w": in_w, f"{prefix}_in_b": in_b,
                f"{prefix}_out_w": out_w, f"{prefix}_out_b": out_b}

    def ln_params(prefix):
        return {f"{prefix}_g": jnp.ones((d_model,), jnp.float32),
                f"{prefix}_b": jnp.zeros((d_model,), jnp.float32)}

    def ffn_params():
        w1, b1 = lin(dff, d_model)
        w2, b2 = lin(d_model, dff)
        return {"ff_w1": w1, "ff_b1": b1, "ff_w2": w2, "ff_b2": b2}

    params = {}
    params["embed_w"], params["embed_b"] = lin(d_model, input_dim)
    params["enc_layers"] = []
    for _ in range(num_layers):
        lyr = {}
        lyr.update(mha_params("sa"))
        lyr.update(ffn_params())
        lyr.update(ln_params("ln1"))
        lyr.update(ln_params("ln2"))
        params["enc_layers"].append(lyr)
    params["dec_layers"] = []
    for _ in range(num_layers):
        lyr = {}
        lyr.update(mha_params("sa"))
        lyr.update(mha_params("ca"))
        lyr.update(ffn_params())
        lyr.update(ln_params("ln1"))
        lyr.update(ln_params("ln2"))
        lyr.update(ln_params("ln3"))
        params["dec_layers"].append(lyr)
    params["enc_norm_g"] = jnp.ones((d_model,), jnp.float32)
    params["enc_norm_b"] = jnp.zeros((d_model,), jnp.float32)
    params["dec_norm_g"] = jnp.ones((d_model,), jnp.float32)
    params["dec_norm_b"] = jnp.zeros((d_model,), jnp.float32)
    params["fc_w"], params["fc_b"] = lin(output_dim, d_model)
    return params


if __name__ == "__main__":
    # Small shapes consistent with TransformerModel(input_dim=12, output_dim=2, ...)
    B, S = 2, 8
    INPUT_DIM, OUTPUT_DIM = 12, 2
    D_MODEL, NHEAD, NLAYERS, DFF = 32, 4, 2, 64

    key = jax.random.PRNGKey(0)
    pkey, xkey = jax.random.split(key)
    params = init_params(pkey, INPUT_DIM, OUTPUT_DIM, D_MODEL, NLAYERS, DFF)
    # bf16 matmul weights (halves VMEM/DMA, feeds bf16 MXU on v6e/v7x);
    # biases / LayerNorm params and all elementwise math stay f32.
    packed = pack_params(params, NHEAD, weight_dtype=jnp.bfloat16)
    x = jax.random.normal(xkey, (B, S, INPUT_DIM), jnp.float32)

    fwd = jax.jit(lambda p, inp: transformer_forward(p, inp, nhead=NHEAD,
                                                     num_layers=NLAYERS))
    logits = fwd(packed, x)
    jax.block_until_ready(logits)
    assert logits.shape == (B, OUTPUT_DIM)
    assert bool(jnp.all(jnp.isfinite(logits)))
    print("KERNEL_OK")
</pallas_src>

<mosaic_0001>
module attributes {stable_mosaic.version = 11 : i64} {
  func.func @kernel(%arg0: i32, %arg1: memref<2x8x12xf32, #tpu.memory_space<vmem>>, %arg2: memref<12x32xbf16, #tpu.memory_space<vmem>>, %arg3: memref<1x32xf32, #tpu.memory_space<vmem>>, %arg4: memref<2x32x96xbf16, #tpu.memory_space<vmem>>, %arg5: memref<2x96xf32, #tpu.memory_space<vmem>>, %arg6: memref<2x32x32xbf16, #tpu.memory_space<vmem>>, %arg7: memref<2x32xf32, #tpu.memory_space<vmem>>, %arg8: memref<2x32xf32, #tpu.memory_space<vmem>>, %arg9: memref<2x32xf32, #tpu.memory_space<vmem>>, %arg10: memref<2x32x64xbf16, #tpu.memory_space<vmem>>, %arg11: memref<2x64xf32, #tpu.memory_space<vmem>>, %arg12: memref<2x64x32xbf16, #tpu.memory_space<vmem>>, %arg13: memref<2x32xf32, #tpu.memory_space<vmem>>, %arg14: memref<2x32xf32, #tpu.memory_space<vmem>>, %arg15: memref<2x32xf32, #tpu.memory_space<vmem>>, %arg16: memref<1x32xf32, #tpu.memory_space<vmem>>, %arg17: memref<1x32xf32, #tpu.memory_space<vmem>>, %arg18: memref<2x32x96xbf16, #tpu.memory_space<vmem>>, %arg19: memref<2x96xf32, #tpu.memory_space<vmem>>, %arg20: memref<2x32x32xbf16, #tpu.memory_space<vmem>>, %arg21: memref<2x32xf32, #tpu.memory_space<vmem>>, %arg22: memref<2x32x32xbf16, #tpu.memory_space<vmem>>, %arg23: memref<2x32xf32, #tpu.memory_space<vmem>>, %arg24: memref<2x32x64xbf16, #tpu.memory_space<vmem>>, %arg25: memref<2x64xf32, #tpu.memory_space<vmem>>, %arg26: memref<2x32x32xbf16, #tpu.memory_space<vmem>>, %arg27: memref<2x32xf32, #tpu.memory_space<vmem>>, %arg28: memref<2x32xf32, #tpu.memory_space<vmem>>, %arg29: memref<2x32xf32, #tpu.memory_space<vmem>>, %arg30: memref<2x32xf32, #tpu.memory_space<vmem>>, %arg31: memref<2x32xf32, #tpu.memory_space<vmem>>, %arg32: memref<2x32xf32, #tpu.memory_space<vmem>>, %arg33: memref<2x32xf32, #tpu.memory_space<vmem>>, %arg34: memref<2x32x64xbf16, #tpu.memory_space<vmem>>, %arg35: memref<2x64xf32, #tpu.memory_space<vmem>>, %arg36: memref<2x64x32xbf16, #tpu.memory_space<vmem>>, %arg37: memref<2x32xf32, #tpu.memory_space<vmem>>, %arg38: memref<1x32xf32, #tpu.memory_space<vmem>>, %arg39: memref<1x32xf32, #tpu.memory_space<vmem>>, %arg40: memref<32x2xbf16, #tpu.memory_space<vmem>>, %arg41: memref<1x2xf32, #tpu.memory_space<vmem>>, %arg42: memref<2x2xf32, #tpu.memory_space<vmem>>) attributes {dimension_semantics = [#tpu.dimension_semantics<arbitrary>], iteration_bounds = array<i64: 1>, scalar_prefetch = 0 : i64, scratch_operands = 0 : i64, tpu.core_type = #tpu.core_type<tc>, window_params = [{pipeline_mode = #tpu.pipeline_mode<synchronous>, transform_indices = @transform_0, window_bounds = array<i64: 2, 8, 12>}, {pipeline_mode = #tpu.pipeline_mode<synchronous>, transform_indices = @transform_1, window_bounds = array<i64: 12, 32>}, {pipeline_mode = #tpu.pipeline_mode<synchronous>, transform_indices = @transform_2, window_bounds = array<i64: 1, 32>}, {pipeline_mode = #tpu.pipeline_mode<synchronous>, transform_indices = @transform_3, window_bounds = array<i64: 2, 32, 96>}, {pipeline_mode = #tpu.pipeline_mode<synchronous>, transform_indices = @transform_4, window_bounds = array<i64: 2, 96>}, {pipeline_mode = #tpu.pipeline_mode<synchronous>, transform_indices = @transform_5, window_bounds = array<i64: 2, 32, 32>}, {pipeline_mode = #tpu.pipeline_mode<synchronous>, transform_indices = @transform_6, window_bounds = array<i64: 2, 32>}, {pipeline_mode = #tpu.pipeline_mode<synchronous>, transform_indices = @transform_7, window_bounds = array<i64: 2, 32>}, {pipeline_mode = #tpu.pipeline_mode<synchronous>, transform_indices = @transform_8, window_bounds = array<i64: 2, 32>}, {pipeline_mode = #tpu.pipeline_mode<synchronous>, transform_indices = @transform_9, window_bounds = array<i64: 2, 32, 64>}, {pipeline_mode = #tpu.pipeline_mode<synchronous>, transform_indices = @transform_10, window_bounds = array<i64: 2, 64>}, {pipeline_mode = #tpu.pipeline_mode<synchronous>, transform_indices = @transform_11, window_bounds = array<i64: 2, 64, 32>}, {pipeline_mode = #tpu.pipeline_mode<synchronous>, transform_indices = @transform_12, window_bounds = array<i64: 2, 32>}, {pipeline_mode = #tpu.pipeline_mode<synchronous>, transform_indices = @transform_13, window_bounds = array<i64: 2, 32>}, {pipeline_mode = #tpu.pipeline_mode<synchronous>, transform_indices = @transform_14, window_bounds = array<i64: 2, 32>}, {pipeline_mode = #tpu.pipeline_mode<synchronous>, transform_indices = @transform_15, window_bounds = array<i64: 1, 32>}, {pipeline_mode = #tpu.pipeline_mode<synchronous>, transform_indices = @transform_16, window_bounds = array<i64: 1, 32>}, {pipeline_mode = #tpu.pipeline_mode<synchronous>, transform_indices = @transform_17, window_bounds = array<i64: 2, 32, 96>}, {pipeline_mode = #tpu.pipeline_mode<synchronous>, transform_indices = @transform_18, window_bounds = array<i64: 2, 96>}, {pipeline_mode = #tpu.pipeline_mode<synchronous>, transform_indices = @transform_19, window_bounds = array<i64: 2, 32, 32>}, {pipeline_mode = #tpu.pipeline_mode<synchronous>, transform_indices = @transform_20, window_bounds = array<i64: 2, 32>}, {pipeline_mode = #tpu.pipeline_mode<synchronous>, transform_indices = @transform_21, window_bounds = array<i64: 2, 32, 32>}, {pipeline_mode = #tpu.pipeline_mode<synchronous>, transform_indices = @transform_22, window_bounds = array<i64: 2, 32>}, {pipeline_mode = #tpu.pipeline_mode<synchronous>, transform_indices = @transform_23, window_bounds = array<i64: 2, 32, 64>}, {pipeline_mode = #tpu.pipeline_mode<synchronous>, transform_indices = @transform_24, window_bounds = array<i64: 2, 64>}, {pipeline_mode = #tpu.pipeline_mode<synchronous>, transform_indices = @transform_25, window_bounds = array<i64: 2, 32, 32>}, {pipeline_mode = #tpu.pipeline_mode<synchronous>, transform_indices = @transform_26, window_bounds = array<i64: 2, 32>}, {pipeline_mode = #tpu.pipeline_mode<synchronous>, transform_indices = @transform_27, window_bounds = array<i64: 2, 32>}, {pipeline_mode = #tpu.pipeline_mode<synchronous>, transform_indices = @transform_28, window_bounds = array<i64: 2, 32>}, {pipeline_mode = #tpu.pipeline_mode<synchronous>, transform_indices = @transform_29, window_bounds = array<i64: 2, 32>}, {pipeline_mode = #tpu.pipeline_mode<synchronous>, transform_indices = @transform_30, window_bounds = array<i64: 2, 32>}, {pipeline_mode = #tpu.pipeline_mode<synchronous>, transform_indices = @transform_31, window_bounds = array<i64: 2, 32>}, {pipeline_mode = #tpu.pipeline_mode<synchronous>, transform_indices = @transform_32, window_bounds = array<i64: 2, 32>}, {pipeline_mode = #tpu.pipeline_mode<synchronous>, transform_indices = @transform_33, window_bounds = array<i64: 2, 32, 64>}, {pipeline_mode = #tpu.pipeline_mode<synchronous>, transform_indices = @transform_34, window_bounds = array<i64: 2, 64>}, {pipeline_mode = #tpu.pipeline_mode<synchronous>, transform_indices = @transform_35, window_bounds = array<i64: 2, 64, 32>}, {pipeline_mode = #tpu.pipeline_mode<synchronous>, transform_indices = @transform_36, window_bounds = array<i64: 2, 32>}, {pipeline_mode = #tpu.pipeline_mode<synchronous>, transform_indices = @transform_37, window_bounds = array<i64: 1, 32>}, {pipeline_mode = #tpu.pipeline_mode<synchronous>, transform_indices = @transform_38, window_bounds = array<i64: 1, 32>}, {pipeline_mode = #tpu.pipeline_mode<synchronous>, transform_indices = @transform_39, window_bounds = array<i64: 32, 2>}, {pipeline_mode = #tpu.pipeline_mode<synchronous>, transform_indices = @transform_40, window_bounds = array<i64: 1, 2>}, {pipeline_mode = #tpu.pipeline_mode<synchronous>, transform_indices = @transform_41, window_bounds = array<i64: 2, 2>}]} {
    %c0 = arith.constant 0 : index
    %c0_0 = arith.constant 0 : index
    %c0_1 = arith.constant 0 : index
    %0 = vector.load %arg1[%c0, %c0_0, %c0_1] : memref<2x8x12xf32, #tpu.memory_space<vmem>>, vector<1x8x12xf32>
    %1 = vector.shape_cast %0 : vector<1x8x12xf32> to vector<8x12xf32>
    %c1 = arith.constant 1 : index
    %c0_2 = arith.constant 0 : index
    %c0_3 = arith.constant 0 : index
    %2 = vector.load %arg1[%c1, %c0_2, %c0_3] : memref<2x8x12xf32, #tpu.memory_space<vmem>>, vector<1x8x12xf32>
    %3 = vector.shape_cast %2 : vector<1x8x12xf32> to vector<8x12xf32>
    %4 = tpu.concatenate %1, %3 in 0 : vector<8x12xf32>, vector<8x12xf32> -> vector<16x12xf32>
    %c0_4 = arith.constant 0 : index
    %c0_5 = arith.constant 0 : index
    %5 = vector.load %arg2[%c0_4, %c0_5] : memref<12x32xbf16, #tpu.memory_space<vmem>>, vector<12x32xbf16>
    %c0_6 = arith.constant 0 : index
    %c0_7 = arith.constant 0 : index
    %6 = vector.load %arg3[%c0_6, %c0_7] : memref<1x32xf32, #tpu.memory_space<vmem>>, vector<1x32xf32>
    %7 = arith.truncf %4 : vector<16x12xf32> to vector<16x12xbf16>
    %cst = arith.constant dense<0.000000e+00> : vector<16x32xf32>
    %8 = tpu.matmul %7, %5, %cst {dimension_numbers = #tpu.dot_dimension_numbers<[1], [0], [0], [1], [0, 0, 1, 1], [], []>} : vector<16x12xbf16>, vector<12x32xbf16>, vector<16x32xf32> -> vector<16x32xf32>
    %9 = vector.broadcast %6 : vector<1x32xf32> to vector<16x32xf32>
    %10 = arith.addf %8, %9 : vector<16x32xf32>
    %c0_8 = arith.constant 0 : index
    %c0_9 = arith.constant 0 : index
    %c0_10 = arith.constant 0 : index
    %11 = vector.load %arg4[%c0_8, %c0_9, %c0_10] : memref<2x32x96xbf16, #tpu.memory_space<vmem>>, vector<1x32x96xbf16>
    %12 = vector.shape_cast %11 : vector<1x32x96xbf16> to vector<32x96xbf16>
    %c0_11 = arith.constant 0 : index
    %c0_12 = arith.constant 0 : index
    %13 = vector.load %arg5[%c0_11, %c0_12] : memref<2x96xf32, #tpu.memory_space<vmem>>, vector<1x96xf32>
    %14 = arith.truncf %10 : vector<16x32xf32> to vector<16x32xbf16>
    %cst_13 = arith.constant dense<0.000000e+00> : vector<16x96xf32>
    %15 = tpu.matmul %14, %12, %cst_13 {dimension_numbers = #tpu.dot_dimension_numbers<[1], [0], [0], [1], [0, 0, 1, 1], [], []>} : vector<16x32xbf16>, vector<32x96xbf16>, vector<16x96xf32> -> vector<16x96xf32>
    %16 = vector.broadcast %13 : vector<1x96xf32> to vector<16x96xf32>
    %17 = arith.addf %15, %16 : vector<16x96xf32>
    %18 = vector.extract_strided_slice %17 {offsets = [0, 0], sizes = [16, 32], strides = [1, 1]} : vector<16x96xf32> to vector<16x32xf32>
    %19 = vector.extract_strided_slice %17 {offsets = [0, 32], sizes = [16, 32], strides = [1, 1]} : vector<16x96xf32> to vector<16x32xf32>
    %20 = vector.extract_strided_slice %17 {offsets = [0, 64], sizes = [16, 32], strides = [1, 1]} : vector<16x96xf32> to vector<16x32xf32>
    %c0_14 = arith.constant 0 : index
    %c0_15 = arith.constant 0 : index
    %c0_16 = arith.constant 0 : index
    %21 = vector.load %arg6[%c0_14, %c0_15, %c0_16] : memref<2x32x32xbf16, #tpu.memory_space<vmem>>, vector<1x32x32xbf16>
    %22 = vector.shape_cast %21 : vector<1x32x32xbf16> to vector<32x32xbf16>
    %c0_17 = arith.constant 0 : index
    %c0_18 = arith.constant 0 : index
    %23 = vector.load %arg7[%c0_17, %c0_18] : memref<2x32xf32, #tpu.memory_space<vmem>>, vector<1x32xf32>
    %24 = vector.extract_strided_slice %18 {offsets = [0, 0], sizes = [8, 8], strides = [1, 1]} : vector<16x32xf32> to vector<8x8xf32>
    %25 = vector.extract_strided_slice %18 {offsets = [0, 8], sizes = [8, 8], strides = [1, 1]} : vector<16x32xf32> to vector<8x8xf32>
    %26 = vector.extract_strided_slice %18 {offsets = [0, 16], sizes = [8, 8], strides = [1, 1]} : vector<16x32xf32> to vector<8x8xf32>
    %27 = vector.extract_strided_slice %18 {offsets = [0, 24], sizes = [8, 8], strides = [1, 1]} : vector<16x32xf32> to vector<8x8xf32>
    %28 = vector.extract_strided_slice %18 {offsets = [8, 0], sizes = [8, 8], strides = [1, 1]} : vector<16x32xf32> to vector<8x8xf32>
    %29 = vector.extract_strided_slice %18 {offsets = [8, 8], sizes = [8, 8], strides = [1, 1]} : vector<16x32xf32> to vector<8x8xf32>
    %30 = vector.extract_strided_slice %18 {offsets = [8, 16], sizes = [8, 8], strides = [1, 1]} : vector<16x32xf32> to vector<8x8xf32>
    %31 = vector.extract_strided_slice %18 {offsets = [8, 24], sizes = [8, 8], strides = [1, 1]} : vector<16x32xf32> to vector<8x8xf32>
    %32 = vector.shape_cast %24 : vector<8x8xf32> to vector<1x8x8xf32>
    %33 = vector.shape_cast %25 : vector<8x8xf32> to vector<1x8x8xf32>
    %34 = vector.shape_cast %26 : vector<8x8xf32> to vector<1x8x8xf32>
    %35 = vector.shape_cast %27 : vector<8x8xf32> to vector<1x8x8xf32>
    %36 = vector.shape_cast %28 : vector<8x8xf32> to vector<1x8x8xf32>
    %37 = vector.shape_cast %29 : vector<8x8xf32> to vector<1x8x8xf32>
    %38 = vector.shape_cast %30 : vector<8x8xf32> to vector<1x8x8xf32>
    %39 = vector.shape_cast %31 : vector<8x8xf32> to vector<1x8x8xf32>
    %40 = tpu.concatenate %32, %33, %34, %35, %36, %37, %38, %39 in 0 : vector<1x8x8xf32>, vector<1x8x8xf32>, vector<1x8x8xf32>, vector<1x8x8xf32>, vector<1x8x8xf32>, vector<1x8x8xf32>, vector<1x8x8xf32>, vector<1x8x8xf32> -> vector<8x8x8xf32>
    %41 = vector.extract_strided_slice %19 {offsets = [0, 0], sizes = [8, 8], strides = [1, 1]} : vector<16x32xf32> to vector<8x8xf32>
    %42 = vector.extract_strided_slice %19 {offsets = [0, 8], sizes = [8, 8], strides = [1, 1]} : vector<16x32xf32> to vector<8x8xf32>
    %43 = vector.extract_strided_slice %19 {offsets = [0, 16], sizes = [8, 8], strides = [1, 1]} : vector<16x32xf32> to vector<8x8xf32>
    %44 = vector.extract_strided_slice %19 {offsets = [0, 24], sizes = [8, 8], strides = [1, 1]} : vector<16x32xf32> to vector<8x8xf32>
    %45 = vector.extract_strided_slice %19 {offsets = [8, 0], sizes = [8, 8], strides = [1, 1]} : vector<16x32xf32> to vector<8x8xf32>
    %46 = vector.extract_strided_slice %19 {offsets = [8, 8], sizes = [8, 8], strides = [1, 1]} : vector<16x32xf32> to vector<8x8xf32>
    %47 = vector.extract_strided_slice %19 {offsets = [8, 16], sizes = [8, 8], strides = [1, 1]} : vector<16x32xf32> to vector<8x8xf32>
    %48 = vector.extract_strided_slice %19 {offsets = [8, 24], sizes = [8, 8], strides = [1, 1]} : vector<16x32xf32> to vector<8x8xf32>
    %49 = vector.shape_cast %41 : vector<8x8xf32> to vector<1x8x8xf32>
    %50 = vector.shape_cast %42 : vector<8x8xf32> to vector<1x8x8xf32>
    %51 = vector.shape_cast %43 : vector<8x8xf32> to vector<1x8x8xf32>
    %52 = vector.shape_cast %44 : vector<8x8xf32> to vector<1x8x8xf32>
    %53 = vector.shape_cast %45 : vector<8x8xf32> to vector<1x8x8xf32>
    %54 = vector.shape_cast %46 : vector<8x8xf32> to vector<1x8x8xf32>
    %55 = vector.shape_cast %47 : vector<8x8xf32> to vector<1x8x8xf32>
    %56 = vector.shape_cast %48 : vector<8x8xf32> to vector<1x8x8xf32>
    %57 = tpu.concatenate %49, %50, %51, %52, %53, %54, %55, %56 in 0 : vector<1x8x8xf32>, vector<1x8x8xf32>, vector<1x8x8xf32>, vector<1x8x8xf32>, vector<1x8x8xf32>, vector<1x8x8xf32>, vector<1x8x8xf32>, vector<1x8x8xf32> -> vector<8x8x8xf32>
    %58 = vector.extract_strided_slice %20 {offsets = [0, 0], sizes = [8, 8], strides = [1, 1]} : vector<16x32xf32> to vector<8x8xf32>
    %59 = vector.extract_strided_slice %20 {offsets = [0, 8], sizes = [8, 8], strides = [1, 1]} : vector<16x32xf32> to vector<8x8xf32>
    %60 = vector.extract_strided_slice %20 {offsets = [0, 16], sizes = [8, 8], strides = [1, 1]} : vector<16x32xf32> to vector<8x8xf32>
    %61 = vector.extract_strided_slice %20 {offsets = [0, 24], sizes = [8, 8], strides = [1, 1]} : vector<16x32xf32> to vector<8x8xf32>
    %62 = vector.extract_strided_slice %20 {offsets = [8, 0], sizes = [8, 8], strides = [1, 1]} : vector<16x32xf32> to vector<8x8xf32>
    %63 = vector.extract_strided_slice %20 {offsets = [8, 8], sizes = [8, 8], strides = [1, 1]} : vector<16x32xf32> to vector<8x8xf32>
    %64 = vector.extract_strided_slice %20 {offsets = [8, 16], sizes = [8, 8], strides = [1, 1]} : vector<16x32xf32> to vector<8x8xf32>
    %65 = vector.extract_strided_slice %20 {offsets = [8, 24], sizes = [8, 8], strides = [1, 1]} : vector<16x32xf32> to vector<8x8xf32>
    %66 = vector.shape_cast %58 : vector<8x8xf32> to vector<1x8x8xf32>
    %67 = vector.shape_cast %59 : vector<8x8xf32> to vector<1x8x8xf32>
    %68 = vector.shape_cast %60 : vector<8x8xf32> to vector<1x8x8xf32>
    %69 = vector.shape_cast %61 : vector<8x8xf32> to vector<1x8x8xf32>
    %70 = vector.shape_cast %62 : vector<8x8xf32> to vector<1x8x8xf32>
    %71 = vector.shape_cast %63 : vector<8x8xf32> to vector<1x8x8xf32>
    %72 = vector.shape_cast %64 : vector<8x8xf32> to vector<1x8x8xf32>
    %73 = vector.shape_cast %65 : vector<8x8xf32> to vector<1x8x8xf32>
    %74 = tpu.concatenate %66, %67, %68, %69, %70, %71, %72, %73 in 0 : vector<1x8x8xf32>, vector<1x8x8xf32>, vector<1x8x8xf32>, vector<1x8x8xf32>, vector<1x8x8xf32>, vector<1x8x8xf32>, vector<1x8x8xf32>, vector<1x8x8xf32> -> vector<8x8x8xf32>
    "tpu.trace_start"() <{level = 10 : i32, message = "gqe,gke->gqk"}> : () -> ()
    %cst_19 = arith.constant dense<0.000000e+00> : vector<8x8x8xf32>
    %75 = tpu.matmul %40, %57, %cst_19 {dimension_numbers = #tpu.dot_dimension_numbers<[2], [2], [1], [1], [0, 0, 0, 1, 1, 1], [0], [0]>} : vector<8x8x8xf32>, vector<8x8x8xf32>, vector<8x8x8xf32> -> vector<8x8x8xf32>
    "tpu.trace_stop"() : () -> ()
    %cst_20 = arith.constant dense<0xFF800000> : vector<8x8xf32>
    %76 = vector.multi_reduction <maximumf>, %75, %cst_20 [2] : vector<8x8x8xf32> to vector<8x8xf32>
    %77 = vector.shape_cast %76 : vector<8x8xf32> to vector<8x8x1xf32>
    %78 = vector.broadcast %77 : vector<8x8x1xf32> to vector<8x8x8xf32>
    %79 = arith.subf %75, %78 : vector<8x8x8xf32>
    %80 = math.exp %79 : vector<8x8x8xf32>
    %cst_21 = arith.constant dense<0.000000e+00> : vector<8x8xf32>
    %81 = vector.multi_reduction <add>, %80, %cst_21 [2] : vector<8x8x8xf32> to vector<8x8xf32>
    %82 = vector.shape_cast %81 : vector<8x8xf32> to vector<8x8x1xf32>
    %83 = tpu.reciprocal %82 {approx = true} : vector<8x8x1xf32> -> vector<8x8x1xf32>
    %84 = vector.broadcast %83 : vector<8x8x1xf32> to vector<8x8x8xf32>
    %85 = arith.mulf %80, %84 : vector<8x8x8xf32>
    "tpu.trace_start"() <{level = 10 : i32, message = "gqk,gke->gqe"}> : () -> ()
    %cst_22 = arith.constant dense<0.000000e+00> : vector<8x8x8xf32>
    %86 = tpu.matmul %85, %74, %cst_22 {dimension_numbers = #tpu.dot_dimension_numbers<[2], [1], [1], [2], [0, 0, 0, 1, 1, 2], [0], [0]>} : vector<8x8x8xf32>, vector<8x8x8xf32>, vector<8x8x8xf32> -> vector<8x8x8xf32>
    "tpu.trace_stop"() : () -> ()
    %87 = vector.extract_strided_slice %86 {offsets = [0, 0, 0], sizes = [1, 8, 8], strides = [1, 1, 1]} : vector<8x8x8xf32> to vector<1x8x8xf32>
    %88 = vector.shape_cast %87 : vector<1x8x8xf32> to vector<8x8xf32>
    %89 = vector.extract_strided_slice %86 {offsets = [1, 0, 0], sizes = [1, 8, 8], strides = [1, 1, 1]} : vector<8x8x8xf32> to vector<1x8x8xf32>
    %90 = vector.shape_cast %89 : vector<1x8x8xf32> to vector<8x8xf32>
    %91 = vector.extract_strided_slice %86 {offsets = [2, 0, 0], sizes = [1, 8, 8], strides = [1, 1, 1]} : vector<8x8x8xf32> to vector<1x8x8xf32>
    %92 = vector.shape_cast %91 : vector<1x8x8xf32> to vector<8x8xf32>
    %93 = vector.extract_strided_slice %86 {offsets = [3, 0, 0], sizes = [1, 8, 8], strides = [1, 1, 1]} : vector<8x8x8xf32> to vector<1x8x8xf32>
    %94 = vector.shape_cast %93 : vector<1x8x8xf32> to vector<8x8xf32>
    %95 = tpu.concatenate %88, %90, %92, %94 in 1 : vector<8x8xf32>, vector<8x8xf32>, vector<8x8xf32>, vector<8x8xf32> -> vector<8x32xf32>
    %96 = vector.extract_strided_slice %86 {offsets = [4, 0, 0], sizes = [1, 8, 8], strides = [1, 1, 1]} : vector<8x8x8xf32> to vector<1x8x8xf32>
    %97 = vector.shape_cast %96 : vector<1x8x8xf32> to vector<8x8xf32>
    %98 = vector.extract_strided_slice %86 {offsets = [5, 0, 0], sizes = [1, 8, 8], strides = [1, 1, 1]} : vector<8x8x8xf32> to vector<1x8x8xf32>
    %99 = vector.shape_cast %98 : vector<1x8x8xf32> to vector<8x8xf32>
    %100 = vector.extract_strided_slice %86 {offsets = [6, 0, 0], sizes = [1, 8, 8], strides = [1, 1, 1]} : vector<8x8x8xf32> to vector<1x8x8xf32>
    %101 = vector.shape_cast %100 : vector<1x8x8xf32> to vector<8x8xf32>
    %102 = vector.extract_strided_slice %86 {offsets = [7, 0, 0], sizes = [1, 8, 8], strides = [1, 1, 1]} : vector<8x8x8xf32> to vector<1x8x8xf32>
    %103 = vector.shape_cast %102 : vector<1x8x8xf32> to vector<8x8xf32>
    %104 = tpu.concatenate %97, %99, %101, %103 in 1 : vector<8x8xf32>, vector<8x8xf32>, vector<8x8xf32>, vector<8x8xf32> -> vector<8x32xf32>
    %105 = tpu.concatenate %95, %104 in 0 : vector<8x32xf32>, vector<8x32xf32> -> vector<16x32xf32>
    %106 = arith.truncf %105 : vector<16x32xf32> to vector<16x32xbf16>
    %cst_23 = arith.constant dense<0.000000e+00> : vector<16x32xf32>
    %107 = tpu.matmul %106, %22, %cst_23 {dimension_numbers = #tpu.dot_dimension_numbers<[1], [0], [0], [1], [0, 0, 1, 1], [], []>} : vector<16x32xbf16>, vector<32x32xbf16>, vector<16x32xf32> -> vector<16x32xf32>
    %108 = vector.broadcast %23 : vector<1x32xf32> to vector<16x32xf32>
    %109 = arith.addf %107, %108 : vector<16x32xf32>
    %110 = arith.addf %10, %109 : vector<16x32xf32>
    %c0_24 = arith.constant 0 : index
    %c0_25 = arith.constant 0 : index
    %111 = vector.load %arg8[%c0_24, %c0_25] : memref<2x32xf32, #tpu.memory_space<vmem>>, vector<1x32xf32>
    %c0_26 = arith.constant 0 : index
    %c0_27 = arith.constant 0 : index
    %112 = vector.load %arg9[%c0_26, %c0_27] : memref<2x32xf32, #tpu.memory_space<vmem>>, vector<1x32xf32>
    %cst_28 = arith.constant dense<0.000000e+00> : vector<16xf32>
    %113 = vector.multi_reduction <add>, %110, %cst_28 [1] : vector<16x32xf32> to vector<16xf32>
    %114 = vector.shape_cast %113 : vector<16xf32> to vector<16x1xf32>
    %cst_29 = arith.constant 3.200000e+01 : f32
    %115 = vector.broadcast %cst_29 : f32 to vector<16x1xf32>
    %116 = arith.divf %114, %115 : vector<16x1xf32>
    %117 = vector.broadcast %116 : vector<16x1xf32> to vector<16x32xf32>
    %118 = arith.subf %110, %117 : vector<16x32xf32>
    %119 = arith.mulf %118, %118 : vector<16x32xf32>
    %cst_30 = arith.constant dense<0.000000e+00> : vector<16xf32>
    %120 = vector.multi_reduction <add>, %119, %cst_30 [1] : vector<16x32xf32> to vector<16xf32>
    %121 = vector.shape_cast %120 : vector<16xf32> to vector<16x1xf32>
    %cst_31 = arith.constant 3.200000e+01 : f32
    %122 = vector.broadcast %cst_31 : f32 to vector<16x1xf32>
    %123 = arith.divf %121, %122 : vector<16x1xf32>
    %124 = vector.broadcast %116 : vector<16x1xf32> to vector<16x32xf32>
    %125 = arith.subf %110, %124 : vector<16x32xf32>
    %cst_32 = arith.constant 9.99999974E-6 : f32
    %126 = vector.broadcast %cst_32 : f32 to vector<16x1xf32>
    %127 = arith.addf %123, %126 : vector<16x1xf32>
    %128 = math.rsqrt %127 : vector<16x1xf32>
    %129 = vector.broadcast %128 : vector<16x1xf32> to vector<16x32xf32>
    %130 = arith.mulf %125, %129 : vector<16x32xf32>
    %131 = vector.broadcast %111 : vector<1x32xf32> to vector<16x32xf32>
    %132 = arith.mulf %130, %131 : vector<16x32xf32>
    %133 = vector.broadcast %112 : vector<1x32xf32> to vector<16x32xf32>
    %134 = arith.addf %132, %133 : vector<16x32xf32>
    %c0_33 = arith.constant 0 : index
    %c0_34 = arith.constant 0 : index
    %c0_35 = arith.constant 0 : index
    %135 = vector.load %arg10[%c0_33, %c0_34, %c0_35] : memref<2x32x64xbf16, #tpu.memory_space<vmem>>, vector<1x32x64xbf16>
    %136 = vector.shape_cast %135 : vector<1x32x64xbf16> to vector<32x64xbf16>
    %c0_36 = arith.constant 0 : index
    %c0_37 = arith.constant 0 : index
    %137 = vector.load %arg11[%c0_36, %c0_37] : memref<2x64xf32, #tpu.memory_space<vmem>>, vector<1x64xf32>
    %c0_38 = arith.constant 0 : index
    %c0_39 = arith.constant 0 : index
    %c0_40 = arith.constant 0 : index
    %138 = vector.load %arg12[%c0_38, %c0_39, %c0_40] : memref<2x64x32xbf16, #tpu.memory_space<vmem>>, vector<1x64x32xbf16>
    %139 = vector.shape_cast %138 : vector<1x64x32xbf16> to vector<64x32xbf16>
    %c0_41 = arith.constant 0 : index
    %c0_42 = arith.constant 0 : index
    %140 = vector.load %arg13[%c0_41, %c0_42] : memref<2x32xf32, #tpu.memory_space<vmem>>, vector<1x32xf32>
    %141 = arith.truncf %134 : vector<16x32xf32> to vector<16x32xbf16>
    %cst_43 = arith.constant dense<0.000000e+00> : vector<16x64xf32>
    %142 = tpu.matmul %141, %136, %cst_43 {dimension_numbers = #tpu.dot_dimension_numbers<[1], [0], [0], [1], [0, 0, 1, 1], [], []>} : vector<16x32xbf16>, vector<32x64xbf16>, vector<16x64xf32> -> vector<16x64xf32>
    %143 = vector.broadcast %137 : vector<1x64xf32> to vector<16x64xf32>
    %144 = arith.addf %142, %143 : vector<16x64xf32>
    %cst_44 = arith.constant 0.000000e+00 : f32
    %145 = vector.broadcast %cst_44 : f32 to vector<16x64xf32>
    %146 = arith.maximumf %144, %145 : vector<16x64xf32>
    %147 = arith.truncf %146 : vector<16x64xf32> to vector<16x64xbf16>
    %cst_45 = arith.constant dense<0.000000e+00> : vector<16x32xf32>
    %148 = tpu.matmul %147, %139, %cst_45 {dimension_numbers = #tpu.dot_dimension_numbers<[1], [0], [0], [1], [0, 0, 1, 1], [], []>} : vector<16x64xbf16>, vector<64x32xbf16>, vector<16x32xf32> -> vector<16x32xf32>
    %149 = vector.broadcast %140 : vector<1x32xf32> to vector<16x32xf32>
    %150 = arith.addf %148, %149 : vector<16x32xf32>
    %151 = arith.addf %134, %150 : vector<16x32xf32>
    %c0_46 = arith.constant 0 : index
    %c0_47 = arith.constant 0 : index
    %152 = vector.load %arg14[%c0_46, %c0_47] : memref<2x32xf32, #tpu.memory_space<vmem>>, vector<1x32xf32>
    %c0_48 = arith.constant 0 : index
    %c0_49 = arith.constant 0 : index
    %153 = vector.load %arg15[%c0_48, %c0_49] : memref<2x32xf32, #tpu.memory_space<vmem>>, vector<1x32xf32>
    %cst_50 = arith.constant dense<0.000000e+00> : vector<16xf32>
    %154 = vector.multi_reduction <add>, %151, %cst_50 [1] : vector<16x32xf32> to vector<16xf32>
    %155 = vector.shape_cast %154 : vector<16xf32> to vector<16x1xf32>
    %cst_51 = arith.constant 3.200000e+01 : f32
    %156 = vector.broadcast %cst_51 : f32 to vector<16x1xf32>
    %157 = arith.divf %155, %156 : vector<16x1xf32>
    %158 = vector.broadcast %157 : vector<16x1xf32> to vector<16x32xf32>
    %159 = arith.subf %151, %158 : vector<16x32xf32>
    %160 = arith.mulf %159, %159 : vector<16x32xf32>
    %cst_52 = arith.constant dense<0.000000e+00> : vector<16xf32>
    %161 = vector.multi_reduction <add>, %160, %cst_52 [1] : vector<16x32xf32> to vector<16xf32>
    %162 = vector.shape_cast %161 : vector<16xf32> to vector<16x1xf32>
    %cst_53 = arith.constant 3.200000e+01 : f32
    %163 = vector.broadcast %cst_53 : f32 to vector<16x1xf32>
    %164 = arith.divf %162, %163 : vector<16x1xf32>
    %165 = vector.broadcast %157 : vector<16x1xf32> to vector<16x32xf32>
    %166 = arith.subf %151, %165 : vector<16x32xf32>
    %cst_54 = arith.constant 9.99999974E-6 : f32
    %167 = vector.broadcast %cst_54 : f32 to vector<16x1xf32>
    %168 = arith.addf %164, %167 : vector<16x1xf32>
    %169 = math.rsqrt %168 : vector<16x1xf32>
    %170 = vector.broadcast %169 : vector<16x1xf32> to vector<16x32xf32>
    %171 = arith.mulf %166, %170 : vector<16x32xf32>
    %172 = vector.broadcast %152 : vector<1x32xf32> to vector<16x32xf32>
    %173 = arith.mulf %171, %172 : vector<16x32xf32>
    %174 = vector.broadcast %153 : vector<1x32xf32> to vector<16x32xf32>
    %175 = arith.addf %173, %174 : vector<16x32xf32>
    %c1_55 = arith.constant 1 : index
    %c0_56 = arith.constant 0 : index
    %c0_57 = arith.constant 0 : index
    %176 = vector.load %arg4[%c1_55, %c0_56, %c0_57] : memref<2x32x96xbf16, #tpu.memory_space<vmem>>, vector<1x32x96xbf16>
    %177 = vector.shape_cast %176 : vector<1x32x96xbf16> to vector<32x96xbf16>
    %c1_58 = arith.constant 1 : index
    %c0_59 = arith.constant 0 : index
    %178 = vector.load %arg5[%c1_58, %c0_59] : memref<2x96xf32, #tpu.memory_space<vmem>>, vector<1x96xf32>
    %179 = arith.truncf %175 : vector<16x32xf32> to vector<16x32xbf16>
    %cst_60 = arith.constant dense<0.000000e+00> : vector<16x96xf32>
    %180 = tpu.matmul %179, %177, %cst_60 {dimension_numbers = #tpu.dot_dimension_numbers<[1], [0], [0], [1], [0, 0, 1, 1], [], []>} : vector<16x32xbf16>, vector<32x96xbf16>, vector<16x96xf32> -> vector<16x96xf32>
    %181 = vector.broadcast %178 : vector<1x96xf32> to vector<16x96xf32>
    %182 = arith.addf %180, %181 : vector<16x96xf32>
    %183 = vector.extract_strided_slice %182 {offsets = [0, 0], sizes = [16, 32], strides = [1, 1]} : vector<16x96xf32> to vector<16x32xf32>
    %184 = vector.extract_strided_slice %182 {offsets = [0, 32], sizes = [16, 32], strides = [1, 1]} : vector<16x96xf32> to vector<16x32xf32>
    %185 = vector.extract_strided_slice %182 {offsets = [0, 64], sizes = [16, 32], strides = [1, 1]} : vector<16x96xf32> to vector<16x32xf32>
    %c1_61 = arith.constant 1 : index
    %c0_62 = arith.constant 0 : index
    %c0_63 = arith.constant 0 : index
    %186 = vector.load %arg6[%c1_61, %c0_62, %c0_63] : memref<2x32x32xbf16, #tpu.memory_space<vmem>>, vector<1x32x32xbf16>
    %187 = vector.shape_cast %186 : vector<1x32x32xbf16> to vector<32x32xbf16>
    %c1_64 = arith.constant 1 : index
    %c0_65 = arith.constant 0 : index
    %188 = vector.load %arg7[%c1_64, %c0_65] : memref<2x32xf32, #tpu.memory_space<vmem>>, vector<1x32xf32>
    %189 = vector.extract_strided_slice %183 {offsets = [0, 0], sizes = [8, 8], strides = [1, 1]} : vector<16x32xf32> to vector<8x8xf32>
    %190 = vector.extract_strided_slice %183 {offsets = [0, 8], sizes = [8, 8], strides = [1, 1]} : vector<16x32xf32> to vector<8x8xf32>
    %191 = vector.extract_strided_slice %183 {offsets = [0, 16], sizes = [8, 8], strides = [1, 1]} : vector<16x32xf32> to vector<8x8xf32>
    %192 = vector.extract_strided_slice %183 {offsets = [0, 24], sizes = [8, 8], strides = [1, 1]} : vector<16x32xf32> to vector<8x8xf32>
    %193 = vector.extract_strided_slice %183 {offsets = [8, 0], sizes = [8, 8], strides = [1, 1]} : vector<16x32xf32> to vector<8x8xf32>
    %194 = vector.extract_strided_slice %183 {offsets = [8, 8], sizes = [8, 8], strides = [1, 1]} : vector<16x32xf32> to vector<8x8xf32>
    %195 = vector.extract_strided_slice %183 {offsets = [8, 16], sizes = [8, 8], strides = [1, 1]} : vector<16x32xf32> to vector<8x8xf32>
    %196 = vector.extract_strided_slice %183 {offsets = [8, 24], sizes = [8, 8], strides = [1, 1]} : vector<16x32xf32> to vector<8x8xf32>
    %197 = vector.shape_cast %189 : vector<8x8xf32> to vector<1x8x8xf32>
    %198 = vector.shape_cast %190 : vector<8x8xf32> to vector<1x8x8xf32>
    %199 = vector.shape_cast %191 : vector<8x8xf32> to vector<1x8x8xf32>
    %200 = vector.shape_cast %192 : vector<8x8xf32> to vector<1x8x8xf32>
    %201 = vector.shape_cast %193 : vector<8x8xf32> to vector<1x8x8xf32>
    %202 = vector.shape_cast %194 : vector<8x8xf32> to vector<1x8x8xf32>
    %203 = vector.shape_cast %195 : vector<8x8xf32> to vector<1x8x8xf32>
    %204 = vector.shape_cast %196 : vector<8x8xf32> to vector<1x8x8xf32>
    %205 = tpu.concatenate %197, %198, %199, %200, %201, %202, %203, %204 in 0 : vector<1x8x8xf32>, vector<1x8x8xf32>, vector<1x8x8xf32>, vector<1x8x8xf32>, vector<1x8x8xf32>, vector<1x8x8xf32>, vector<1x8x8xf32>, vector<1x8x8xf32> -> vector<8x8x8xf32>
    %206 = vector.extract_strided_slice %184 {offsets = [0, 0], sizes = [8, 8], strides = [1, 1]} : vector<16x32xf32> to vector<8x8xf32>
    %207 = vector.extract_strided_slice %184 {offsets = [0, 8], sizes = [8, 8], strides = [1, 1]} : vector<16x32xf32> to vector<8x8xf32>
    %208 = vector.extract_strided_slice %184 {offsets = [0, 16], sizes = [8, 8], strides = [1, 1]} : vector<16x32xf32> to vector<8x8xf32>
    %209 = vector.extract_strided_slice %184 {offsets = [0, 24], sizes = [8, 8], strides = [1, 1]} : vector<16x32xf32> to vector<8x8xf32>
    %210 = vector.extract_strided_slice %184 {offsets = [8, 0], sizes = [8, 8], strides = [1, 1]} : vector<16x32xf32> to vector<8x8xf32>
    %211 = vector.extract_strided_slice %184 {offsets = [8, 8], sizes = [8, 8], strides = [1, 1]} : vector<16x32xf32> to vector<8x8xf32>
    %212 = vector.extract_strided_slice %184 {offsets = [8, 16], sizes = [8, 8], strides = [1, 1]} : vector<16x32xf32> to vector<8x8xf32>
    %213 = vector.extract_strided_slice %184 {offsets = [8, 24], sizes = [8, 8], strides = [1, 1]} : vector<16x32xf32> to vector<8x8xf32>
    %214 = vector.shape_cast %206 : vector<8x8xf32> to vector<1x8x8xf32>
    %215 = vector.shape_cast %207 : vector<8x8xf32> to vector<1x8x8xf32>
    %216 = vector.shape_cast %208 : vector<8x8xf32> to vector<1x8x8xf32>
    %217 = vector.shape_cast %209 : vector<8x8xf32> to vector<1x8x8xf32>
    %218 = vector.shape_cast %210 : vector<8x8xf32> to vector<1x8x8xf32>
    %219 = vector.shape_cast %211 : vector<8x8xf32> to vector<1x8x8xf32>
    %220 = vector.shape_cast %212 : vector<8x8xf32> to vector<1x8x8xf32>
    %221 = vector.shape_cast %213 : vector<8x8xf32> to vector<1x8x8xf32>
    %222 = tpu.concatenate %214, %215, %216, %217, %218, %219, %220, %221 in 0 : vector<1x8x8xf32>, vector<1x8x8xf32>, vector<1x8x8xf32>, vector<1x8x8xf32>, vector<1x8x8xf32>, vector<1x8x8xf32>, vector<1x8x8xf32>, vector<1x8x8xf32> -> vector<8x8x8xf32>
    %223 = vector.extract_strided_slice %185 {offsets = [0, 0], sizes = [8, 8], strides = [1, 1]} : vector<16x32xf32> to vector<8x8xf32>
    %224 = vector.extract_strided_slice %185 {offsets = [0, 8], sizes = [8, 8], strides = [1, 1]} : vector<16x32xf32> to vector<8x8xf32>
    %225 = vector.extract_strided_slice %185 {offsets = [0, 16], sizes = [8, 8], strides = [1, 1]} : vector<16x32xf32> to vector<8x8xf32>
    %226 = vector.extract_strided_slice %185 {offsets = [0, 24], sizes = [8, 8], strides = [1, 1]} : vector<16x32xf32> to vector<8x8xf32>
    %227 = vector.extract_strided_slice %185 {offsets = [8, 0], sizes = [8, 8], strides = [1, 1]} : vector<16x32xf32> to vector<8x8xf32>
    %228 = vector.extract_strided_slice %185 {offsets = [8, 8], sizes = [8, 8], strides = [1, 1]} : vector<16x32xf32> to vector<8x8xf32>
    %229 = vector.extract_strided_slice %185 {offsets = [8, 16], sizes = [8, 8], strides = [1, 1]} : vector<16x32xf32> to vector<8x8xf32>
    %230 = vector.extract_strided_slice %185 {offsets = [8, 24], sizes = [8, 8], strides = [1, 1]} : vector<16x32xf32> to vector<8x8xf32>
    %231 = vector.shape_cast %223 : vector<8x8xf32> to vector<1x8x8xf32>
    %232 = vector.shape_cast %224 : vector<8x8xf32> to vector<1x8x8xf32>
    %233 = vector.shape_cast %225 : vector<8x8xf32> to vector<1x8x8xf32>
    %234 = vector.shape_cast %226 : vector<8x8xf32> to vector<1x8x8xf32>
    %235 = vector.shape_cast %227 : vector<8x8xf32> to vector<1x8x8xf32>
    %236 = vector.shape_cast %228 : vector<8x8xf32> to vector<1x8x8xf32>
    %237 = vector.shape_cast %229 : vector<8x8xf32> to vector<1x8x8xf32>
    %238 = vector.shape_cast %230 : vector<8x8xf32> to vector<1x8x8xf32>
    %239 = tpu.concatenate %231, %232, %233, %234, %235, %236, %237, %238 in 0 : vector<1x8x8xf32>, vector<1x8x8xf32>, vector<1x8x8xf32>, vector<1x8x8xf32>, vector<1x8x8xf32>, vector<1x8x8xf32>, vector<1x8x8xf32>, vector<1x8x8xf32> -> vector<8x8x8xf32>
    "tpu.trace_start"() <{level = 10 : i32, message = "gqe,gke->gqk"}> : () -> ()
    %cst_66 = arith.constant dense<0.000000e+00> : vector<8x8x8xf32>
    %240 = tpu.matmul %205, %222, %cst_66 {dimension_numbers = #tpu.dot_dimension_numbers<[2], [2], [1], [1], [0, 0, 0, 1, 1, 1], [0], [0]>} : vector<8x8x8xf32>, vector<8x8x8xf32>, vector<8x8x8xf32> -> vector<8x8x8xf32>
    "tpu.trace_stop"() : () -> ()
    %cst_67 = arith.constant dense<0xFF800000> : vector<8x8xf32>
    %241 = vector.multi_reduction <maximumf>, %240, %cst_67 [2] : vector<8x8x8xf32> to vector<8x8xf32>
    %242 = vector.shape_cast %241 : vector<8x8xf32> to vector<8x8x1xf32>
    %243 = vector.broadcast %242 : vector<8x8x1xf32> to vector<8x8x8xf32>
    %244 = arith.subf %240, %243 : vector<8x8x8xf32>
    %245 = math.exp %244 : vector<8x8x8xf32>
    %cst_68 = arith.constant dense<0.000000e+00> : vector<8x8xf32>
    %246 = vector.multi_reduction <add>, %245, %cst_68 [2] : vector<8x8x8xf32> to vector<8x8xf32>
    %247 = vector.shape_cast %246 : vector<8x8xf32> to vector<8x8x1xf32>
    %248 = tpu.reciprocal %247 {approx = true} : vector<8x8x1xf32> -> vector<8x8x1xf32>
    %249 = vector.broadcast %248 : vector<8x8x1xf32> to vector<8x8x8xf32>
    %250 = arith.mulf %245, %249 : vector<8x8x8xf32>
    "tpu.trace_start"() <{level = 10 : i32, message = "gqk,gke->gqe"}> : () -> ()
    %cst_69 = arith.constant dense<0.000000e+00> : vector<8x8x8xf32>
    %251 = tpu.matmul %250, %239, %cst_69 {dimension_numbers = #tpu.dot_dimension_numbers<[2], [1], [1], [2], [0, 0, 0, 1, 1, 2], [0], [0]>} : vector<8x8x8xf32>, vector<8x8x8xf32>, vector<8x8x8xf32> -> vector<8x8x8xf32>
    "tpu.trace_stop"() : () -> ()
    %252 = vector.extract_strided_slice %251 {offsets = [0, 0, 0], sizes = [1, 8, 8], strides = [1, 1, 1]} : vector<8x8x8xf32> to vector<1x8x8xf32>
    %253 = vector.shape_cast %252 : vector<1x8x8xf32> to vector<8x8xf32>
    %254 = vector.extract_strided_slice %251 {offsets = [1, 0, 0], sizes = [1, 8, 8], strides = [1, 1, 1]} : vector<8x8x8xf32> to vector<1x8x8xf32>
    %255 = vector.shape_cast %254 : vector<1x8x8xf32> to vector<8x8xf32>
    %256 = vector.extract_strided_slice %251 {offsets = [2, 0, 0], sizes = [1, 8, 8], strides = [1, 1, 1]} : vector<8x8x8xf32> to vector<1x8x8xf32>
    %257 = vector.shape_cast %256 : vector<1x8x8xf32> to vector<8x8xf32>
    %258 = vector.extract_strided_slice %251 {offsets = [3, 0, 0], sizes = [1, 8, 8], strides = [1, 1, 1]} : vector<8x8x8xf32> to vector<1x8x8xf32>
    %259 = vector.shape_cast %258 : vector<1x8x8xf32> to vector<8x8xf32>
    %260 = tpu.concatenate %253, %255, %257, %259 in 1 : vector<8x8xf32>, vector<8x8xf32>, vector<8x8xf32>, vector<8x8xf32> -> vector<8x32xf32>
    %261 = vector.extract_strided_slice %251 {offsets = [4, 0, 0], sizes = [1, 8, 8], strides = [1, 1, 1]} : vector<8x8x8xf32> to vector<1x8x8xf32>
    %262 = vector.shape_cast %261 : vector<1x8x8xf32> to vector<8x8xf32>
    %263 = vector.extract_strided_slice %251 {offsets = [5, 0, 0], sizes = [1, 8, 8], strides = [1, 1, 1]} : vector<8x8x8xf32> to vector<1x8x8xf32>
    %264 = vector.shape_cast %263 : vector<1x8x8xf32> to vector<8x8xf32>
    %265 = vector.extract_strided_slice %251 {offsets = [6, 0, 0], sizes = [1, 8, 8], strides = [1, 1, 1]} : vector<8x8x8xf32> to vector<1x8x8xf32>
    %266 = vector.shape_cast %265 : vector<1x8x8xf32> to vector<8x8xf32>
    %267 = vector.extract_strided_slice %251 {offsets = [7, 0, 0], sizes = [1, 8, 8], strides = [1, 1, 1]} : vector<8x8x8xf32> to vector<1x8x8xf32>
    %268 = vector.shape_cast %267 : vector<1x8x8xf32> to vector<8x8xf32>
    %269 = tpu.concatenate %262, %264, %266, %268 in 1 : vector<8x8xf32>, vector<8x8xf32>, vector<8x8xf32>, vector<8x8xf32> -> vector<8x32xf32>
    %270 = tpu.concatenate %260, %269 in 0 : vector<8x32xf32>, vector<8x32xf32> -> vector<16x32xf32>
    %271 = arith.truncf %270 : vector<16x32xf32> to vector<16x32xbf16>
    %cst_70 = arith.constant dense<0.000000e+00> : vector<16x32xf32>
    %272 = tpu.matmul %271, %187, %cst_70 {dimension_numbers = #tpu.dot_dimension_numbers<[1], [0], [0], [1], [0, 0, 1, 1], [], []>} : vector<16x32xbf16>, vector<32x32xbf16>, vector<16x32xf32> -> vector<16x32xf32>
    %273 = vector.broadcast %188 : vector<1x32xf32> to vector<16x32xf32>
    %274 = arith.addf %272, %273 : vector<16x32xf32>
    %275 = arith.addf %175, %274 : vector<16x32xf32>
    %c1_71 = arith.constant 1 : index
    %c0_72 = arith.constant 0 : index
    %276 = vector.load %arg8[%c1_71, %c0_72] : memref<2x32xf32, #tpu.memory_space<vmem>>, vector<1x32xf32>
    %c1_73 = arith.constant 1 : index
    %c0_74 = arith.constant 0 : index
    %277 = vector.load %arg9[%c1_73, %c0_74] : memref<2x32xf32, #tpu.memory_space<vmem>>, vector<1x32xf32>
    %cst_75 = arith.constant dense<0.000000e+00> : vector<16xf32>
    %278 = vector.multi_reduction <add>, %275, %cst_75 [1] : vector<16x32xf32> to vector<16xf32>
    %279 = vector.shape_cast %278 : vector<16xf32> to vector<16x1xf32>
    %cst_76 = arith.constant 3.200000e+01 : f32
    %280 = vector.broadcast %cst_76 : f32 to vector<16x1xf32>
    %281 = arith.divf %279, %280 : vector<16x1xf32>
    %282 = vector.broadcast %281 : vector<16x1xf32> to vector<16x32xf32>
    %283 = arith.subf %275, %282 : vector<16x32xf32>
    %284 = arith.mulf %283, %283 : vector<16x32xf32>
    %cst_77 = arith.constant dense<0.000000e+00> : vector<16xf32>
    %285 = vector.multi_reduction <add>, %284, %cst_77 [1] : vector<16x32xf32> to vector<16xf32>
    %286 = vector.shape_cast %285 : vector<16xf32> to vector<16x1xf32>
    %cst_78 = arith.constant 3.200000e+01 : f32
    %287 = vector.broadcast %cst_78 : f32 to vector<16x1xf32>
    %288 = arith.divf %286, %287 : vector<16x1xf32>
    %289 = vector.broadcast %281 : vector<16x1xf32> to vector<16x32xf32>
    %290 = arith.subf %275, %289 : vector<16x32xf32>
    %cst_79 = arith.constant 9.99999974E-6 : f32
    %291 = vector.broadcast %cst_79 : f32 to vector<16x1xf32>
    %292 = arith.addf %288, %291 : vector<16x1xf32>
    %293 = math.rsqrt %292 : vector<16x1xf32>
    %294 = vector.broadcast %293 : vector<16x1xf32> to vector<16x32xf32>
    %295 = arith.mulf %290, %294 : vector<16x32xf32>
    %296 = vector.broadcast %276 : vector<1x32xf32> to vector<16x32xf32>
    %297 = arith.mulf %295, %296 : vector<16x32xf32>
    %298 = vector.broadcast %277 : vector<1x32xf32> to vector<16x32xf32>
    %299 = arith.addf %297, %298 : vector<16x32xf32>
    %c1_80 = arith.constant 1 : index
    %c0_81 = arith.constant 0 : index
    %c0_82 = arith.constant 0 : index
    %300 = vector.load %arg10[%c1_80, %c0_81, %c0_82] : memref<2x32x64xbf16, #tpu.memory_space<vmem>>, vector<1x32x64xbf16>
    %301 = vector.shape_cast %300 : vector<1x32x64xbf16> to vector<32x64xbf16>
    %c1_83 = arith.constant 1 : index
    %c0_84 = arith.constant 0 : index
    %302 = vector.load %arg11[%c1_83, %c0_84] : memref<2x64xf32, #tpu.memory_space<vmem>>, vector<1x64xf32>
    %c1_85 = arith.constant 1 : index
    %c0_86 = arith.constant 0 : index
    %c0_87 = arith.constant 0 : index
    %303 = vector.load %arg12[%c1_85, %c0_86, %c0_87] : memref<2x64x32xbf16, #tpu.memory_space<vmem>>, vector<1x64x32xbf16>
    %304 = vector.shape_cast %303 : vector<1x64x32xbf16> to vector<64x32xbf16>
    %c1_88 = arith.constant 1 : index
    %c0_89 = arith.constant 0 : index
    %305 = vector.load %arg13[%c1_88, %c0_89] : memref<2x32xf32, #tpu.memory_space<vmem>>, vector<1x32xf32>
    %306 = arith.truncf %299 : vector<16x32xf32> to vector<16x32xbf16>
    %cst_90 = arith.constant dense<0.000000e+00> : vector<16x64xf32>
    %307 = tpu.matmul %306, %301, %cst_90 {dimension_numbers = #tpu.dot_dimension_numbers<[1], [0], [0], [1], [0, 0, 1, 1], [], []>} : vector<16x32xbf16>, vector<32x64xbf16>, vector<16x64xf32> -> vector<16x64xf32>
    %308 = vector.broadcast %302 : vector<1x64xf32> to vector<16x64xf32>
    %309 = arith.addf %307, %308 : vector<16x64xf32>
    %cst_91 = arith.constant 0.000000e+00 : f32
    %310 = vector.broadcast %cst_91 : f32 to vector<16x64xf32>
    %311 = arith.maximumf %309, %310 : vector<16x64xf32>
    %312 = arith.truncf %311 : vector<16x64xf32> to vector<16x64xbf16>
    %cst_92 = arith.constant dense<0.000000e+00> : vector<16x32xf32>
    %313 = tpu.matmul %312, %304, %cst_92 {dimension_numbers = #tpu.dot_dimension_numbers<[1], [0], [0], [1], [0, 0, 1, 1], [], []>} : vector<16x64xbf16>, vector<64x32xbf16>, vector<16x32xf32> -> vector<16x32xf32>
    %314 = vector.broadcast %305 : vector<1x32xf32> to vector<16x32xf32>
    %315 = arith.addf %313, %314 : vector<16x32xf32>
    %316 = arith.addf %299, %315 : vector<16x32xf32>
    %c1_93 = arith.constant 1 : index
    %c0_94 = arith.constant 0 : index
    %317 = vector.load %arg14[%c1_93, %c0_94] : memref<2x32xf32, #tpu.memory_space<vmem>>, vector<1x32xf32>
    %c1_95 = arith.constant 1 : index
    %c0_96 = arith.constant 0 : index
    %318 = vector.load %arg15[%c1_95, %c0_96] : memref<2x32xf32, #tpu.memory_space<vmem>>, vector<1x32xf32>
    %cst_97 = arith.constant dense<0.000000e+00> : vector<16xf32>
    %319 = vector.multi_reduction <add>, %316, %cst_97 [1] : vector<16x32xf32> to vector<16xf32>
    %320 = vector.shape_cast %319 : vector<16xf32> to vector<16x1xf32>
    %cst_98 = arith.constant 3.200000e+01 : f32
    %321 = vector.broadcast %cst_98 : f32 to vector<16x1xf32>
    %322 = arith.divf %320, %321 : vector<16x1xf32>
    %323 = vector.broadcast %322 : vector<16x1xf32> to vector<16x32xf32>
    %324 = arith.subf %316, %323 : vector<16x32xf32>
    %325 = arith.mulf %324, %324 : vector<16x32xf32>
    %cst_99 = arith.constant dense<0.000000e+00> : vector<16xf32>
    %326 = vector.multi_reduction <add>, %325, %cst_99 [1] : vector<16x32xf32> to vector<16xf32>
    %327 = vector.shape_cast %326 : vector<16xf32> to vector<16x1xf32>
    %cst_100 = arith.constant 3.200000e+01 : f32
    %328 = vector.broadcast %cst_100 : f32 to vector<16x1xf32>
    %329 = arith.divf %327, %328 : vector<16x1xf32>
    %330 = vector.broadcast %322 : vector<16x1xf32> to vector<16x32xf32>
    %331 = arith.subf %316, %330 : vector<16x32xf32>
    %cst_101 = arith.constant 9.99999974E-6 : f32
    %332 = vector.broadcast %cst_101 : f32 to vector<16x1xf32>
    %333 = arith.addf %329, %332 : vector<16x1xf32>
    %334 = math.rsqrt %333 : vector<16x1xf32>
    %335 = vector.broadcast %334 : vector<16x1xf32> to vector<16x32xf32>
    %336 = arith.mulf %331, %335 : vector<16x32xf32>
    %337 = vector.broadcast %317 : vector<1x32xf32> to vector<16x32xf32>
    %338 = arith.mulf %336, %337 : vector<16x32xf32>
    %339 = vector.broadcast %318 : vector<1x32xf32> to vector<16x32xf32>
    %340 = arith.addf %338, %339 : vector<16x32xf32>
    %c0_102 = arith.constant 0 : index
    %c0_103 = arith.constant 0 : index
    %341 = vector.load %arg16[%c0_102, %c0_103] : memref<1x32xf32, #tpu.memory_space<vmem>>, vector<1x32xf32>
    %c0_104 = arith.constant 0 : index
    %c0_105 = arith.constant 0 : index
    %342 = vector.load %arg17[%c0_104, %c0_105] : memref<1x32xf32, #tpu.memory_space<vmem>>, vector<1x32xf32>
    %cst_106 = arith.constant dense<0.000000e+00> : vector<16xf32>
    %343 = vector.multi_reduction <add>, %340, %cst_106 [1] : vector<16x32xf32> to vector<16xf32>
    %344 = vector.shape_cast %343 : vector<16xf32> to vector<16x1xf32>
    %cst_107 = arith.constant 3.200000e+01 : f32
    %345 = vector.broadcast %cst_107 : f32 to vector<16x1xf32>
    %346 = arith.divf %344, %345 : vector<16x1xf32>
    %347 = vector.broadcast %346 : vector<16x1xf32> to vector<16x32xf32>
    %348 = arith.subf %340, %347 : vector<16x32xf32>
    %349 = arith.mulf %348, %348 : vector<16x32xf32>
    %cst_108 = arith.constant dense<0.000000e+00> : vector<16xf32>
    %350 = vector.multi_reduction <add>, %349, %cst_108 [1] : vector<16x32xf32> to vector<16xf32>
    %351 = vector.shape_cast %350 : vector<16xf32> to vector<16x1xf32>
    %cst_109 = arith.constant 3.200000e+01 : f32
    %352 = vector.broadcast %cst_109 : f32 to vector<16x1xf32>
    %353 = arith.divf %351, %352 : vector<16x1xf32>
    %354 = vector.broadcast %346 : vector<16x1xf32> to vector<16x32xf32>
    %355 = arith.subf %340, %354 : vector<16x32xf32>
    %cst_110 = arith.constant 9.99999974E-6 : f32
    %356 = vector.broadcast %cst_110 : f32 to vector<16x1xf32>
    %357 = arith.addf %353, %356 : vector<16x1xf32>
    %358 = math.rsqrt %357 : vector<16x1xf32>
    %359 = vector.broadcast %358 : vector<16x1xf32> to vector<16x32xf32>
    %360 = arith.mulf %355, %359 : vector<16x32xf32>
    %361 = vector.broadcast %341 : vector<1x32xf32> to vector<16x32xf32>
    %362 = arith.mulf %360, %361 : vector<16x32xf32>
    %363 = vector.broadcast %342 : vector<1x32xf32> to vector<16x32xf32>
    %364 = arith.addf %362, %363 : vector<16x32xf32>
    %c0_111 = arith.constant 0 : index
    %c0_112 = arith.constant 0 : index
    %c0_113 = arith.constant 0 : index
    %365 = vector.load %arg18[%c0_111, %c0_112, %c0_113] : memref<2x32x96xbf16, #tpu.memory_space<vmem>>, vector<1x32x96xbf16>
    %366 = vector.shape_cast %365 : vector<1x32x96xbf16> to vector<32x96xbf16>
    %c0_114 = arith.constant 0 : index
    %c0_115 = arith.constant 0 : index
    %367 = vector.load %arg19[%c0_114, %c0_115] : memref<2x96xf32, #tpu.memory_space<vmem>>, vector<1x96xf32>
    %368 = arith.truncf %10 : vector<16x32xf32> to vector<16x32xbf16>
    %cst_116 = arith.constant dense<0.000000e+00> : vector<16x96xf32>
    %369 = tpu.matmul %368, %366, %cst_116 {dimension_numbers = #tpu.dot_dimension_numbers<[1], [0], [0], [1], [0, 0, 1, 1], [], []>} : vector<16x32xbf16>, vector<32x96xbf16>, vector<16x96xf32> -> vector<16x96xf32>
    %370 = vector.broadcast %367 : vector<1x96xf32> to vector<16x96xf32>
    %371 = arith.addf %369, %370 : vector<16x96xf32>
    %372 = vector.extract_strided_slice %371 {offsets = [0, 0], sizes = [16, 32], strides = [1, 1]} : vector<16x96xf32> to vector<16x32xf32>
    %373 = vector.extract_strided_slice %371 {offsets = [0, 32], sizes = [16, 32], strides = [1, 1]} : vector<16x96xf32> to vector<16x32xf32>
    %374 = vector.extract_strided_slice %371 {offsets = [0, 64], sizes = [16, 32], strides = [1, 1]} : vector<16x96xf32> to vector<16x32xf32>
    %c0_117 = arith.constant 0 : index
    %c0_118 = arith.constant 0 : index
    %c0_119 = arith.constant 0 : index
    %375 = vector.load %arg20[%c0_117, %c0_118, %c0_119] : memref<2x32x32xbf16, #tpu.memory_space<vmem>>, vector<1x32x32xbf16>
    %376 = vector.shape_cast %375 : vector<1x32x32xbf16> to vector<32x32xbf16>
    %c0_120 = arith.constant 0 : index
    %c0_121 = arith.constant 0 : index
    %377 = vector.load %arg21[%c0_120, %c0_121] : memref<2x32xf32, #tpu.memory_space<vmem>>, vector<1x32xf32>
    %378 = vector.extract_strided_slice %372 {offsets = [0, 0], sizes = [8, 8], strides = [1, 1]} : vector<16x32xf32> to vector<8x8xf32>
    %379 = vector.extract_strided_slice %372 {offsets = [0, 8], sizes = [8, 8], strides = [1, 1]} : vector<16x32xf32> to vector<8x8xf32>
    %380 = vector.extract_strided_slice %372 {offsets = [0, 16], sizes = [8, 8], strides = [1, 1]} : vector<16x32xf32> to vector<8x8xf32>
    %381 = vector.extract_strided_slice %372 {offsets = [0, 24], sizes = [8, 8], strides = [1, 1]} : vector<16x32xf32> to vector<8x8xf32>
    %382 = vector.extract_strided_slice %372 {offsets = [8, 0], sizes = [8, 8], strides = [1, 1]} : vector<16x32xf32> to vector<8x8xf32>
    %383 = vector.extract_strided_slice %372 {offsets = [8, 8], sizes = [8, 8], strides = [1, 1]} : vector<16x32xf32> to vector<8x8xf32>
    %384 = vector.extract_strided_slice %372 {offsets = [8, 16], sizes = [8, 8], strides = [1, 1]} : vector<16x32xf32> to vector<8x8xf32>
    %385 = vector.extract_strided_slice %372 {offsets = [8, 24], sizes = [8, 8], strides = [1, 1]} : vector<16x32xf32> to vector<8x8xf32>
    %386 = vector.shape_cast %378 : vector<8x8xf32> to vector<1x8x8xf32>
    %387 = vector.shape_cast %379 : vector<8x8xf32> to vector<1x8x8xf32>
    %388 = vector.shape_cast %380 : vector<8x8xf32> to vector<1x8x8xf32>
    %389 = vector.shape_cast %381 : vector<8x8xf32> to vector<1x8x8xf32>
    %390 = vector.shape_cast %382 : vector<8x8xf32> to vector<1x8x8xf32>
    %391 = vector.shape_cast %383 : vector<8x8xf32> to vector<1x8x8xf32>
    %392 = vector.shape_cast %384 : vector<8x8xf32> to vector<1x8x8xf32>
    %393 = vector.shape_cast %385 : vector<8x8xf32> to vector<1x8x8xf32>
    %394 = tpu.concatenate %386, %387, %388, %389, %390, %391, %392, %393 in 0 : vector<1x8x8xf32>, vector<1x8x8xf32>, vector<1x8x8xf32>, vector<1x8x8xf32>, vector<1x8x8xf32>, vector<1x8x8xf32>, vector<1x8x8xf32>, vector<1x8x8xf32> -> vector<8x8x8xf32>
    %395 = vector.extract_strided_slice %373 {offsets = [0, 0], sizes = [8, 8], strides = [1, 1]} : vector<16x32xf32> to vector<8x8xf32>
    %396 = vector.extract_strided_slice %373 {offsets = [0, 8], sizes = [8, 8], strides = [1, 1]} : vector<16x32xf32> to vector<8x8xf32>
    %397 = vector.extract_strided_slice %373 {offsets = [0, 16], sizes = [8, 8], strides = [1, 1]} : vector<16x32xf32> to vector<8x8xf32>
    %398 = vector.extract_strided_slice %373 {offsets = [0, 24], sizes = [8, 8], strides = [1, 1]} : vector<16x32xf32> to vector<8x8xf32>
    %399 = vector.extract_strided_slice %373 {offsets = [8, 0], sizes = [8, 8], strides = [1, 1]} : vector<16x32xf32> to vector<8x8xf32>
    %400 = vector.extract_strided_slice %373 {offsets = [8, 8], sizes = [8, 8], strides = [1, 1]} : vector<16x32xf32> to vector<8x8xf32>
    %401 = vector.extract_strided_slice %373 {offsets = [8, 16], sizes = [8, 8], strides = [1, 1]} : vector<16x32xf32> to vector<8x8xf32>
    %402 = vector.extract_strided_slice %373 {offsets = [8, 24], sizes = [8, 8], strides = [1, 1]} : vector<16x32xf32> to vector<8x8xf32>
    %403 = vector.shape_cast %395 : vector<8x8xf32> to vector<1x8x8xf32>
    %404 = vector.shape_cast %396 : vector<8x8xf32> to vector<1x8x8xf32>
    %405 = vector.shape_cast %397 : vector<8x8xf32> to vector<1x8x8xf32>
    %406 = vector.shape_cast %398 : vector<8x8xf32> to vector<1x8x8xf32>
    %407 = vector.shape_cast %399 : vector<8x8xf32> to vector<1x8x8xf32>
    %408 = vector.shape_cast %400 : vector<8x8xf32> to vector<1x8x8xf32>
    %409 = vector.shape_cast %401 : vector<8x8xf32> to vector<1x8x8xf32>
    %410 = vector.shape_cast %402 : vector<8x8xf32> to vector<1x8x8xf32>
    %411 = tpu.concatenate %403, %404, %405, %406, %407, %408, %409, %410 in 0 : vector<1x8x8xf32>, vector<1x8x8xf32>, vector<1x8x8xf32>, vector<1x8x8xf32>, vector<1x8x8xf32>, vector<1x8x8xf32>, vector<1x8x8xf32>, vector<1x8x8xf32> -> vector<8x8x8xf32>
    %412 = vector.extract_strided_slice %374 {offsets = [0, 0], sizes = [8, 8], strides = [1, 1]} : vector<16x32xf32> to vector<8x8xf32>
    %413 = vector.extract_strided_slice %374 {offsets = [0, 8], sizes = [8, 8], strides = [1, 1]} : vector<16x32xf32> to vector<8x8xf32>
    %414 = vector.extract_strided_slice %374 {offsets = [0, 16], sizes = [8, 8], strides = [1, 1]} : vector<16x32xf32> to vector<8x8xf32>
    %415 = vector.extract_strided_slice %374 {offsets = [0, 24], sizes = [8, 8], strides = [1, 1]} : vector<16x32xf32> to vector<8x8xf32>
    %416 = vector.extract_strided_slice %374 {offsets = [8, 0], sizes = [8, 8], strides = [1, 1]} : vector<16x32xf32> to vector<8x8xf32>
    %417 = vector.extract_strided_slice %374 {offsets = [8, 8], sizes = [8, 8], strides = [1, 1]} : vector<16x32xf32> to vector<8x8xf32>
    %418 = vector.extract_strided_slice %374 {offsets = [8, 16], sizes = [8, 8], strides = [1, 1]} : vector<16x32xf32> to vector<8x8xf32>
    %419 = vector.extract_strided_slice %374 {offsets = [8, 24], sizes = [8, 8], strides = [1, 1]} : vector<16x32xf32> to vector<8x8xf32>
    %420 = vector.shape_cast %412 : vector<8x8xf32> to vector<1x8x8xf32>
    %421 = vector.shape_cast %413 : vector<8x8xf32> to vector<1x8x8xf32>
    %422 = vector.shape_cast %414 : vector<8x8xf32> to vector<1x8x8xf32>
    %423 = vector.shape_cast %415 : vector<8x8xf32> to vector<1x8x8xf32>
    %424 = vector.shape_cast %416 : vector<8x8xf32> to vector<1x8x8xf32>
    %425 = vector.shape_cast %417 : vector<8x8xf32> to vector<1x8x8xf32>
    %426 = vector.shape_cast %418 : vector<8x8xf32> to vector<1x8x8xf32>
    %427 = vector.shape_cast %419 : vector<8x8xf32> to vector<1x8x8xf32>
    %428 = tpu.concatenate %420, %421, %422, %423, %424, %425, %426, %427 in 0 : vector<1x8x8xf32>, vector<1x8x8xf32>, vector<1x8x8xf32>, vector<1x8x8xf32>, vector<1x8x8xf32>, vector<1x8x8xf32>, vector<1x8x8xf32>, vector<1x8x8xf32> -> vector<8x8x8xf32>
    "tpu.trace_start"() <{level = 10 : i32, message = "gqe,gke->gqk"}> : () -> ()
    %cst_122 = arith.constant dense<0.000000e+00> : vector<8x8x8xf32>
    %429 = tpu.matmul %394, %411, %cst_122 {dimension_numbers = #tpu.dot_dimension_numbers<[2], [2], [1], [1], [0, 0, 0, 1, 1, 1], [0], [0]>} : vector<8x8x8xf32>, vector<8x8x8xf32>, vector<8x8x8xf32> -> vector<8x8x8xf32>
    "tpu.trace_stop"() : () -> ()
    %cst_123 = arith.constant dense<0xFF800000> : vector<8x8xf32>
    %430 = vector.multi_reduction <maximumf>, %429, %cst_123 [2] : vector<8x8x8xf32> to vector<8x8xf32>
    %431 = vector.shape_cast %430 : vector<8x8xf32> to vector<8x8x1xf32>
    %432 = vector.broadcast %431 : vector<8x8x1xf32> to vector<8x8x8xf32>
    %433 = arith.subf %429, %432 : vector<8x8x8xf32>
    %434 = math.exp %433 : vector<8x8x8xf32>
    %cst_124 = arith.constant dense<0.000000e+00> : vector<8x8xf32>
    %435 = vector.multi_reduction <add>, %434, %cst_124 [2] : vector<8x8x8xf32> to vector<8x8xf32>
    %436 = vector.shape_cast %435 : vector<8x8xf32> to vector<8x8x1xf32>
    %437 = tpu.reciprocal %436 {approx = true} : vector<8x8x1xf32> -> vector<8x8x1xf32>
    %438 = vector.broadcast %437 : vector<8x8x1xf32> to vector<8x8x8xf32>
    %439 = arith.mulf %434, %438 : vector<8x8x8xf32>
    "tpu.trace_start"() <{level = 10 : i32, message = "gqk,gke->gqe"}> : () -> ()
    %cst_125 = arith.constant dense<0.000000e+00> : vector<8x8x8xf32>
    %440 = tpu.matmul %439, %428, %cst_125 {dimension_numbers = #tpu.dot_dimension_numbers<[2], [1], [1], [2], [0, 0, 0, 1, 1, 2], [0], [0]>} : vector<8x8x8xf32>, vector<8x8x8xf32>, vector<8x8x8xf32> -> vector<8x8x8xf32>
    "tpu.trace_stop"() : () -> ()
    %441 = vector.extract_strided_slice %440 {offsets = [0, 0, 0], sizes = [1, 8, 8], strides = [1, 1, 1]} : vector<8x8x8xf32> to vector<1x8x8xf32>
    %442 = vector.shape_cast %441 : vector<1x8x8xf32> to vector<8x8xf32>
    %443 = vector.extract_strided_slice %440 {offsets = [1, 0, 0], sizes = [1, 8, 8], strides = [1, 1, 1]} : vector<8x8x8xf32> to vector<1x8x8xf32>
    %444 = vector.shape_cast %443 : vector<1x8x8xf32> to vector<8x8xf32>
    %445 = vector.extract_strided_slice %440 {offsets = [2, 0, 0], sizes = [1, 8, 8], strides = [1, 1, 1]} : vector<8x8x8xf32> to vector<1x8x8xf32>
    %446 = vector.shape_cast %445 : vector<1x8x8xf32> to vector<8x8xf32>
    %447 = vector.extract_strided_slice %440 {offsets = [3, 0, 0], sizes = [1, 8, 8], strides = [1, 1, 1]} : vector<8x8x8xf32> to vector<1x8x8xf32>
    %448 = vector.shape_cast %447 : vector<1x8x8xf32> to vector<8x8xf32>
    %449 = tpu.concatenate %442, %444, %446, %448 in 1 : vector<8x8xf32>, vector<8x8xf32>, vector<8x8xf32>, vector<8x8xf32> -> vector<8x32xf32>
    %450 = vector.extract_strided_slice %440 {offsets = [4, 0, 0], sizes = [1, 8, 8], strides = [1, 1, 1]} : vector<8x8x8xf32> to vector<1x8x8xf32>
    %451 = vector.shape_cast %450 : vector<1x8x8xf32> to vector<8x8xf32>
    %452 = vector.extract_strided_slice %440 {offsets = [5, 0, 0], sizes = [1, 8, 8], strides = [1, 1, 1]} : vector<8x8x8xf32> to vector<1x8x8xf32>
    %453 = vector.shape_cast %452 : vector<1x8x8xf32> to vector<8x8xf32>
    %454 = vector.extract_strided_slice %440 {offsets = [6, 0, 0], sizes = [1, 8, 8], strides = [1, 1, 1]} : vector<8x8x8xf32> to vector<1x8x8xf32>
    %455 = vector.shape_cast %454 : vector<1x8x8xf32> to vector<8x8xf32>
    %456 = vector.extract_strided_slice %440 {offsets = [7, 0, 0], sizes = [1, 8, 8], strides = [1, 1, 1]} : vector<8x8x8xf32> to vector<1x8x8xf32>
    %457 = vector.shape_cast %456 : vector<1x8x8xf32> to vector<8x8xf32>
    %458 = tpu.concatenate %451, %453, %455, %457 in 1 : vector<8x8xf32>, vector<8x8xf32>, vector<8x8xf32>, vector<8x8xf32> -> vector<8x32xf32>
    %459 = tpu.concatenate %449, %458 in 0 : vector<8x32xf32>, vector<8x32xf32> -> vector<16x32xf32>
    %460 = arith.truncf %459 : vector<16x32xf32> to vector<16x32xbf16>
    %cst_126 = arith.constant dense<0.000000e+00> : vector<16x32xf32>
    %461 = tpu.matmul %460, %376, %cst_126 {dimension_numbers = #tpu.dot_dimension_numbers<[1], [0], [0], [1], [0, 0, 1, 1], [], []>} : vector<16x32xbf16>, vector<32x32xbf16>, vector<16x32xf32> -> vector<16x32xf32>
    %462 = vector.broadcast %377 : vector<1x32xf32> to vector<16x32xf32>
    %463 = arith.addf %461, %462 : vector<16x32xf32>
    %464 = arith.addf %10, %463 : vector<16x32xf32>
    %c0_127 = arith.constant 0 : index
    %c0_128 = arith.constant 0 : index
    %465 = vector.load %arg28[%c0_127, %c0_128] : memref<2x32xf32, #tpu.memory_space<vmem>>, vector<1x32xf32>
    %c0_129 = arith.constant 0 : index
    %c0_130 = arith.constant 0 : index
    %466 = vector.load %arg29[%c0_129, %c0_130] : memref<2x32xf32, #tpu.memory_space<vmem>>, vector<1x32xf32>
    %cst_131 = arith.constant dense<0.000000e+00> : vector<16xf32>
    %467 = vector.multi_reduction <add>, %464, %cst_131 [1] : vector<16x32xf32> to vector<16xf32>
    %468 = vector.shape_cast %467 : vector<16xf32> to vector<16x1xf32>
    %cst_132 = arith.constant 3.200000e+01 : f32
    %469 = vector.broadcast %cst_132 : f32 to vector<16x1xf32>
    %470 = arith.divf %468, %469 : vector<16x1xf32>
    %471 = vector.broadcast %470 : vector<16x1xf32> to vector<16x32xf32>
    %472 = arith.subf %464, %471 : vector<16x32xf32>
    %473 = arith.mulf %472, %472 : vector<16x32xf32>
    %cst_133 = arith.constant dense<0.000000e+00> : vector<16xf32>
    %474 = vector.multi_reduction <add>, %473, %cst_133 [1] : vector<16x32xf32> to vector<16xf32>
    %475 = vector.shape_cast %474 : vector<16xf32> to vector<16x1xf32>
    %cst_134 = arith.constant 3.200000e+01 : f32
    %476 = vector.broadcast %cst_134 : f32 to vector<16x1xf32>
    %477 = arith.divf %475, %476 : vector<16x1xf32>
    %478 = vector.broadcast %470 : vector<16x1xf32> to vector<16x32xf32>
    %479 = arith.subf %464, %478 : vector<16x32xf32>
    %cst_135 = arith.constant 9.99999974E-6 : f32
    %480 = vector.broadcast %cst_135 : f32 to vector<16x1xf32>
    %481 = arith.addf %477, %480 : vector<16x1xf32>
    %482 = math.rsqrt %481 : vector<16x1xf32>
    %483 = vector.broadcast %482 : vector<16x1xf32> to vector<16x32xf32>
    %484 = arith.mulf %479, %483 : vector<16x32xf32>
    %485 = vector.broadcast %465 : vector<1x32xf32> to vector<16x32xf32>
    %486 = arith.mulf %484, %485 : vector<16x32xf32>
    %487 = vector.broadcast %466 : vector<1x32xf32> to vector<16x32xf32>
    %488 = arith.addf %486, %487 : vector<16x32xf32>
    %c0_136 = arith.constant 0 : index
    %c0_137 = arith.constant 0 : index
    %c0_138 = arith.constant 0 : index
    %489 = vector.load %arg22[%c0_136, %c0_137, %c0_138] : memref<2x32x32xbf16, #tpu.memory_space<vmem>>, vector<1x32x32xbf16>
    %490 = vector.shape_cast %489 : vector<1x32x32xbf16> to vector<32x32xbf16>
    %c0_139 = arith.constant 0 : index
    %c0_140 = arith.constant 0 : index
    %491 = vector.load %arg23[%c0_139, %c0_140] : memref<2x32xf32, #tpu.memory_space<vmem>>, vector<1x32xf32>
    %492 = arith.truncf %488 : vector<16x32xf32> to vector<16x32xbf16>
    %cst_141 = arith.constant dense<0.000000e+00> : vector<16x32xf32>
    %493 = tpu.matmul %492, %490, %cst_141 {dimension_numbers = #tpu.dot_dimension_numbers<[1], [0], [0], [1], [0, 0, 1, 1], [], []>} : vector<16x32xbf16>, vector<32x32xbf16>, vector<16x32xf32> -> vector<16x32xf32>
    %494 = vector.broadcast %491 : vector<1x32xf32> to vector<16x32xf32>
    %495 = arith.addf %493, %494 : vector<16x32xf32>
    %c0_142 = arith.constant 0 : index
    %c0_143 = arith.constant 0 : index
    %c0_144 = arith.constant 0 : index
    %496 = vector.load %arg24[%c0_142, %c0_143, %c0_144] : memref<2x32x64xbf16, #tpu.memory_space<vmem>>, vector<1x32x64xbf16>
    %497 = vector.shape_cast %496 : vector<1x32x64xbf16> to vector<32x64xbf16>
    %c0_145 = arith.constant 0 : index
    %c0_146 = arith.constant 0 : index
    %498 = vector.load %arg25[%c0_145, %c0_146] : memref<2x64xf32, #tpu.memory_space<vmem>>, vector<1x64xf32>
    %499 = arith.truncf %364 : vector<16x32xf32> to vector<16x32xbf16>
    %cst_147 = arith.constant dense<0.000000e+00> : vector<16x64xf32>
    %500 = tpu.matmul %499, %497, %cst_147 {dimension_numbers = #tpu.dot_dimension_numbers<[1], [0], [0], [1], [0, 0, 1, 1], [], []>} : vector<16x32xbf16>, vector<32x64xbf16>, vector<16x64xf32> -> vector<16x64xf32>
    %501 = vector.broadcast %498 : vector<1x64xf32> to vector<16x64xf32>
    %502 = arith.addf %500, %501 : vector<16x64xf32>
    %503 = vector.extract_strided_slice %502 {offsets = [0, 0], sizes = [16, 32], strides = [1, 1]} : vector<16x64xf32> to vector<16x32xf32>
    %504 = vector.extract_strided_slice %502 {offsets = [0, 32], sizes = [16, 32], strides = [1, 1]} : vector<16x64xf32> to vector<16x32xf32>
    %c0_148 = arith.constant 0 : index
    %c0_149 = arith.constant 0 : index
    %c0_150 = arith.constant 0 : index
    %505 = vector.load %arg26[%c0_148, %c0_149, %c0_150] : memref<2x32x32xbf16, #tpu.memory_space<vmem>>, vector<1x32x32xbf16>
    %506 = vector.shape_cast %505 : vector<1x32x32xbf16> to vector<32x32xbf16>
    %c0_151 = arith.constant 0 : index
    %c0_152 = arith.constant 0 : index
    %507 = vector.load %arg27[%c0_151, %c0_152] : memref<2x32xf32, #tpu.memory_space<vmem>>, vector<1x32xf32>
    %508 = vector.extract_strided_slice %495 {offsets = [0, 0], sizes = [8, 8], strides = [1, 1]} : vector<16x32xf32> to vector<8x8xf32>
    %509 = vector.extract_strided_slice %495 {offsets = [0, 8], sizes = [8, 8], strides = [1, 1]} : vector<16x32xf32> to vector<8x8xf32>
    %510 = vector.extract_strided_slice %495 {offsets = [0, 16], sizes = [8, 8], strides = [1, 1]} : vector<16x32xf32> to vector<8x8xf32>
    %511 = vector.extract_strided_slice %495 {offsets = [0, 24], sizes = [8, 8], strides = [1, 1]} : vector<16x32xf32> to vector<8x8xf32>
    %512 = vector.extract_strided_slice %495 {offsets = [8, 0], sizes = [8, 8], strides = [1, 1]} : vector<16x32xf32> to vector<8x8xf32>
    %513 = vector.extract_strided_slice %495 {offsets = [8, 8], sizes = [8, 8], strides = [1, 1]} : vector<16x32xf32> to vector<8x8xf32>
    %514 = vector.extract_strided_slice %495 {offsets = [8, 16], sizes = [8, 8], strides = [1, 1]} : vector<16x32xf32> to vector<8x8xf32>
    %515 = vector.extract_strided_slice %495 {offsets = [8, 24], sizes = [8, 8], strides = [1, 1]} : vector<16x32xf32> to vector<8x8xf32>
    %516 = vector.shape_cast %508 : vector<8x8xf32> to vector<1x8x8xf32>
    %517 = vector.shape_cast %509 : vector<8x8xf32> to vector<1x8x8xf32>
    %518 = vector.shape_cast %510 : vector<8x8xf32> to vector<1x8x8xf32>
    %519 = vector.shape_cast %511 : vector<8x8xf32> to vector<1x8x8xf32>
    %520 = vector.shape_cast %512 : vector<8x8xf32> to vector<1x8x8xf32>
    %521 = vector.shape_cast %513 : vector<8x8xf32> to vector<1x8x8xf32>
    %522 = vector.shape_cast %514 : vector<8x8xf32> to vector<1x8x8xf32>
    %523 = vector.shape_cast %515 : vector<8x8xf32> to vector<1x8x8xf32>
    %524 = tpu.concatenate %516, %517, %518, %519, %520, %521, %522, %523 in 0 : vector<1x8x8xf32>, vector<1x8x8xf32>, vector<1x8x8xf32>, vector<1x8x8xf32>, vector<1x8x8xf32>, vector<1x8x8xf32>, vector<1x8x8xf32>, vector<1x8x8xf32> -> vector<8x8x8xf32>
    %525 = vector.extract_strided_slice %503 {offsets = [0, 0], sizes = [8, 8], strides = [1, 1]} : vector<16x32xf32> to vector<8x8xf32>
    %526 = vector.extract_strided_slice %503 {offsets = [0, 8], sizes = [8, 8], strides = [1, 1]} : vector<16x32xf32> to vector<8x8xf32>
    %527 = vector.extract_strided_slice %503 {offsets = [0, 16], sizes = [8, 8], strides = [1, 1]} : vector<16x32xf32> to vector<8x8xf32>
    %528 = vector.extract_strided_slice %503 {offsets = [0, 24], sizes = [8, 8], strides = [1, 1]} : vector<16x32xf32> to vector<8x8xf32>
    %529 = vector.extract_strided_slice %503 {offsets = [8, 0], sizes = [8, 8], strides = [1, 1]} : vector<16x32xf32> to vector<8x8xf32>
    %530 = vector.extract_strided_slice %503 {offsets = [8, 8], sizes = [8, 8], strides = [1, 1]} : vector<16x32xf32> to vector<8x8xf32>
    %531 = vector.extract_strided_slice %503 {offsets = [8, 16], sizes = [8, 8], strides = [1, 1]} : vector<16x32xf32> to vector<8x8xf32>
    %532 = vector.extract_strided_slice %503 {offsets = [8, 24], sizes = [8, 8], strides = [1, 1]} : vector<16x32xf32> to vector<8x8xf32>
    %533 = vector.shape_cast %525 : vector<8x8xf32> to vector<1x8x8xf32>
    %534 = vector.shape_cast %526 : vector<8x8xf32> to vector<1x8x8xf32>
    %535 = vector.shape_cast %527 : vector<8x8xf32> to vector<1x8x8xf32>
    %536 = vector.shape_cast %528 : vector<8x8xf32> to vector<1x8x8xf32>
    %537 = vector.shape_cast %529 : vector<8x8xf32> to vector<1x8x8xf32>
    %538 = vector.shape_cast %530 : vector<8x8xf32> to vector<1x8x8xf32>
    %539 = vector.shape_cast %531 : vector<8x8xf32> to vector<1x8x8xf32>
    %540 = vector.shape_cast %532 : vector<8x8xf32> to vector<1x8x8xf32>
    %541 = tpu.concatenate %533, %534, %535, %536, %537, %538, %539, %540 in 0 : vector<1x8x8xf32>, vector<1x8x8xf32>, vector<1x8x8xf32>, vector<1x8x8xf32>, vector<1x8x8xf32>, vector<1x8x8xf32>, vector<1x8x8xf32>, vector<1x8x8xf32> -> vector<8x8x8xf32>
    %542 = vector.extract_strided_slice %504 {offsets = [0, 0], sizes = [8, 8], strides = [1, 1]} : vector<16x32xf32> to vector<8x8xf32>
    %543 = vector.extract_strided_slice %504 {offsets = [0, 8], sizes = [8, 8], strides = [1, 1]} : vector<16x32xf32> to vector<8x8xf32>
    %544 = vector.extract_strided_slice %504 {offsets = [0, 16], sizes = [8, 8], strides = [1, 1]} : vector<16x32xf32> to vector<8x8xf32>
    %545 = vector.extract_strided_slice %504 {offsets = [0, 24], sizes = [8, 8], strides = [1, 1]} : vector<16x32xf32> to vector<8x8xf32>
    %546 = vector.extract_strided_slice %504 {offsets = [8, 0], sizes = [8, 8], strides = [1, 1]} : vector<16x32xf32> to vector<8x8xf32>
    %547 = vector.extract_strided_slice %504 {offsets = [8, 8], sizes = [8, 8], strides = [1, 1]} : vector<16x32xf32> to vector<8x8xf32>
    %548 = vector.extract_strided_slice %504 {offsets = [8, 16], sizes = [8, 8], strides = [1, 1]} : vector<16x32xf32> to vector<8x8xf32>
    %549 = vector.extract_strided_slice %504 {offsets = [8, 24], sizes = [8, 8], strides = [1, 1]} : vector<16x32xf32> to vector<8x8xf32>
    %550 = vector.shape_cast %542 : vector<8x8xf32> to vector<1x8x8xf32>
    %551 = vector.shape_cast %543 : vector<8x8xf32> to vector<1x8x8xf32>
    %552 = vector.shape_cast %544 : vector<8x8xf32> to vector<1x8x8xf32>
    %553 = vector.shape_cast %545 : vector<8x8xf32> to vector<1x8x8xf32>
    %554 = vector.shape_cast %546 : vector<8x8xf32> to vector<1x8x8xf32>
    %555 = vector.shape_cast %547 : vector<8x8xf32> to vector<1x8x8xf32>
    %556 = vector.shape_cast %548 : vector<8x8xf32> to vector<1x8x8xf32>
    %557 = vector.shape_cast %549 : vector<8x8xf32> to vector<1x8x8xf32>
    %558 = tpu.concatenate %550, %551, %552, %553, %554, %555, %556, %557 in 0 : vector<1x8x8xf32>, vector<1x8x8xf32>, vector<1x8x8xf32>, vector<1x8x8xf32>, vector<1x8x8xf32>, vector<1x8x8xf32>, vector<1x8x8xf32>, vector<1x8x8xf32> -> vector<8x8x8xf32>
    "tpu.trace_start"() <{level = 10 : i32, message = "gqe,gke->gqk"}> : () -> ()
    %cst_153 = arith.constant dense<0.000000e+00> : vector<8x8x8xf32>
    %559 = tpu.matmul %524, %541, %cst_153 {dimension_numbers = #tpu.dot_dimension_numbers<[2], [2], [1], [1], [0, 0, 0, 1, 1, 1], [0], [0]>} : vector<8x8x8xf32>, vector<8x8x8xf32>, vector<8x8x8xf32> -> vector<8x8x8xf32>
    "tpu.trace_stop"() : () -> ()
    %cst_154 = arith.constant dense<0xFF800000> : vector<8x8xf32>
    %560 = vector.multi_reduction <maximumf>, %559, %cst_154 [2] : vector<8x8x8xf32> to vector<8x8xf32>
    %561 = vector.shape_cast %560 : vector<8x8xf32> to vector<8x8x1xf32>
    %562 = vector.broadcast %561 : vector<8x8x1xf32> to vector<8x8x8xf32>
    %563 = arith.subf %559, %562 : vector<8x8x8xf32>
    %564 = math.exp %563 : vector<8x8x8xf32>
    %cst_155 = arith.constant dense<0.000000e+00> : vector<8x8xf32>
    %565 = vector.multi_reduction <add>, %564, %cst_155 [2] : vector<8x8x8xf32> to vector<8x8xf32>
    %566 = vector.shape_cast %565 : vector<8x8xf32> to vector<8x8x1xf32>
    %567 = tpu.reciprocal %566 {approx = true} : vector<8x8x1xf32> -> vector<8x8x1xf32>
    %568 = vector.broadcast %567 : vector<8x8x1xf32> to vector<8x8x8xf32>
    %569 = arith.mulf %564, %568 : vector<8x8x8xf32>
    "tpu.trace_start"() <{level = 10 : i32, message = "gqk,gke->gqe"}> : () -> ()
    %cst_156 = arith.constant dense<0.000000e+00> : vector<8x8x8xf32>
    %570 = tpu.matmul %569, %558, %cst_156 {dimension_numbers = #tpu.dot_dimension_numbers<[2], [1], [1], [2], [0, 0, 0, 1, 1, 2], [0], [0]>} : vector<8x8x8xf32>, vector<8x8x8xf32>, vector<8x8x8xf32> -> vector<8x8x8xf32>
    "tpu.trace_stop"() : () -> ()
    %571 = vector.extract_strided_slice %570 {offsets = [0, 0, 0], sizes = [1, 8, 8], strides = [1, 1, 1]} : vector<8x8x8xf32> to vector<1x8x8xf32>
    %572 = vector.shape_cast %571 : vector<1x8x8xf32> to vector<8x8xf32>
    %573 = vector.extract_strided_slice %570 {offsets = [1, 0, 0], sizes = [1, 8, 8], strides = [1, 1, 1]} : vector<8x8x8xf32> to vector<1x8x8xf32>
    %574 = vector.shape_cast %573 : vector<1x8x8xf32> to vector<8x8xf32>
    %575 = vector.extract_strided_slice %570 {offsets = [2, 0, 0], sizes = [1, 8, 8], strides = [1, 1, 1]} : vector<8x8x8xf32> to vector<1x8x8xf32>
    %576 = vector.shape_cast %575 : vector<1x8x8xf32> to vector<8x8xf32>
    %577 = vector.extract_strided_slice %570 {offsets = [3, 0, 0], sizes = [1, 8, 8], strides = [1, 1, 1]} : vector<8x8x8xf32> to vector<1x8x8xf32>
    %578 = vector.shape_cast %577 : vector<1x8x8xf32> to vector<8x8xf32>
    %579 = tpu.concatenate %572, %574, %576, %578 in 1 : vector<8x8xf32>, vector<8x8xf32>, vector<8x8xf32>, vector<8x8xf32> -> vector<8x32xf32>
    %580 = vector.extract_strided_slice %570 {offsets = [4, 0, 0], sizes = [1, 8, 8], strides = [1, 1, 1]} : vector<8x8x8xf32> to vector<1x8x8xf32>
    %581 = vector.shape_cast %580 : vector<1x8x8xf32> to vector<8x8xf32>
    %582 = vector.extract_strided_slice %570 {offsets = [5, 0, 0], sizes = [1, 8, 8], strides = [1, 1, 1]} : vector<8x8x8xf32> to vector<1x8x8xf32>
    %583 = vector.shape_cast %582 : vector<1x8x8xf32> to vector<8x8xf32>
    %584 = vector.extract_strided_slice %570 {offsets = [6, 0, 0], sizes = [1, 8, 8], strides = [1, 1, 1]} : vector<8x8x8xf32> to vector<1x8x8xf32>
    %585 = vector.shape_cast %584 : vector<1x8x8xf32> to vector<8x8xf32>
    %586 = vector.extract_strided_slice %570 {offsets = [7, 0, 0], sizes = [1, 8, 8], strides = [1, 1, 1]} : vector<8x8x8xf32> to vector<1x8x8xf32>
    %587 = vector.shape_cast %586 : vector<1x8x8xf32> to vector<8x8xf32>
    %588 = tpu.concatenate %581, %583, %585, %587 in 1 : vector<8x8xf32>, vector<8x8xf32>, vector<8x8xf32>, vector<8x8xf32> -> vector<8x32xf32>
    %589 = tpu.concatenate %579, %588 in 0 : vector<8x32xf32>, vector<8x32xf32> -> vector<16x32xf32>
    %590 = arith.truncf %589 : vector<16x32xf32> to vector<16x32xbf16>
    %cst_157 = arith.constant dense<0.000000e+00> : vector<16x32xf32>
    %591 = tpu.matmul %590, %506, %cst_157 {dimension_numbers = #tpu.dot_dimension_numbers<[1], [0], [0], [1], [0, 0, 1, 1], [], []>} : vector<16x32xbf16>, vector<32x32xbf16>, vector<16x32xf32> -> vector<16x32xf32>
    %592 = vector.broadcast %507 : vector<1x32xf32> to vector<16x32xf32>
    %593 = arith.addf %591, %592 : vector<16x32xf32>
    %594 = arith.addf %488, %593 : vector<16x32xf32>
    %c0_158 = arith.constant 0 : index
    %c0_159 = arith.constant 0 : index
    %595 = vector.load %arg30[%c0_158, %c0_159] : memref<2x32xf32, #tpu.memory_space<vmem>>, vector<1x32xf32>
    %c0_160 = arith.constant 0 : index
    %c0_161 = arith.constant 0 : index
    %596 = vector.load %arg31[%c0_160, %c0_161] : memref<2x32xf32, #tpu.memory_space<vmem>>, vector<1x32xf32>
    %cst_162 = arith.constant dense<0.000000e+00> : vector<16xf32>
    %597 = vector.multi_reduction <add>, %594, %cst_162 [1] : vector<16x32xf32> to vector<16xf32>
    %598 = vector.shape_cast %597 : vector<16xf32> to vector<16x1xf32>
    %cst_163 = arith.constant 3.200000e+01 : f32
    %599 = vector.broadcast %cst_163 : f32 to vector<16x1xf32>
    %600 = arith.divf %598, %599 : vector<16x1xf32>
    %601 = vector.broadcast %600 : vector<16x1xf32> to vector<16x32xf32>
    %602 = arith.subf %594, %601 : vector<16x32xf32>
    %603 = arith.mulf %602, %602 : vector<16x32xf32>
    %cst_164 = arith.constant dense<0.000000e+00> : vector<16xf32>
    %604 = vector.multi_reduction <add>, %603, %cst_164 [1] : vector<16x32xf32> to vector<16xf32>
    %605 = vector.shape_cast %604 : vector<16xf32> to vector<16x1xf32>
    %cst_165 = arith.constant 3.200000e+01 : f32
    %606 = vector.broadcast %cst_165 : f32 to vector<16x1xf32>
    %607 = arith.divf %605, %606 : vector<16x1xf32>
    %608 = vector.broadcast %600 : vector<16x1xf32> to vector<16x32xf32>
    %609 = arith.subf %594, %608 : vector<16x32xf32>
    %cst_166 = arith.constant 9.99999974E-6 : f32
    %610 = vector.broadcast %cst_166 : f32 to vector<16x1xf32>
    %611 = arith.addf %607, %610 : vector<16x1xf32>
    %612 = math.rsqrt %611 : vector<16x1xf32>
    %613 = vector.broadcast %612 : vector<16x1xf32> to vector<16x32xf32>
    %614 = arith.mulf %609, %613 : vector<16x32xf32>
    %615 = vector.broadcast %595 : vector<1x32xf32> to vector<16x32xf32>
    %616 = arith.mulf %614, %615 : vector<16x32xf32>
    %617 = vector.broadcast %596 : vector<1x32xf32> to vector<16x32xf32>
    %618 = arith.addf %616, %617 : vector<16x32xf32>
    %c0_167 = arith.constant 0 : index
    %c0_168 = arith.constant 0 : index
    %c0_169 = arith.constant 0 : index
    %619 = vector.load %arg34[%c0_167, %c0_168, %c0_169] : memref<2x32x64xbf16, #tpu.memory_space<vmem>>, vector<1x32x64xbf16>
    %620 = vector.shape_cast %619 : vector<1x32x64xbf16> to vector<32x64xbf16>
    %c0_170 = arith.constant 0 : index
    %c0_171 = arith.constant 0 : index
    %621 = vector.load %arg35[%c0_170, %c0_171] : memref<2x64xf32, #tpu.memory_space<vmem>>, vector<1x64xf32>
    %c0_172 = arith.constant 0 : index
    %c0_173 = arith.constant 0 : index
    %c0_174 = arith.constant 0 : index
    %622 = vector.load %arg36[%c0_172, %c0_173, %c0_174] : memref<2x64x32xbf16, #tpu.memory_space<vmem>>, vector<1x64x32xbf16>
    %623 = vector.shape_cast %622 : vector<1x64x32xbf16> to vector<64x32xbf16>
    %c0_175 = arith.constant 0 : index
    %c0_176 = arith.constant 0 : index
    %624 = vector.load %arg37[%c0_175, %c0_176] : memref<2x32xf32, #tpu.memory_space<vmem>>, vector<1x32xf32>
    %625 = arith.truncf %618 : vector<16x32xf32> to vector<16x32xbf16>
    %cst_177 = arith.constant dense<0.000000e+00> : vector<16x64xf32>
    %626 = tpu.matmul %625, %620, %cst_177 {dimension_numbers = #tpu.dot_dimension_numbers<[1], [0], [0], [1], [0, 0, 1, 1], [], []>} : vector<16x32xbf16>, vector<32x64xbf16>, vector<16x64xf32> -> vector<16x64xf32>
    %627 = vector.broadcast %621 : vector<1x64xf32> to vector<16x64xf32>
    %628 = arith.addf %626, %627 : vector<16x64xf32>
    %cst_178 = arith.constant 0.000000e+00 : f32
    %629 = vector.broadcast %cst_178 : f32 to vector<16x64xf32>
    %630 = arith.maximumf %628, %629 : vector<16x64xf32>
    %631 = arith.truncf %630 : vector<16x64xf32> to vector<16x64xbf16>
    %cst_179 = arith.constant dense<0.000000e+00> : vector<16x32xf32>
    %632 = tpu.matmul %631, %623, %cst_179 {dimension_numbers = #tpu.dot_dimension_numbers<[1], [0], [0], [1], [0, 0, 1, 1], [], []>} : vector<16x64xbf16>, vector<64x32xbf16>, vector<16x32xf32> -> vector<16x32xf32>
    %633 = vector.broadcast %624 : vector<1x32xf32> to vector<16x32xf32>
    %634 = arith.addf %632, %633 : vector<16x32xf32>
    %635 = arith.addf %618, %634 : vector<16x32xf32>
    %c0_180 = arith.constant 0 : index
    %c0_181 = arith.constant 0 : index
    %636 = vector.load %arg32[%c0_180, %c0_181] : memref<2x32xf32, #tpu.memory_space<vmem>>, vector<1x32xf32>
    %c0_182 = arith.constant 0 : index
    %c0_183 = arith.constant 0 : index
    %637 = vector.load %arg33[%c0_182, %c0_183] : memref<2x32xf32, #tpu.memory_space<vmem>>, vector<1x32xf32>
    %cst_184 = arith.constant dense<0.000000e+00> : vector<16xf32>
    %638 = vector.multi_reduction <add>, %635, %cst_184 [1] : vector<16x32xf32> to vector<16xf32>
    %639 = vector.shape_cast %638 : vector<16xf32> to vector<16x1xf32>
    %cst_185 = arith.constant 3.200000e+01 : f32
    %640 = vector.broadcast %cst_185 : f32 to vector<16x1xf32>
    %641 = arith.divf %639, %640 : vector<16x1xf32>
    %642 = vector.broadcast %641 : vector<16x1xf32> to vector<16x32xf32>
    %643 = arith.subf %635, %642 : vector<16x32xf32>
    %644 = arith.mulf %643, %643 : vector<16x32xf32>
    %cst_186 = arith.constant dense<0.000000e+00> : vector<16xf32>
    %645 = vector.multi_reduction <add>, %644, %cst_186 [1] : vector<16x32xf32> to vector<16xf32>
    %646 = vector.shape_cast %645 : vector<16xf32> to vector<16x1xf32>
    %cst_187 = arith.constant 3.200000e+01 : f32
    %647 = vector.broadcast %cst_187 : f32 to vector<16x1xf32>
    %648 = arith.divf %646, %647 : vector<16x1xf32>
    %649 = vector.broadcast %641 : vector<16x1xf32> to vector<16x32xf32>
    %650 = arith.subf %635, %649 : vector<16x32xf32>
    %cst_188 = arith.constant 9.99999974E-6 : f32
    %651 = vector.broadcast %cst_188 : f32 to vector<16x1xf32>
    %652 = arith.addf %648, %651 : vector<16x1xf32>
    %653 = math.rsqrt %652 : vector<16x1xf32>
    %654 = vector.broadcast %653 : vector<16x1xf32> to vector<16x32xf32>
    %655 = arith.mulf %650, %654 : vector<16x32xf32>
    %656 = vector.broadcast %636 : vector<1x32xf32> to vector<16x32xf32>
    %657 = arith.mulf %655, %656 : vector<16x32xf32>
    %658 = vector.broadcast %637 : vector<1x32xf32> to vector<16x32xf32>
    %659 = arith.addf %657, %658 : vector<16x32xf32>
    %c1_189 = arith.constant 1 : index
    %c0_190 = arith.constant 0 : index
    %c0_191 = arith.constant 0 : index
    %660 = vector.load %arg18[%c1_189, %c0_190, %c0_191] : memref<2x32x96xbf16, #tpu.memory_space<vmem>>, vector<1x32x96xbf16>
    %661 = vector.shape_cast %660 : vector<1x32x96xbf16> to vector<32x96xbf16>
    %c1_192 = arith.constant 1 : index
    %c0_193 = arith.constant 0 : index
    %662 = vector.load %arg19[%c1_192, %c0_193] : memref<2x96xf32, #tpu.memory_space<vmem>>, vector<1x96xf32>
    %663 = arith.truncf %659 : vector<16x32xf32> to vector<16x32xbf16>
    %cst_194 = arith.constant dense<0.000000e+00> : vector<16x96xf32>
    %664 = tpu.matmul %663, %661, %cst_194 {dimension_numbers = #tpu.dot_dimension_numbers<[1], [0], [0], [1], [0, 0, 1, 1], [], []>} : vector<16x32xbf16>, vector<32x96xbf16>, vector<16x96xf32> -> vector<16x96xf32>
    %665 = vector.broadcast %662 : vector<1x96xf32> to vector<16x96xf32>
    %666 = arith.addf %664, %665 : vector<16x96xf32>
    %667 = vector.extract_strided_slice %666 {offsets = [0, 0], sizes = [16, 32], strides = [1, 1]} : vector<16x96xf32> to vector<16x32xf32>
    %668 = vector.extract_strided_slice %666 {offsets = [0, 32], sizes = [16, 32], strides = [1, 1]} : vector<16x96xf32> to vector<16x32xf32>
    %669 = vector.extract_strided_slice %666 {offsets = [0, 64], sizes = [16, 32], strides = [1, 1]} : vector<16x96xf32> to vector<16x32xf32>
    %c1_195 = arith.constant 1 : index
    %c0_196 = arith.constant 0 : index
    %c0_197 = arith.constant 0 : index
    %670 = vector.load %arg20[%c1_195, %c0_196, %c0_197] : memref<2x32x32xbf16, #tpu.memory_space<vmem>>, vector<1x32x32xbf16>
    %671 = vector.shape_cast %670 : vector<1x32x32xbf16> to vector<32x32xbf16>
    %c1_198 = arith.constant 1 : index
    %c0_199 = arith.constant 0 : index
    %672 = vector.load %arg21[%c1_198, %c0_199] : memref<2x32xf32, #tpu.memory_space<vmem>>, vector<1x32xf32>
    %673 = vector.extract_strided_slice %667 {offsets = [0, 0], sizes = [8, 8], strides = [1, 1]} : vector<16x32xf32> to vector<8x8xf32>
    %674 = vector.extract_strided_slice %667 {offsets = [0, 8], sizes = [8, 8], strides = [1, 1]} : vector<16x32xf32> to vector<8x8xf32>
    %675 = vector.extract_strided_slice %667 {offsets = [0, 16], sizes = [8, 8], strides = [1, 1]} : vector<16x32xf32> to vector<8x8xf32>
    %676 = vector.extract_strided_slice %667 {offsets = [0, 24], sizes = [8, 8], strides = [1, 1]} : vector<16x32xf32> to vector<8x8xf32>
    %677 = vector.extract_strided_slice %667 {offsets = [8, 0], sizes = [8, 8], strides = [1, 1]} : vector<16x32xf32> to vector<8x8xf32>
    %678 = vector.extract_strided_slice %667 {offsets = [8, 8], sizes = [8, 8], strides = [1, 1]} : vector<16x32xf32> to vector<8x8xf32>
    %679 = vector.extract_strided_slice %667 {offsets = [8, 16], sizes = [8, 8], strides = [1, 1]} : vector<16x32xf32> to vector<8x8xf32>
    %680 = vector.extract_strided_slice %667 {offsets = [8, 24], sizes = [8, 8], strides = [1, 1]} : vector<16x32xf32> to vector<8x8xf32>
    %681 = vector.shape_cast %673 : vector<8x8xf32> to vector<1x8x8xf32>
    %682 = vector.shape_cast %674 : vector<8x8xf32> to vector<1x8x8xf32>
    %683 = vector.shape_cast %675 : vector<8x8xf32> to vector<1x8x8xf32>
    %684 = vector.shape_cast %676 : vector<8x8xf32> to vector<1x8x8xf32>
    %685 = vector.shape_cast %677 : vector<8x8xf32> to vector<1x8x8xf32>
    %686 = vector.shape_cast %678 : vector<8x8xf32> to vector<1x8x8xf32>
    %687 = vector.shape_cast %679 : vector<8x8xf32> to vector<1x8x8xf32>
    %688 = vector.shape_cast %680 : vector<8x8xf32> to vector<1x8x8xf32>
    %689 = tpu.concatenate %681, %682, %683, %684, %685, %686, %687, %688 in 0 : vector<1x8x8xf32>, vector<1x8x8xf32>, vector<1x8x8xf32>, vector<1x8x8xf32>, vector<1x8x8xf32>, vector<1x8x8xf32>, vector<1x8x8xf32>, vector<1x8x8xf32> -> vector<8x8x8xf32>
    %690 = vector.extract_strided_slice %668 {offsets = [0, 0], sizes = [8, 8], strides = [1, 1]} : vector<16x32xf32> to vector<8x8xf32>
    %691 = vector.extract_strided_slice %668 {offsets = [0, 8], sizes = [8, 8], strides = [1, 1]} : vector<16x32xf32> to vector<8x8xf32>
    %692 = vector.extract_strided_slice %668 {offsets = [0, 16], sizes = [8, 8], strides = [1, 1]} : vector<16x32xf32> to vector<8x8xf32>
    %693 = vector.extract_strided_slice %668 {offsets = [0, 24], sizes = [8, 8], strides = [1, 1]} : vector<16x32xf32> to vector<8x8xf32>
    %694 = vector.extract_strided_slice %668 {offsets = [8, 0], sizes = [8, 8], strides = [1, 1]} : vector<16x32xf32> to vector<8x8xf32>
    %695 = vector.extract_strided_slice %668 {offsets = [8, 8], sizes = [8, 8], strides = [1, 1]} : vector<16x32xf32> to vector<8x8xf32>
    %696 = vector.extract_strided_slice %668 {offsets = [8, 16], sizes = [8, 8], strides = [1, 1]} : vector<16x32xf32> to vector<8x8xf32>
    %697 = vector.extract_strided_slice %668 {offsets = [8, 24], sizes = [8, 8], strides = [1, 1]} : vector<16x32xf32> to vector<8x8xf32>
    %698 = vector.shape_cast %690 : vector<8x8xf32> to vector<1x8x8xf32>
    %699 = vector.shape_cast %691 : vector<8x8xf32> to vector<1x8x8xf32>
    %700 = vector.shape_cast %692 : vector<8x8xf32> to vector<1x8x8xf32>
    %701 = vector.shape_cast %693 : vector<8x8xf32> to vector<1x8x8xf32>
    %702 = vector.shape_cast %694 : vector<8x8xf32> to vector<1x8x8xf32>
    %703 = vector.shape_cast %695 : vector<8x8xf32> to vector<1x8x8xf32>
    %704 = vector.shape_cast %696 : vector<8x8xf32> to vector<1x8x8xf32>
    %705 = vector.shape_cast %697 : vector<8x8xf32> to vector<1x8x8xf32>
    %706 = tpu.concatenate %698, %699, %700, %701, %702, %703, %704, %705 in 0 : vector<1x8x8xf32>, vector<1x8x8xf32>, vector<1x8x8xf32>, vector<1x8x8xf32>, vector<1x8x8xf32>, vector<1x8x8xf32>, vector<1x8x8xf32>, vector<1x8x8xf32> -> vector<8x8x8xf32>
    %707 = vector.extract_strided_slice %669 {offsets = [0, 0], sizes = [8, 8], strides = [1, 1]} : vector<16x32xf32> to vector<8x8xf32>
    %708 = vector.extract_strided_slice %669 {offsets = [0, 8], sizes = [8, 8], strides = [1, 1]} : vector<16x32xf32> to vector<8x8xf32>
    %709 = vector.extract_strided_slice %669 {offsets = [0, 16], sizes = [8, 8], strides = [1, 1]} : vector<16x32xf32> to vector<8x8xf32>
    %710 = vector.extract_strided_slice %669 {offsets = [0, 24], sizes = [8, 8], strides = [1, 1]} : vector<16x32xf32> to vector<8x8xf32>
    %711 = vector.extract_strided_slice %669 {offsets = [8, 0], sizes = [8, 8], strides = [1, 1]} : vector<16x32xf32> to vector<8x8xf32>
    %712 = vector.extract_strided_slice %669 {offsets = [8, 8], sizes = [8, 8], strides = [1, 1]} : vector<16x32xf32> to vector<8x8xf32>
    %713 = vector.extract_strided_slice %669 {offsets = [8, 16], sizes = [8, 8], strides = [1, 1]} : vector<16x32xf32> to vector<8x8xf32>
    %714 = vector.extract_strided_slice %669 {offsets = [8, 24], sizes = [8, 8], strides = [1, 1]} : vector<16x32xf32> to vector<8x8xf32>
    %715 = vector.shape_cast %707 : vector<8x8xf32> to vector<1x8x8xf32>
    %716 = vector.shape_cast %708 : vector<8x8xf32> to vector<1x8x8xf32>
    %717 = vector.shape_cast %709 : vector<8x8xf32> to vector<1x8x8xf32>
    %718 = vector.shape_cast %710 : vector<8x8xf32> to vector<1x8x8xf32>
    %719 = vector.shape_cast %711 : vector<8x8xf32> to vector<1x8x8xf32>
    %720 = vector.shape_cast %712 : vector<8x8xf32> to vector<1x8x8xf32>
    %721 = vector.shape_cast %713 : vector<8x8xf32> to vector<1x8x8xf32>
    %722 = vector.shape_cast %714 : vector<8x8xf32> to vector<1x8x8xf32>
    %723 = tpu.concatenate %715, %716, %717, %718, %719, %720, %721, %722 in 0 : vector<1x8x8xf32>, vector<1x8x8xf32>, vector<1x8x8xf32>, vector<1x8x8xf32>, vector<1x8x8xf32>, vector<1x8x8xf32>, vector<1x8x8xf32>, vector<1x8x8xf32> -> vector<8x8x8xf32>
    "tpu.trace_start"() <{level = 10 : i32, message = "gqe,gke->gqk"}> : () -> ()
    %cst_200 = arith.constant dense<0.000000e+00> : vector<8x8x8xf32>
    %724 = tpu.matmul %689, %706, %cst_200 {dimension_numbers = #tpu.dot_dimension_numbers<[2], [2], [1], [1], [0, 0, 0, 1, 1, 1], [0], [0]>} : vector<8x8x8xf32>, vector<8x8x8xf32>, vector<8x8x8xf32> -> vector<8x8x8xf32>
    "tpu.trace_stop"() : () -> ()
    %cst_201 = arith.constant dense<0xFF800000> : vector<8x8xf32>
    %725 = vector.multi_reduction <maximumf>, %724, %cst_201 [2] : vector<8x8x8xf32> to vector<8x8xf32>
    %726 = vector.shape_cast %725 : vector<8x8xf32> to vector<8x8x1xf32>
    %727 = vector.broadcast %726 : vector<8x8x1xf32> to vector<8x8x8xf32>
    %728 = arith.subf %724, %727 : vector<8x8x8xf32>
    %729 = math.exp %728 : vector<8x8x8xf32>
    %cst_202 = arith.constant dense<0.000000e+00> : vector<8x8xf32>
    %730 = vector.multi_reduction <add>, %729, %cst_202 [2] : vector<8x8x8xf32> to vector<8x8xf32>
    %731 = vector.shape_cast %730 : vector<8x8xf32> to vector<8x8x1xf32>
    %732 = tpu.reciprocal %731 {approx = true} : vector<8x8x1xf32> -> vector<8x8x1xf32>
    %733 = vector.broadcast %732 : vector<8x8x1xf32> to vector<8x8x8xf32>
    %734 = arith.mulf %729, %733 : vector<8x8x8xf32>
    "tpu.trace_start"() <{level = 10 : i32, message = "gqk,gke->gqe"}> : () -> ()
    %cst_203 = arith.constant dense<0.000000e+00> : vector<8x8x8xf32>
    %735 = tpu.matmul %734, %723, %cst_203 {dimension_numbers = #tpu.dot_dimension_numbers<[2], [1], [1], [2], [0, 0, 0, 1, 1, 2], [0], [0]>} : vector<8x8x8xf32>, vector<8x8x8xf32>, vector<8x8x8xf32> -> vector<8x8x8xf32>
    "tpu.trace_stop"() : () -> ()
    %736 = vector.extract_strided_slice %735 {offsets = [0, 0, 0], sizes = [1, 8, 8], strides = [1, 1, 1]} : vector<8x8x8xf32> to vector<1x8x8xf32>
    %737 = vector.shape_cast %736 : vector<1x8x8xf32> to vector<8x8xf32>
    %738 = vector.extract_strided_slice %735 {offsets = [1, 0, 0], sizes = [1, 8, 8], strides = [1, 1, 1]} : vector<8x8x8xf32> to vector<1x8x8xf32>
    %739 = vector.shape_cast %738 : vector<1x8x8xf32> to vector<8x8xf32>
    %740 = vector.extract_strided_slice %735 {offsets = [2, 0, 0], sizes = [1, 8, 8], strides = [1, 1, 1]} : vector<8x8x8xf32> to vector<1x8x8xf32>
    %741 = vector.shape_cast %740 : vector<1x8x8xf32> to vector<8x8xf32>
    %742 = vector.extract_strided_slice %735 {offsets = [3, 0, 0], sizes = [1, 8, 8], strides = [1, 1, 1]} : vector<8x8x8xf32> to vector<1x8x8xf32>
    %743 = vector.shape_cast %742 : vector<1x8x8xf32> to vector<8x8xf32>
    %744 = tpu.concatenate %737, %739, %741, %743 in 1 : vector<8x8xf32>, vector<8x8xf32>, vector<8x8xf32>, vector<8x8xf32> -> vector<8x32xf32>
    %745 = vector.extract_strided_slice %735 {offsets = [4, 0, 0], sizes = [1, 8, 8], strides = [1, 1, 1]} : vector<8x8x8xf32> to vector<1x8x8xf32>
    %746 = vector.shape_cast %745 : vector<1x8x8xf32> to vector<8x8xf32>
    %747 = vector.extract_strided_slice %735 {offsets = [5, 0, 0], sizes = [1, 8, 8], strides = [1, 1, 1]} : vector<8x8x8xf32> to vector<1x8x8xf32>
    %748 = vector.shape_cast %747 : vector<1x8x8xf32> to vector<8x8xf32>
    %749 = vector.extract_strided_slice %735 {offsets = [6, 0, 0], sizes = [1, 8, 8], strides = [1, 1, 1]} : vector<8x8x8xf32> to vector<1x8x8xf32>
    %750 = vector.shape_cast %749 : vector<1x8x8xf32> to vector<8x8xf32>
    %751 = vector.extract_strided_slice %735 {offsets = [7, 0, 0], sizes = [1, 8, 8], strides = [1, 1, 1]} : vector<8x8x8xf32> to vector<1x8x8xf32>
    %752 = vector.shape_cast %751 : vector<1x8x8xf32> to vector<8x8xf32>
    %753 = tpu.concatenate %746, %748, %750, %752 in 1 : vector<8x8xf32>, vector<8x8xf32>, vector<8x8xf32>, vector<8x8xf32> -> vector<8x32xf32>
    %754 = tpu.concatenate %744, %753 in 0 : vector<8x32xf32>, vector<8x32xf32> -> vector<16x32xf32>
    %755 = arith.truncf %754 : vector<16x32xf32> to vector<16x32xbf16>
    %cst_204 = arith.constant dense<0.000000e+00> : vector<16x32xf32>
    %756 = tpu.matmul %755, %671, %cst_204 {dimension_numbers = #tpu.dot_dimension_numbers<[1], [0], [0], [1], [0, 0, 1, 1], [], []>} : vector<16x32xbf16>, vector<32x32xbf16>, vector<16x32xf32> -> vector<16x32xf32>
    %757 = vector.broadcast %672 : vector<1x32xf32> to vector<16x32xf32>
    %758 = arith.addf %756, %757 : vector<16x32xf32>
    %759 = arith.addf %659, %758 : vector<16x32xf32>
    %c1_205 = arith.constant 1 : index
    %c0_206 = arith.constant 0 : index
    %760 = vector.load %arg28[%c1_205, %c0_206] : memref<2x32xf32, #tpu.memory_space<vmem>>, vector<1x32xf32>
    %c1_207 = arith.constant 1 : index
    %c0_208 = arith.constant 0 : index
    %761 = vector.load %arg29[%c1_207, %c0_208] : memref<2x32xf32, #tpu.memory_space<vmem>>, vector<1x32xf32>
    %cst_209 = arith.constant dense<0.000000e+00> : vector<16xf32>
    %762 = vector.multi_reduction <add>, %759, %cst_209 [1] : vector<16x32xf32> to vector<16xf32>
    %763 = vector.shape_cast %762 : vector<16xf32> to vector<16x1xf32>
    %cst_210 = arith.constant 3.200000e+01 : f32
    %764 = vector.broadcast %cst_210 : f32 to vector<16x1xf32>
    %765 = arith.divf %763, %764 : vector<16x1xf32>
    %766 = vector.broadcast %765 : vector<16x1xf32> to vector<16x32xf32>
    %767 = arith.subf %759, %766 : vector<16x32xf32>
    %768 = arith.mulf %767, %767 : vector<16x32xf32>
    %cst_211 = arith.constant dense<0.000000e+00> : vector<16xf32>
    %769 = vector.multi_reduction <add>, %768, %cst_211 [1] : vector<16x32xf32> to vector<16xf32>
    %770 = vector.shape_cast %769 : vector<16xf32> to vector<16x1xf32>
    %cst_212 = arith.constant 3.200000e+01 : f32
    %771 = vector.broadcast %cst_212 : f32 to vector<16x1xf32>
    %772 = arith.divf %770, %771 : vector<16x1xf32>
    %773 = vector.broadcast %765 : vector<16x1xf32> to vector<16x32xf32>
    %774 = arith.subf %759, %773 : vector<16x32xf32>
    %cst_213 = arith.constant 9.99999974E-6 : f32
    %775 = vector.broadcast %cst_213 : f32 to vector<16x1xf32>
    %776 = arith.addf %772, %775 : vector<16x1xf32>
    %777 = math.rsqrt %776 : vector<16x1xf32>
    %778 = vector.broadcast %777 : vector<16x1xf32> to vector<16x32xf32>
    %779 = arith.mulf %774, %778 : vector<16x32xf32>
    %780 = vector.broadcast %760 : vector<1x32xf32> to vector<16x32xf32>
    %781 = arith.mulf %779, %780 : vector<16x32xf32>
    %782 = vector.broadcast %761 : vector<1x32xf32> to vector<16x32xf32>
    %783 = arith.addf %781, %782 : vector<16x32xf32>
    %c1_214 = arith.constant 1 : index
    %c0_215 = arith.constant 0 : index
    %c0_216 = arith.constant 0 : index
    %784 = vector.load %arg22[%c1_214, %c0_215, %c0_216] : memref<2x32x32xbf16, #tpu.memory_space<vmem>>, vector<1x32x32xbf16>
    %785 = vector.shape_cast %784 : vector<1x32x32xbf16> to vector<32x32xbf16>
    %c1_217 = arith.constant 1 : index
    %c0_218 = arith.constant 0 : index
    %786 = vector.load %arg23[%c1_217, %c0_218] : memref<2x32xf32, #tpu.memory_space<vmem>>, vector<1x32xf32>
    %787 = arith.truncf %783 : vector<16x32xf32> to vector<16x32xbf16>
    %cst_219 = arith.constant dense<0.000000e+00> : vector<16x32xf32>
    %788 = tpu.matmul %787, %785, %cst_219 {dimension_numbers = #tpu.dot_dimension_numbers<[1], [0], [0], [1], [0, 0, 1, 1], [], []>} : vector<16x32xbf16>, vector<32x32xbf16>, vector<16x32xf32> -> vector<16x32xf32>
    %789 = vector.broadcast %786 : vector<1x32xf32> to vector<16x32xf32>
    %790 = arith.addf %788, %789 : vector<16x32xf32>
    %c1_220 = arith.constant 1 : index
    %c0_221 = arith.constant 0 : index
    %c0_222 = arith.constant 0 : index
    %791 = vector.load %arg24[%c1_220, %c0_221, %c0_222] : memref<2x32x64xbf16, #tpu.memory_space<vmem>>, vector<1x32x64xbf16>
    %792 = vector.shape_cast %791 : vector<1x32x64xbf16> to vector<32x64xbf16>
    %c1_223 = arith.constant 1 : index
    %c0_224 = arith.constant 0 : index
    %793 = vector.load %arg25[%c1_223, %c0_224] : memref<2x64xf32, #tpu.memory_space<vmem>>, vector<1x64xf32>
    %794 = arith.truncf %364 : vector<16x32xf32> to vector<16x32xbf16>
    %cst_225 = arith.constant dense<0.000000e+00> : vector<16x64xf32>
    %795 = tpu.matmul %794, %792, %cst_225 {dimension_numbers = #tpu.dot_dimension_numbers<[1], [0], [0], [1], [0, 0, 1, 1], [], []>} : vector<16x32xbf16>, vector<32x64xbf16>, vector<16x64xf32> -> vector<16x64xf32>
    %796 = vector.broadcast %793 : vector<1x64xf32> to vector<16x64xf32>
    %797 = arith.addf %795, %796 : vector<16x64xf32>
    %798 = vector.extract_strided_slice %797 {offsets = [0, 0], sizes = [16, 32], strides = [1, 1]} : vector<16x64xf32> to vector<16x32xf32>
    %799 = vector.extract_strided_slice %797 {offsets = [0, 32], sizes = [16, 32], strides = [1, 1]} : vector<16x64xf32> to vector<16x32xf32>
    %c1_226 = arith.constant 1 : index
    %c0_227 = arith.constant 0 : index
    %c0_228 = arith.constant 0 : index
    %800 = vector.load %arg26[%c1_226, %c0_227, %c0_228] : memref<2x32x32xbf16, #tpu.memory_space<vmem>>, vector<1x32x32xbf16>
    %801 = vector.shape_cast %800 : vector<1x32x32xbf16> to vector<32x32xbf16>
    %c1_229 = arith.constant 1 : index
    %c0_230 = arith.constant 0 : index
    %802 = vector.load %arg27[%c1_229, %c0_230] : memref<2x32xf32, #tpu.memory_space<vmem>>, vector<1x32xf32>
    %803 = vector.extract_strided_slice %790 {offsets = [0, 0], sizes = [8, 8], strides = [1, 1]} : vector<16x32xf32> to vector<8x8xf32>
    %804 = vector.extract_strided_slice %790 {offsets = [0, 8], sizes = [8, 8], strides = [1, 1]} : vector<16x32xf32> to vector<8x8xf32>
    %805 = vector.extract_strided_slice %790 {offsets = [0, 16], sizes = [8, 8], strides = [1, 1]} : vector<16x32xf32> to vector<8x8xf32>
    %806 = vector.extract_strided_slice %790 {offsets = [0, 24], sizes = [8, 8], strides = [1, 1]} : vector<16x32xf32> to vector<8x8xf32>
    %807 = vector.extract_strided_slice %790 {offsets = [8, 0], sizes = [8, 8], strides = [1, 1]} : vector<16x32xf32> to vector<8x8xf32>
    %808 = vector.extract_strided_slice %790 {offsets = [8, 8], sizes = [8, 8], strides = [1, 1]} : vector<16x32xf32> to vector<8x8xf32>
    %809 = vector.extract_strided_slice %790 {offsets = [8, 16], sizes = [8, 8], strides = [1, 1]} : vector<16x32xf32> to vector<8x8xf32>
    %810 = vector.extract_strided_slice %790 {offsets = [8, 24], sizes = [8, 8], strides = [1, 1]} : vector<16x32xf32> to vector<8x8xf32>
    %811 = vector.shape_cast %803 : vector<8x8xf32> to vector<1x8x8xf32>
    %812 = vector.shape_cast %804 : vector<8x8xf32> to vector<1x8x8xf32>
    %813 = vector.shape_cast %805 : vector<8x8xf32> to vector<1x8x8xf32>
    %814 = vector.shape_cast %806 : vector<8x8xf32> to vector<1x8x8xf32>
    %815 = vector.shape_cast %807 : vector<8x8xf32> to vector<1x8x8xf32>
    %816 = vector.shape_cast %808 : vector<8x8xf32> to vector<1x8x8xf32>
    %817 = vector.shape_cast %809 : vector<8x8xf32> to vector<1x8x8xf32>
    %818 = vector.shape_cast %810 : vector<8x8xf32> to vector<1x8x8xf32>
    %819 = tpu.concatenate %811, %812, %813, %814, %815, %816, %817, %818 in 0 : vector<1x8x8xf32>, vector<1x8x8xf32>, vector<1x8x8xf32>, vector<1x8x8xf32>, vector<1x8x8xf32>, vector<1x8x8xf32>, vector<1x8x8xf32>, vector<1x8x8xf32> -> vector<8x8x8xf32>
    %820 = vector.extract_strided_slice %798 {offsets = [0, 0], sizes = [8, 8], strides = [1, 1]} : vector<16x32xf32> to vector<8x8xf32>
    %821 = vector.extract_strided_slice %798 {offsets = [0, 8], sizes = [8, 8], strides = [1, 1]} : vector<16x32xf32> to vector<8x8xf32>
    %822 = vector.extract_strided_slice %798 {offsets = [0, 16], sizes = [8, 8], strides = [1, 1]} : vector<16x32xf32> to vector<8x8xf32>
    %823 = vector.extract_strided_slice %798 {offsets = [0, 24], sizes = [8, 8], strides = [1, 1]} : vector<16x32xf32> to vector<8x8xf32>
    %824 = vector.extract_strided_slice %798 {offsets = [8, 0], sizes = [8, 8], strides = [1, 1]} : vector<16x32xf32> to vector<8x8xf32>
    %825 = vector.extract_strided_slice %798 {offsets = [8, 8], sizes = [8, 8], strides = [1, 1]} : vector<16x32xf32> to vector<8x8xf32>
    %826 = vector.extract_strided_slice %798 {offsets = [8, 16], sizes = [8, 8], strides = [1, 1]} : vector<16x32xf32> to vector<8x8xf32>
    %827 = vector.extract_strided_slice %798 {offsets = [8, 24], sizes = [8, 8], strides = [1, 1]} : vector<16x32xf32> to vector<8x8xf32>
    %828 = vector.shape_cast %820 : vector<8x8xf32> to vector<1x8x8xf32>
    %829 = vector.shape_cast %821 : vector<8x8xf32> to vector<1x8x8xf32>
    %830 = vector.shape_cast %822 : vector<8x8xf32> to vector<1x8x8xf32>
    %831 = vector.shape_cast %823 : vector<8x8xf32> to vector<1x8x8xf32>
    %832 = vector.shape_cast %824 : vector<8x8xf32> to vector<1x8x8xf32>
    %833 = vector.shape_cast %825 : vector<8x8xf32> to vector<1x8x8xf32>
    %834 = vector.shape_cast %826 : vector<8x8xf32> to vector<1x8x8xf32>
    %835 = vector.shape_cast %827 : vector<8x8xf32> to vector<1x8x8xf32>
    %836 = tpu.concatenate %828, %829, %830, %831, %832, %833, %834, %835 in 0 : vector<1x8x8xf32>, vector<1x8x8xf32>, vector<1x8x8xf32>, vector<1x8x8xf32>, vector<1x8x8xf32>, vector<1x8x8xf32>, vector<1x8x8xf32>, vector<1x8x8xf32> -> vector<8x8x8xf32>
    %837 = vector.extract_strided_slice %799 {offsets = [0, 0], sizes = [8, 8], strides = [1, 1]} : vector<16x32xf32> to vector<8x8xf32>
    %838 = vector.extract_strided_slice %799 {offsets = [0, 8], sizes = [8, 8], strides = [1, 1]} : vector<16x32xf32> to vector<8x8xf32>
    %839 = vector.extract_strided_slice %799 {offsets = [0, 16], sizes = [8, 8], strides = [1, 1]} : vector<16x32xf32> to vector<8x8xf32>
    %840 = vector.extract_strided_slice %799 {offsets = [0, 24], sizes = [8, 8], strides = [1, 1]} : vector<16x32xf32> to vector<8x8xf32>
    %841 = vector.extract_strided_slice %799 {offsets = [8, 0], sizes = [8, 8], strides = [1, 1]} : vector<16x32xf32> to vector<8x8xf32>
    %842 = vector.extract_strided_slice %799 {offsets = [8, 8], sizes = [8, 8], strides = [1, 1]} : vector<16x32xf32> to vector<8x8xf32>
    %843 = vector.extract_strided_slice %799 {offsets = [8, 16], sizes = [8, 8], strides = [1, 1]} : vector<16x32xf32> to vector<8x8xf32>
    %844 = vector.extract_strided_slice %799 {offsets = [8, 24], sizes = [8, 8], strides = [1, 1]} : vector<16x32xf32> to vector<8x8xf32>
    %845 = vector.shape_cast %837 : vector<8x8xf32> to vector<1x8x8xf32>
    %846 = vector.shape_cast %838 : vector<8x8xf32> to vector<1x8x8xf32>
    %847 = vector.shape_cast %839 : vector<8x8xf32> to vector<1x8x8xf32>
    %848 = vector.shape_cast %840 : vector<8x8xf32> to vector<1x8x8xf32>
    %849 = vector.shape_cast %841 : vector<8x8xf32> to vector<1x8x8xf32>
    %850 = vector.shape_cast %842 : vector<8x8xf32> to vector<1x8x8xf32>
    %851 = vector.shape_cast %843 : vector<8x8xf32> to vector<1x8x8xf32>
    %852 = vector.shape_cast %844 : vector<8x8xf32> to vector<1x8x8xf32>
    %853 = tpu.concatenate %845, %846, %847, %848, %849, %850, %851, %852 in 0 : vector<1x8x8xf32>, vector<1x8x8xf32>, vector<1x8x8xf32>, vector<1x8x8xf32>, vector<1x8x8xf32>, vector<1x8x8xf32>, vector<1x8x8xf32>, vector<1x8x8xf32> -> vector<8x8x8xf32>
    "tpu.trace_start"() <{level = 10 : i32, message = "gqe,gke->gqk"}> : () -> ()
    %cst_231 = arith.constant dense<0.000000e+00> : vector<8x8x8xf32>
    %854 = tpu.matmul %819, %836, %cst_231 {dimension_numbers = #tpu.dot_dimension_numbers<[2], [2], [1], [1], [0, 0, 0, 1, 1, 1], [0], [0]>} : vector<8x8x8xf32>, vector<8x8x8xf32>, vector<8x8x8xf32> -> vector<8x8x8xf32>
    "tpu.trace_stop"() : () -> ()
    %cst_232 = arith.constant dense<0xFF800000> : vector<8x8xf32>
    %855 = vector.multi_reduction <maximumf>, %854, %cst_232 [2] : vector<8x8x8xf32> to vector<8x8xf32>
    %856 = vector.shape_cast %855 : vector<8x8xf32> to vector<8x8x1xf32>
    %857 = vector.broadcast %856 : vector<8x8x1xf32> to vector<8x8x8xf32>
    %858 = arith.subf %854, %857 : vector<8x8x8xf32>
    %859 = math.exp %858 : vector<8x8x8xf32>
    %cst_233 = arith.constant dense<0.000000e+00> : vector<8x8xf32>
    %860 = vector.multi_reduction <add>, %859, %cst_233 [2] : vector<8x8x8xf32> to vector<8x8xf32>
    %861 = vector.shape_cast %860 : vector<8x8xf32> to vector<8x8x1xf32>
    %862 = tpu.reciprocal %861 {approx = true} : vector<8x8x1xf32> -> vector<8x8x1xf32>
    %863 = vector.broadcast %862 : vector<8x8x1xf32> to vector<8x8x8xf32>
    %864 = arith.mulf %859, %863 : vector<8x8x8xf32>
    "tpu.trace_start"() <{level = 10 : i32, message = "gqk,gke->gqe"}> : () -> ()
    %cst_234 = arith.constant dense<0.000000e+00> : vector<8x8x8xf32>
    %865 = tpu.matmul %864, %853, %cst_234 {dimension_numbers = #tpu.dot_dimension_numbers<[2], [1], [1], [2], [0, 0, 0, 1, 1, 2], [0], [0]>} : vector<8x8x8xf32>, vector<8x8x8xf32>, vector<8x8x8xf32> -> vector<8x8x8xf32>
    "tpu.trace_stop"() : () -> ()
    %866 = vector.extract_strided_slice %865 {offsets = [0, 0, 0], sizes = [1, 8, 8], strides = [1, 1, 1]} : vector<8x8x8xf32> to vector<1x8x8xf32>
    %867 = vector.shape_cast %866 : vector<1x8x8xf32> to vector<8x8xf32>
    %868 = vector.extract_strided_slice %865 {offsets = [1, 0, 0], sizes = [1, 8, 8], strides = [1, 1, 1]} : vector<8x8x8xf32> to vector<1x8x8xf32>
    %869 = vector.shape_cast %868 : vector<1x8x8xf32> to vector<8x8xf32>
    %870 = vector.extract_strided_slice %865 {offsets = [2, 0, 0], sizes = [1, 8, 8], strides = [1, 1, 1]} : vector<8x8x8xf32> to vector<1x8x8xf32>
    %871 = vector.shape_cast %870 : vector<1x8x8xf32> to vector<8x8xf32>
    %872 = vector.extract_strided_slice %865 {offsets = [3, 0, 0], sizes = [1, 8, 8], strides = [1, 1, 1]} : vector<8x8x8xf32> to vector<1x8x8xf32>
    %873 = vector.shape_cast %872 : vector<1x8x8xf32> to vector<8x8xf32>
    %874 = tpu.concatenate %867, %869, %871, %873 in 1 : vector<8x8xf32>, vector<8x8xf32>, vector<8x8xf32>, vector<8x8xf32> -> vector<8x32xf32>
    %875 = vector.extract_strided_slice %865 {offsets = [4, 0, 0], sizes = [1, 8, 8], strides = [1, 1, 1]} : vector<8x8x8xf32> to vector<1x8x8xf32>
    %876 = vector.shape_cast %875 : vector<1x8x8xf32> to vector<8x8xf32>
    %877 = vector.extract_strided_slice %865 {offsets = [5, 0, 0], sizes = [1, 8, 8], strides = [1, 1, 1]} : vector<8x8x8xf32> to vector<1x8x8xf32>
    %878 = vector.shape_cast %877 : vector<1x8x8xf32> to vector<8x8xf32>
    %879 = vector.extract_strided_slice %865 {offsets = [6, 0, 0], sizes = [1, 8, 8], strides = [1, 1, 1]} : vector<8x8x8xf32> to vector<1x8x8xf32>
    %880 = vector.shape_cast %879 : vector<1x8x8xf32> to vector<8x8xf32>
    %881 = vector.extract_strided_slice %865 {offsets = [7, 0, 0], sizes = [1, 8, 8], strides = [1, 1, 1]} : vector<8x8x8xf32> to vector<1x8x8xf32>
    %882 = vector.shape_cast %881 : vector<1x8x8xf32> to vector<8x8xf32>
    %883 = tpu.concatenate %876, %878, %880, %882 in 1 : vector<8x8xf32>, vector<8x8xf32>, vector<8x8xf32>, vector<8x8xf32> -> vector<8x32xf32>
    %884 = tpu.concatenate %874, %883 in 0 : vector<8x32xf32>, vector<8x32xf32> -> vector<16x32xf32>
    %885 = arith.truncf %884 : vector<16x32xf32> to vector<16x32xbf16>
    %cst_235 = arith.constant dense<0.000000e+00> : vector<16x32xf32>
    %886 = tpu.matmul %885, %801, %cst_235 {dimension_numbers = #tpu.dot_dimension_numbers<[1], [0], [0], [1], [0, 0, 1, 1], [], []>} : vector<16x32xbf16>, vector<32x32xbf16>, vector<16x32xf32> -> vector<16x32xf32>
    %887 = vector.broadcast %802 : vector<1x32xf32> to vector<16x32xf32>
    %888 = arith.addf %886, %887 : vector<16x32xf32>
    %889 = arith.addf %783, %888 : vector<16x32xf32>
    %c1_236 = arith.constant 1 : index
    %c0_237 = arith.constant 0 : index
    %890 = vector.load %arg30[%c1_236, %c0_237] : memref<2x32xf32, #tpu.memory_space<vmem>>, vector<1x32xf32>
    %c1_238 = arith.constant 1 : index
    %c0_239 = arith.constant 0 : index
    %891 = vector.load %arg31[%c1_238, %c0_239] : memref<2x32xf32, #tpu.memory_space<vmem>>, vector<1x32xf32>
    %cst_240 = arith.constant dense<0.000000e+00> : vector<16xf32>
    %892 = vector.multi_reduction <add>, %889, %cst_240 [1] : vector<16x32xf32> to vector<16xf32>
    %893 = vector.shape_cast %892 : vector<16xf32> to vector<16x1xf32>
    %cst_241 = arith.constant 3.200000e+01 : f32
    %894 = vector.broadcast %cst_241 : f32 to vector<16x1xf32>
    %895 = arith.divf %893, %894 : vector<16x1xf32>
    %896 = vector.broadcast %895 : vector<16x1xf32> to vector<16x32xf32>
    %897 = arith.subf %889, %896 : vector<16x32xf32>
    %898 = arith.mulf %897, %897 : vector<16x32xf32>
    %cst_242 = arith.constant dense<0.000000e+00> : vector<16xf32>
    %899 = vector.multi_reduction <add>, %898, %cst_242 [1] : vector<16x32xf32> to vector<16xf32>
    %900 = vector.shape_cast %899 : vector<16xf32> to vector<16x1xf32>
    %cst_243 = arith.constant 3.200000e+01 : f32
    %901 = vector.broadcast %cst_243 : f32 to vector<16x1xf32>
    %902 = arith.divf %900, %901 : vector<16x1xf32>
    %903 = vector.broadcast %895 : vector<16x1xf32> to vector<16x32xf32>
    %904 = arith.subf %889, %903 : vector<16x32xf32>
    %cst_244 = arith.constant 9.99999974E-6 : f32
    %905 = vector.broadcast %cst_244 : f32 to vector<16x1xf32>
    %906 = arith.addf %902, %905 : vector<16x1xf32>
    %907 = math.rsqrt %906 : vector<16x1xf32>
    %908 = vector.broadcast %907 : vector<16x1xf32> to vector<16x32xf32>
    %909 = arith.mulf %904, %908 : vector<16x32xf32>
    %910 = vector.broadcast %890 : vector<1x32xf32> to vector<16x32xf32>
    %911 = arith.mulf %909, %910 : vector<16x32xf32>
    %912 = vector.broadcast %891 : vector<1x32xf32> to vector<16x32xf32>
    %913 = arith.addf %911, %912 : vector<16x32xf32>
    %c1_245 = arith.constant 1 : index
    %c0_246 = arith.constant 0 : index
    %c0_247 = arith.constant 0 : index
    %914 = vector.load %arg34[%c1_245, %c0_246, %c0_247] : memref<2x32x64xbf16, #tpu.memory_space<vmem>>, vector<1x32x64xbf16>
    %915 = vector.shape_cast %914 : vector<1x32x64xbf16> to vector<32x64xbf16>
    %c1_248 = arith.constant 1 : index
    %c0_249 = arith.constant 0 : index
    %916 = vector.load %arg35[%c1_248, %c0_249] : memref<2x64xf32, #tpu.memory_space<vmem>>, vector<1x64xf32>
    %c1_250 = arith.constant 1 : index
    %c0_251 = arith.constant 0 : index
    %c0_252 = arith.constant 0 : index
    %917 = vector.load %arg36[%c1_250, %c0_251, %c0_252] : memref<2x64x32xbf16, #tpu.memory_space<vmem>>, vector<1x64x32xbf16>
    %918 = vector.shape_cast %917 : vector<1x64x32xbf16> to vector<64x32xbf16>
    %c1_253 = arith.constant 1 : index
    %c0_254 = arith.constant 0 : index
    %919 = vector.load %arg37[%c1_253, %c0_254] : memref<2x32xf32, #tpu.memory_space<vmem>>, vector<1x32xf32>
    %920 = arith.truncf %913 : vector<16x32xf32> to vector<16x32xbf16>
    %cst_255 = arith.constant dense<0.000000e+00> : vector<16x64xf32>
    %921 = tpu.matmul %920, %915, %cst_255 {dimension_numbers = #tpu.dot_dimension_numbers<[1], [0], [0], [1], [0, 0, 1, 1], [], []>} : vector<16x32xbf16>, vector<32x64xbf16>, vector<16x64xf32> -> vector<16x64xf32>
    %922 = vector.broadcast %916 : vector<1x64xf32> to vector<16x64xf32>
    %923 = arith.addf %921, %922 : vector<16x64xf32>
    %cst_256 = arith.constant 0.000000e+00 : f32
    %924 = vector.broadcast %cst_256 : f32 to vector<16x64xf32>
    %925 = arith.maximumf %923, %924 : vector<16x64xf32>
    %926 = arith.truncf %925 : vector<16x64xf32> to vector<16x64xbf16>
    %cst_257 = arith.constant dense<0.000000e+00> : vector<16x32xf32>
    %927 = tpu.matmul %926, %918, %cst_257 {dimension_numbers = #tpu.dot_dimension_numbers<[1], [0], [0], [1], [0, 0, 1, 1], [], []>} : vector<16x64xbf16>, vector<64x32xbf16>, vector<16x32xf32> -> vector<16x32xf32>
    %928 = vector.broadcast %919 : vector<1x32xf32> to vector<16x32xf32>
    %929 = arith.addf %927, %928 : vector<16x32xf32>
    %930 = arith.addf %913, %929 : vector<16x32xf32>
    %c1_258 = arith.constant 1 : index
    %c0_259 = arith.constant 0 : index
    %931 = vector.load %arg32[%c1_258, %c0_259] : memref<2x32xf32, #tpu.memory_space<vmem>>, vector<1x32xf32>
    %c1_260 = arith.constant 1 : index
    %c0_261 = arith.constant 0 : index
    %932 = vector.load %arg33[%c1_260, %c0_261] : memref<2x32xf32, #tpu.memory_space<vmem>>, vector<1x32xf32>
    %cst_262 = arith.constant dense<0.000000e+00> : vector<16xf32>
    %933 = vector.multi_reduction <add>, %930, %cst_262 [1] : vector<16x32xf32> to vector<16xf32>
    %934 = vector.shape_cast %933 : vector<16xf32> to vector<16x1xf32>
    %cst_263 = arith.constant 3.200000e+01 : f32
    %935 = vector.broadcast %cst_263 : f32 to vector<16x1xf32>
    %936 = arith.divf %934, %935 : vector<16x1xf32>
    %937 = vector.broadcast %936 : vector<16x1xf32> to vector<16x32xf32>
    %938 = arith.subf %930, %937 : vector<16x32xf32>
    %939 = arith.mulf %938, %938 : vector<16x32xf32>
    %cst_264 = arith.constant dense<0.000000e+00> : vector<16xf32>
    %940 = vector.multi_reduction <add>, %939, %cst_264 [1] : vector<16x32xf32> to vector<16xf32>
    %941 = vector.shape_cast %940 : vector<16xf32> to vector<16x1xf32>
    %cst_265 = arith.constant 3.200000e+01 : f32
    %942 = vector.broadcast %cst_265 : f32 to vector<16x1xf32>
    %943 = arith.divf %941, %942 : vector<16x1xf32>
    %944 = vector.broadcast %936 : vector<16x1xf32> to vector<16x32xf32>
    %945 = arith.subf %930, %944 : vector<16x32xf32>
    %cst_266 = arith.constant 9.99999974E-6 : f32
    %946 = vector.broadcast %cst_266 : f32 to vector<16x1xf32>
    %947 = arith.addf %943, %946 : vector<16x1xf32>
    %948 = math.rsqrt %947 : vector<16x1xf32>
    %949 = vector.broadcast %948 : vector<16x1xf32> to vector<16x32xf32>
    %950 = arith.mulf %945, %949 : vector<16x32xf32>
    %951 = vector.broadcast %931 : vector<1x32xf32> to vector<16x32xf32>
    %952 = arith.mulf %950, %951 : vector<16x32xf32>
    %953 = vector.broadcast %932 : vector<1x32xf32> to vector<16x32xf32>
    %954 = arith.addf %952, %953 : vector<16x32xf32>
    %c0_267 = arith.constant 0 : index
    %c0_268 = arith.constant 0 : index
    %955 = vector.load %arg38[%c0_267, %c0_268] : memref<1x32xf32, #tpu.memory_space<vmem>>, vector<1x32xf32>
    %c0_269 = arith.constant 0 : index
    %c0_270 = arith.constant 0 : index
    %956 = vector.load %arg39[%c0_269, %c0_270] : memref<1x32xf32, #tpu.memory_space<vmem>>, vector<1x32xf32>
    %cst_271 = arith.constant dense<0.000000e+00> : vector<16xf32>
    %957 = vector.multi_reduction <add>, %954, %cst_271 [1] : vector<16x32xf32> to vector<16xf32>
    %958 = vector.shape_cast %957 : vector<16xf32> to vector<16x1xf32>
    %cst_272 = arith.constant 3.200000e+01 : f32
    %959 = vector.broadcast %cst_272 : f32 to vector<16x1xf32>
    %960 = arith.divf %958, %959 : vector<16x1xf32>
    %961 = vector.broadcast %960 : vector<16x1xf32> to vector<16x32xf32>
    %962 = arith.subf %954, %961 : vector<16x32xf32>
    %963 = arith.mulf %962, %962 : vector<16x32xf32>
    %cst_273 = arith.constant dense<0.000000e+00> : vector<16xf32>
    %964 = vector.multi_reduction <add>, %963, %cst_273 [1] : vector<16x32xf32> to vector<16xf32>
    %965 = vector.shape_cast %964 : vector<16xf32> to vector<16x1xf32>
    %cst_274 = arith.constant 3.200000e+01 : f32
    %966 = vector.broadcast %cst_274 : f32 to vector<16x1xf32>
    %967 = arith.divf %965, %966 : vector<16x1xf32>
    %968 = vector.broadcast %960 : vector<16x1xf32> to vector<16x32xf32>
    %969 = arith.subf %954, %968 : vector<16x32xf32>
    %cst_275 = arith.constant 9.99999974E-6 : f32
    %970 = vector.broadcast %cst_275 : f32 to vector<16x1xf32>
    %971 = arith.addf %967, %970 : vector<16x1xf32>
    %972 = math.rsqrt %971 : vector<16x1xf32>
    %973 = vector.broadcast %972 : vector<16x1xf32> to vector<16x32xf32>
    %974 = arith.mulf %969, %973 : vector<16x32xf32>
    %975 = vector.broadcast %955 : vector<1x32xf32> to vector<16x32xf32>
    %976 = arith.mulf %974, %975 : vector<16x32xf32>
    %977 = vector.broadcast %956 : vector<1x32xf32> to vector<16x32xf32>
    %978 = arith.addf %976, %977 : vector<16x32xf32>
    %979 = vector.extract_strided_slice %978 {offsets = [7, 0], sizes = [1, 32], strides = [1, 1]} : vector<16x32xf32> to vector<1x32xf32>
    %980 = vector.extract_strided_slice %978 {offsets = [15, 0], sizes = [1, 32], strides = [1, 1]} : vector<16x32xf32> to vector<1x32xf32>
    %981 = tpu.concatenate %979, %980 in 0 : vector<1x32xf32>, vector<1x32xf32> -> vector<2x32xf32>
    %c0_276 = arith.constant 0 : index
    %c0_277 = arith.constant 0 : index
    %982 = vector.load %arg40[%c0_276, %c0_277] : memref<32x2xbf16, #tpu.memory_space<vmem>>, vector<32x2xbf16>
    %c0_278 = arith.constant 0 : index
    %c0_279 = arith.constant 0 : index
    %983 = vector.load %arg41[%c0_278, %c0_279] : memref<1x2xf32, #tpu.memory_space<vmem>>, vector<1x2xf32>
    %984 = arith.truncf %981 : vector<2x32xf32> to vector<2x32xbf16>
    %cst_280 = arith.constant dense<0.000000e+00> : vector<2x2xf32>
    %985 = tpu.matmul %984, %982, %cst_280 {dimension_numbers = #tpu.dot_dimension_numbers<[1], [0], [0], [1], [0, 0, 1, 1], [], []>} : vector<2x32xbf16>, vector<32x2xbf16>, vector<2x2xf32> -> vector<2x2xf32>
    %986 = vector.broadcast %983 : vector<1x2xf32> to vector<2x2xf32>
    %987 = arith.addf %985, %986 : vector<2x2xf32>
    %c0_281 = arith.constant 0 : index
    %c0_282 = arith.constant 0 : index
    %988 = vector.load %arg42[%c0_281, %c0_282] : memref<2x2xf32, #tpu.memory_space<vmem>>, vector<2x2xf32>
    tpu.vector_store %arg42[%c0_281, %c0_282], %987 {strides = array<i32>} : memref<2x2xf32, #tpu.memory_space<vmem>>, vector<2x2xf32>,
    return
  }
  func.func @transform_0(%arg0: i32) -> (i32, i32, i32) {
    %c0_i32 = arith.constant 0 : i32
    %c0_i32_0 = arith.constant 0 : i32
    %c0_i32_1 = arith.constant 0 : i32
    %c0_i32_2 = arith.constant 0 : i32
    return %c0_i32, %c0_i32_0, %c0_i32_1 : i32, i32, i32
  }
  func.func @transform_1(%arg0: i32) -> (i32, i32) {
    %c0_i32 = arith.constant 0 : i32
    %c0_i32_0 = arith.constant 0 : i32
    %c0_i32_1 = arith.constant 0 : i32
    return %c0_i32, %c0_i32_0 : i32, i32
  }
  func.func @transform_2(%arg0: i32) -> (i32, i32) {
    %c0_i32 = arith.constant 0 : i32
    %c0_i32_0 = arith.constant 0 : i32
    %c0_i32_1 = arith.constant 0 : i32
    return %c0_i32, %c0_i32_0 : i32, i32
  }
  func.func @transform_3(%arg0: i32) -> (i32, i32, i32) {
    %c0_i32 = arith.constant 0 : i32
    %c0_i32_0 = arith.constant 0 : i32
    %c0_i32_1 = arith.constant 0 : i32
    %c0_i32_2 = arith.constant 0 : i32
    return %c0_i32, %c0_i32_0, %c0_i32_1 : i32, i32, i32
  }
  func.func @transform_4(%arg0: i32) -> (i32, i32) {
    %c0_i32 = arith.constant 0 : i32
    %c0_i32_0 = arith.constant 0 : i32
    %c0_i32_1 = arith.constant 0 : i32
    return %c0_i32, %c0_i32_0 : i32, i32
  }
  func.func @transform_5(%arg0: i32) -> (i32, i32, i32) {
    %c0_i32 = arith.constant 0 : i32
    %c0_i32_0 = arith.constant 0 : i32
    %c0_i32_1 = arith.constant 0 : i32
    %c0_i32_2 = arith.constant 0 : i32
    return %c0_i32, %c0_i32_0, %c0_i32_1 : i32, i32, i32
  }
  func.func @transform_6(%arg0: i32) -> (i32, i32) {
    %c0_i32 = arith.constant 0 : i32
    %c0_i32_0 = arith.constant 0 : i32
    %c0_i32_1 = arith.constant 0 : i32
    return %c0_i32, %c0_i32_0 : i32, i32
  }
  func.func @transform_7(%arg0: i32) -> (i32, i32) {
    %c0_i32 = arith.constant 0 : i32
    %c0_i32_0 = arith.constant 0 : i32
    %c0_i32_1 = arith.constant 0 : i32
    return %c0_i32, %c0_i32_0 : i32, i32
  }
  func.func @transform_8(%arg0: i32) -> (i32, i32) {
    %c0_i32 = arith.constant 0 : i32
    %c0_i32_0 = arith.constant 0 : i32
    %c0_i32_1 = arith.constant 0 : i32
    return %c0_i32, %c0_i32_0 : i32, i32
  }
  func.func @transform_9(%arg0: i32) -> (i32, i32, i32) {
    %c0_i32 = arith.constant 0 : i32
    %c0_i32_0 = arith.constant 0 : i32
    %c0_i32_1 = arith.constant 0 : i32
    %c0_i32_2 = arith.constant 0 : i32
    return %c0_i32, %c0_i32_0, %c0_i32_1 : i32, i32, i32
  }
  func.func @transform_10(%arg0: i32) -> (i32, i32) {
    %c0_i32 = arith.constant 0 : i32
    %c0_i32_0 = arith.constant 0 : i32
    %c0_i32_1 = arith.constant 0 : i32
    return %c0_i32, %c0_i32_0 : i32, i32
  }
  func.func @transform_11(%arg0: i32) -> (i32, i32, i32) {
    %c0_i32 = arith.constant 0 : i32
    %c0_i32_0 = arith.constant 0 : i32
    %c0_i32_1 = arith.constant 0 : i32
    %c0_i32_2 = arith.constant 0 : i32
    return %c0_i32, %c0_i32_0, %c0_i32_1 : i32, i32, i32
  }
  func.func @transform_12(%arg0: i32) -> (i32, i32) {
    %c0_i32 = arith.constant 0 : i32
    %c0_i32_0 = arith.constant 0 : i32
    %c0_i32_1 = arith.constant 0 : i32
    return %c0_i32, %c0_i32_0 : i32, i32
  }
  func.func @transform_13(%arg0: i32) -> (i32, i32) {
    %c0_i32 = arith.constant 0 : i32
    %c0_i32_0 = arith.constant 0 : i32
    %c0_i32_1 = arith.constant 0 : i32
    return %c0_i32, %c0_i32_0 : i32, i32
  }
  func.func @transform_14(%arg0: i32) -> (i32, i32) {
    %c0_i32 = arith.constant 0 : i32
    %c0_i32_0 = arith.constant 0 : i32
    %c0_i32_1 = arith.constant 0 : i32
    return %c0_i32, %c0_i32_0 : i32, i32
  }
  func.func @transform_15(%arg0: i32) -> (i32, i32) {
    %c0_i32 = arith.constant 0 : i32
    %c0_i32_0 = arith.constant 0 : i32
    %c0_i32_1 = arith.constant 0 : i32
    return %c0_i32, %c0_i32_0 : i32, i32
  }
  func.func @transform_16(%arg0: i32) -> (i32, i32) {
    %c0_i32 = arith.constant 0 : i32
    %c0_i32_0 = arith.constant 0 : i32
    %c0_i32_1 = arith.constant 0 : i32
    return %c0_i32, %c0_i32_0 : i32, i32
  }
  func.func @transform_17(%arg0: i32) -> (i32, i32, i32) {
    %c0_i32 = arith.constant 0 : i32
    %c0_i32_0 = arith.constant 0 : i32
    %c0_i32_1 = arith.constant 0 : i32
    %c0_i32_2 = arith.constant 0 : i32
    return %c0_i32, %c0_i32_0, %c0_i32_1 : i32, i32, i32
  }
  func.func @transform_18(%arg0: i32) -> (i32, i32) {
    %c0_i32 = arith.constant 0 : i32
    %c0_i32_0 = arith.constant 0 : i32
    %c0_i32_1 = arith.constant 0 : i32
    return %c0_i32, %c0_i32_0 : i32, i32
  }
  func.func @transform_19(%arg0: i32) -> (i32, i32, i32) {
    %c0_i32 = arith.constant 0 : i32
    %c0_i32_0 = arith.constant 0 : i32
    %c0_i32_1 = arith.constant 0 : i32
    %c0_i32_2 = arith.constant 0 : i32
    return %c0_i32, %c0_i32_0, %c0_i32_1 : i32, i32, i32
  }
  func.func @transform_20(%arg0: i32) -> (i32, i32) {
    %c0_i32 = arith.constant 0 : i32
    %c0_i32_0 = arith.constant 0 : i32
    %c0_i32_1 = arith.constant 0 : i32
    return %c0_i32, %c0_i32_0 : i32, i32
  }
  func.func @transform_21(%arg0: i32) -> (i32, i32, i32) {
    %c0_i32 = arith.constant 0 : i32
    %c0_i32_0 = arith.constant 0 : i32
    %c0_i32_1 = arith.constant 0 : i32
    %c0_i32_2 = arith.constant 0 : i32
    return %c0_i32, %c0_i32_0, %c0_i32_1 : i32, i32, i32
  }
  func.func @transform_22(%arg0: i32) -> (i32, i32) {
    %c0_i32 = arith.constant 0 : i32
    %c0_i32_0 = arith.constant 0 : i32
    %c0_i32_1 = arith.constant 0 : i32
    return %c0_i32, %c0_i32_0 : i32, i32
  }
  func.func @transform_23(%arg0: i32) -> (i32, i32, i32) {
    %c0_i32 = arith.constant 0 : i32
    %c0_i32_0 = arith.constant 0 : i32
    %c0_i32_1 = arith.constant 0 : i32
    %c0_i32_2 = arith.constant 0 : i32
    return %c0_i32, %c0_i32_0, %c0_i32_1 : i32, i32, i32
  }
  func.func @transform_24(%arg0: i32) -> (i32, i32) {
    %c0_i32 = arith.constant 0 : i32
    %c0_i32_0 = arith.constant 0 : i32
    %c0_i32_1 = arith.constant 0 : i32
    return %c0_i32, %c0_i32_0 : i32, i32
  }
  func.func @transform_25(%arg0: i32) -> (i32, i32, i32) {
    %c0_i32 = arith.constant 0 : i32
    %c0_i32_0 = arith.constant 0 : i32
    %c0_i32_1 = arith.constant 0 : i32
    %c0_i32_2 = arith.constant 0 : i32
    return %c0_i32, %c0_i32_0, %c0_i32_1 : i32, i32, i32
  }
  func.func @transform_26(%arg0: i32) -> (i32, i32) {
    %c0_i32 = arith.constant 0 : i32
    %c0_i32_0 = arith.constant 0 : i32
    %c0_i32_1 = arith.constant 0 : i32
    return %c0_i32, %c0_i32_0 : i32, i32
  }
  func.func @transform_27(%arg0: i32) -> (i32, i32) {
    %c0_i32 = arith.constant 0 : i32
    %c0_i32_0 = arith.constant 0 : i32
    %c0_i32_1 = arith.constant 0 : i32
    return %c0_i32, %c0_i32_0 : i32, i32
  }
  func.func @transform_28(%arg0: i32) -> (i32, i32) {
    %c0_i32 = arith.constant 0 : i32
    %c0_i32_0 = arith.constant 0 : i32
    %c0_i32_1 = arith.constant 0 : i32
    return %c0_i32, %c0_i32_0 : i32, i32
  }
  func.func @transform_29(%arg0: i32) -> (i32, i32) {
    %c0_i32 = arith.constant 0 : i32
    %c0_i32_0 = arith.constant 0 : i32
    %c0_i32_1 = arith.constant 0 : i32
    return %c0_i32, %c0_i32_0 : i32, i32
  }
  func.func @transform_30(%arg0: i32) -> (i32, i32) {
    %c0_i32 = arith.constant 0 : i32
    %c0_i32_0 = arith.constant 0 : i32
    %c0_i32_1 = arith.constant 0 : i32
    return %c0_i32, %c0_i32_0 : i32, i32
  }
  func.func @transform_31(%arg0: i32) -> (i32, i32) {
    %c0_i32 = arith.constant 0 : i32
    %c0_i32_0 = arith.constant 0 : i32
    %c0_i32_1 = arith.constant 0 : i32
    return %c0_i32, %c0_i32_0 : i32, i32
  }
  func.func @transform_32(%arg0: i32) -> (i32, i32) {
    %c0_i32 = arith.constant 0 : i32
    %c0_i32_0 = arith.constant 0 : i32
    %c0_i32_1 = arith.constant 0 : i32
    return %c0_i32, %c0_i32_0 : i32, i32
  }
  func.func @transform_33(%arg0: i32) -> (i32, i32, i32) {
    %c0_i32 = arith.constant 0 : i32
    %c0_i32_0 = arith.constant 0 : i32
    %c0_i32_1 = arith.constant 0 : i32
    %c0_i32_2 = arith.constant 0 : i32
    return %c0_i32, %c0_i32_0, %c0_i32_1 : i32, i32, i32
  }
  func.func @transform_34(%arg0: i32) -> (i32, i32) {
    %c0_i32 = arith.constant 0 : i32
    %c0_i32_0 = arith.constant 0 : i32
    %c0_i32_1 = arith.constant 0 : i32
    return %c0_i32, %c0_i32_0 : i32, i32
  }
  func.func @transform_35(%arg0: i32) -> (i32, i32, i32) {
    %c0_i32 = arith.constant 0 : i32
    %c0_i32_0 = arith.constant 0 : i32
    %c0_i32_1 = arith.constant 0 : i32
    %c0_i32_2 = arith.constant 0 : i32
    return %c0_i32, %c0_i32_0, %c0_i32_1 : i32, i32, i32
  }
  func.func @transform_36(%arg0: i32) -> (i32, i32) {
    %c0_i32 = arith.constant 0 : i32
    %c0_i32_0 = arith.constant 0 : i32
    %c0_i32_1 = arith.constant 0 : i32
    return %c0_i32, %c0_i32_0 : i32, i32
  }
  func.func @transform_37(%arg0: i32) -> (i32, i32) {
    %c0_i32 = arith.constant 0 : i32
    %c0_i32_0 = arith.constant 0 : i32
    %c0_i32_1 = arith.constant 0 : i32
    return %c0_i32, %c0_i32_0 : i32, i32
  }
  func.func @transform_38(%arg0: i32) -> (i32, i32) {
    %c0_i32 = arith.constant 0 : i32
    %c0_i32_0 = arith.constant 0 : i32
    %c0_i32_1 = arith.constant 0 : i32
    return %c0_i32, %c0_i32_0 : i32, i32
  }
  func.func @transform_39(%arg0: i32) -> (i32, i32) {
    %c0_i32 = arith.constant 0 : i32
    %c0_i32_0 = arith.constant 0 : i32
    %c0_i32_1 = arith.constant 0 : i32
    return %c0_i32, %c0_i32_0 : i32, i32
  }
  func.func @transform_40(%arg0: i32) -> (i32, i32) {
    %c0_i32 = arith.constant 0 : i32
    %c0_i32_0 = arith.constant 0 : i32
    %c0_i32_1 = arith.constant 0 : i32
    return %c0_i32, %c0_i32_0 : i32, i32
  }
  func.func @transform_41(%arg0: i32) -> (i32, i32) {
    %c0_i32 = arith.constant 0 : i32
    %c0_i32_0 = arith.constant 0 : i32
    %c0_i32_1 = arith.constant 0 : i32
    return %c0_i32, %c0_i32_0 : i32, i32
  }
}

</mosaic_0001>

<bundles_post_ra>
// kernel: _lambda_.1
= control target key start
LH: loop header
LB: loop body
LE: loop exit
PB: predicated region body
PF: predicated region fallthrough
CT: control target
= control target key end

     0   :  { %s12945_s6 = smov 1   ;;  %s12946_s10 = smov 2   ;;  %s14601_s0 = inlined_call_operand.smem [shape: u32[42], index: -1, kind: input, shape index: {}] }
   0x1   :  { %s13027_s5 = sld [smem:[%s14601_s0]]   ;;  %s12947_s14 = smov 3  }
   0x2   :  { %s13032_s9 = sld [smem:[%s14601_s0 + %s12945_s6]]   ;;  %s12948_s18 = smov 4  }
   0x3   :  { %s13037_s13 = sld [smem:[%s14601_s0 + %s12946_s10]]   ;;  %s12949_s22 = smov 5  }
   0x4   :  { %s13042_s17 = sld [smem:[%s14601_s0 + %s12947_s14]]   ;;  %s12950_s26 = smov 6  }
   0x5   :  { %s13047_s21 = sld [smem:[%s14601_s0 + %s12948_s18]]   ;;  %s12951_s30 = smov 7  }
   0x6   :  { %s13052_s25 = sld [smem:[%s14601_s0 + %s12949_s22]]   ;;  %s12952_s4 = smov 8  }
   0x7   :  { %14616 = sst [smem:[#allocation48_spill]] %s13027_s5  ;;  %s12953_s10 = smov 9  }
   0x8   :  { %14617 = sst [smem:[#allocation49_spill]] %s13032_s9  ;;  %s12954_s15 = smov 10  }
   0x9   :  { %14618 = sst [smem:[#allocation50_spill]] %s13037_s13  ;;  %s12955_s20 = smov 11  }
   0xa   :  { %14619 = sst [smem:[#allocation51_spill]] %s13042_s17  ;;  %s12957_s1 = smov 13  }
   0xb   :  { %14620 = sst [smem:[#allocation52_spill]] %s13047_s21  ;;  %s12958_s7 = smov 14  }
   0xc   :  { %14621 = sst [smem:[#allocation53_spill]] %s13052_s25  ;;  %s12960_s22 = smov 16  }
   0xd   :  { %s13057_s29 = sld [smem:[%s14601_s0 + %s12950_s26]]   ;;  %s12956_s26 = smov 12  }
   0xe   :  { %s13062_s3 = sld [smem:[%s14601_s0 + %s12951_s30]]   ;;  %s12961_s28 = smov 17  }
   0xf   :  { %s13067_s8 = sld [smem:[%s14601_s0 + %s12952_s4]]  }
  0x10   :  { %s13072_s14 = sld [smem:[%s14601_s0 + %s12953_s10]]  }
  0x11   :  { %s13077_s19 = sld [smem:[%s14601_s0 + %s12954_s15]]   ;;  %s12959_s15 = smov 15  }
  0x12   :  { %s13082_s24 = sld [smem:[%s14601_s0 + %s12955_s20]]  }
  0x13   :  { %s13087_s30 = sld [smem:[%s14601_s0 + %s12956_s26]]  }
  0x14   :  { %14622 = sst [smem:[#allocation54_spill]] %s13062_s3 }
  0x15   :  { %14623 = sst [smem:[#allocation55_spill]] %s13067_s8 }
  0x16   :  { %14624 = sst [smem:[#allocation56_spill]] %s13072_s14 }
  0x17   :  { %s13092_s6 = sld [smem:[%s14601_s0 + %s12957_s1]]  }
  0x18   :  { %14625 = sst [smem:[#allocation57_spill]] %s13082_s24 }
  0x19   :  { %14626 = sst [smem:[#allocation58_spill]] %s13087_s30 }
  0x1a   :  { %s13097_s12 = sld [smem:[%s14601_s0 + %s12958_s7]]   ;;  %s12962_s7 = smov 18  }
  0x1b   :  { %s13102_s20 = sld [smem:[%s14601_s0 + %s12959_s15]]   ;;  %s12963_s15 = smov 19  }
  0x1c   :  { %s13107_s27 = sld [smem:[%s14601_s0 + %s12960_s22]]   ;;  %s12964_s22 = smov 20  }
  0x1d   :  { %14627 = sst [smem:[#allocation59_spill]] %s13092_s6 }
  0x1e   :  { %s13112_s4 = sld [smem:[%s14601_s0 + %s12961_s28]]   ;;  %s12965_s28 = smov 21  }
  0x20   :  { %14628 = sst [smem:[#allocation60_spill]] %s13097_s12 }
  0x21   :  { %14629 = sst [smem:[#allocation61_spill]] %s13102_s20 }
  0x22   :  { %14630 = sst [smem:[#allocation62_spill]] %s13107_s27 }
  0x23   :  { %s13117_s12 = sld [smem:[%s14601_s0 + %s12962_s7]]   ;;  %s12966_s7 = smov 22  }
  0x24   :  { %14631 = sst [smem:[#allocation63_spill]] %s13112_s4 }
  0x25   :  { %s13122_s20 = sld [smem:[%s14601_s0 + %s12963_s15]]   ;;  %s12967_s15 = smov 23  }
  0x26   :  { %s13127_s27 = sld [smem:[%s14601_s0 + %s12964_s22]]   ;;  %s12968_s22 = smov 24  }
  0x27   :  { %s13132_s4 = sld [smem:[%s14601_s0 + %s12965_s28]]   ;;  %s12969_s28 = smov 25  }
  0x28   :  { %s13137_s6 = sld [smem:[%s14601_s0 + %s12966_s7]]   ;;  %s12970_s7 = smov 26  }
  0x29   :  { %s13147_s30 = sld [smem:[%s14601_s0 + %s12968_s22]]   ;;  %s12972_s22 = smov 28  }
  0x2a   :  { %s13152_s8 = sld [smem:[%s14601_s0 + %s12969_s28]]   ;;  %s12973_s28 = smov 29  }
  0x2b   :  { %14632 = sst [smem:[#allocation64_spill]] %s13122_s20 }
  0x2c   :  { %s13142_s20 = sld [smem:[%s14601_s0 + %s12967_s15]]   ;;  %s12971_s15 = smov 27  }
  0x2d   :  { %s13157_s3 = sld [smem:[%s14601_s0 + %s12970_s7]]   ;;  %s12974_s7 = smov 30  }
  0x2e   :  { %s13162_s24 = sld [smem:[%s14601_s0 + %s12971_s15]]   ;;  %s12975_s15 = smov 31  }
  0x2f   :  { %s13167_s14 = sld [smem:[%s14601_s0 + %s12972_s22]]   ;;  %s12976_s22 = smov 32  }
  0x30   :  { %14633 = sst [smem:[#allocation65_spill]] %s13152_s8 }
  0x31   :  { %s13172_s25 = sld [smem:[%s14601_s0 + %s12973_s28]]   ;;  %s12977_s28 = smov 33  }
  0x32   :  { %s13177_s21 = sld [smem:[%s14601_s0 + %s12974_s7]]   ;;  %s12978_s7 = smov 34  }
  0x33   :  { %s13182_s13 = sld [smem:[%s14601_s0 + %s12975_s15]]   ;;  %s12979_s15 = smov 35  }
  0x34   :  { %14634 = sst [smem:[#allocation66_spill]] %s13162_s24 }
  0x35   :  { %s13187_s17 = sld [smem:[%s14601_s0 + %s12976_s22]]   ;;  %s12980_s22 = smov 36  }
  0x36   :  { %s13192_s5 = sld [smem:[%s14601_s0 + %s12977_s28]]   ;;  %s12981_s28 = smov 37  }
  0x37   :  { %14635 = sst [smem:[#allocation67_spill]] %s13172_s25 }
  0x38   :  { %s13197_s9 = sld [smem:[%s14601_s0 + %s12978_s7]]   ;;  %s12982_s7 = smov 38  }
  0x39   :  { %14636 = sst [smem:[#allocation68_spill]] %s13182_s13 }
  0x3a   :  { %s13202_s13 = sld [smem:[%s14601_s0 + %s12979_s15]]   ;;  %s12983_s15 = smov 39  }
  0x3b   :  { %s13207_s25 = sld [smem:[%s14601_s0 + %s12980_s22]]   ;;  %s12984_s22 = smov 40  }
  0x3c   :  { %14637 = sst [smem:[#allocation69_spill]] %s13192_s5 }
  0x3d   :  { %s13212_s5 = sld [smem:[%s14601_s0 + %s12981_s28]]   ;;  %s12985_s28 = smov 41  }
  0x3e   :  { %s13217_s24 = sld [smem:[%s14601_s0 + %s12982_s7]]  }
  0x3f   :  { %s13232_s8 = sld [smem:[%s14601_s0 + %s12985_s28]]  }
  0x40   :  { %14638 = sst [smem:[#allocation70_spill]] %s13202_s13 }
  0x41   :  { %14639 = sst [smem:[#allocation71_spill]] %s13207_s25 }
  0x42   :  { %s13222_s13 = sld [smem:[%s14601_s0 + %s12983_s15]]  }
  0x43   :  { %s13227_s25 = sld [smem:[%s14601_s0 + %s12984_s22]]  }
  0x44   :  { %88 = vsyncpa [#allocation3], 0 }
  0x45   :  { %89 = vsyncpa [#allocation6], 0 }
  0x46   :  { %90 = vsyncpa [#allocation9], 0 }
  0x47   :  { %91 = vsyncpa [#allocation12], 0 }
  0x48   :  { %92 = vsyncpa [#allocation15], 0 }
  0x49   :  { %93 = vsyncpa [#allocation18], 0 }
  0x4a   :  { %94 = vsyncpa [#allocation21], 0 }
  0x4b   :  { %95 = vsyncpa [#allocation24], 0 }
  0x4c   :  { %96 = vsyncpa [#allocation27], 0 }
  0x4d   :  { %97 = vsyncpa [#allocation30], 0 }
  0x4e   :  { %98 = vsyncpa [#allocation33], 0 }
  0x4f   :  { %99 = vsyncpa [#allocation4], 0  ;;  %s12986_s7 = smov [#allocation5]   ;;  %s12987_s11 = smov [#allocation8]  }
  0x50   :  { %s134_s10 = sshll.u32 %s12986_s7, 4  ;;  %s170_s15 = sshll.u32 %s12987_s11, 4  ;;  %s135_s10 = int_to_ptr.vmem [resolvable:$true] %s134_s10  ;;  %s171_s15 = int_to_ptr.vmem [resolvable:$true] %s170_s15 }
  0x51   :  { %s12489_s0 = scalar_lea.vmem %s135_s10, 32  ;;  %p12494_p1 = scmp.lt.s32.totalorder %s135_s10, %s135_s10 }
  0x52   :  { %p12490_p0 = scmp.ne.s32.totalorder %s135_s10, %s12489_s0  ;;  %p12495_p2 = scmp.lt.s32.totalorder %s12489_s0, %s12489_s0 }
  0x54   :  { %p12496_p3 = por %p12495_p2, %p12494_p1 }
  0x56   :  { %p12497_p4 = pnand %p12496_p3, %p12490_p0 }
  0x58   :  { %12500 = shalt.err (!%p12497_p4)
}
  0x59   :  { %137 = dma.hbm_to_vmem [thread:$0]  %s13077_s19, 32, %s135_s10, [#allocation6]  }
  0x5a   :  { %s12509_s16 = scalar_lea.vmem %s171_s15, 32  ;;  %p12514_p6 = scmp.lt.s32.totalorder %s171_s15, %s171_s15 }
  0x5b   :  { %p12510_p5 = scmp.ne.s32.totalorder %s171_s15, %s12509_s16  ;;  %p12515_p7 = scmp.lt.s32.totalorder %s12509_s16, %s12509_s16 }
  0x5d   :  { %p12516_p8 = por %p12515_p7, %p12514_p6 }
  0x5f   :  { %p12517_p9 = pnand %p12516_p8, %p12510_p5 }
  0x61   :  { %12520 = shalt.err (!%p12517_p9)
}
  0x62   :  { %173 = dma.hbm_to_vmem [thread:$0]  %s13127_s27, 32, %s171_s15, [#allocation9]  }
  0x63   :  { %s12988_s18 = smov [#allocation11]   ;;  %s12989_s23 = smov [#allocation14]  }
  0x64   :  { %s192_s22 = sshll.u32 %s12988_s18, 4  ;;  %s214_s26 = sshll.u32 %s12989_s23, 4  ;;  %s193_s22 = int_to_ptr.vmem [resolvable:$true] %s192_s22  ;;  %s215_s26 = int_to_ptr.vmem [resolvable:$true] %s214_s26 }
  0x65   :  { %s12529_s28 = scalar_lea.vmem %s193_s22, 32  ;;  %p12534_p11 = scmp.lt.s32.totalorder %s193_s22, %s193_s22 }
  0x66   :  { %p12530_p10 = scmp.ne.s32.totalorder %s193_s22, %s12529_s28  ;;  %p12535_p12 = scmp.lt.s32.totalorder %s12529_s28, %s12529_s28 }
  0x68   :  { %p12536_p13 = por %p12535_p12, %p12534_p11 }
  0x6a   :  { %p12537_p0 = pnand %p12536_p13, %p12530_p10 }
  0x6c   :  { %12540 = shalt.err (!%p12537_p0)
}
  0x6d   :  { %195 = dma.hbm_to_vmem [thread:$0]  %s13137_s6, 32, %s193_s22, [#allocation12]  }
  0x6e   :  { %s12549_s19 = scalar_lea.vmem %s215_s26, 32  ;;  %p12554_p2 = scmp.lt.s32.totalorder %s215_s26, %s215_s26 }
  0x6f   :  { %p12550_p1 = scmp.ne.s32.totalorder %s215_s26, %s12549_s19  ;;  %p12555_p3 = scmp.lt.s32.totalorder %s12549_s19, %s12549_s19 }
  0x71   :  { %p12556_p4 = por %p12555_p3, %p12554_p2 }
  0x73   :  { %p12557_p5 = pnand %p12556_p4, %p12550_p1 }
  0x75   :  { %12560 = shalt.err (!%p12557_p5)
}
  0x76   :  { %217 = dma.hbm_to_vmem [thread:$0]  %s13147_s30, 32, %s215_s26, [#allocation15]  }
  0x77   :  { %s12990_s27 = smov [#allocation17]   ;;  %s12991_s2 = smov [#allocation20]  }
  0x78   :  { %s236_s1 = sshll.u32 %s12990_s27, 4  ;;  %s256_s7 = sshll.u32 %s12991_s2, 4  ;;  %s237_s1 = int_to_ptr.vmem [resolvable:$true] %s236_s1  ;;  %s257_s7 = int_to_ptr.vmem [resolvable:$true] %s256_s7 }
  0x79   :  { %s12569_s10 = scalar_lea.vmem %s237_s1, 32  ;;  %p12574_p7 = scmp.lt.s32.totalorder %s237_s1, %s237_s1 }
  0x7a   :  { %p12570_p6 = scmp.ne.s32.totalorder %s237_s1, %s12569_s10  ;;  %p12575_p8 = scmp.lt.s32.totalorder %s12569_s10, %s12569_s10 }
  0x7c   :  { %p12576_p9 = por %p12575_p8, %p12574_p7 }
  0x7e   :  { %p12577_p10 = pnand %p12576_p9, %p12570_p6 }
  0x80   :  { %12580 = shalt.err (!%p12577_p10)
}
  0x81   :  { %239 = dma.hbm_to_vmem [thread:$0]  %s13157_s3, 32, %s237_s1, [#allocation18]  }
  0x82   :  { %s12589_s6 = scalar_lea.vmem %s257_s7, 32  ;;  %p12594_p12 = scmp.lt.s32.totalorder %s257_s7, %s257_s7 }
  0x83   :  { %p12590_p11 = scmp.ne.s32.totalorder %s257_s7, %s12589_s6  ;;  %p12595_p13 = scmp.lt.s32.totalorder %s12589_s6, %s12589_s6 }
  0x85   :  { %p12596_p0 = por %p12595_p13, %p12594_p12 }
  0x87   :  { %p12597_p1 = pnand %p12596_p0, %p12590_p11 }
  0x89   :  { %12600 = shalt.err (!%p12597_p1)
}
  0x8a   :  { %259 = dma.hbm_to_vmem [thread:$0]  %s13167_s14, 32, %s257_s7, [#allocation21]  }
  0x8b   :  { %s12992_s30 = smov [#allocation23]   ;;  %s12993_s15 = smov [#allocation26]  }
  0x8c   :  { %s276_s11 = sshll.u32 %s12992_s30, 4  ;;  %s296_s0 = sshll.u32 %s12993_s15, 4  ;;  %s277_s11 = int_to_ptr.vmem [resolvable:$true] %s276_s11  ;;  %s297_s0 = int_to_ptr.vmem [resolvable:$true] %s296_s0 }
  0x8d   :  { %s12609_s16 = scalar_lea.vmem %s277_s11, 32  ;;  %p12614_p3 = scmp.lt.s32.totalorder %s277_s11, %s277_s11 }
  0x8e   :  { %p12610_p2 = scmp.ne.s32.totalorder %s277_s11, %s12609_s16  ;;  %p12615_p4 = scmp.lt.s32.totalorder %s12609_s16, %s12609_s16 }
  0x90   :  { %p12616_p5 = por %p12615_p4, %p12614_p3 }
  0x92   :  { %p12617_p6 = pnand %p12616_p5, %p12610_p2 }
  0x94   :  { %12620 = shalt.err (!%p12617_p6)
}
  0x95   :  { %279 = dma.hbm_to_vmem [thread:$0]  %s13177_s21, 32, %s277_s11, [#allocation24]  }
  0x96   :  { %s12629_s3 = scalar_lea.vmem %s297_s0, 32  ;;  %p12634_p8 = scmp.lt.s32.totalorder %s297_s0, %s297_s0 }
  0x97   :  { %p12630_p7 = scmp.ne.s32.totalorder %s297_s0, %s12629_s3  ;;  %p12635_p9 = scmp.lt.s32.totalorder %s12629_s3, %s12629_s3 }
  0x99   :  { %p12636_p10 = por %p12635_p9, %p12634_p8 }
  0x9b   :  { %p12637_p11 = pnand %p12636_p10, %p12630_p7 }
  0x9d   :  { %12640 = shalt.err (!%p12637_p11)
}
  0x9e   :  { %299 = dma.hbm_to_vmem [thread:$0]  %s13187_s17, 32, %s297_s0, [#allocation27]  }
  0x9f   :  { %s12994_s14 = smov [#allocation29]   ;;  %s12995_s22 = smov [#allocation32]  }
  0xa0   :  { %s318_s18 = sshll.u32 %s12994_s14, 4  ;;  %s340_s23 = sshll.u32 %s12995_s22, 4  ;;  %s319_s18 = int_to_ptr.vmem [resolvable:$true] %s318_s18  ;;  %s341_s23 = int_to_ptr.vmem [resolvable:$true] %s340_s23 }
  0xa1   :  { %s12649_s26 = scalar_lea.vmem %s319_s18, 32  ;;  %p12654_p13 = scmp.lt.s32.totalorder %s319_s18, %s319_s18 }
  0xa2   :  { %p12650_p12 = scmp.ne.s32.totalorder %s319_s18, %s12649_s26  ;;  %p12655_p0 = scmp.lt.s32.totalorder %s12649_s26, %s12649_s26 }
  0xa4   :  { %p12656_p1 = por %p12655_p0, %p12654_p13 }
  0xa6   :  { %p12657_p2 = pnand %p12656_p1, %p12650_p12 }
  0xa8   :  { %12660 = shalt.err (!%p12657_p2)
}
  0xa9   :  { %321 = dma.hbm_to_vmem [thread:$0]  %s13197_s9, 32, %s319_s18, [#allocation30]  }
  0xaa   :  { %s12669_s21 = scalar_lea.vmem %s341_s23, 16  ;;  %s12673_s28 = scalar_lea.vmem %s341_s23, 32 }
  0xab   :  { %p12670_p3 = scmp.ne.s32.totalorder %s341_s23, %s12669_s21  ;;  %p12674_p4 = scmp.lt.s32.totalorder %s341_s23, %s341_s23 }
  0xac   :  { %p12675_p5 = scmp.lt.s32.totalorder %s12673_s28, %s12669_s21 }
  0xae   :  { %p12676_p6 = por %p12675_p5, %p12674_p4 }
  0xb0   :  { %p12677_p7 = pnand %p12676_p6, %p12670_p3 }
  0xb2   :  { %12680 = shalt.err (!%p12677_p7)
}
  0xb3   :  { %343 = dma.hbm_to_vmem [thread:$0]  %s13212_s5, 16, %s341_s23, [#allocation33]  }
  0xb4   :  { %s12996_s17 = smov [#allocation2]   ;;  %s12997_s27 = smov [#allocation7]  }
  0xb5   :  { %s118_s19 = sshll.u32 %s12996_s17, 4  ;;  %s158_s1 = sshll.u32 %s12997_s27, 4  ;;  %s119_s19 = int_to_ptr.vmem [resolvable:$true] %s118_s19  ;;  %s159_s1 = int_to_ptr.vmem [resolvable:$true] %s158_s1 }
  0xb6   :  { %s12689_s2 = scalar_lea.vmem %s119_s19, 32  ;;  %p12694_p9 = scmp.lt.s32.totalorder %s119_s19, %s119_s19 }
  0xb7   :  { %p12690_p8 = scmp.ne.s32.totalorder %s119_s19, %s12689_s2  ;;  %p12695_p10 = scmp.lt.s32.totalorder %s12689_s2, %s12689_s2 }
  0xb9   :  { %p12696_p11 = por %p12695_p10, %p12694_p9 }
  0xbb   :  { %p12697_p12 = pnand %p12696_p11, %p12690_p8 }
  0xbd   :  { %12700 = shalt.err (!%p12697_p12)
}
  0xbe   :  { %121 = dma.hbm_to_vmem [thread:$0]  %s13057_s29, 32, %s119_s19, [#allocation3]  }
  0xbf   :  { %s12709_s9 = scalar_lea.vmem %s159_s1, 32  ;;  %p12714_p0 = scmp.lt.s32.totalorder %s159_s1, %s159_s1 }
  0xc0   :  { %p12710_p13 = scmp.ne.s32.totalorder %s159_s1, %s12709_s9  ;;  %p12715_p1 = scmp.lt.s32.totalorder %s12709_s9, %s12709_s9 }
  0xc2   :  { %p12716_p2 = por %p12715_p1, %p12714_p0 }
  0xc4   :  { %p12717_p3 = pnand %p12716_p2, %p12710_p13 }
  0xc6   :  { %12720 = shalt.err (!%p12717_p3)
}
  0xc7   :  { %161 = dma.hbm_to_vmem [thread:$0]  %s13117_s12, 32, %s159_s1, [#allocation6]  }
  0xc8   :  { %s12998_s5 = smov [#allocation10]  }
  0xc9   :  { %s179_s7 = sshll.u32 %s12998_s5, 4  ;;  %s180_s7 = int_to_ptr.vmem [resolvable:$true] %s179_s7 }
  0xca   :  { %s12729_s10 = scalar_lea.vmem %s180_s7, 512  ;;  %p12734_p5 = scmp.lt.s32.totalorder %s180_s7, %s180_s7 }
  0xcb   :  { %p12730_p4 = scmp.ne.s32.totalorder %s180_s7, %s12729_s10  ;;  %p12735_p6 = scmp.lt.s32.totalorder %s12729_s10, %s12729_s10 }
  0xcd   :  { %p12736_p7 = por %p12735_p6, %p12734_p5 }
  0xcf   :  { %p12737_p8 = pnand %p12736_p7, %p12730_p4 }
  0xd1   :  { %12740 = shalt.err (!%p12737_p8)
}
  0xd2   :  { %s12999_s29 = smov 64   ;;  %s13000_s6 = smov 4  }
  0xd3   :  { %185 = dma.hbm_to_vmem [thread:$0]  %s13132_s4, 512, %s180_s7, [#allocation9], %s12999_s29, %s12999_s29, %s13000_s6  }
  0xd4   :  { %s13001_s30 = smov [#allocation13]   ;;  %s13002_s12 = smov [#allocation16]  }
  0xd5   :  { %s201_s11 = sshll.u32 %s13001_s30, 4  ;;  %s223_s15 = sshll.u32 %s13002_s12, 4  ;;  %s202_s11 = int_to_ptr.vmem [resolvable:$true] %s201_s11  ;;  %s224_s15 = int_to_ptr.vmem [resolvable:$true] %s223_s15 }
  0xd6   :  { %s12749_s0 = scalar_lea.vmem %s202_s11, 512  ;;  %p12754_p10 = scmp.lt.s32.totalorder %s202_s11, %s202_s11 }
  0xd7   :  { %p12750_p9 = scmp.ne.s32.totalorder %s202_s11, %s12749_s0  ;;  %p12755_p11 = scmp.lt.s32.totalorder %s12749_s0, %s12749_s0 }
  0xd9   :  { %p12756_p12 = por %p12755_p11, %p12754_p10 }
  0xdb   :  { %p12757_p13 = pnand %p12756_p12, %p12750_p9 }
  0xdd   :  { %12760 = shalt.err (!%p12757_p13)
}
  0xde   :  { %207 = dma.hbm_to_vmem [thread:$0]  %s13142_s20, 512, %s202_s11, [#allocation12], %s12999_s29, %s12999_s29, %s13000_s6  }
  0xdf   :  { %s12769_s16 = scalar_lea.vmem %s224_s15, 512  ;;  %p12774_p1 = scmp.lt.s32.totalorder %s224_s15, %s224_s15 }
  0xe0   :  { %p12770_p0 = scmp.ne.s32.totalorder %s224_s15, %s12769_s16  ;;  %p12775_p2 = scmp.lt.s32.totalorder %s12769_s16, %s12769_s16 }
  0xe2   :  { %p12776_p3 = por %p12775_p2, %p12774_p1 }
  0xe4   :  { %p12777_p4 = pnand %p12776_p3, %p12770_p0 }
  0xe6   :  { %12780 = shalt.err (!%p12777_p4)
}
  0xe7   :  { %s14640_s4 = sld [smem:[#allocation65_spill]]  ;;  %s13003_s3 = smov [#allocation19]  }
  0xe8   :  { %s246_s14 = sshll.u32 %s13003_s3, 4  ;;  %s13004_s18 = smov [#allocation22]   ;;  %s247_s14 = int_to_ptr.vmem [resolvable:$true] %s246_s14 }
  0xe9   :  { %s266_s22 = sshll.u32 %s13004_s18, 4  ;;  %s12789_s23 = scalar_lea.vmem %s247_s14, 32  ;;  %s267_s22 = int_to_ptr.vmem [resolvable:$true] %s266_s22 }
  0xea   :  { %p12790_p5 = scmp.ne.s32.totalorder %s247_s14, %s12789_s23  ;;  %p12794_p6 = scmp.lt.s32.totalorder %s247_s14, %s247_s14 }
  0xeb   :  { %p12795_p7 = scmp.lt.s32.totalorder %s12789_s23, %s12789_s23 }
  0xed   :  { %229 = dma.hbm_to_vmem [thread:$0]  %s14640_s4, 512, %s224_s15, [#allocation15], %s12999_s29, %s12999_s29, %s13000_s6  }
  0xee   :  { %p12796_p8 = por %p12795_p7, %p12794_p6 }
  0xf0   :  { %p12797_p9 = pnand %p12796_p8, %p12790_p5 }
  0xf2   :  { %12800 = shalt.err (!%p12797_p9)
}
  0xf3   :  { %s14641_s20 = sld [smem:[#allocation66_spill]]  ;;  %s12809_s26 = scalar_lea.vmem %s267_s22, 32 }
  0xf4   :  { %p12810_p10 = scmp.ne.s32.totalorder %s267_s22, %s12809_s26  ;;  %p12814_p11 = scmp.lt.s32.totalorder %s267_s22, %s267_s22 }
  0xf5   :  { %p12815_p12 = scmp.lt.s32.totalorder %s12809_s26, %s12809_s26 }
  0xf7   :  { %p12816_p13 = por %p12815_p12, %p12814_p11 }
  0xf9   :  { %249 = dma.hbm_to_vmem [thread:$0]  %s14641_s20, 32, %s247_s14, [#allocation18]  }
  0xfa   :  { %p12817_p0 = pnand %p12816_p13, %p12810_p10 }
  0xfc   :  { %12820 = shalt.err (!%p12817_p0)
}
  0xfd   :  { %s14642_s21 = sld [smem:[#allocation67_spill]]  ;;  %s13005_s28 = smov [#allocation25]  }
  0xfe   :  { %s286_s17 = sshll.u32 %s13005_s28, 4  ;;  %s13006_s19 = smov [#allocation28]   ;;  %s287_s17 = int_to_ptr.vmem [resolvable:$true] %s286_s17 }
  0xff   :  { %s305_s27 = sshll.u32 %s13006_s19, 4  ;;  %s12829_s1 = scalar_lea.vmem %s287_s17, 32  ;;  %s306_s27 = int_to_ptr.vmem [resolvable:$true] %s305_s27 }
 0x100   :  { %p12830_p1 = scmp.ne.s32.totalorder %s287_s17, %s12829_s1  ;;  %p12834_p2 = scmp.lt.s32.totalorder %s287_s17, %s287_s17 }
 0x101   :  { %p12835_p3 = scmp.lt.s32.totalorder %s12829_s1, %s12829_s1 }
 0x103   :  { %269 = dma.hbm_to_vmem [thread:$0]  %s14642_s21, 32, %s267_s22, [#allocation21]  }
 0x104   :  { %p12836_p4 = por %p12835_p3, %p12834_p2 }
 0x106   :  { %p12837_p5 = pnand %p12836_p4, %p12830_p1 }
 0x108   :  { %12840 = shalt.err (!%p12837_p5)
}
 0x109   :  { %s14643_s2 = sld [smem:[#allocation68_spill]]  ;;  %s12849_s9 = scalar_lea.vmem %s306_s27, 512 }
 0x10a   :  { %p12850_p6 = scmp.ne.s32.totalorder %s306_s27, %s12849_s9  ;;  %p12854_p7 = scmp.lt.s32.totalorder %s306_s27, %s306_s27 }
 0x10b   :  { %p12855_p8 = scmp.lt.s32.totalorder %s12849_s9, %s12849_s9 }
 0x10d   :  { %p12856_p9 = por %p12855_p8, %p12854_p7 }
 0x10f   :  { %289 = dma.hbm_to_vmem [thread:$0]  %s14643_s2, 32, %s287_s17, [#allocation24]  }
 0x110   :  { %p12857_p10 = pnand %p12856_p9, %p12850_p6 }
 0x112   :  { %12860 = shalt.err (!%p12857_p10)
}
 0x113   :  { %s14644_s5 = sld [smem:[#allocation69_spill]]  ;;  %s13007_s7 = smov [#allocation31]  }
 0x114   :  { %s330_s10 = sshll.u32 %s13007_s7, 4  ;;  %s13008_s30 = smov [#allocation34]   ;;  %s331_s10 = int_to_ptr.vmem [resolvable:$true] %s330_s10 }
 0x115   :  { %s350_s11 = sshll.u32 %s13008_s30, 4  ;;  %s12869_s12 = scalar_lea.vmem %s331_s10, 32  ;;  %s351_s11 = int_to_ptr.vmem [resolvable:$true] %s350_s11 }
 0x116   :  { %p12870_p11 = scmp.ne.s32.totalorder %s331_s10, %s12869_s12  ;;  %p12874_p12 = scmp.lt.s32.totalorder %s331_s10, %s331_s10 }
 0x117   :  { %p12875_p13 = scmp.lt.s32.totalorder %s12869_s12, %s12869_s12 }
 0x119   :  { %311 = dma.hbm_to_vmem [thread:$0]  %s14644_s5, 512, %s306_s27, [#allocation27], %s12999_s29, %s12999_s29, %s13000_s6  }
 0x11a   :  { %p12876_p0 = por %p12875_p13, %p12874_p12 }
 0x11c   :  { %p12877_p1 = pnand %p12876_p0, %p12870_p11 }
 0x11e   :  { %12880 = shalt.err (!%p12877_p1)
}
 0x11f   :  { %s14645_s15 = sld [smem:[#allocation71_spill]]  ;;  %s12889_s0 = scalar_lea.vmem %s351_s11, 16 }
 0x120   :  { %p12890_p2 = scmp.ne.s32.totalorder %s351_s11, %s12889_s0  ;;  %s12893_s16 = scalar_lea.vmem %s351_s11, 32 }
 0x121   :  { %p12894_p3 = scmp.lt.s32.totalorder %s351_s11, %s351_s11  ;;  %p12895_p4 = scmp.lt.s32.totalorder %s12893_s16, %s12889_s0 }
 0x123   :  { %p12896_p5 = por %p12895_p4, %p12894_p3 }
 0x125   :  { %333 = dma.hbm_to_vmem [thread:$0]  %s14645_s15, 32, %s331_s10, [#allocation30]  }
 0x126   :  { %p12897_p6 = pnand %p12896_p5, %p12890_p2 }
 0x128   :  { %12900 = shalt.err (!%p12897_p6)
}
 0x129   :  { %353 = dma.hbm_to_vmem [thread:$0]  %s13217_s24, 16, %s351_s11, [#allocation33]  }
 0x12a   :  { %12921 = dma.done.wait [#allocation3], 32  }
 0x12b   :  { %12922 = vsyncadd [#allocation3], 4294967264 }
 0x12c   :  { %12923 = dma.done.wait [#allocation6], 64  }
 0x12d   :  { %12924 = vsyncadd [#allocation6], 4294967232 }
 0x12e   :  { %12925 = dma.done.wait [#allocation9], 544  }
 0x12f   :  { %12926 = vsyncadd [#allocation9], 4294966752 }
 0x130   :  { %12927 = dma.done.wait [#allocation12], 544  }
 0x131   :  { %12928 = vsyncadd [#allocation12], 4294966752 }
 0x132   :  { %12929 = dma.done.wait [#allocation15], 544  }
 0x133   :  { %12930 = vsyncadd [#allocation15], 4294966752 }
 0x134   :  { %12931 = dma.done.wait [#allocation18], 64  }
 0x135   :  { %12932 = vsyncadd [#allocation18], 4294967232 }
 0x136   :  { %12933 = dma.done.wait [#allocation21], 64  }
 0x137   :  { %12934 = vsyncadd [#allocation21], 4294967232 }
 0x138   :  { %12935 = dma.done.wait [#allocation24], 64  }
 0x139   :  { %12936 = vsyncadd [#allocation24], 4294967232 }
 0x13a   :  { %12937 = dma.done.wait [#allocation27], 544  }
 0x13b   :  { %12938 = vsyncadd [#allocation27], 4294966752 }
 0x13c   :  { %12939 = dma.done.wait [#allocation30], 64  }
 0x13d   :  { %12940 = vsyncadd [#allocation30], 4294967232 }
 0x13e   :  { %12941 = dma.done.wait [#allocation33], 32  }
 0x13f   :  { %12942 = vsyncadd [#allocation33], 4294967264  ;;  %s14646_s24 = sld [smem:[#allocation49_spill]]  ;;  %v13009_v0 = vmov 0.0   ;;  %vm13010_vm0 = vmmov 0   ;;  %vm444_vm1 = vcmask 1045504  }
 0x140   :  { %s14647_s6 = sld [smem:[#allocation48_spill]]  ;;  %11336 = vmatprep.subr.bf16.mxu0 %v13009_v0  ;;  %11338 = vmatprep.mubr.msk.bf16.mxu0 %vm13010_vm0, %v13009_v0  ;;  %vm440_vm2 = vcmask 97280   ;;  %vm511_vm3 = vcmask 261120   ;;  %s13011_s18 = smov 104   ;;  %vm577_vm4 = vcmask 64512   ;;  %vm1893_vm5 = vcmask 130048  }
 0x141   :  { %s14648_s4 = sld [smem:[#allocation51_spill]]  ;;  %11342 = vmatprep.subr.bf16.mxu1 %v13009_v0  ;;  %11346 = vmatprep.mubr.msk.bf16.mxu1 %vm13010_vm0, %v13009_v0  ;;  %s13012_s22 = smov 120   ;;  %vm1895_vm6 = vcmask 195584   ;;  %vm2122_vm7 = vcmask 523264   ;;  %vm10620_vm8 = vcmask 1040384   ;;  %vm10689_vm9 = vcmask 9216  }
 0x142   :  { %s14649_s3 = sld [smem:[#allocation50_spill]]  ;;  %s13013_s23 = smov 112  }
 0x143   :  { %s14650_s14 = sld [smem:[#allocation52_spill]]  ;;  %s13014_s20 = smov 96  }
 0x144   :  { %s14651_s26 = sld [smem:[#allocation53_spill]]  ;;  %s13015_s21 = smov 16  }
 0x145   :  { %v12186_v1 = vld [vmem:[%s14646_s24] sm:$0x3f]   ;;  %s13016_s28 = smov 8   ;;  %s13017_s17 = smov 24  }
 0x146   :  { %v422_v2 = vld [vmem:[%s14647_s6] sm:$0xff]  ;;  %v10757_v3 = vld [vmem:[%s14647_s6 + $0x8] sm:$0xff]  ;;  %v446_v4 = vsel %vm444_vm1, %v12186_v1, 0  ;;  %s14652_s19 = sld [smem:[#allocation56_spill]] }
 0x147   :  { %v428_v5 = vpack.c.bf16 %v10757_v3, %v422_v2  ;;  %11337 = vmatpush3.bf16.msra.mxu0 %v446_v4  ;;  %v12187_v6 = vld [vmem:[%s14648_s4 + $0x8] sm:$0xff]   ;;  %v12188_v7 = vld [vmem:[%s14648_s4] sm:$0xff]   ;;  %s14653_s27 = sld [smem:[#allocation57_spill]] }
 0x148   :  { %11350 = vmatprep.subr.mxu0 %v13009_v0  ;;  %11343 = vmatpush3.bf16.msra.mxu1 %v12187_v6  ;;  %v10758_v9 = vld [vmem:[%s14649_s3] ss:$0 sm:$0xff]  ;;  %s14654_s1 = sld [smem:[#allocation54_spill]] }
 0x149   :  { %11344 = vmatprep.subr.bf16.mxu1 %v13009_v0  ;;  %v10761_v16 = vld [vmem:[%s14650_s14] ss:$0 sm:$0xff]  ;;  %s14655_s2 = sld [smem:[#allocation55_spill]] }
 0x14a   :  { %11339 = vmatmul.mubr.msk.bf16.vlgmr.msra.gmra.mxu0 %vm440_vm2, %v428_v5  ;;  %s14656_s9 = sld [smem:[#allocation58_spill]] }
 0x14b   :  { %11352 = vmatprep.mubr.msk.f32.mxu0 %vm13010_vm0, %v13009_v0  ;;  %s14657_s5 = sld [smem:[#allocation59_spill]] }
 0x14c   :  { %11345 = vmatpush3.bf16.msra.mxu1 %v12188_v7  ;;  %s14658_s7 = sld [smem:[#allocation60_spill]] }
 0x14d   :  { %11360 = vmatprep.subr.mxu1 %v13009_v0  ;;  %s14659_s10 = sld [smem:[#allocation63_spill]] }
 0x14e   :  { %s14660_s30 = sld [smem:[#allocation64_spill]] }
 0x14f   :  { %s14661_s11 = sld [smem:[#allocation61_spill]] }
 0x150   :  { %s14662_s12 = sld [smem:[#allocation62_spill]] }
 0x151   :  { %s14663_s15 = sld [smem:[#allocation70_spill]] }
 0x20a   :  { %v482_v8 = vpop.f32.mrf.mxu0 }
 0x20b   :  { %v13284_v12 = vadd.f32 %v10758_v9, %v482_v8 }
 0x20c   :  { %v11340_v10 = vpop.f32.mrf.mxu0 }
 0x20e   :  { %v485_v11 = vpop.f32.mrf.mxu0 }
 0x20f   :  { %v13286_v13 = vadd.f32 %v10758_v9, %v485_v11 }
 0x210   :  { %v11341_v14 = vpop.f32.mrf.mxu0 }
 0x211   :  { %v13290_v15 = vpack.c.bf16 %v13286_v13, %v13284_v12 }
 0x213   :  { %11347 = vmatmul.mubr.msk.bf16.vlgmr.msra.gmra.mxu1 %vm511_vm3, %v13290_v15 }
 0x214   :  { %11362 = vmatprep.mubr.msk.f32.mxu1 %vm13010_vm0, %v13009_v0 }
 0x2d3   :  { %v549_v17 = vpop.f32.mrf.mxu1 }
 0x2d4   :  { %v13297_v18 = vadd.f32 %v10761_v16, %v549_v17 }
 0x2d5   :  { %v11348_v19 = vpop.f32.mrf.mxu1 }
 0x2d6   :  { %566 = vrot.lane.b32.xlu1 %v13297_v18, %s13011_s18  ;;  %562 = vrot.lane.b32.xlu0 %v13297_v18, %s13012_s22 }
 0x2d7   :  { %v552_v20 = vpop.f32.mrf.mxu1 }
 0x2d8   :  { %v13303_v21 = vadd.f32 %v10761_v16, %v552_v20 }
 0x2d9   :  { %v11349_v22 = vpop.f32.mrf.mxu1 }
 0x2da   :  { %564 = vrot.lane.b32.xlu0 %v13297_v18, %s13013_s23  ;;  %569 = vrot.lane.b32.xlu1 %v13303_v21, %s13012_s22 }
 0x2de   :  { %571 = vrot.lane.b32.xlu0 %v13303_v21, %s13013_s23  ;;  %573 = vrot.lane.b32.xlu1 %v13303_v21, %s13011_s18 }
 0x2e2   :  { %575 = vrot.lane.b32.xlu0 %v13297_v18, %s13014_s20 }
 0x348   :  { %v13315_v23 = vpop.permute.xlu0 %562  ;;  %v13317_v24 = vpop.permute.xlu1 %566 }
 0x349   :  { %652 = vrot.lane.b32.xlu1 %v13315_v23, %s13014_s20 }
 0x34c   :  { %v13321_v25 = vpop.permute.xlu0 %564  ;;  %v13327_v26 = vpop.permute.xlu1 %569 }
 0x34d   :  { %728 = vrot.lane.b32.xlu0 %v13321_v25, %s13014_s20  ;;  %804 = vrot.lane.b32.xlu1 %v13317_v24, %s13014_s20 }
 0x350   :  { %v13329_v27 = vpop.permute.xlu0 %571  ;;  %v13335_v29 = vpop.permute.xlu1 %573 }
 0x351   :  { %880 = vrot.lane.b32.xlu0 %v13303_v21, %s13014_s20  ;;  %956 = vrot.lane.b32.xlu1 %v13327_v26, %s13014_s20 }
 0x354   :  { %v576_v28 = vpop.permute.xlu0 %575 }
 0x355   :  { %1032 = vrot.lane.b32.xlu0 %v13329_v27, %s13014_s20  ;;  %11351 = vmatpush3.xpose.msk.msra.mxu0 %vm577_vm4, %v576_v28 }
 0x356   :  { %1108 = vrot.lane.b32.xlu1 %v13335_v29, %s13014_s20  ;;  %11355 = vmatprep.subr.mxu0 %v13009_v0 }
 0x358   :  { %11353 = vmatmul.mubr.msk.f32.vlgmr.msra.gmra.mxu0 %vm577_vm4, %v13297_v18 }
 0x359   :  { %11357 = vmatprep.mubr.msk.f32.mxu0 %vm13010_vm0, %v13009_v0 }
 0x3bb   :  { %v653_v30 = vpop.permute.xlu1 %652 }
 0x3bc   :  { %11356 = vmatpush3.xpose.msk.msra.mxu0 %vm577_vm4, %v653_v30 }
 0x3bd   :  { %11365 = vmatprep.subr.mxu0 %v13009_v0 }
 0x3bf   :  { %v729_v31 = vpop.permute.xlu0 %728  ;;  %11358 = vmatmul.mubr.msk.f32.vlgmr.msra.gmra.mxu0 %vm577_vm4, %v13315_v23  ;;  %v805_v32 = vpop.permute.xlu1 %804 }
 0x3c0   :  { %11361 = vmatpush3.xpose.msk.msra.mxu1 %vm577_vm4, %v729_v31  ;;  %11366 = vmatpush3.xpose.msk.msra.mxu0 %vm577_vm4, %v805_v32 }
 0x3c1   :  { %11367 = vmatprep.mubr.msk.f32.mxu0 %vm13010_vm0, %v13009_v0  ;;  %11370 = vmatprep.subr.mxu1 %v13009_v0 }
 0x3c2   :  { %11375 = vmatprep.subr.mxu0 %v13009_v0 }
 0x3c3   :  { %11363 = vmatmul.mubr.msk.f32.vlgmr.msra.gmra.mxu1 %vm577_vm4, %v13321_v25  ;;  %v881_v33 = vpop.permute.xlu0 %880  ;;  %11368 = vmatmul.mubr.msk.f32.vlgmr.msra.gmra.mxu0 %vm577_vm4, %v13317_v24  ;;  %v957_v34 = vpop.permute.xlu1 %956 }
 0x3c4   :  { %11371 = vmatpush3.xpose.msk.msra.mxu1 %vm577_vm4, %v881_v33  ;;  %11376 = vmatpush3.xpose.msk.msra.mxu0 %vm577_vm4, %v957_v34 }
 0x3c5   :  { %11372 = vmatprep.mubr.msk.f32.mxu1 %vm13010_vm0, %v13009_v0  ;;  %11377 = vmatprep.mubr.msk.f32.mxu0 %vm13010_vm0, %v13009_v0 }
 0x3c6   :  { %11380 = vmatprep.subr.mxu1 %v13009_v0  ;;  %11385 = vmatprep.subr.mxu0 %v13009_v0 }
 0x3c7   :  { %11373 = vmatmul.mubr.msk.f32.vlgmr.msra.gmra.mxu1 %vm577_vm4, %v13303_v21  ;;  %v1033_v35 = vpop.permute.xlu0 %1032  ;;  %11378 = vmatmul.mubr.msk.f32.vlgmr.msra.gmra.mxu0 %vm577_vm4, %v13327_v26 }
 0x3c8   :  { %v1109_v36 = vpop.permute.xlu1 %1108  ;;  %11381 = vmatpush3.xpose.msk.msra.mxu1 %vm577_vm4, %v1033_v35  ;;  %11382 = vmatprep.mubr.msk.f32.mxu1 %vm13010_vm0, %v13009_v0 }
 0x3c9   :  { %11386 = vmatpush3.xpose.msk.msra.mxu0 %vm577_vm4, %v1109_v36  ;;  %11387 = vmatprep.mubr.msk.f32.mxu0 %vm13010_vm0, %v13009_v0 }
 0x3ca   :  { %11390 = vmatprep.subr.mxu1 %v13009_v0  ;;  %11395 = vmatprep.subr.mxu0 %v13009_v0 }
 0x3cb   :  { %11383 = vmatmul.mubr.msk.f32.vlgmr.msra.gmra.mxu1 %vm577_vm4, %v13329_v27 }
 0x3cc   :  { %11388 = vmatmul.mubr.msk.f32.vlgmr.msra.gmra.mxu0 %vm577_vm4, %v13335_v29  ;;  %11392 = vmatprep.mubr.msk.f32.mxu1 %vm13010_vm0, %v13009_v0 }
 0x3cd   :  { %11397 = vmatprep.mubr.msk.f32.mxu0 %vm13010_vm0, %v13009_v0 }
 0x418   :  { %v648_v37 = vpop.f32.mrf.mxu0 }
 0x419   :  { %v1184_v38 = vsel %vm577_vm4, %v648_v37, -inf }
 0x41a   :  { %1185 = vmax.xlane.f32.xlu0 %v1184_v38  ;;  %v11354_v39 = vpop.f32.mrf.mxu0 }
 0x47f   :  { %v724_v40 = vpop.f32.mrf.mxu0 }
 0x480   :  { %v1187_v41 = vsel %vm577_vm4, %v724_v40, -inf }
 0x481   :  { %1188 = vmax.xlane.f32.xlu1 %v1187_v41  ;;  %v11359_v42 = vpop.f32.mrf.mxu0 }
 0x483   :  { %v800_v43 = vpop.f32.mrf.mxu1  ;;  %v876_v44 = vpop.f32.mrf.mxu0 }
 0x484   :  { %v1190_v45 = vsel %vm577_vm4, %v800_v43, -inf  ;;  %v1193_v51 = vsel %vm577_vm4, %v876_v44, -inf }
 0x485   :  { %v11364_v46 = vpop.f32.mrf.mxu1  ;;  %1191 = vmax.xlane.f32.xlu0 %v1190_v45  ;;  %v11369_v47 = vpop.f32.mrf.mxu0 }
 0x487   :  { %v952_v48 = vpop.f32.mrf.mxu1  ;;  %v1028_v49 = vpop.f32.mrf.mxu0 }
 0x488   :  { %v1196_v50 = vsel %vm577_vm4, %v952_v48, -inf  ;;  %v1199_v57 = vsel %vm577_vm4, %v1028_v49, -inf }
 0x489   :  { %v11374_v52 = vpop.f32.mrf.mxu1  ;;  %1197 = vmax.xlane.f32.xlu1 %v1196_v50  ;;  %1194 = vmax.xlane.f32.xlu0 %v1193_v51  ;;  %v11379_v53 = vpop.f32.mrf.mxu0 }
 0x48b   :  { %v1104_v54 = vpop.f32.mrf.mxu1 }
 0x48c   :  { %v1180_v55 = vpop.f32.mrf.mxu0  ;;  %v1202_v56 = vsel %vm577_vm4, %v1104_v54, -inf }
 0x48d   :  { %v11384_v58 = vpop.f32.mrf.mxu1  ;;  %1203 = vmax.xlane.f32.xlu1 %v1202_v56  ;;  %1200 = vmax.xlane.f32.xlu0 %v1199_v57  ;;  %v1205_v60 = vsel %vm577_vm4, %v1180_v55, -inf }
 0x48e   :  { %v11389_v59 = vpop.f32.mrf.mxu0 }
 0x491   :  { %1206 = vmax.xlane.f32.xlu0 %v1205_v60 }
 0x49e   :  { %1272 = vrot.lane.b32.xlu1 %v13297_v18, %s12999_s29 }
 0x4a2   :  { %1424 = vrot.lane.b32.xlu1 %v13321_v25, %s12999_s29 }
 0x4a3   :  { %v1186_v61 = vpop.xlane.xlu0 %1185 }
 0x4a4   :  { %v1208_v62 = vsub.f32 %v648_v37, %v1186_v61 }
 0x4a6   :  { %1500 = vrot.lane.b32.xlu1 %v13317_v24, %s12999_s29  ;;  %v1216_v63 = vmul.f32 1.442695, %v1208_v62 }
 0x4a7   :  { %1348 = vrot.lane.b32.xlu0 %v13315_v23, %s12999_s29 }
 0x4a8   :  { %12241 = vpow2.f32 %v1216_v63 }
 0x4aa   :  { %1652 = vrot.lane.b32.xlu1 %v13327_v26, %s12999_s29 }
 0x4ab   :  { %1576 = vrot.lane.b32.xlu0 %v13303_v21, %s12999_s29 }
 0x4b5   :  { %v13409_v1 = vpop.eup %12241 }
 0x4b6   :  { %v1232_v2 = vsel %vm577_vm4, %v13409_v1, 0.0 }
 0x4ce   :  { %1233 = vadd.xlane.f32.xlu1 %v1232_v2 }
 0x50a   :  { %v1189_v3 = vpop.xlane.xlu1 %1188 }
 0x50b   :  { %v1209_v4 = vsub.f32 %v724_v40, %v1189_v3 }
 0x50d   :  { %v1218_v5 = vmul.f32 1.442695, %v1209_v4 }
 0x50e   :  { %v1192_v6 = vpop.xlane.xlu0 %1191 }
 0x50f   :  { %12243 = vpow2.f32 %v1218_v5  ;;  %v1210_v7 = vsub.f32 %v800_v43, %v1192_v6 }
 0x511   :  { %v1220_v8 = vmul.f32 1.442695, %v1210_v7 }
 0x512   :  { %v1198_v9 = vpop.xlane.xlu1 %1197  ;;  %v1195_v10 = vpop.xlane.xlu0 %1194 }
 0x513   :  { %12245 = vpow2.f32 %v1220_v8  ;;  %v1212_v11 = vsub.f32 %v952_v48, %v1198_v9  ;;  %v1211_v14 = vsub.f32 %v876_v44, %v1195_v10 }
 0x515   :  { %v1224_v16 = vmul.f32 1.442695, %v1212_v11  ;;  %v1222_v17 = vmul.f32 1.442695, %v1211_v14 }
 0x516   :  { %v1204_v18 = vpop.xlane.xlu1 %1203  ;;  %v1201_v19 = vpop.xlane.xlu0 %1200 }
 0x517   :  { %12247 = vpow2.f32 %v1224_v16  ;;  %v1214_v20 = vsub.f32 %v1104_v54, %v1204_v18  ;;  %v1213_v21 = vsub.f32 %v1028_v49, %v1201_v19  ;;  %v12189_v18 = vld [vmem:[%s14651_s26 + $0x8] sm:$0xff]  }
 0x518   :  { %12249 = vpow2.f32 %v1222_v17 }
 0x519   :  { %v1228_v22 = vmul.f32 1.442695, %v1214_v20  ;;  %v1226_v23 = vmul.f32 1.442695, %v1213_v21  ;;  %v12190_v21 = vld [vmem:[%s14651_s26] sm:$0xff]  }
 0x51a   :  { %v1273_v24 = vpop.permute.xlu1 %1272  ;;  %v1207_v25 = vpop.xlane.xlu0 %1206 }
 0x51b   :  { %12251 = vpow2.f32 %v1228_v22  ;;  %v1215_v26 = vsub.f32 %v1180_v55, %v1207_v25  ;;  %11391 = vmatpush3.msra.mxu1 %v1273_v24 }
 0x51c   :  { %v12244_v28 = vpop.eup %12243  ;;  %12253 = vpow2.f32 %v1226_v23  ;;  %11400 = vmatprep.subr.mxu1 %v13009_v0 }
 0x51d   :  { %v1230_v30 = vmul.f32 1.442695, %v1215_v26  ;;  %v1235_v31 = vsel %vm577_vm4, %v12244_v28, 0.0 }
 0x51e   :  { %1236 = vadd.xlane.f32.xlu0 %v1235_v31  ;;  %v1349_v32 = vpop.permute.xlu0 %1348  ;;  %v1425_v45 = vpop.permute.xlu1 %1424 }
 0x51f   :  { %12255 = vpow2.f32 %v1230_v30  ;;  %11396 = vmatpush3.msra.mxu0 %v1349_v32 }
 0x520   :  { %v12246_v33 = vpop.eup %12245  ;;  %11405 = vmatprep.subr.mxu0 %v13009_v0 }
 0x521   :  { %v1238_v34 = vsel %vm577_vm4, %v12246_v33, 0.0 }
 0x522   :  { %1239 = vadd.xlane.f32.xlu1 %v1238_v34  ;;  %v1501_v46 = vpop.permute.xlu1 %1500 }
 0x524   :  { %v12248_v35 = vpop.eup %12247 }
 0x525   :  { %v12250_v36 = vpop.eup %12249  ;;  %v1244_v37 = vsel %vm577_vm4, %v12248_v35, 0.0 }
 0x526   :  { %1245 = vadd.xlane.f32.xlu1 %v1244_v37  ;;  %v1241_v38 = vsel %vm577_vm4, %v12250_v36, 0.0  ;;  %v1653_v47 = vpop.permute.xlu1 %1652 }
 0x527   :  { %1242 = vadd.xlane.f32.xlu0 %v1241_v38 }
 0x528   :  { %v12252_v39 = vpop.eup %12251 }
 0x529   :  { %v13419_v40 = vpop.eup %12253  ;;  %v1250_v41 = vsel %vm577_vm4, %v12252_v39, 0.0 }
 0x52a   :  { %1251 = vadd.xlane.f32.xlu1 %v1250_v41  ;;  %v1247_v42 = vsel %vm577_vm4, %v13419_v40, 0.0 }
 0x52b   :  { %1248 = vadd.xlane.f32.xlu0 %v1247_v42 }
 0x52c   :  { %v13424_v43 = vpop.eup %12255 }
 0x52d   :  { %v1253_v44 = vsel %vm577_vm4, %v13424_v43, 0.0 }
 0x52f   :  { %1254 = vadd.xlane.f32.xlu0 %v1253_v44 }
 0x53b   :  { %1804 = vrot.lane.b32.xlu1 %v13335_v29, %s12999_s29  ;;  %v1577_v29 = vpop.permute.xlu0 %1576 }
 0x545   :  { %1728 = vrot.lane.b32.xlu0 %v13329_v27, %s12999_s29 }
 0x557   :  { %v1234_v48 = vpop.xlane.xlu1 %1233 }
 0x558   :  { %12257 = vrcp.f32 %v1234_v48 }
 0x565   :  { %v12258_v49 = vpop.eup %12257 }
 0x566   :  { %v1264_v50 = vmul.f32 %v12258_v49, %v13409_v1 }
 0x568   :  { %11393 = vmatmul.mubr.msk.f32.vlgmr.msra.gmra.mxu1 %vm577_vm4, %v1264_v50 }
 0x569   :  { %11401 = vmatpush3.msra.mxu1 %v1425_v45  ;;  %11402 = vmatprep.mubr.msk.f32.mxu1 %vm13010_vm0, %v13009_v0 }
 0x56a   :  { %11410 = vmatprep.subr.mxu1 %v13009_v0 }
 0x5a7   :  { %v1237_v51 = vpop.xlane.xlu0 %1236 }
 0x5a8   :  { %12259 = vrcp.f32 %v1237_v51  ;;  %v10789_v51 = vld [vmem:[#allocation2] ss:$0 sm:$0xff] }
 0x5ab   :  { %v1240_v27 = vpop.xlane.xlu1 %1239 }
 0x5ac   :  { %12261 = vrcp.f32 %v1240_v27 }
 0x5af   :  { %v1246_v52 = vpop.xlane.xlu1 %1245 }
 0x5b0   :  { %12263 = vrcp.f32 %v1246_v52  ;;  %v1243_v53 = vpop.xlane.xlu0 %1242 }
 0x5b1   :  { %12265 = vrcp.f32 %v1243_v53 }
 0x5b3   :  { %v1252_v54 = vpop.xlane.xlu1 %1251 }
 0x5b4   :  { %12267 = vrcp.f32 %v1252_v54  ;;  %v1249_v55 = vpop.xlane.xlu0 %1248 }
 0x5b5   :  { %v12260_v56 = vpop.eup %12259  ;;  %12269 = vrcp.f32 %v1249_v55 }
 0x5b6   :  { %v1265_v57 = vmul.f32 %v12260_v56, %v12244_v28 }
 0x5b7   :  { %v1805_v7 = vpop.permute.xlu1 %1804 }
 0x5b8   :  { %v1255_v58 = vpop.xlane.xlu0 %1254  ;;  %11398 = vmatmul.mubr.msk.f32.vlgmr.msra.gmra.mxu0 %vm577_vm4, %v1265_v57 }
 0x5b9   :  { %v12262_v59 = vpop.eup %12261  ;;  %12271 = vrcp.f32 %v1255_v58  ;;  %11406 = vmatpush3.msra.mxu0 %v1501_v46  ;;  %11407 = vmatprep.mubr.msk.f32.mxu0 %vm13010_vm0, %v13009_v0 }
 0x5ba   :  { %v1266_v60 = vmul.f32 %v12262_v59, %v12246_v33  ;;  %11415 = vmatprep.subr.mxu0 %v13009_v0 }
 0x5bc   :  { %11403 = vmatmul.mubr.msk.f32.vlgmr.msra.gmra.mxu1 %vm577_vm4, %v1266_v60  ;;  %v1729_v2 = vpop.permute.xlu0 %1728 }
 0x5bd   :  { %v12264_v61 = vpop.eup %12263  ;;  %11411 = vmatpush3.msra.mxu1 %v1577_v29  ;;  %11412 = vmatprep.mubr.msk.f32.mxu1 %vm13010_vm0, %v13009_v0 }
 0x5be   :  { %v12266_v62 = vpop.eup %12265  ;;  %11420 = vmatprep.subr.mxu1 %v13009_v0  ;;  %v1268_v63 = vmul.f32 %v12264_v61, %v12248_v35 }
 0x5bf   :  { %v1267_v1 = vmul.f32 %v12266_v62, %v12250_v36 }
 0x5c0   :  { %11413 = vmatmul.mubr.msk.f32.vlgmr.msra.gmra.mxu1 %vm577_vm4, %v1268_v63 }
 0x5c1   :  { %v12268_v3 = vpop.eup %12267  ;;  %11408 = vmatmul.mubr.msk.f32.vlgmr.msra.gmra.mxu0 %vm577_vm4, %v1267_v1  ;;  %11421 = vmatpush3.msra.mxu1 %v1729_v2 }
 0x5c2   :  { %v12270_v4 = vpop.eup %12269  ;;  %11416 = vmatpush3.msra.mxu0 %v1653_v47  ;;  %11417 = vmatprep.mubr.msk.f32.mxu0 %vm13010_vm0, %v13009_v0  ;;  %v1270_v5 = vmul.f32 %v12268_v3, %v12252_v39 }
 0x5c3   :  { %11422 = vmatprep.mubr.msk.f32.mxu1 %vm13010_vm0, %v13009_v0  ;;  %11425 = vmatprep.subr.mxu0 %v13009_v0  ;;  %v1269_v6 = vmul.f32 %v12270_v4, %v13419_v40 }
 0x5c4   :  { %11423 = vmatmul.mubr.msk.f32.vlgmr.msra.gmra.mxu1 %vm577_vm4, %v1270_v5  ;;  %11430 = vmatprep.subr.bf16.mxu1 %v13009_v0 }
 0x5c5   :  { %11418 = vmatmul.mubr.msk.f32.vlgmr.msra.gmra.mxu0 %vm577_vm4, %v1269_v6  ;;  %11434 = vmatprep.mubr.msk.bf16.mxu1 %vm13010_vm0, %v13009_v0 }
 0x5c6   :  { %v12272_v8 = vpop.eup %12271  ;;  %11426 = vmatpush3.msra.mxu0 %v1805_v7  ;;  %11427 = vmatprep.mubr.msk.f32.mxu0 %vm13010_vm0, %v13009_v0 }
 0x5c7   :  { %v1271_v9 = vmul.f32 %v12272_v8, %v13424_v43  ;;  %11438 = vmatprep.subr.bf16.mxu0 %v13009_v0  ;;  %11431 = vmatpush3.bf16.msra.mxu1 %v12189_v18  ;;  %v12191_v8 = vld [vmem:[%s14652_s19 + $0x8] sm:$0xff]  }
 0x5c8   :  { %11432 = vmatprep.subr.bf16.mxu1 %v13009_v0 }
 0x5c9   :  { %11428 = vmatmul.mubr.msk.f32.vlgmr.msra.gmra.mxu0 %vm577_vm4, %v1271_v9  ;;  %v12192_v9 = vld [vmem:[%s14652_s19] sm:$0xff]  }
 0x5ca   :  { %11442 = vmatprep.mubr.msk.bf16.mxu0 %vm13010_vm0, %v13009_v0  ;;  %11439 = vmatpush3.bf16.msra.mxu0 %v12191_v8 }
 0x5cb   :  { %11433 = vmatpush3.bf16.msra.mxu1 %v12190_v21  ;;  %11440 = vmatprep.subr.bf16.mxu0 %v13009_v0 }
 0x5cc   :  { %11446 = vmatprep.subr.bf16.mxu1 %v13009_v0 }
 0x5ce   :  { %11441 = vmatpush3.bf16.msra.mxu0 %v12192_v9 }
 0x5cf   :  { %11458 = vmatprep.subr.bf16.mxu0 %v13009_v0 }
 0x628   :  { %v1344_v10 = vpop.f32.mrf.mxu1 }
 0x62a   :  { %v11394_v11 = vpop.f32.mrf.mxu1 }
 0x678   :  { %v1420_v14 = vpop.f32.mrf.mxu0 }
 0x67a   :  { %v11399_v16 = vpop.f32.mrf.mxu0 }
 0x67c   :  { %v1496_v17 = vpop.f32.mrf.mxu1 }
 0x67e   :  { %v11404_v19 = vpop.f32.mrf.mxu1 }
 0x680   :  { %v1648_v20 = vpop.f32.mrf.mxu1 }
 0x681   :  { %v1572_v22 = vpop.f32.mrf.mxu0 }
 0x682   :  { %v11414_v23 = vpop.f32.mrf.mxu1 }
 0x683   :  { %v11409_v24 = vpop.f32.mrf.mxu0 }
 0x684   :  { %v1800_v25 = vpop.f32.mrf.mxu1 }
 0x685   :  { %v1724_v26 = vpop.f32.mrf.mxu0  ;;  %v12101_v28 = vpack.i.bf16 %v1800_v25, %v1496_v17 }
 0x686   :  { %v12096_v30 = vpack.i.bf16 %v1724_v26, %v1420_v14  ;;  %v11424_v31 = vpop.f32.mrf.mxu1  ;;  %v10794_v26 = vld [vmem:[%s14655_s2] ss:$0 sm:$0xff] }
 0x687   :  { %v11419_v32 = vpop.f32.mrf.mxu0  ;;  %12102 = vrot.lane.b32.xlu1 %v12101_v28, %s13015_s21 }
 0x688   :  { %12097 = vrot.lane.b32.xlu0 %v12096_v30, %s13016_s28 }
 0x689   :  { %v1876_v33 = vpop.f32.mrf.mxu0 }
 0x68a   :  { %v12106_v34 = vpack.i.bf16 %v1876_v33, %v1572_v22  ;;  %v10793_v22 = vld [vmem:[%s14654_s1] ss:$0 sm:$0xff]  ;;  %v12194_v33 = vld [vmem:[%s14653_s27 + $0x10] sm:$0xff]  }
 0x68b   :  { %v11429_v35 = vpop.f32.mrf.mxu0 }
 0x68c   :  { %12107 = vrot.lane.b32.xlu0 %v12106_v34, %s13017_s17  ;;  %v12195_v34 = vld [vmem:[%s14653_s27 + $0x8] sm:$0xff]   ;;  %v12196_v35 = vld [vmem:[%s14653_s27] sm:$0xff]  }
 0x6f9   :  { %v12103_v36 = vpop.permute.xlu1 %12102 }
 0x6fa   :  { %v12098_v37 = vpop.permute.xlu0 %12097  ;;  %v12105_v40 = vunpack.i.h.bf16 %v12103_v36  ;;  %v12104_v41 = vunpack.i.l.bf16 %v12103_v36  ;;  %v10795_v36 = vld [vmem:[#allocation5] ss:$0 sm:$0xff] }
 0x6fb   :  { %v12100_v38 = vunpack.i.h.bf16 %v12098_v37  ;;  %v12099_v39 = vunpack.i.l.bf16 %v12098_v37 }
 0x6fd   :  { %v1909_v42 = vsel %vm577_vm4, %v1648_v20, %v12100_v38  ;;  %v1892_v43 = vsel %vm577_vm4, %v1344_v10, %v12099_v39  ;;  %v12193_v10 = vld [vmem:[%s14653_s27 + $0x18] sm:$0xff]  }
 0x6fe   :  { %v12108_v44 = vpop.permute.xlu0 %12107  ;;  %v1894_v47 = vsel %vm1893_vm5, %v1892_v43, %v12104_v41  ;;  %v1910_v48 = vsel %vm1893_vm5, %v1909_v42, %v12105_v40 }
 0x6ff   :  { %v12110_v45 = vunpack.i.h.bf16 %v12108_v44  ;;  %v12109_v46 = vunpack.i.l.bf16 %v12108_v44 }
 0x701   :  { %v1911_v49 = vsel %vm1895_vm6, %v1910_v48, %v12110_v45  ;;  %v1896_v50 = vsel %vm1895_vm6, %v1894_v47, %v12109_v46  ;;  %v10799_v46 = vld [vmem:[%s14656_s9] ss:$0 sm:$0xff] }
 0x702   :  { %v1912_v29 = vpack.c.bf16 %v1911_v49, %v1896_v50 }
 0x704   :  { %11435 = vmatmul.mubr.msk.bf16.vlgmr.msra.gmra.mxu1 %vm511_vm3, %v1912_v29 }
 0x705   :  { %11454 = vmatprep.mubr.msk.bf16.mxu1 %vm13010_vm0, %v13009_v0  ;;  %11447 = vmatpush3.bf16.msra.mxu1 %v12193_v10 }
 0x706   :  { %11448 = vmatprep.subr.bf16.mxu1 %v13009_v0 }
 0x709   :  { %11449 = vmatpush3.bf16.msra.mxu1 %v12194_v33 }
 0x70a   :  { %11450 = vmatprep.subr.bf16.mxu1 %v13009_v0 }
 0x70d   :  { %11451 = vmatpush3.bf16.msra.mxu1 %v12195_v34 }
 0x70e   :  { %11452 = vmatprep.subr.bf16.mxu1 %v13009_v0 }
 0x711   :  { %11453 = vmatpush3.bf16.msra.mxu1 %v12196_v35 }
 0x712   :  { %11476 = vmatprep.subr.mxu1 %v13009_v0 }
 0x7c4   :  { %v1966_v27 = vpop.f32.mrf.mxu1 }
 0x7c5   :  { %v1967_v52 = vadd.f32 %v10789_v51, %v1966_v27 }
 0x7c6   :  { %v11436_v53 = vpop.f32.mrf.mxu1 }
 0x7c7   :  { %v1973_v54 = vadd.f32 %v1967_v52, %v13284_v12 }
 0x7c8   :  { %v1969_v55 = vpop.f32.mrf.mxu1 }
 0x7c9   :  { %v1970_v56 = vadd.f32 %v10789_v51, %v1969_v55  ;;  %v1977_v57 = vsel %vm511_vm3, %v1973_v54, 0.0 }
 0x7ca   :  { %1978 = vadd.xlane.f32.xlu1 %v1977_v57  ;;  %v11437_v58 = vpop.f32.mrf.mxu1 }
 0x7cb   :  { %v1974_v59 = vadd.f32 %v1970_v56, %v13286_v13 }
 0x7cd   :  { %v1980_v60 = vsel %vm511_vm3, %v1974_v59, 0.0 }
 0x7ce   :  { %1981 = vadd.xlane.f32.xlu0 %v1980_v60 }
 0x853   :  { %v1979_v61 = vpop.xlane.xlu1 %1978 }
 0x854   :  { %v1984_v62 = vmul.f32 0.03125, %v1979_v61 }
 0x856   :  { %v1986_v63 = vsub.f32 %v1973_v54, %v1984_v62 }
 0x857   :  { %v1982_v1 = vpop.xlane.xlu0 %1981 }
 0x858   :  { %v1985_v2 = vmul.f32 0.03125, %v1982_v1  ;;  %v1988_v3 = vmul.f32 %v1986_v63, %v1986_v63 }
 0x85a   :  { %v1987_v4 = vsub.f32 %v1974_v59, %v1985_v2  ;;  %v1990_v5 = vsel %vm511_vm3, %v1988_v3, 0.0  ;;  %v12197_v2 = vld [vmem:[%s14648_s4 + $0x18] sm:$0xff]   ;;  %v12198_v3 = vld [vmem:[%s14648_s4 + $0x10] sm:$0xff]  }
 0x85b   :  { %1991 = vadd.xlane.f32.xlu0 %v1990_v5 }
 0x85c   :  { %v1989_v6 = vmul.f32 %v1987_v4, %v1987_v4 }
 0x85e   :  { %v1993_v7 = vsel %vm511_vm3, %v1989_v6, 0.0 }
 0x85f   :  { %1994 = vadd.xlane.f32.xlu1 %v1993_v7 }
 0x8e4   :  { %v1992_v11 = vpop.xlane.xlu0 %1991 }
 0x8e5   :  { %v1996_v14 = vmul.f32 0.03125, %v1992_v11 }
 0x8e7   :  { %v1998_v16 = vadd.f32 1e-05, %v1996_v14  ;;  %v10805_v14 = vld [vmem:[%s14657_s5] ss:$0 sm:$0xff] }
 0x8e8   :  { %v1995_v17 = vpop.xlane.xlu1 %1994 }
 0x8e9   :  { %12273 = vrsqrt.f32 %v1998_v16  ;;  %v1997_v18 = vmul.f32 0.03125, %v1995_v17 }
 0x8eb   :  { %v1999_v19 = vadd.f32 1e-05, %v1997_v18 }
 0x8ed   :  { %12275 = vrsqrt.f32 %v1999_v19  ;;  %v10806_v19 = vld [vmem:[%s14658_s7] ss:$0 sm:$0xff] }
 0x8f6   :  { %v12274_v20 = vpop.eup %12273 }
 0x8f7   :  { %v2002_v21 = vmul.f32 %v12274_v20, %v1986_v63 }
 0x8f9   :  { %v2008_v25 = vmul.f32 %v10793_v22, %v2002_v21 }
 0x8fa   :  { %v12276_v23 = vpop.eup %12275 }
 0x8fb   :  { %v2003_v24 = vmul.f32 %v12276_v23, %v1987_v4  ;;  %v2014_v30 = vadd.f32 %v10794_v26, %v2008_v25 }
 0x8fd   :  { %v2009_v28 = vmul.f32 %v10793_v22, %v2003_v24  ;;  %v10811_v24 = vld [vmem:[%s14650_s14 + $0x1] ss:$0 sm:$0xff] }
 0x8ff   :  { %v2015_v31 = vadd.f32 %v10794_v26, %v2009_v28 }
 0x901   :  { %v2030_v32 = vpack.c.bf16 %v2015_v31, %v2014_v30 }
 0x903   :  { %11443 = vmatmul.mubr.msk.bf16.vlgmr.msra.gmra.mxu0 %vm511_vm3, %v2030_v32 }
 0x904   :  { %11462 = vmatprep.mubr.msk.bf16.mxu0 %vm13010_vm0, %v13009_v0  ;;  %11459 = vmatpush3.bf16.msra.mxu0 %v12197_v2 }
 0x905   :  { %11460 = vmatprep.subr.bf16.mxu0 %v13009_v0 }
 0x908   :  { %11461 = vmatpush3.bf16.msra.mxu0 %v12198_v3 }
 0x909   :  { %11466 = vmatprep.subr.mxu0 %v13009_v0 }
 0x9c3   :  { %v2084_v37 = vpop.f32.mrf.mxu0 }
 0x9c4   :  { %v2085_v39 = vadd.f32 %v10795_v36, %v2084_v37 }
 0x9c5   :  { %v11444_v38 = vpop.f32.mrf.mxu0 }
 0x9c6   :  { %v2091_v43 = vmax.f32 %v2085_v39, 0.0 }
 0x9c7   :  { %v2087_v40 = vpop.f32.mrf.mxu0 }
 0x9c8   :  { %v2088_v41 = vadd.f32 %v10795_v36, %v2087_v40 }
 0x9c9   :  { %v11445_v42 = vpop.f32.mrf.mxu0 }
 0x9ca   :  { %v2092_v44 = vmax.f32 %v2088_v41, 0.0 }
 0x9cc   :  { %v2093_v45 = vpack.c.bf16 %v2092_v44, %v2091_v43 }
 0x9ce   :  { %11455 = vmatmul.mubr.msk.bf16.vlgmr.msra.gmra.mxu1 %vm2122_vm7, %v2093_v45 }
 0x9cf   :  { %11478 = vmatprep.mubr.msk.f32.mxu1 %vm13010_vm0, %v13009_v0 }
 0xa8e   :  { %v2160_v47 = vpop.f32.mrf.mxu1 }
 0xa8f   :  { %v2161_v48 = vadd.f32 %v10799_v46, %v2160_v47 }
 0xa90   :  { %v11456_v49 = vpop.f32.mrf.mxu1 }
 0xa91   :  { %v2167_v50 = vadd.f32 %v2161_v48, %v2014_v30 }
 0xa92   :  { %v2163_v29 = vpop.f32.mrf.mxu1 }
 0xa93   :  { %v2164_v51 = vadd.f32 %v10799_v46, %v2163_v29  ;;  %v2171_v27 = vsel %vm511_vm3, %v2167_v50, 0.0 }
 0xa94   :  { %2172 = vadd.xlane.f32.xlu0 %v2171_v27  ;;  %v11457_v52 = vpop.f32.mrf.mxu1 }
 0xa95   :  { %v2168_v53 = vadd.f32 %v2164_v51, %v2015_v31 }
 0xa97   :  { %v2174_v54 = vsel %vm511_vm3, %v2168_v53, 0.0 }
 0xa98   :  { %2175 = vadd.xlane.f32.xlu1 %v2174_v54 }
 0xb1d   :  { %v2173_v55 = vpop.xlane.xlu0 %2172 }
 0xb1e   :  { %v2177_v56 = vmul.f32 0.03125, %v2173_v55 }
 0xb20   :  { %v2179_v57 = vsub.f32 %v2167_v50, %v2177_v56 }
 0xb21   :  { %v2176_v58 = vpop.xlane.xlu1 %2175 }
 0xb22   :  { %v2178_v59 = vmul.f32 0.03125, %v2176_v58  ;;  %v2181_v60 = vmul.f32 %v2179_v57, %v2179_v57 }
 0xb24   :  { %v2180_v61 = vsub.f32 %v2168_v53, %v2178_v59  ;;  %v2183_v62 = vsel %vm511_vm3, %v2181_v60, 0.0 }
 0xb25   :  { %2184 = vadd.xlane.f32.xlu0 %v2183_v62 }
 0xb26   :  { %v2182_v63 = vmul.f32 %v2180_v61, %v2180_v61 }
 0xb28   :  { %v2186_v1 = vsel %vm511_vm3, %v2182_v63, 0.0 }
 0xb29   :  { %2187 = vadd.xlane.f32.xlu1 %v2186_v1 }
 0xbae   :  { %v2185_v4 = vpop.xlane.xlu0 %2184 }
 0xbaf   :  { %v2189_v5 = vmul.f32 0.03125, %v2185_v4 }
 0xbb1   :  { %v2191_v6 = vadd.f32 1e-05, %v2189_v5 }
 0xbb2   :  { %v2188_v7 = vpop.xlane.xlu1 %2187 }
 0xbb3   :  { %12277 = vrsqrt.f32 %v2191_v6  ;;  %v2190_v8 = vmul.f32 0.03125, %v2188_v7 }
 0xbb5   :  { %v2192_v9 = vadd.f32 1e-05, %v2190_v8 }
 0xbb7   :  { %12279 = vrsqrt.f32 %v2192_v9 }
 0xbc0   :  { %v12278_v10 = vpop.eup %12277 }
 0xbc1   :  { %v2195_v11 = vmul.f32 %v12278_v10, %v2179_v57 }
 0xbc3   :  { %v2201_v18 = vmul.f32 %v10805_v14, %v2195_v11 }
 0xbc4   :  { %v12280_v16 = vpop.eup %12279 }
 0xbc5   :  { %v2196_v17 = vmul.f32 %v12280_v16, %v2180_v61  ;;  %v13518_v21 = vadd.f32 %v10806_v19, %v2201_v18 }
 0xbc7   :  { %v2202_v20 = vmul.f32 %v10805_v14, %v2196_v17 }
 0xbc9   :  { %v13520_v22 = vadd.f32 %v10806_v19, %v2202_v20 }
 0xbcb   :  { %v2215_v23 = vpack.c.bf16 %v13520_v22, %v13518_v21 }
 0xbcd   :  { %11463 = vmatmul.mubr.msk.bf16.vlgmr.msra.gmra.mxu0 %vm511_vm3, %v2215_v23 }
 0xbce   :  { %11468 = vmatprep.mubr.msk.f32.mxu0 %vm13010_vm0, %v13009_v0 }
 0xc8d   :  { %v2269_v25 = vpop.f32.mrf.mxu0 }
 0xc8e   :  { %v13528_v26 = vadd.f32 %v10811_v24, %v2269_v25 }
 0xc8f   :  { %v11464_v28 = vpop.f32.mrf.mxu0 }
 0xc90   :  { %2285 = vrot.lane.b32.xlu1 %v13528_v26, %s13013_s23  ;;  %2283 = vrot.lane.b32.xlu0 %v13528_v26, %s13012_s22 }
 0xc91   :  { %v2272_v30 = vpop.f32.mrf.mxu0 }
 0xc92   :  { %v13534_v31 = vadd.f32 %v10811_v24, %v2272_v30 }
 0xc93   :  { %v11465_v32 = vpop.f32.mrf.mxu0 }
 0xc94   :  { %2287 = vrot.lane.b32.xlu1 %v13528_v26, %s13011_s18  ;;  %2290 = vrot.lane.b32.xlu0 %v13534_v31, %s13012_s22 }
 0xc98   :  { %2292 = vrot.lane.b32.xlu1 %v13534_v31, %s13013_s23  ;;  %2294 = vrot.lane.b32.xlu0 %v13534_v31, %s13011_s18 }
 0xc9c   :  { %2296 = vrot.lane.b32.xlu1 %v13528_v26, %s13014_s20 }
 0xd02   :  { %v13546_v33 = vpop.permute.xlu1 %2285  ;;  %v13548_v34 = vpop.permute.xlu0 %2283 }
 0xd03   :  { %2448 = vrot.lane.b32.xlu1 %v13546_v33, %s13014_s20  ;;  %2372 = vrot.lane.b32.xlu0 %v13548_v34, %s13014_s20 }
 0xd06   :  { %v13554_v35 = vpop.permute.xlu1 %2287  ;;  %v13560_v36 = vpop.permute.xlu0 %2290 }
 0xd07   :  { %2600 = vrot.lane.b32.xlu1 %v13534_v31, %s13014_s20  ;;  %2524 = vrot.lane.b32.xlu0 %v13554_v35, %s13014_s20 }
 0xd0a   :  { %v13562_v37 = vpop.permute.xlu1 %2292  ;;  %v13568_v38 = vpop.permute.xlu0 %2294 }
 0xd0b   :  { %2752 = vrot.lane.b32.xlu1 %v13562_v37, %s13014_s20  ;;  %2676 = vrot.lane.b32.xlu0 %v13560_v36, %s13014_s20 }
 0xd0e   :  { %v2297_v39 = vpop.permute.xlu1 %2296 }
 0xd0f   :  { %11467 = vmatpush3.xpose.msk.msra.mxu0 %vm577_vm4, %v2297_v39  ;;  %2828 = vrot.lane.b32.xlu0 %v13568_v38, %s13014_s20 }
 0xd10   :  { %11471 = vmatprep.subr.mxu0 %v13009_v0 }
 0xd12   :  { %11469 = vmatmul.mubr.msk.f32.vlgmr.msra.gmra.mxu0 %vm577_vm4, %v13528_v26 }
 0xd13   :  { %11473 = vmatprep.mubr.msk.f32.mxu0 %vm13010_vm0, %v13009_v0 }
 0xd75   :  { %v2449_v40 = vpop.permute.xlu1 %2448  ;;  %v2373_v41 = vpop.permute.xlu0 %2372 }
 0xd76   :  { %11472 = vmatpush3.xpose.msk.msra.mxu0 %vm577_vm4, %v2373_v41  ;;  %11477 = vmatpush3.xpose.msk.msra.mxu1 %vm577_vm4, %v2449_v40 }
 0xd77   :  { %11486 = vmatprep.subr.mxu1 %v13009_v0  ;;  %11481 = vmatprep.subr.mxu0 %v13009_v0 }
 0xd79   :  { %11479 = vmatmul.mubr.msk.f32.vlgmr.msra.gmra.mxu1 %vm577_vm4, %v13546_v33  ;;  %v2601_v42 = vpop.permute.xlu1 %2600  ;;  %11474 = vmatmul.mubr.msk.f32.vlgmr.msra.gmra.mxu0 %vm577_vm4, %v13548_v34  ;;  %v2525_v43 = vpop.permute.xlu0 %2524 }
 0xd7a   :  { %11482 = vmatpush3.xpose.msk.msra.mxu0 %vm577_vm4, %v2525_v43  ;;  %11487 = vmatpush3.xpose.msk.msra.mxu1 %vm577_vm4, %v2601_v42 }
 0xd7b   :  { %11483 = vmatprep.mubr.msk.f32.mxu0 %vm13010_vm0, %v13009_v0  ;;  %11488 = vmatprep.mubr.msk.f32.mxu1 %vm13010_vm0, %v13009_v0 }
 0xd7c   :  { %11496 = vmatprep.subr.mxu1 %v13009_v0  ;;  %11491 = vmatprep.subr.mxu0 %v13009_v0 }
 0xd7d   :  { %11489 = vmatmul.mubr.msk.f32.vlgmr.msra.gmra.mxu1 %vm577_vm4, %v13534_v31  ;;  %v2753_v44 = vpop.permute.xlu1 %2752  ;;  %11484 = vmatmul.mubr.msk.f32.vlgmr.msra.gmra.mxu0 %vm577_vm4, %v13554_v35  ;;  %v2677_v45 = vpop.permute.xlu0 %2676 }
 0xd7e   :  { %11492 = vmatpush3.xpose.msk.msra.mxu0 %vm577_vm4, %v2677_v45  ;;  %11497 = vmatpush3.xpose.msk.msra.mxu1 %vm577_vm4, %v2753_v44 }
 0xd7f   :  { %11493 = vmatprep.mubr.msk.f32.mxu0 %vm13010_vm0, %v13009_v0  ;;  %11498 = vmatprep.mubr.msk.f32.mxu1 %vm13010_vm0, %v13009_v0 }
 0xd80   :  { %11501 = vmatprep.subr.mxu0 %v13009_v0  ;;  %11506 = vmatprep.subr.mxu1 %v13009_v0 }
 0xd81   :  { %11494 = vmatmul.mubr.msk.f32.vlgmr.msra.gmra.mxu0 %vm577_vm4, %v13560_v36  ;;  %11499 = vmatmul.mubr.msk.f32.vlgmr.msra.gmra.mxu1 %vm577_vm4, %v13562_v37  ;;  %v2829_v46 = vpop.permute.xlu0 %2828 }
 0xd82   :  { %11502 = vmatpush3.xpose.msk.msra.mxu0 %vm577_vm4, %v2829_v46  ;;  %11503 = vmatprep.mubr.msk.f32.mxu0 %vm13010_vm0, %v13009_v0 }
 0xd83   :  { %11511 = vmatprep.subr.mxu0 %v13009_v0  ;;  %11508 = vmatprep.mubr.msk.f32.mxu1 %vm13010_vm0, %v13009_v0 }
 0xd85   :  { %11504 = vmatmul.mubr.msk.f32.vlgmr.msra.gmra.mxu0 %vm577_vm4, %v13568_v38 }
 0xd86   :  { %11513 = vmatprep.mubr.msk.f32.mxu0 %vm13010_vm0, %v13009_v0 }
 0xdd2   :  { %v2368_v47 = vpop.f32.mrf.mxu0 }
 0xdd3   :  { %v2904_v48 = vsel %vm577_vm4, %v2368_v47, -inf }
 0xdd4   :  { %2905 = vmax.xlane.f32.xlu1 %v2904_v48  ;;  %v11470_v49 = vpop.f32.mrf.mxu0 }
 0xe39   :  { %v2444_v50 = vpop.f32.mrf.mxu0  ;;  %v2520_v29 = vpop.f32.mrf.mxu1 }
 0xe3a   :  { %v2907_v51 = vsel %vm577_vm4, %v2444_v50, -inf  ;;  %v2910_v55 = vsel %vm577_vm4, %v2520_v29, -inf }
 0xe3b   :  { %v11480_v27 = vpop.f32.mrf.mxu1  ;;  %2908 = vmax.xlane.f32.xlu0 %v2907_v51  ;;  %v11475_v52 = vpop.f32.mrf.mxu0 }
 0xe3d   :  { %v2596_v53 = vpop.f32.mrf.mxu0  ;;  %v2672_v54 = vpop.f32.mrf.mxu1 }
 0xe3e   :  { %v2913_v56 = vsel %vm577_vm4, %v2596_v53, -inf  ;;  %v2916_v61 = vsel %vm577_vm4, %v2672_v54, -inf }
 0xe3f   :  { %v11490_v57 = vpop.f32.mrf.mxu1  ;;  %2911 = vmax.xlane.f32.xlu0 %v2910_v55  ;;  %2914 = vmax.xlane.f32.xlu1 %v2913_v56  ;;  %v11485_v58 = vpop.f32.mrf.mxu0 }
 0xe41   :  { %v2748_v59 = vpop.f32.mrf.mxu0  ;;  %v2824_v60 = vpop.f32.mrf.mxu1 }
 0xe42   :  { %v2919_v62 = vsel %vm577_vm4, %v2748_v59, -inf  ;;  %v2922_v3 = vsel %vm577_vm4, %v2824_v60, -inf }
 0xe43   :  { %v11500_v63 = vpop.f32.mrf.mxu1  ;;  %2917 = vmax.xlane.f32.xlu0 %v2916_v61  ;;  %2920 = vmax.xlane.f32.xlu1 %v2919_v62  ;;  %v11495_v1 = vpop.f32.mrf.mxu0 }
 0xe45   :  { %v2900_v2 = vpop.f32.mrf.mxu0 }
 0xe46   :  { %v2925_v4 = vsel %vm577_vm4, %v2900_v2, -inf }
 0xe47   :  { %2923 = vmax.xlane.f32.xlu0 %v2922_v3  ;;  %2926 = vmax.xlane.f32.xlu1 %v2925_v4  ;;  %v11505_v5 = vpop.f32.mrf.mxu0 }
 0xe58   :  { %3068 = vrot.lane.b32.xlu1 %v13548_v34, %s12999_s29 }
 0xe5c   :  { %3144 = vrot.lane.b32.xlu1 %v13546_v33, %s12999_s29 }
 0xe5d   :  { %2992 = vrot.lane.b32.xlu0 %v13528_v26, %s12999_s29  ;;  %v2906_v6 = vpop.xlane.xlu1 %2905 }
 0xe5e   :  { %v2928_v7 = vsub.f32 %v2368_v47, %v2906_v6 }
 0xe60   :  { %3296 = vrot.lane.b32.xlu1 %v13534_v31, %s12999_s29  ;;  %v2936_v8 = vmul.f32 1.442695, %v2928_v7 }
 0xe61   :  { %3220 = vrot.lane.b32.xlu0 %v13554_v35, %s12999_s29 }
 0xe62   :  { %12281 = vpow2.f32 %v2936_v8 }
 0xe65   :  { %3372 = vrot.lane.b32.xlu0 %v13560_v36, %s12999_s29 }
 0xe6f   :  { %v13640_v9 = vpop.eup %12281 }
 0xe70   :  { %v2952_v10 = vsel %vm577_vm4, %v13640_v9, 0.0 }
 0xe84   :  { %2953 = vadd.xlane.f32.xlu0 %v2952_v10 }
 0xec4   :  { %v2909_v11 = vpop.xlane.xlu0 %2908 }
 0xec5   :  { %v2929_v14 = vsub.f32 %v2444_v50, %v2909_v11 }
 0xec7   :  { %v2938_v16 = vmul.f32 1.442695, %v2929_v14 }
 0xec8   :  { %v2912_v17 = vpop.xlane.xlu0 %2911  ;;  %v2915_v18 = vpop.xlane.xlu1 %2914 }
 0xec9   :  { %12283 = vpow2.f32 %v2938_v16  ;;  %v2930_v19 = vsub.f32 %v2520_v29, %v2912_v17  ;;  %v2931_v20 = vsub.f32 %v2596_v53, %v2915_v18 }
 0xecb   :  { %v2940_v23 = vmul.f32 1.442695, %v2930_v19  ;;  %v2942_v24 = vmul.f32 1.442695, %v2931_v20 }
 0xecc   :  { %v2918_v25 = vpop.xlane.xlu0 %2917  ;;  %v2921_v26 = vpop.xlane.xlu1 %2920 }
 0xecd   :  { %12285 = vpow2.f32 %v2940_v23  ;;  %v2932_v28 = vsub.f32 %v2672_v54, %v2918_v25  ;;  %v2933_v30 = vsub.f32 %v2748_v59, %v2921_v26 }
 0xece   :  { %12287 = vpow2.f32 %v2942_v24 }
 0xecf   :  { %v2944_v31 = vmul.f32 1.442695, %v2932_v28  ;;  %v2946_v32 = vmul.f32 1.442695, %v2933_v30  ;;  %v12199_v30 = vld [vmem:[%s14651_s26 + $0x18] sm:$0xff]  }
 0xed0   :  { %v2924_v33 = vpop.xlane.xlu0 %2923  ;;  %v2927_v34 = vpop.xlane.xlu1 %2926 }
 0xed1   :  { %12289 = vpow2.f32 %v2944_v31  ;;  %v2934_v35 = vsub.f32 %v2824_v60, %v2924_v33  ;;  %v2935_v36 = vsub.f32 %v2900_v2, %v2927_v34  ;;  %v12200_v34 = vld [vmem:[%s14651_s26 + $0x10] sm:$0xff]  }
 0xed2   :  { %12291 = vpow2.f32 %v2946_v32 }
 0xed3   :  { %v2948_v39 = vmul.f32 1.442695, %v2934_v35  ;;  %v2950_v40 = vmul.f32 1.442695, %v2935_v36 }
 0xed4   :  { %v2993_v41 = vpop.permute.xlu0 %2992  ;;  %v3069_v42 = vpop.permute.xlu1 %3068 }
 0xed5   :  { %12293 = vpow2.f32 %v2948_v39  ;;  %11507 = vmatpush3.msra.mxu1 %v2993_v41  ;;  %11512 = vmatpush3.msra.mxu0 %v3069_v42 }
 0xed6   :  { %v12284_v43 = vpop.eup %12283  ;;  %12295 = vpow2.f32 %v2950_v40  ;;  %11516 = vmatprep.subr.mxu1 %v13009_v0  ;;  %11521 = vmatprep.subr.mxu0 %v13009_v0 }
 0xed7   :  { %v2955_v44 = vsel %vm577_vm4, %v12284_v43, 0.0 }
 0xed8   :  { %2956 = vadd.xlane.f32.xlu1 %v2955_v44  ;;  %v3221_v55 = vpop.permute.xlu0 %3220  ;;  %v3145_v60 = vpop.permute.xlu1 %3144 }
 0xeda   :  { %v12286_v45 = vpop.eup %12285 }
 0xedb   :  { %v12288_v46 = vpop.eup %12287  ;;  %v2958_v47 = vsel %vm577_vm4, %v12286_v45, 0.0 }
 0xedc   :  { %2959 = vadd.xlane.f32.xlu0 %v2958_v47  ;;  %v2961_v48 = vsel %vm577_vm4, %v12288_v46, 0.0  ;;  %v3373_v56 = vpop.permute.xlu0 %3372 }
 0xedd   :  { %2962 = vadd.xlane.f32.xlu1 %v2961_v48 }
 0xede   :  { %v12290_v49 = vpop.eup %12289 }
 0xedf   :  { %v12292_v50 = vpop.eup %12291  ;;  %v2964_v29 = vsel %vm577_vm4, %v12290_v49, 0.0 }
 0xee0   :  { %2965 = vadd.xlane.f32.xlu0 %v2964_v29  ;;  %v2967_v51 = vsel %vm577_vm4, %v12292_v50, 0.0 }
 0xee1   :  { %2968 = vadd.xlane.f32.xlu1 %v2967_v51 }
 0xee2   :  { %v13651_v27 = vpop.eup %12293 }
 0xee3   :  { %v13653_v52 = vpop.eup %12295  ;;  %v2970_v53 = vsel %vm577_vm4, %v13651_v27, 0.0 }
 0xee4   :  { %2971 = vadd.xlane.f32.xlu0 %v2970_v53  ;;  %v2973_v54 = vsel %vm577_vm4, %v13653_v52, 0.0 }
 0xee5   :  { %2974 = vadd.xlane.f32.xlu1 %v2973_v54 }
 0xef6   :  { %3448 = vrot.lane.b32.xlu1 %v13562_v37, %s12999_s29  ;;  %v3297_v37 = vpop.permute.xlu1 %3296 }
 0xefa   :  { %3524 = vrot.lane.b32.xlu0 %v13568_v38, %s12999_s29 }
 0xf0d   :  { %v2954_v57 = vpop.xlane.xlu0 %2953 }
 0xf0e   :  { %12297 = vrcp.f32 %v2954_v57 }
 0xf1b   :  { %v12298_v58 = vpop.eup %12297 }
 0xf1c   :  { %v2984_v59 = vmul.f32 %v12298_v58, %v13640_v9 }
 0xf1e   :  { %11509 = vmatmul.mubr.msk.f32.vlgmr.msra.gmra.mxu1 %vm577_vm4, %v2984_v59 }
 0xf1f   :  { %11517 = vmatpush3.msra.mxu1 %v3145_v60  ;;  %11518 = vmatprep.mubr.msk.f32.mxu1 %vm13010_vm0, %v13009_v0 }
 0xf20   :  { %11526 = vmatprep.subr.mxu1 %v13009_v0 }
 0xf61   :  { %v2957_v61 = vpop.xlane.xlu1 %2956 }
 0xf62   :  { %12299 = vrcp.f32 %v2957_v61 }
 0xf65   :  { %v2960_v38 = vpop.xlane.xlu0 %2959 }
 0xf66   :  { %12301 = vrcp.f32 %v2960_v38  ;;  %v2963_v62 = vpop.xlane.xlu1 %2962 }
 0xf67   :  { %12303 = vrcp.f32 %v2963_v62  ;;  %v10843_v62 = vld [vmem:[#allocation2 + $0x1] ss:$0 sm:$0xff] }
 0xf69   :  { %v2966_v63 = vpop.xlane.xlu0 %2965 }
 0xf6a   :  { %12305 = vrcp.f32 %v2966_v63  ;;  %v2969_v1 = vpop.xlane.xlu1 %2968 }
 0xf6b   :  { %12307 = vrcp.f32 %v2969_v1 }
 0xf6d   :  { %v2972_v2 = vpop.xlane.xlu0 %2971 }
 0xf6e   :  { %12309 = vrcp.f32 %v2972_v2  ;;  %v2975_v3 = vpop.xlane.xlu1 %2974 }
 0xf6f   :  { %v12300_v4 = vpop.eup %12299  ;;  %12311 = vrcp.f32 %v2975_v3 }
 0xf70   :  { %v2985_v5 = vmul.f32 %v12300_v4, %v12284_v43 }
 0xf71   :  { %v3525_v19 = vpop.permute.xlu0 %3524 }
 0xf72   :  { %11514 = vmatmul.mubr.msk.f32.vlgmr.msra.gmra.mxu0 %vm577_vm4, %v2985_v5  ;;  %v3449_v17 = vpop.permute.xlu1 %3448 }
 0xf73   :  { %v12302_v6 = vpop.eup %12301  ;;  %11522 = vmatpush3.msra.mxu0 %v3221_v55  ;;  %11523 = vmatprep.mubr.msk.f32.mxu0 %vm13010_vm0, %v13009_v0 }
 0xf74   :  { %v12304_v7 = vpop.eup %12303  ;;  %11531 = vmatprep.subr.mxu0 %v13009_v0  ;;  %v2986_v8 = vmul.f32 %v12302_v6, %v12286_v45 }
 0xf75   :  { %v2987_v9 = vmul.f32 %v12304_v7, %v12288_v46 }
 0xf76   :  { %11519 = vmatmul.mubr.msk.f32.vlgmr.msra.gmra.mxu1 %vm577_vm4, %v2986_v8 }
 0xf77   :  { %v12306_v10 = vpop.eup %12305  ;;  %11524 = vmatmul.mubr.msk.f32.vlgmr.msra.gmra.mxu0 %vm577_vm4, %v2987_v9  ;;  %11527 = vmatpush3.msra.mxu1 %v3297_v37 }
 0xf78   :  { %v12308_v11 = vpop.eup %12307  ;;  %11532 = vmatpush3.msra.mxu0 %v3373_v56  ;;  %11528 = vmatprep.mubr.msk.f32.mxu1 %vm13010_vm0, %v13009_v0  ;;  %v2988_v14 = vmul.f32 %v12306_v10, %v12290_v49 }
 0xf79   :  { %11533 = vmatprep.mubr.msk.f32.mxu0 %vm13010_vm0, %v13009_v0  ;;  %11536 = vmatprep.subr.mxu1 %v13009_v0  ;;  %v2989_v16 = vmul.f32 %v12308_v11, %v12292_v50 }
 0xf7a   :  { %11541 = vmatprep.subr.mxu0 %v13009_v0  ;;  %11529 = vmatmul.mubr.msk.f32.vlgmr.msra.gmra.mxu1 %vm577_vm4, %v2988_v14 }
 0xf7b   :  { %v12310_v18 = vpop.eup %12309  ;;  %11534 = vmatmul.mubr.msk.f32.vlgmr.msra.gmra.mxu0 %vm577_vm4, %v2989_v16  ;;  %11537 = vmatpush3.msra.mxu1 %v3449_v17 }
 0xf7c   :  { %v12312_v20 = vpop.eup %12311  ;;  %11542 = vmatpush3.msra.mxu0 %v3525_v19  ;;  %11538 = vmatprep.mubr.msk.f32.mxu1 %vm13010_vm0, %v13009_v0  ;;  %v2990_v23 = vmul.f32 %v12310_v18, %v13651_v27 }
 0xf7d   :  { %11543 = vmatprep.mubr.msk.f32.mxu0 %vm13010_vm0, %v13009_v0  ;;  %v2991_v24 = vmul.f32 %v12312_v20, %v13653_v52  ;;  %11546 = vmatprep.subr.bf16.mxu1 %v13009_v0 }
 0xf7e   :  { %11539 = vmatmul.mubr.msk.f32.vlgmr.msra.gmra.mxu1 %vm577_vm4, %v2990_v23  ;;  %11554 = vmatprep.subr.bf16.mxu0 %v13009_v0 }
 0xf7f   :  { %11544 = vmatmul.mubr.msk.f32.vlgmr.msra.gmra.mxu0 %vm577_vm4, %v2991_v24  ;;  %11550 = vmatprep.mubr.msk.bf16.mxu1 %vm13010_vm0, %v13009_v0  ;;  %v12202_v24 = vld [vmem:[%s14652_s19 + $0x10] sm:$0xff]  }
 0xf80   :  { %11558 = vmatprep.mubr.msk.bf16.mxu0 %vm13010_vm0, %v13009_v0  ;;  %11547 = vmatpush3.bf16.msra.mxu1 %v12199_v30 }
 0xf81   :  { %11548 = vmatprep.subr.bf16.mxu1 %v13009_v0 }
 0xf84   :  { %11549 = vmatpush3.bf16.msra.mxu1 %v12200_v34 }
 0xf85   :  { %11562 = vmatprep.subr.bf16.mxu1 %v13009_v0 }
 0xfde   :  { %v3064_v25 = vpop.f32.mrf.mxu1 }
 0xfe0   :  { %v11510_v26 = vpop.f32.mrf.mxu1 }
0x1032   :  { %v3140_v28 = vpop.f32.mrf.mxu0 }
0x1034   :  { %v11515_v31 = vpop.f32.mrf.mxu0 }
0x1036   :  { %v3216_v32 = vpop.f32.mrf.mxu1 }
0x1037   :  { %v3292_v33 = vpop.f32.mrf.mxu0 }
0x1038   :  { %v11520_v35 = vpop.f32.mrf.mxu1 }
0x1039   :  { %v11525_v36 = vpop.f32.mrf.mxu0 }
0x103a   :  { %v3368_v39 = vpop.f32.mrf.mxu1  ;;  %v10847_v36 = vld [vmem:[%s14654_s1 + $0x1] ss:$0 sm:$0xff] }
0x103b   :  { %v3444_v40 = vpop.f32.mrf.mxu0 }
0x103c   :  { %v12111_v41 = vpack.i.bf16 %v3444_v40, %v3140_v28  ;;  %v11530_v42 = vpop.f32.mrf.mxu1 }
0x103d   :  { %v11535_v43 = vpop.f32.mrf.mxu0  ;;  %v10848_v42 = vld [vmem:[%s14655_s2 + $0x1] ss:$0 sm:$0xff] }
0x103e   :  { %12112 = vrot.lane.b32.xlu1 %v12111_v41, %s13016_s28  ;;  %v3520_v44 = vpop.f32.mrf.mxu1 }
0x103f   :  { %v12116_v45 = vpack.i.bf16 %v3520_v44, %v3216_v32  ;;  %v3596_v46 = vpop.f32.mrf.mxu0 }
0x1040   :  { %v12121_v47 = vpack.i.bf16 %v3596_v46, %v3292_v33  ;;  %v11540_v48 = vpop.f32.mrf.mxu1  ;;  %v12203_v46 = vld [vmem:[%s14659_s10 + $0x8] sm:$0xff]  }
0x1041   :  { %v11545_v49 = vpop.f32.mrf.mxu0  ;;  %12117 = vrot.lane.b32.xlu0 %v12116_v45, %s13015_s21  ;;  %v12204_v48 = vld [vmem:[%s14659_s10] sm:$0xff]  }
0x1042   :  { %12122 = vrot.lane.b32.xlu1 %v12121_v47, %s13017_s17  ;;  %v12206_v49 = vld [vmem:[%s14653_s27 + $0x30] sm:$0xff]  }
0x10b0   :  { %v12113_v50 = vpop.permute.xlu1 %12112 }
0x10b1   :  { %v12115_v29 = vunpack.i.h.bf16 %v12113_v50  ;;  %v12114_v51 = vunpack.i.l.bf16 %v12113_v50  ;;  %v12207_v50 = vld [vmem:[%s14653_s27 + $0x28] sm:$0xff]  }
0x10b3   :  { %v12118_v27 = vpop.permute.xlu0 %12117  ;;  %v3627_v55 = vsel %vm577_vm4, %v3368_v39, %v12115_v29  ;;  %v3612_v56 = vsel %vm577_vm4, %v3064_v25, %v12114_v51  ;;  %v12205_v25 = vld [vmem:[%s14653_s27 + $0x38] sm:$0xff]   ;;  %v12208_v29 = vld [vmem:[%s14653_s27 + $0x20] sm:$0xff]  }
0x10b4   :  { %v12120_v52 = vunpack.i.h.bf16 %v12118_v27  ;;  %v12119_v53 = vunpack.i.l.bf16 %v12118_v27  ;;  %v12123_v54 = vpop.permute.xlu1 %12122  ;;  %v10861_v51 = vld [vmem:[#allocation5 + $0x1] ss:$0 sm:$0xff] }
0x10b5   :  { %v12125_v57 = vunpack.i.h.bf16 %v12123_v54  ;;  %v12124_v58 = vunpack.i.l.bf16 %v12123_v54 }
0x10b6   :  { %v3613_v59 = vsel %vm1893_vm5, %v3612_v56, %v12119_v53  ;;  %v3628_v60 = vsel %vm1893_vm5, %v3627_v55, %v12120_v52  ;;  %v10875_v56 = vld [vmem:[#allocation7] ss:$0 sm:$0xff] }
0x10b7   :  { %v3629_v37 = vsel %vm1895_vm6, %v3628_v60, %v12125_v57  ;;  %v3614_v61 = vsel %vm1895_vm6, %v3613_v59, %v12124_v58 }
0x10b8   :  { %v3630_v38 = vpack.c.bf16 %v3629_v37, %v3614_v61 }
0x10ba   :  { %11551 = vmatmul.mubr.msk.bf16.vlgmr.msra.gmra.mxu1 %vm511_vm3, %v3630_v38 }
0x10bb   :  { %11570 = vmatprep.mubr.msk.bf16.mxu1 %vm13010_vm0, %v13009_v0  ;;  %11563 = vmatpush3.bf16.msra.mxu1 %v12205_v25 }
0x10bc   :  { %11564 = vmatprep.subr.bf16.mxu1 %v13009_v0 }
0x10bf   :  { %11565 = vmatpush3.bf16.msra.mxu1 %v12206_v49 }
0x10c0   :  { %11566 = vmatprep.subr.bf16.mxu1 %v13009_v0 }
0x10c3   :  { %11567 = vmatpush3.bf16.msra.mxu1 %v12207_v50 }
0x10c4   :  { %11568 = vmatprep.subr.bf16.mxu1 %v13009_v0 }
0x10c7   :  { %11569 = vmatpush3.bf16.msra.mxu1 %v12208_v29 }
0x10c8   :  { %11592 = vmatprep.subr.mxu1 %v13009_v0 }
0x117a   :  { %v3684_v63 = vpop.f32.mrf.mxu1 }
0x117b   :  { %v3685_v1 = vadd.f32 %v10843_v62, %v3684_v63 }
0x117c   :  { %v11552_v2 = vpop.f32.mrf.mxu1 }
0x117d   :  { %v3691_v3 = vadd.f32 %v3685_v1, %v13518_v21 }
0x117e   :  { %v3687_v4 = vpop.f32.mrf.mxu1 }
0x117f   :  { %v3688_v5 = vadd.f32 %v10843_v62, %v3687_v4  ;;  %v3695_v6 = vsel %vm511_vm3, %v3691_v3, 0.0 }
0x1180   :  { %3696 = vadd.xlane.f32.xlu0 %v3695_v6  ;;  %v11553_v7 = vpop.f32.mrf.mxu1 }
0x1181   :  { %v3692_v8 = vadd.f32 %v3688_v5, %v13520_v22  ;;  %v12201_v22 = vld [vmem:[%s14652_s19 + $0x18] sm:$0xff]  }
0x1182   :  { %11555 = vmatpush3.bf16.msra.mxu0 %v12201_v22 }
0x1183   :  { %v3698_v9 = vsel %vm511_vm3, %v3692_v8, 0.0  ;;  %11556 = vmatprep.subr.bf16.mxu0 %v13009_v0 }
0x1184   :  { %3699 = vadd.xlane.f32.xlu1 %v3698_v9 }
0x1186   :  { %11557 = vmatpush3.bf16.msra.mxu0 %v12202_v24 }
0x1187   :  { %11574 = vmatprep.subr.bf16.mxu0 %v13009_v0 }
0x1209   :  { %v3697_v10 = vpop.xlane.xlu0 %3696 }
0x120a   :  { %v3701_v11 = vmul.f32 0.03125, %v3697_v10 }
0x120c   :  { %v3703_v14 = vsub.f32 %v3691_v3, %v3701_v11 }
0x120d   :  { %v3700_v16 = vpop.xlane.xlu1 %3699 }
0x120e   :  { %v3702_v17 = vmul.f32 0.03125, %v3700_v16  ;;  %v3705_v21 = vmul.f32 %v3703_v14, %v3703_v14 }
0x1210   :  { %v3704_v18 = vsub.f32 %v3692_v8, %v3702_v17  ;;  %v3707_v19 = vsel %vm511_vm3, %v3705_v21, 0.0 }
0x1211   :  { %3708 = vadd.xlane.f32.xlu0 %v3707_v19 }
0x1212   :  { %v3706_v20 = vmul.f32 %v3704_v18, %v3704_v18 }
0x1214   :  { %v3710_v23 = vsel %vm511_vm3, %v3706_v20, 0.0 }
0x1215   :  { %3711 = vadd.xlane.f32.xlu0 %v3710_v23 }
0x129a   :  { %v3709_v26 = vpop.xlane.xlu0 %3708 }
0x129b   :  { %v3713_v28 = vmul.f32 0.03125, %v3709_v26 }
0x129d   :  { %v3715_v30 = vadd.f32 1e-05, %v3713_v28 }
0x129e   :  { %v3712_v31 = vpop.xlane.xlu0 %3711 }
0x129f   :  { %12313 = vrsqrt.f32 %v3715_v30  ;;  %v3714_v32 = vmul.f32 0.03125, %v3712_v31 }
0x12a1   :  { %v3716_v33 = vadd.f32 1e-05, %v3714_v32 }
0x12a3   :  { %12315 = vrsqrt.f32 %v3716_v33 }
0x12ac   :  { %v12314_v34 = vpop.eup %12313 }
0x12ad   :  { %v3719_v35 = vmul.f32 %v12314_v34, %v3703_v14 }
0x12af   :  { %v3725_v41 = vmul.f32 %v10847_v36, %v3719_v35 }
0x12b0   :  { %v12316_v39 = vpop.eup %12315 }
0x12b1   :  { %v3720_v40 = vmul.f32 %v12316_v39, %v3704_v18  ;;  %v13726_v44 = vadd.f32 %v10848_v42, %v3725_v41 }
0x12b3   :  { %v3726_v43 = vmul.f32 %v10847_v36, %v3720_v40 }
0x12b5   :  { %v13728_v45 = vadd.f32 %v10848_v42, %v3726_v43 }
0x12b7   :  { %v3749_v47 = vpack.c.bf16 %v13728_v45, %v13726_v44 }
0x12b9   :  { %11559 = vmatmul.mubr.msk.bf16.vlgmr.msra.gmra.mxu0 %vm511_vm3, %v3749_v47 }
0x12ba   :  { %11575 = vmatpush3.bf16.msra.mxu0 %v12203_v46  ;;  %11578 = vmatprep.mubr.msk.bf16.mxu0 %vm13010_vm0, %v13009_v0 }
0x12bb   :  { %11576 = vmatprep.subr.bf16.mxu0 %v13009_v0 }
0x12be   :  { %11577 = vmatpush3.bf16.msra.mxu0 %v12204_v48 }
0x12bf   :  { %11582 = vmatprep.subr.mxu0 %v13009_v0 }
0x12c1   :  { %11579 = vmatmul.mubr.msk.bf16.vlgmr.msra.gmra.mxu0 %vm511_vm3, %v13290_v15 }
0x12c2   :  { %11584 = vmatprep.mubr.msk.f32.mxu0 %vm13010_vm0, %v13009_v0 }
0x1379   :  { %v3803_v27 = vpop.f32.mrf.mxu0 }
0x137a   :  { %v3804_v53 = vadd.f32 %v10861_v51, %v3803_v27 }
0x137b   :  { %v11560_v52 = vpop.f32.mrf.mxu0 }
0x137c   :  { %v3810_v57 = vmax.f32 %v3804_v53, 0.0 }
0x137d   :  { %v3806_v15 = vpop.f32.mrf.mxu0 }
0x137e   :  { %v3807_v54 = vadd.f32 %v10861_v51, %v3806_v15 }
0x137f   :  { %v11561_v55 = vpop.f32.mrf.mxu0 }
0x1380   :  { %v3811_v58 = vmax.f32 %v3807_v54, 0.0 }
0x1381   :  { %v4026_v59 = vpop.f32.mrf.mxu0 }
0x1382   :  { %v3812_v60 = vpack.c.bf16 %v3811_v58, %v3810_v57  ;;  %v13749_v37 = vadd.f32 %v10875_v56, %v4026_v59 }
0x1383   :  { %v11580_v61 = vpop.f32.mrf.mxu0 }
0x1384   :  { %11571 = vmatmul.mubr.msk.bf16.vlgmr.msra.gmra.mxu1 %vm2122_vm7, %v3812_v60  ;;  %4041 = vrot.lane.b32.xlu0 %v13749_v37, %s13013_s23 }
0x1385   :  { %4039 = vrot.lane.b32.xlu1 %v13749_v37, %s13012_s22  ;;  %v4029_v38 = vpop.f32.mrf.mxu0  ;;  %11594 = vmatprep.mubr.msk.f32.mxu1 %vm13010_vm0, %v13009_v0 }
0x1386   :  { %v13758_v62 = vadd.f32 %v10875_v56, %v4029_v38 }
0x1387   :  { %v11581_v63 = vpop.f32.mrf.mxu0 }
0x1388   :  { %4048 = vrot.lane.b32.xlu0 %v13758_v62, %s13013_s23 }
0x1389   :  { %4043 = vrot.lane.b32.xlu1 %v13749_v37, %s13011_s18 }
0x138c   :  { %4052 = vrot.lane.b32.xlu0 %v13749_v37, %s13014_s20 }
0x138d   :  { %4046 = vrot.lane.b32.xlu1 %v13758_v62, %s13012_s22 }
0x1391   :  { %4050 = vrot.lane.b32.xlu1 %v13758_v62, %s13011_s18 }
0x13f6   :  { %v13770_v1 = vpop.permute.xlu0 %4041 }
0x13f7   :  { %v13772_v2 = vpop.permute.xlu1 %4039  ;;  %4204 = vrot.lane.b32.xlu0 %v13770_v1, %s13014_s20 }
0x13f8   :  { %4128 = vrot.lane.b32.xlu1 %v13772_v2, %s13014_s20 }
0x13fa   :  { %v13778_v3 = vpop.permute.xlu0 %4048 }
0x13fb   :  { %v13780_v4 = vpop.permute.xlu1 %4043  ;;  %4356 = vrot.lane.b32.xlu0 %v13758_v62, %s13014_s20 }
0x13fc   :  { %4280 = vrot.lane.b32.xlu1 %v13780_v4, %s13014_s20 }
0x13fe   :  { %v4053_v5 = vpop.permute.xlu0 %4052 }
0x13ff   :  { %v13786_v6 = vpop.permute.xlu1 %4046  ;;  %4508 = vrot.lane.b32.xlu0 %v13778_v3, %s13014_s20  ;;  %11583 = vmatpush3.xpose.msk.msra.mxu0 %vm577_vm4, %v4053_v5 }
0x1400   :  { %4432 = vrot.lane.b32.xlu1 %v13786_v6, %s13014_s20  ;;  %11587 = vmatprep.subr.mxu0 %v13009_v0 }
0x1402   :  { %11585 = vmatmul.mubr.msk.f32.vlgmr.msra.gmra.mxu0 %vm577_vm4, %v13749_v37 }
0x1403   :  { %v13796_v7 = vpop.permute.xlu1 %4050  ;;  %11589 = vmatprep.mubr.msk.f32.mxu0 %vm13010_vm0, %v13009_v0 }
0x1404   :  { %4584 = vrot.lane.b32.xlu1 %v13796_v7, %s13014_s20 }
0x1444   :  { %v13802_v8 = vpop.f32.mrf.mxu1 }
0x1446   :  { %v11572_v9 = vpop.f32.mrf.mxu1 }
0x1448   :  { %v13804_v10 = vpop.f32.mrf.mxu1 }
0x144a   :  { %v11573_v11 = vpop.f32.mrf.mxu1 }
0x1469   :  { %v4205_v14 = vpop.permute.xlu0 %4204 }
0x146a   :  { %v4129_v16 = vpop.permute.xlu1 %4128  ;;  %11593 = vmatpush3.xpose.msk.msra.mxu1 %vm577_vm4, %v4205_v14 }
0x146b   :  { %11588 = vmatpush3.xpose.msk.msra.mxu0 %vm577_vm4, %v4129_v16  ;;  %11602 = vmatprep.subr.mxu1 %v13009_v0 }
0x146c   :  { %11597 = vmatprep.subr.mxu0 %v13009_v0 }
0x146d   :  { %11595 = vmatmul.mubr.msk.f32.vlgmr.msra.gmra.mxu1 %vm577_vm4, %v13770_v1  ;;  %v4357_v17 = vpop.permute.xlu0 %4356 }
0x146e   :  { %11590 = vmatmul.mubr.msk.f32.vlgmr.msra.gmra.mxu0 %vm577_vm4, %v13772_v2  ;;  %v4281_v21 = vpop.permute.xlu1 %4280  ;;  %11603 = vmatpush3.xpose.msk.msra.mxu1 %vm577_vm4, %v4357_v17 }
0x146f   :  { %11598 = vmatpush3.xpose.msk.msra.mxu0 %vm577_vm4, %v4281_v21  ;;  %11599 = vmatprep.mubr.msk.f32.mxu0 %vm13010_vm0, %v13009_v0 }
0x1470   :  { %11604 = vmatprep.mubr.msk.f32.mxu1 %vm13010_vm0, %v13009_v0  ;;  %11612 = vmatprep.subr.mxu1 %v13009_v0 }
0x1471   :  { %11605 = vmatmul.mubr.msk.f32.vlgmr.msra.gmra.mxu1 %vm577_vm4, %v13758_v62  ;;  %v4509_v18 = vpop.permute.xlu0 %4508  ;;  %11607 = vmatprep.subr.mxu0 %v13009_v0 }
0x1472   :  { %11600 = vmatmul.mubr.msk.f32.vlgmr.msra.gmra.mxu0 %vm577_vm4, %v13780_v4  ;;  %v4433_v19 = vpop.permute.xlu1 %4432  ;;  %11613 = vmatpush3.xpose.msk.msra.mxu1 %vm577_vm4, %v4509_v18 }
0x1473   :  { %11608 = vmatpush3.xpose.msk.msra.mxu0 %vm577_vm4, %v4433_v19  ;;  %11609 = vmatprep.mubr.msk.f32.mxu0 %vm13010_vm0, %v13009_v0 }
0x1474   :  { %11614 = vmatprep.mubr.msk.f32.mxu1 %vm13010_vm0, %v13009_v0  ;;  %11617 = vmatprep.subr.mxu0 %v13009_v0 }
0x1475   :  { %11615 = vmatmul.mubr.msk.f32.vlgmr.msra.gmra.mxu1 %vm577_vm4, %v13778_v3  ;;  %11622 = vmatprep.subr.mxu1 %v13009_v0 }
0x1476   :  { %11610 = vmatmul.mubr.msk.f32.vlgmr.msra.gmra.mxu0 %vm577_vm4, %v13786_v6  ;;  %v4585_v20 = vpop.permute.xlu1 %4584  ;;  %11624 = vmatprep.mubr.msk.f32.mxu1 %vm13010_vm0, %v13009_v0 }
0x1477   :  { %11618 = vmatpush3.xpose.msk.msra.mxu0 %vm577_vm4, %v4585_v20  ;;  %11619 = vmatprep.mubr.msk.f32.mxu0 %vm13010_vm0, %v13009_v0 }
0x1478   :  { %11627 = vmatprep.subr.mxu0 %v13009_v0 }
0x147a   :  { %11620 = vmatmul.mubr.msk.f32.vlgmr.msra.gmra.mxu0 %vm577_vm4, %v13796_v7 }
0x147b   :  { %11629 = vmatprep.mubr.msk.f32.mxu0 %vm13010_vm0, %v13009_v0 }
0x14c2   :  { %v4124_v23 = vpop.f32.mrf.mxu0 }
0x14c3   :  { %v4660_v22 = vsel %vm577_vm4, %v4124_v23, -inf }
0x14c4   :  { %4661 = vmax.xlane.f32.xlu0 %v4660_v22  ;;  %v11586_v24 = vpop.f32.mrf.mxu0 }
0x152d   :  { %v4276_v25 = vpop.f32.mrf.mxu1 }
0x152e   :  { %v4200_v26 = vpop.f32.mrf.mxu0  ;;  %v4666_v28 = vsel %vm577_vm4, %v4276_v25, -inf }
0x152f   :  { %v11596_v30 = vpop.f32.mrf.mxu1  ;;  %4667 = vmax.xlane.f32.xlu0 %v4666_v28  ;;  %v4663_v31 = vsel %vm577_vm4, %v4200_v26, -inf }
0x1530   :  { %4664 = vmax.xlane.f32.xlu1 %v4663_v31  ;;  %v11591_v32 = vpop.f32.mrf.mxu0 }
0x1531   :  { %v4428_v33 = vpop.f32.mrf.mxu1 }
0x1532   :  { %v4352_v34 = vpop.f32.mrf.mxu0  ;;  %v4672_v35 = vsel %vm577_vm4, %v4428_v33, -inf }
0x1533   :  { %v11606_v36 = vpop.f32.mrf.mxu1  ;;  %v4669_v39 = vsel %vm577_vm4, %v4352_v34, -inf }
0x1534   :  { %4673 = vmax.xlane.f32.xlu1 %v4672_v35  ;;  %4670 = vmax.xlane.f32.xlu0 %v4669_v39  ;;  %v11601_v40 = vpop.f32.mrf.mxu0 }
0x1535   :  { %v4580_v41 = vpop.f32.mrf.mxu1 }
0x1536   :  { %v4504_v42 = vpop.f32.mrf.mxu0  ;;  %v4678_v43 = vsel %vm577_vm4, %v4580_v41, -inf }
0x1537   :  { %v11616_v46 = vpop.f32.mrf.mxu1  ;;  %v4675_v47 = vsel %vm577_vm4, %v4504_v42, -inf }
0x1538   :  { %4679 = vmax.xlane.f32.xlu1 %v4678_v43  ;;  %4676 = vmax.xlane.f32.xlu0 %v4675_v47  ;;  %v11611_v48 = vpop.f32.mrf.mxu0 }
0x153a   :  { %v4656_v49 = vpop.f32.mrf.mxu0 }
0x153b   :  { %v4681_v50 = vsel %vm577_vm4, %v4656_v49, -inf }
0x153c   :  { %4682 = vmax.xlane.f32.xlu0 %v4681_v50  ;;  %v11621_v29 = vpop.f32.mrf.mxu0 }
0x1549   :  { %4748 = vrot.lane.b32.xlu1 %v13749_v37, %s12999_s29 }
0x154d   :  { %4900 = vrot.lane.b32.xlu1 %v13770_v1, %s12999_s29  ;;  %v4662_v51 = vpop.xlane.xlu0 %4661 }
0x154e   :  { %v4684_v27 = vsub.f32 %v4124_v23, %v4662_v51 }
0x1550   :  { %v4692_v52 = vmul.f32 1.442695, %v4684_v27 }
0x1551   :  { %4976 = vrot.lane.b32.xlu1 %v13780_v4, %s12999_s29 }
0x1552   :  { %4824 = vrot.lane.b32.xlu0 %v13772_v2, %s12999_s29  ;;  %12317 = vpow2.f32 %v4692_v52 }
0x1555   :  { %5128 = vrot.lane.b32.xlu1 %v13786_v6, %s12999_s29 }
0x1556   :  { %5052 = vrot.lane.b32.xlu0 %v13758_v62, %s12999_s29 }
0x155f   :  { %v13868_v53 = vpop.eup %12317 }
0x1560   :  { %v4708_v15 = vsel %vm577_vm4, %v13868_v53, 0.0 }
0x1579   :  { %4709 = vadd.xlane.f32.xlu1 %v4708_v15 }
0x15b8   :  { %v4668_v54 = vpop.xlane.xlu0 %4667 }
0x15b9   :  { %v4686_v55 = vsub.f32 %v4276_v25, %v4668_v54  ;;  %v4665_v56 = vpop.xlane.xlu1 %4664 }
0x15ba   :  { %v4685_v57 = vsub.f32 %v4200_v26, %v4665_v56 }
0x15bb   :  { %v4696_v58 = vmul.f32 1.442695, %v4686_v55 }
0x15bc   :  { %v4694_v59 = vmul.f32 1.442695, %v4685_v57 }
0x15bd   :  { %12319 = vpow2.f32 %v4696_v58  ;;  %v4674_v60 = vpop.xlane.xlu1 %4673  ;;  %v4671_v37 = vpop.xlane.xlu0 %4670 }
0x15be   :  { %12321 = vpow2.f32 %v4694_v59  ;;  %v4688_v61 = vsub.f32 %v4428_v33, %v4674_v60  ;;  %v4687_v38 = vsub.f32 %v4352_v34, %v4671_v37 }
0x15c0   :  { %v4700_v62 = vmul.f32 1.442695, %v4688_v61  ;;  %v4698_v63 = vmul.f32 1.442695, %v4687_v38 }
0x15c1   :  { %v4680_v1 = vpop.xlane.xlu1 %4679  ;;  %v4677_v2 = vpop.xlane.xlu0 %4676 }
0x15c2   :  { %12323 = vpow2.f32 %v4700_v62  ;;  %v4690_v4 = vsub.f32 %v4580_v41, %v4680_v1  ;;  %v4689_v5 = vsub.f32 %v4504_v42, %v4677_v2 }
0x15c3   :  { %12325 = vpow2.f32 %v4698_v63 }
0x15c4   :  { %v4704_v6 = vmul.f32 1.442695, %v4690_v4  ;;  %v4702_v9 = vmul.f32 1.442695, %v4689_v5  ;;  %v12209_v4 = vld [vmem:[%s14660_s30 + $0x8] sm:$0xff]  }
0x15c5   :  { %v4749_v11 = vpop.permute.xlu1 %4748  ;;  %v4683_v14 = vpop.xlane.xlu0 %4682 }
0x15c6   :  { %12327 = vpow2.f32 %v4704_v6  ;;  %v4691_v16 = vsub.f32 %v4656_v49, %v4683_v14  ;;  %11623 = vmatpush3.msra.mxu1 %v4749_v11  ;;  %v12210_v11 = vld [vmem:[%s14660_s30] sm:$0xff]  }
0x15c7   :  { %12329 = vpow2.f32 %v4702_v9  ;;  %11632 = vmatprep.subr.mxu1 %v13009_v0 }
0x15c8   :  { %v4706_v17 = vmul.f32 1.442695, %v4691_v16 }
0x15c9   :  { %v4825_v21 = vpop.permute.xlu0 %4824  ;;  %v4901_v35 = vpop.permute.xlu1 %4900 }
0x15ca   :  { %v12320_v18 = vpop.eup %12319  ;;  %12331 = vpow2.f32 %v4706_v17  ;;  %11628 = vmatpush3.msra.mxu0 %v4825_v21 }
0x15cb   :  { %v12322_v19 = vpop.eup %12321  ;;  %v4714_v20 = vsel %vm577_vm4, %v12320_v18, 0.0  ;;  %11637 = vmatprep.subr.mxu0 %v13009_v0 }
0x15cc   :  { %4715 = vadd.xlane.f32.xlu1 %v4714_v20  ;;  %v4711_v23 = vsel %vm577_vm4, %v12322_v19, 0.0 }
0x15cd   :  { %4712 = vadd.xlane.f32.xlu0 %v4711_v23  ;;  %v4977_v36 = vpop.permute.xlu1 %4976 }
0x15cf   :  { %v12324_v22 = vpop.eup %12323 }
0x15d0   :  { %v12326_v24 = vpop.eup %12325  ;;  %v4720_v25 = vsel %vm577_vm4, %v12324_v22, 0.0 }
0x15d1   :  { %4721 = vadd.xlane.f32.xlu1 %v4720_v25  ;;  %v4717_v26 = vsel %vm577_vm4, %v12326_v24, 0.0  ;;  %v5129_v39 = vpop.permute.xlu1 %5128 }
0x15d2   :  { %4718 = vadd.xlane.f32.xlu0 %v4717_v26 }
0x15d3   :  { %v12328_v28 = vpop.eup %12327 }
0x15d4   :  { %v13878_v30 = vpop.eup %12329  ;;  %v4726_v31 = vsel %vm577_vm4, %v12328_v28, 0.0 }
0x15d5   :  { %4727 = vadd.xlane.f32.xlu1 %v4726_v31  ;;  %v4723_v32 = vsel %vm577_vm4, %v13878_v30, 0.0 }
0x15d6   :  { %4724 = vadd.xlane.f32.xlu0 %v4723_v32 }
0x15d7   :  { %v13883_v33 = vpop.eup %12331 }
0x15d8   :  { %v4729_v34 = vsel %vm577_vm4, %v13883_v33, 0.0 }
0x15da   :  { %4730 = vadd.xlane.f32.xlu0 %v4729_v34 }
0x15e6   :  { %5280 = vrot.lane.b32.xlu1 %v13796_v7, %s12999_s29  ;;  %v5053_v7 = vpop.permute.xlu0 %5052 }
0x15f0   :  { %5204 = vrot.lane.b32.xlu0 %v13778_v3, %s12999_s29 }
0x1602   :  { %v4710_v40 = vpop.xlane.xlu1 %4709 }
0x1603   :  { %12333 = vrcp.f32 %v4710_v40 }
0x1610   :  { %v12334_v41 = vpop.eup %12333 }
0x1611   :  { %v4740_v42 = vmul.f32 %v12334_v41, %v13868_v53 }
0x1613   :  { %11625 = vmatmul.mubr.msk.f32.vlgmr.msra.gmra.mxu1 %vm577_vm4, %v4740_v42 }
0x1614   :  { %11633 = vmatpush3.msra.mxu1 %v4901_v35  ;;  %11634 = vmatprep.mubr.msk.f32.mxu1 %vm13010_vm0, %v13009_v0 }
0x1615   :  { %11642 = vmatprep.subr.mxu1 %v13009_v0 }
0x1655   :  { %v4716_v43 = vpop.xlane.xlu1 %4715 }
0x1656   :  { %12335 = vrcp.f32 %v4716_v43  ;;  %v4713_v3 = vpop.xlane.xlu0 %4712 }
0x1657   :  { %12337 = vrcp.f32 %v4713_v3 }
0x165a   :  { %v4722_v46 = vpop.xlane.xlu1 %4721 }
0x165b   :  { %12339 = vrcp.f32 %v4722_v46  ;;  %v4719_v47 = vpop.xlane.xlu0 %4718 }
0x165c   :  { %12341 = vrcp.f32 %v4719_v47 }
0x165e   :  { %v4728_v48 = vpop.xlane.xlu1 %4727 }
0x165f   :  { %12343 = vrcp.f32 %v4728_v48  ;;  %v4725_v49 = vpop.xlane.xlu0 %4724 }
0x1660   :  { %12345 = vrcp.f32 %v4725_v49 }
0x1662   :  { %v5281_v37 = vpop.permute.xlu1 %5280 }
0x1663   :  { %v12336_v50 = vpop.eup %12335  ;;  %v4731_v29 = vpop.xlane.xlu0 %4730 }
0x1664   :  { %v12338_v51 = vpop.eup %12337  ;;  %12347 = vrcp.f32 %v4731_v29  ;;  %v4742_v27 = vmul.f32 %v12336_v50, %v12320_v18 }
0x1665   :  { %v4741_v52 = vmul.f32 %v12338_v51, %v12322_v19 }
0x1666   :  { %11635 = vmatmul.mubr.msk.f32.vlgmr.msra.gmra.mxu1 %vm577_vm4, %v4742_v27 }
0x1667   :  { %11630 = vmatmul.mubr.msk.f32.vlgmr.msra.gmra.mxu0 %vm577_vm4, %v4741_v52  ;;  %11643 = vmatpush3.msra.mxu1 %v5053_v7  ;;  %v5205_v56 = vpop.permute.xlu0 %5204 }
0x1668   :  { %v12340_v53 = vpop.eup %12339  ;;  %11638 = vmatpush3.msra.mxu0 %v4977_v36  ;;  %11639 = vmatprep.mubr.msk.f32.mxu0 %vm13010_vm0, %v13009_v0 }
0x1669   :  { %v12342_v15 = vpop.eup %12341  ;;  %11644 = vmatprep.mubr.msk.f32.mxu1 %vm13010_vm0, %v13009_v0  ;;  %11647 = vmatprep.subr.mxu0 %v13009_v0  ;;  %v4744_v54 = vmul.f32 %v12340_v53, %v12324_v22 }
0x166a   :  { %11652 = vmatprep.subr.mxu1 %v13009_v0  ;;  %v4743_v55 = vmul.f32 %v12342_v15, %v12326_v24 }
0x166b   :  { %11645 = vmatmul.mubr.msk.f32.vlgmr.msra.gmra.mxu1 %vm577_vm4, %v4744_v54 }
0x166c   :  { %v12344_v57 = vpop.eup %12343  ;;  %11640 = vmatmul.mubr.msk.f32.vlgmr.msra.gmra.mxu0 %vm577_vm4, %v4743_v55  ;;  %11653 = vmatpush3.msra.mxu1 %v5205_v56 }
0x166d   :  { %v12346_v58 = vpop.eup %12345  ;;  %11648 = vmatpush3.msra.mxu0 %v5129_v39  ;;  %11649 = vmatprep.mubr.msk.f32.mxu0 %vm13010_vm0, %v13009_v0  ;;  %v4746_v59 = vmul.f32 %v12344_v57, %v12328_v28  ;;  %v10865_v28 = vld [vmem:[%s14656_s9 + $0x1] ss:$0 sm:$0xff] }
0x166e   :  { %11654 = vmatprep.mubr.msk.f32.mxu1 %vm13010_vm0, %v13009_v0  ;;  %11657 = vmatprep.subr.mxu0 %v13009_v0  ;;  %v4745_v60 = vmul.f32 %v12346_v58, %v13878_v30  ;;  %v3879_v30 = vadd.f32 %v10865_v28, %v13802_v8  ;;  %v3882_v31 = vadd.f32 %v10865_v28, %v13804_v10 }
0x166f   :  { %11655 = vmatmul.mubr.msk.f32.vlgmr.msra.gmra.mxu1 %vm577_vm4, %v4746_v59  ;;  %11662 = vmatprep.subr.bf16.mxu1 %v13009_v0 }
0x1670   :  { %11650 = vmatmul.mubr.msk.f32.vlgmr.msra.gmra.mxu0 %vm577_vm4, %v4745_v60  ;;  %11666 = vmatprep.mubr.msk.bf16.mxu1 %vm13010_vm0, %v13009_v0  ;;  %v3885_v32 = vadd.f32 %v3879_v30, %v13726_v44 }
0x1671   :  { %v12348_v61 = vpop.eup %12347  ;;  %11658 = vmatpush3.msra.mxu0 %v5281_v37  ;;  %11659 = vmatprep.mubr.msk.f32.mxu0 %vm13010_vm0, %v13009_v0 }
0x1672   :  { %v4747_v38 = vmul.f32 %v12348_v61, %v13883_v33  ;;  %11670 = vmatprep.subr.bf16.mxu0 %v13009_v0  ;;  %11663 = vmatpush3.bf16.msra.mxu1 %v12209_v4  ;;  %v3886_v33 = vadd.f32 %v3882_v31, %v13728_v45  ;;  %v3889_v35 = vsel %vm511_vm3, %v3885_v32, 0.0  ;;  %v10871_v4 = vld [vmem:[%s14657_s5 + $0x1] ss:$0 sm:$0xff] }
0x1673   :  { %11664 = vmatprep.subr.bf16.mxu1 %v13009_v0 }
0x1674   :  { %11660 = vmatmul.mubr.msk.f32.vlgmr.msra.gmra.mxu0 %vm577_vm4, %v4747_v38  ;;  %v3892_v34 = vsel %vm511_vm3, %v3886_v33, 0.0 }
0x1675   :  { %11674 = vmatprep.mubr.msk.bf16.mxu0 %vm13010_vm0, %v13009_v0 }
0x1676   :  { %11665 = vmatpush3.bf16.msra.mxu1 %v12210_v11  ;;  %v10872_v11 = vld [vmem:[%s14658_s7 + $0x1] ss:$0 sm:$0xff] }
0x1677   :  { %11678 = vmatprep.subr.bf16.mxu1 %v13009_v0 }
0x16d3   :  { %v4820_v62 = vpop.f32.mrf.mxu1 }
0x16d5   :  { %v11626_v63 = vpop.f32.mrf.mxu1 }
0x1726   :  { %v4972_v1 = vpop.f32.mrf.mxu1 }
0x1727   :  { %v4896_v2 = vpop.f32.mrf.mxu0 }
0x1728   :  { %v11636_v5 = vpop.f32.mrf.mxu1 }
0x1729   :  { %v11631_v6 = vpop.f32.mrf.mxu0 }
0x172a   :  { %v10903_v6 = vld [vmem:[#allocation8] ss:$0 sm:$0xff] }
0x172b   :  { %v5124_v9 = vpop.f32.mrf.mxu1 }
0x172c   :  { %v5048_v14 = vpop.f32.mrf.mxu0 }
0x172d   :  { %v11646_v16 = vpop.f32.mrf.mxu1 }
0x172e   :  { %v11641_v17 = vpop.f32.mrf.mxu0 }
0x172f   :  { %v5276_v21 = vpop.f32.mrf.mxu1 }
0x1730   :  { %v5200_v18 = vpop.f32.mrf.mxu0  ;;  %v12131_v19 = vpack.i.bf16 %v5276_v21, %v4972_v1 }
0x1731   :  { %v12126_v20 = vpack.i.bf16 %v5200_v18, %v4896_v2  ;;  %v11656_v23 = vpop.f32.mrf.mxu1 }
0x1732   :  { %v11651_v22 = vpop.f32.mrf.mxu0  ;;  %12132 = vrot.lane.b32.xlu1 %v12131_v19, %s13015_s21 }
0x1733   :  { %12127 = vrot.lane.b32.xlu0 %v12126_v20, %s13016_s28 }
0x1734   :  { %v5352_v24 = vpop.f32.mrf.mxu0 }
0x1735   :  { %v12136_v25 = vpack.i.bf16 %v5352_v24, %v5048_v14 }
0x1736   :  { %v11661_v26 = vpop.f32.mrf.mxu0 }
0x1737   :  { %12137 = vrot.lane.b32.xlu0 %v12136_v25, %s13017_s17 }
0x1756   :  { %3893 = vadd.xlane.f32.xlu0 %v3892_v34  ;;  %3890 = vadd.xlane.f32.xlu1 %v3889_v35 }
0x17a4   :  { %v12133_v36 = vpop.permute.xlu1 %12132 }
0x17a5   :  { %v12128_v39 = vpop.permute.xlu0 %12127  ;;  %v12135_v42 = vunpack.i.h.bf16 %v12133_v36  ;;  %v12134_v7 = vunpack.i.l.bf16 %v12133_v36 }
0x17a6   :  { %v12130_v40 = vunpack.i.h.bf16 %v12128_v39  ;;  %v12129_v41 = vunpack.i.l.bf16 %v12128_v39 }
0x17a8   :  { %v5383_v8 = vsel %vm577_vm4, %v5124_v9, %v12130_v40  ;;  %v5368_v10 = vsel %vm577_vm4, %v4820_v62, %v12129_v41 }
0x17a9   :  { %v12138_v43 = vpop.permute.xlu0 %12137  ;;  %v5369_v45 = vsel %vm1893_vm5, %v5368_v10, %v12134_v7  ;;  %v5384_v46 = vsel %vm1893_vm5, %v5383_v8, %v12135_v42 }
0x17aa   :  { %v12140_v44 = vunpack.i.h.bf16 %v12138_v43  ;;  %v12139_v3 = vunpack.i.l.bf16 %v12138_v43 }
0x17ac   :  { %v5385_v47 = vsel %vm1895_vm6, %v5384_v46, %v12140_v44  ;;  %v5370_v48 = vsel %vm1895_vm6, %v5369_v45, %v12139_v3  ;;  %v12211_v46 = vld [vmem:[#allocation13 + $0x8] sm:$0xff]  }
0x17ad   :  { %v5386_v49 = vpack.c.bf16 %v5385_v47, %v5370_v48  ;;  %v12212_v47 = vld [vmem:[#allocation10 + $0x8] sm:$0xff]  }
0x17ae   :  { %v12213_v48 = vld [vmem:[#allocation13] sm:$0xff]   ;;  %11671 = vmatpush3.bf16.msra.mxu0 %v12212_v47 }
0x17af   :  { %11667 = vmatmul.mubr.msk.bf16.vlgmr.msra.gmra.mxu1 %vm511_vm3, %v5386_v49  ;;  %11672 = vmatprep.subr.bf16.mxu0 %v13009_v0  ;;  %v12214_v49 = vld [vmem:[#allocation10] sm:$0xff]  }
0x17b0   :  { %11682 = vmatprep.mubr.msk.bf16.mxu1 %vm13010_vm0, %v13009_v0  ;;  %11679 = vmatpush3.bf16.msra.mxu1 %v12211_v46 }
0x17b1   :  { %11680 = vmatprep.subr.bf16.mxu1 %v13009_v0 }
0x17b2   :  { %11673 = vmatpush3.bf16.msra.mxu0 %v12214_v49 }
0x17b3   :  { %11686 = vmatprep.subr.mxu0 %v13009_v0 }
0x17b4   :  { %11681 = vmatpush3.bf16.msra.mxu1 %v12213_v48 }
0x17b5   :  { %11696 = vmatprep.subr.mxu1 %v13009_v0 }
0x17df   :  { %v3894_v50 = vpop.xlane.xlu0 %3893  ;;  %v3891_v29 = vpop.xlane.xlu1 %3890 }
0x17e0   :  { %v3896_v51 = vmul.f32 0.03125, %v3894_v50  ;;  %v3895_v27 = vmul.f32 0.03125, %v3891_v29 }
0x17e2   :  { %v3898_v52 = vsub.f32 %v3886_v33, %v3896_v51  ;;  %v3897_v53 = vsub.f32 %v3885_v32, %v3895_v27 }
0x17e4   :  { %v3900_v15 = vmul.f32 %v3898_v52, %v3898_v52  ;;  %v3899_v54 = vmul.f32 %v3897_v53, %v3897_v53 }
0x17e6   :  { %v3904_v55 = vsel %vm511_vm3, %v3900_v15, 0.0  ;;  %v3901_v56 = vsel %vm511_vm3, %v3899_v54, 0.0 }
0x17e7   :  { %3905 = vadd.xlane.f32.xlu1 %v3904_v55  ;;  %3902 = vadd.xlane.f32.xlu0 %v3901_v56 }
0x186f   :  { %v5440_v57 = vpop.f32.mrf.mxu1 }
0x1870   :  { %v3906_v58 = vpop.xlane.xlu1 %3905  ;;  %v3903_v59 = vpop.xlane.xlu0 %3902  ;;  %v5441_v21 = vadd.f32 %v10903_v6, %v5440_v57 }
0x1871   :  { %v3908_v60 = vmul.f32 0.03125, %v3906_v58  ;;  %v3907_v37 = vmul.f32 0.03125, %v3903_v59  ;;  %v11668_v61 = vpop.f32.mrf.mxu1 }
0x1872   :  { %v5447_v24 = vadd.f32 %v5441_v21, %v13284_v12 }
0x1873   :  { %v3910_v38 = vadd.f32 1e-05, %v3908_v60  ;;  %v3909_v62 = vadd.f32 1e-05, %v3907_v37  ;;  %v5443_v63 = vpop.f32.mrf.mxu1  ;;  %v10873_v60 = vld [vmem:[%s14661_s11] ss:$0 sm:$0xff] }
0x1874   :  { %v5444_v16 = vadd.f32 %v10903_v6, %v5443_v63  ;;  %v5451_v28 = vsel %vm511_vm3, %v5447_v24, 0.0 }
0x1875   :  { %12349 = vrsqrt.f32 %v3910_v38  ;;  %v11669_v1 = vpop.f32.mrf.mxu1 }
0x1876   :  { %12351 = vrsqrt.f32 %v3909_v62  ;;  %v5448_v23 = vadd.f32 %v5444_v16, %v13286_v13  ;;  %v10874_v62 = vld [vmem:[%s14662_s12] ss:$0 sm:$0xff]  ;;  %v10908_v16 = vld [vmem:[#allocation20] ss:$0 sm:$0xff] }
0x1878   :  { %v5454_v26 = vsel %vm511_vm3, %v5448_v23, 0.0 }
0x1882   :  { %v12350_v2 = vpop.eup %12349 }
0x1883   :  { %v12352_v5 = vpop.eup %12351  ;;  %v3914_v9 = vmul.f32 %v12350_v2, %v3898_v52 }
0x1884   :  { %v3913_v14 = vmul.f32 %v12352_v5, %v3897_v53 }
0x1885   :  { %v3920_v17 = vmul.f32 %v10871_v4, %v3914_v9 }
0x1886   :  { %v3919_v18 = vmul.f32 %v10871_v4, %v3913_v14  ;;  %v10907_v4 = vld [vmem:[#allocation19] ss:$0 sm:$0xff] }
0x1887   :  { %v3926_v19 = vadd.f32 %v10872_v11, %v3920_v17 }
0x1888   :  { %v3925_v20 = vadd.f32 %v10872_v11, %v3919_v18 }
0x1889   :  { %v3932_v22 = vsel %vm511_vm3, %v3926_v19, 0.0 }
0x188a   :  { %3933 = vadd.xlane.f32.xlu1 %v3932_v22  ;;  %v3929_v25 = vsel %vm511_vm3, %v3925_v20, 0.0  ;;  %v10913_v22 = vld [vmem:[#allocation14] ss:$0 sm:$0xff] }
0x188b   :  { %3930 = vadd.xlane.f32.xlu0 %v3929_v25 }
0x188e   :  { %5455 = vadd.xlane.f32.xlu1 %v5454_v26 }
0x188f   :  { %5452 = vadd.xlane.f32.xlu0 %v5451_v28  ;;  %v10909_v28 = vld [vmem:[#allocation11] ss:$0 sm:$0xff] }
0x1913   :  { %v3934_v30 = vpop.xlane.xlu1 %3933 }
0x1914   :  { %v3936_v31 = vmul.f32 0.03125, %v3934_v30  ;;  %v3931_v32 = vpop.xlane.xlu0 %3930 }
0x1915   :  { %v3935_v33 = vmul.f32 0.03125, %v3931_v32 }
0x1916   :  { %v3938_v34 = vsub.f32 %v3926_v19, %v3936_v31 }
0x1917   :  { %v3937_v13 = vsub.f32 %v3925_v20, %v3935_v33  ;;  %v5456_v35 = vpop.xlane.xlu1 %5455 }
0x1918   :  { %v5458_v36 = vmul.f32 0.03125, %v5456_v35  ;;  %v5453_v39 = vpop.xlane.xlu0 %5452  ;;  %v3940_v12 = vmul.f32 %v3938_v34, %v3938_v34 }
0x1919   :  { %v5457_v40 = vmul.f32 0.03125, %v5453_v39  ;;  %v3939_v41 = vmul.f32 %v3937_v13, %v3937_v13 }
0x191a   :  { %v5460_v42 = vsub.f32 %v5448_v23, %v5458_v36  ;;  %v3944_v7 = vsel %vm511_vm3, %v3940_v12, 0.0 }
0x191b   :  { %v5459_v8 = vsub.f32 %v5447_v24, %v5457_v40  ;;  %3945 = vadd.xlane.f32.xlu1 %v3944_v7  ;;  %v3941_v10 = vsel %vm511_vm3, %v3939_v41, 0.0 }
0x191c   :  { %3942 = vadd.xlane.f32.xlu0 %v3941_v10  ;;  %v5462_v43 = vmul.f32 %v5460_v42, %v5460_v42 }
0x191d   :  { %v5461_v44 = vmul.f32 %v5459_v8, %v5459_v8 }
0x191e   :  { %v5466_v3 = vsel %vm511_vm3, %v5462_v43, 0.0 }
0x191f   :  { %5467 = vadd.xlane.f32.xlu1 %v5466_v3  ;;  %v5463_v45 = vsel %vm511_vm3, %v5461_v44, 0.0 }
0x1920   :  { %5464 = vadd.xlane.f32.xlu0 %v5463_v45 }
0x19a4   :  { %v3946_v50 = vpop.xlane.xlu1 %3945 }
0x19a5   :  { %v3948_v29 = vmul.f32 0.03125, %v3946_v50  ;;  %v3943_v51 = vpop.xlane.xlu0 %3942 }
0x19a6   :  { %v3947_v27 = vmul.f32 0.03125, %v3943_v51 }
0x19a7   :  { %v3950_v52 = vadd.f32 1e-05, %v3948_v29 }
0x19a8   :  { %v3949_v53 = vadd.f32 1e-05, %v3947_v27  ;;  %v5468_v15 = vpop.xlane.xlu1 %5467 }
0x19a9   :  { %12353 = vrsqrt.f32 %v3950_v52  ;;  %v5470_v54 = vmul.f32 0.03125, %v5468_v15  ;;  %v5465_v55 = vpop.xlane.xlu0 %5464 }
0x19aa   :  { %12355 = vrsqrt.f32 %v3949_v53  ;;  %v5469_v56 = vmul.f32 0.03125, %v5465_v55 }
0x19ab   :  { %v5472_v57 = vadd.f32 1e-05, %v5470_v54 }
0x19ac   :  { %v5471_v58 = vadd.f32 1e-05, %v5469_v56 }
0x19ad   :  { %12357 = vrsqrt.f32 %v5472_v57 }
0x19ae   :  { %12359 = vrsqrt.f32 %v5471_v58 }
0x19b6   :  { %v12354_v59 = vpop.eup %12353 }
0x19b7   :  { %v12356_v37 = vpop.eup %12355  ;;  %v3954_v61 = vmul.f32 %v12354_v59, %v3938_v34 }
0x19b8   :  { %v3953_v38 = vmul.f32 %v12356_v37, %v3937_v13 }
0x19b9   :  { %v3962_v63 = vmul.f32 %v10873_v60, %v3954_v61 }
0x19ba   :  { %v12358_v1 = vpop.eup %12357  ;;  %v3961_v2 = vmul.f32 %v10873_v60, %v3953_v38 }
0x19bb   :  { %v12360_v5 = vpop.eup %12359  ;;  %v5476_v6 = vmul.f32 %v12358_v1, %v5460_v42  ;;  %v3970_v9 = vadd.f32 %v10874_v62, %v3962_v63 }
0x19bc   :  { %v5475_v11 = vmul.f32 %v12360_v5, %v5459_v8  ;;  %v3969_v14 = vadd.f32 %v10874_v62, %v3961_v2 }
0x19bd   :  { %v5482_v17 = vmul.f32 %v10907_v4, %v5476_v6 }
0x19be   :  { %v13967_v21 = vpack.c.bf16 %v3970_v9, %v3969_v14  ;;  %v5481_v18 = vmul.f32 %v10907_v4, %v5475_v11 }
0x19bf   :  { %v13969_v19 = vadd.f32 %v10908_v16, %v5482_v17 }
0x19c0   :  { %11683 = vmatmul.mubr.msk.bf16.vlgmr.msra.gmra.mxu1 %vm511_vm3, %v13967_v21  ;;  %v13973_v20 = vadd.f32 %v10908_v16, %v5481_v18 }
0x19c1   :  { %11698 = vmatprep.mubr.msk.f32.mxu1 %vm13010_vm0, %v13009_v0 }
0x19c2   :  { %v5494_v23 = vpack.c.bf16 %v13969_v19, %v13973_v20 }
0x19c4   :  { %11675 = vmatmul.mubr.msk.bf16.vlgmr.msra.gmra.mxu0 %vm511_vm3, %v5494_v23 }
0x19c5   :  { %11688 = vmatprep.mubr.msk.f32.mxu0 %vm13010_vm0, %v13009_v0 }
0x1a80   :  { %v5614_v24 = vpop.f32.mrf.mxu1 }
0x1a81   :  { %v13982_v25 = vadd.f32 %v10913_v22, %v5614_v24 }
0x1a82   :  { %v11684_v26 = vpop.f32.mrf.mxu1 }
0x1a83   :  { %5643 = vrot.lane.b32.xlu1 %v13982_v25, %s13013_s23  ;;  %5641 = vrot.lane.b32.xlu0 %v13982_v25, %s13012_s22 }
0x1a84   :  { %11687 = vmatpush3.xpose.msk.msra.mxu0 %vm577_vm4, %v13982_v25  ;;  %v5548_v30 = vpop.f32.mrf.mxu0  ;;  %v5617_v31 = vpop.f32.mrf.mxu1 }
0x1a85   :  { %v5549_v32 = vadd.f32 %v10909_v28, %v5548_v30  ;;  %v13990_v33 = vadd.f32 %v10913_v22, %v5617_v31  ;;  %11691 = vmatprep.subr.mxu0 %v13009_v0 }
0x1a86   :  { %v11676_v34 = vpop.f32.mrf.mxu0  ;;  %v11685_v13 = vpop.f32.mrf.mxu1 }
0x1a87   :  { %5645 = vrot.lane.b32.xlu0 %v13982_v25, %s13011_s18  ;;  %5648 = vrot.lane.b32.xlu1 %v13990_v33, %s13012_s22 }
0x1a88   :  { %11689 = vmatmul.mubr.msk.f32.vlgmr.msra.gmra.mxu0 %vm577_vm4, %v5549_v32  ;;  %v5551_v35 = vpop.f32.mrf.mxu0 }
0x1a89   :  { %11693 = vmatprep.mubr.msk.f32.mxu0 %vm13010_vm0, %v13009_v0  ;;  %v5552_v39 = vadd.f32 %v10909_v28, %v5551_v35 }
0x1a8a   :  { %v11677_v36 = vpop.f32.mrf.mxu0 }
0x1a8b   :  { %5652 = vrot.lane.b32.xlu0 %v13990_v33, %s13011_s18  ;;  %5627 = vrot.lane.b32.xlu1 %v5549_v32, %s13012_s22 }
0x1a8f   :  { %5631 = vrot.lane.b32.xlu0 %v5549_v32, %s13011_s18  ;;  %5629 = vrot.lane.b32.xlu1 %v5549_v32, %s13013_s23 }
0x1a93   :  { %5650 = vrot.lane.b32.xlu1 %v13990_v33, %s13013_s23  ;;  %5634 = vrot.lane.b32.xlu0 %v5552_v39, %s13012_s22 }
0x1a97   :  { %5636 = vrot.lane.b32.xlu1 %v5552_v39, %s13013_s23  ;;  %5638 = vrot.lane.b32.xlu0 %v5552_v39, %s13011_s18 }
0x1af5   :  { %v14010_v12 = vpop.permute.xlu1 %5643  ;;  %v14012_v40 = vpop.permute.xlu0 %5641 }
0x1af6   :  { %11692 = vmatpush3.xpose.msk.msra.mxu0 %vm577_vm4, %v14012_v40  ;;  %11697 = vmatpush3.xpose.msk.msra.mxu1 %vm577_vm4, %v14010_v12 }
0x1af7   :  { %11701 = vmatprep.subr.mxu0 %v13009_v0  ;;  %11706 = vmatprep.subr.mxu1 %v13009_v0 }
0x1af9   :  { %v14020_v41 = vpop.permute.xlu0 %5645  ;;  %v14022_v42 = vpop.permute.xlu1 %5648 }
0x1afd   :  { %v14024_v7 = vpop.permute.xlu0 %5652  ;;  %v5628_v8 = vpop.permute.xlu1 %5627 }
0x1afe   :  { %11694 = vmatmul.mubr.msk.f32.vlgmr.msra.gmra.mxu0 %vm577_vm4, %v5628_v8 }
0x1aff   :  { %11702 = vmatpush3.xpose.msk.msra.mxu0 %vm577_vm4, %v14020_v41  ;;  %11703 = vmatprep.mubr.msk.f32.mxu0 %vm13010_vm0, %v13009_v0 }
0x1b00   :  { %11711 = vmatprep.subr.mxu0 %v13009_v0 }
0x1b01   :  { %v5632_v10 = vpop.permute.xlu0 %5631  ;;  %v5630_v43 = vpop.permute.xlu1 %5629 }
0x1b02   :  { %11699 = vmatmul.mubr.msk.f32.vlgmr.msra.gmra.mxu1 %vm577_vm4, %v5630_v43  ;;  %11704 = vmatmul.mubr.msk.f32.vlgmr.msra.gmra.mxu0 %vm577_vm4, %v5632_v10 }
0x1b03   :  { %11707 = vmatpush3.xpose.msk.msra.mxu1 %vm577_vm4, %v13990_v33  ;;  %11712 = vmatpush3.xpose.msk.msra.mxu0 %vm577_vm4, %v14022_v42 }
0x1b04   :  { %11708 = vmatprep.mubr.msk.f32.mxu1 %vm13010_vm0, %v13009_v0  ;;  %11716 = vmatprep.subr.mxu1 %v13009_v0 }
0x1b05   :  { %v14041_v44 = vpop.permute.xlu1 %5650  ;;  %11713 = vmatprep.mubr.msk.f32.mxu0 %vm13010_vm0, %v13009_v0  ;;  %11721 = vmatprep.subr.mxu0 %v13009_v0  ;;  %v5635_v3 = vpop.permute.xlu0 %5634 }
0x1b06   :  { %11709 = vmatmul.mubr.msk.f32.vlgmr.msra.gmra.mxu1 %vm577_vm4, %v5552_v39  ;;  %11714 = vmatmul.mubr.msk.f32.vlgmr.msra.gmra.mxu0 %vm577_vm4, %v5635_v3 }
0x1b07   :  { %11717 = vmatpush3.xpose.msk.msra.mxu1 %vm577_vm4, %v14041_v44  ;;  %11722 = vmatpush3.xpose.msk.msra.mxu0 %vm577_vm4, %v14024_v7 }
0x1b08   :  { %11723 = vmatprep.mubr.msk.f32.mxu0 %vm13010_vm0, %v13009_v0  ;;  %11718 = vmatprep.mubr.msk.f32.mxu1 %vm13010_vm0, %v13009_v0 }
0x1b09   :  { %v5637_v45 = vpop.permute.xlu1 %5636  ;;  %v5639_v46 = vpop.permute.xlu0 %5638  ;;  %11726 = vmatprep.subr.mxu1 %v13009_v0  ;;  %11731 = vmatprep.subr.mxu0 %v13009_v0 }
0x1b0a   :  { %11719 = vmatmul.mubr.msk.f32.vlgmr.msra.gmra.mxu1 %vm577_vm4, %v5637_v45  ;;  %11724 = vmatmul.mubr.msk.f32.vlgmr.msra.gmra.mxu0 %vm577_vm4, %v5639_v46 }
0x1b0b   :  { %11728 = vmatprep.mubr.msk.f32.mxu1 %vm13010_vm0, %v13009_v0  ;;  %11733 = vmatprep.mubr.msk.f32.mxu0 %vm13010_vm0, %v13009_v0 }
0x1b48   :  { %v5724_v47 = vpop.f32.mrf.mxu0 }
0x1b49   :  { %v6246_v48 = vsel %vm577_vm4, %v5724_v47, -inf }
0x1b4a   :  { %6247 = vmax.xlane.f32.xlu1 %v6246_v48  ;;  %v11690_v49 = vpop.f32.mrf.mxu0 }
0x1bbe   :  { %v5798_v50 = vpop.f32.mrf.mxu0 }
0x1bbf   :  { %v6249_v29 = vsel %vm577_vm4, %v5798_v50, -inf }
0x1bc0   :  { %6250 = vmax.xlane.f32.xlu0 %v6249_v29  ;;  %v11695_v51 = vpop.f32.mrf.mxu0 }
0x1bc2   :  { %v5872_v27 = vpop.f32.mrf.mxu1  ;;  %v5946_v52 = vpop.f32.mrf.mxu0 }
0x1bc3   :  { %v6252_v53 = vsel %vm577_vm4, %v5872_v27, -inf  ;;  %v6255_v15 = vsel %vm577_vm4, %v5946_v52, -inf }
0x1bc4   :  { %v11700_v54 = vpop.f32.mrf.mxu1  ;;  %6253 = vmax.xlane.f32.xlu0 %v6252_v53  ;;  %6256 = vmax.xlane.f32.xlu1 %v6255_v15  ;;  %v11705_v55 = vpop.f32.mrf.mxu0 }
0x1bc6   :  { %v6020_v56 = vpop.f32.mrf.mxu1  ;;  %v6094_v57 = vpop.f32.mrf.mxu0 }
0x1bc7   :  { %v6258_v58 = vsel %vm577_vm4, %v6020_v56, -inf  ;;  %v6261_v59 = vsel %vm577_vm4, %v6094_v57, -inf }
0x1bc8   :  { %v11710_v60 = vpop.f32.mrf.mxu1  ;;  %6259 = vmax.xlane.f32.xlu0 %v6258_v58  ;;  %6262 = vmax.xlane.f32.xlu1 %v6261_v59  ;;  %v11715_v37 = vpop.f32.mrf.mxu0 }
0x1bca   :  { %v6168_v61 = vpop.f32.mrf.mxu1  ;;  %v6242_v38 = vpop.f32.mrf.mxu0 }
0x1bcb   :  { %v6264_v62 = vsel %vm577_vm4, %v6168_v61, -inf  ;;  %v6267_v63 = vsel %vm577_vm4, %v6242_v38, -inf }
0x1bcc   :  { %v11720_v1 = vpop.f32.mrf.mxu1  ;;  %6265 = vmax.xlane.f32.xlu0 %v6264_v62  ;;  %6268 = vmax.xlane.f32.xlu1 %v6267_v63  ;;  %v11725_v2 = vpop.f32.mrf.mxu0 }
0x1bd3   :  { %v6248_v4 = vpop.xlane.xlu1 %6247 }
0x1bd4   :  { %v6270_v5 = vsub.f32 %v5724_v47, %v6248_v4 }
0x1bd6   :  { %v6278_v6 = vmul.f32 1.442695, %v6270_v5 }
0x1bd8   :  { %12361 = vpow2.f32 %v6278_v6 }
0x1bdd   :  { %6410 = vrot.lane.b32.xlu1 %v14012_v40, %s13014_s20 }
0x1be1   :  { %6486 = vrot.lane.b32.xlu1 %v14010_v12, %s13014_s20 }
0x1be2   :  { %6334 = vrot.lane.b32.xlu0 %v13982_v25, %s13014_s20 }
0x1be5   :  { %6638 = vrot.lane.b32.xlu1 %v13990_v33, %s13014_s20  ;;  %v14084_v9 = vpop.eup %12361 }
0x1be6   :  { %6562 = vrot.lane.b32.xlu0 %v14020_v41, %s13014_s20  ;;  %v6294_v11 = vsel %vm577_vm4, %v14084_v9, 0.0 }
0x1bea   :  { %6714 = vrot.lane.b32.xlu0 %v14022_v42, %s13014_s20 }
0x1c09   :  { %6295 = vadd.xlane.f32.xlu0 %v6294_v11 }
0x1c49   :  { %v6251_v14 = vpop.xlane.xlu0 %6250 }
0x1c4a   :  { %v6271_v16 = vsub.f32 %v5798_v50, %v6251_v14 }
0x1c4c   :  { %v6280_v17 = vmul.f32 1.442695, %v6271_v16 }
0x1c4d   :  { %v6254_v18 = vpop.xlane.xlu0 %6253  ;;  %v6257_v23 = vpop.xlane.xlu1 %6256 }
0x1c4e   :  { %12363 = vpow2.f32 %v6280_v17  ;;  %v6272_v22 = vsub.f32 %v5872_v27, %v6254_v18  ;;  %v6273_v24 = vsub.f32 %v5946_v52, %v6257_v23 }
0x1c50   :  { %v6282_v25 = vmul.f32 1.442695, %v6272_v22  ;;  %v6284_v26 = vmul.f32 1.442695, %v6273_v24 }
0x1c51   :  { %v6260_v28 = vpop.xlane.xlu0 %6259  ;;  %v6263_v30 = vpop.xlane.xlu1 %6262 }
0x1c52   :  { %12365 = vpow2.f32 %v6282_v25  ;;  %v6274_v31 = vsub.f32 %v6020_v56, %v6260_v28  ;;  %v6275_v32 = vsub.f32 %v6094_v57, %v6263_v30  ;;  %v12215_v30 = vld [vmem:[#allocation16 + $0x8] sm:$0xff]  }
0x1c53   :  { %12367 = vpow2.f32 %v6284_v26 }
0x1c54   :  { %v6286_v33 = vmul.f32 1.442695, %v6274_v31  ;;  %v6288_v34 = vmul.f32 1.442695, %v6275_v32 }
0x1c55   :  { %v6266_v13 = vpop.xlane.xlu0 %6265  ;;  %v6269_v35 = vpop.xlane.xlu1 %6268 }
0x1c56   :  { %12369 = vpow2.f32 %v6286_v33  ;;  %v6276_v36 = vsub.f32 %v6168_v61, %v6266_v13  ;;  %v6277_v39 = vsub.f32 %v6242_v38, %v6269_v35 }
0x1c57   :  { %12371 = vpow2.f32 %v6288_v34  ;;  %v12216_v34 = vld [vmem:[#allocation16] sm:$0xff]  }
0x1c58   :  { %v6290_v12 = vmul.f32 1.442695, %v6276_v36  ;;  %v6292_v40 = vmul.f32 1.442695, %v6277_v39 }
0x1c59   :  { %v6335_v41 = vpop.permute.xlu0 %6334  ;;  %v6411_v42 = vpop.permute.xlu1 %6410 }
0x1c5a   :  { %12373 = vpow2.f32 %v6290_v12  ;;  %11727 = vmatpush3.msra.mxu1 %v6335_v41  ;;  %11732 = vmatpush3.msra.mxu0 %v6411_v42 }
0x1c5b   :  { %v12364_v8 = vpop.eup %12363  ;;  %12375 = vpow2.f32 %v6292_v40  ;;  %11736 = vmatprep.subr.mxu1 %v13009_v0  ;;  %11741 = vmatprep.subr.mxu0 %v13009_v0 }
0x1c5c   :  { %v6297_v10 = vsel %vm577_vm4, %v12364_v8, 0.0 }
0x1c5d   :  { %6298 = vadd.xlane.f32.xlu1 %v6297_v10  ;;  %v6563_v53 = vpop.permute.xlu0 %6562  ;;  %v6487_v57 = vpop.permute.xlu1 %6486 }
0x1c5f   :  { %v12366_v43 = vpop.eup %12365 }
0x1c60   :  { %v12368_v3 = vpop.eup %12367  ;;  %v6300_v45 = vsel %vm577_vm4, %v12366_v43, 0.0 }
0x1c61   :  { %6301 = vadd.xlane.f32.xlu0 %v6300_v45  ;;  %v6303_v46 = vsel %vm577_vm4, %v12368_v3, 0.0  ;;  %v6715_v15 = vpop.permute.xlu0 %6714 }
0x1c62   :  { %6304 = vadd.xlane.f32.xlu1 %v6303_v46 }
0x1c63   :  { %v12370_v47 = vpop.eup %12369 }
0x1c64   :  { %v12372_v48 = vpop.eup %12371  ;;  %v6306_v49 = vsel %vm577_vm4, %v12370_v47, 0.0 }
0x1c65   :  { %6307 = vadd.xlane.f32.xlu0 %v6306_v49  ;;  %v6309_v50 = vsel %vm577_vm4, %v12372_v48, 0.0 }
0x1c66   :  { %6310 = vadd.xlane.f32.xlu1 %v6309_v50 }
0x1c67   :  { %v14095_v29 = vpop.eup %12373 }
0x1c68   :  { %v14097_v51 = vpop.eup %12375  ;;  %v6312_v27 = vsel %vm577_vm4, %v14095_v29, 0.0 }
0x1c69   :  { %6313 = vadd.xlane.f32.xlu0 %v6312_v27  ;;  %v6315_v52 = vsel %vm577_vm4, %v14097_v51, 0.0 }
0x1c6a   :  { %6316 = vadd.xlane.f32.xlu1 %v6315_v52 }
0x1c7b   :  { %6790 = vrot.lane.b32.xlu1 %v14041_v44, %s13014_s20  ;;  %v6639_v44 = vpop.permute.xlu1 %6638 }
0x1c7f   :  { %6866 = vrot.lane.b32.xlu0 %v14024_v7, %s13014_s20 }
0x1c92   :  { %v6296_v54 = vpop.xlane.xlu0 %6295 }
0x1c93   :  { %12377 = vrcp.f32 %v6296_v54 }
0x1ca0   :  { %v12378_v55 = vpop.eup %12377 }
0x1ca1   :  { %v6326_v56 = vmul.f32 %v12378_v55, %v14084_v9 }
0x1ca3   :  { %11729 = vmatmul.mubr.msk.f32.vlgmr.msra.gmra.mxu1 %vm577_vm4, %v6326_v56 }
0x1ca4   :  { %11737 = vmatpush3.msra.mxu1 %v6487_v57  ;;  %11738 = vmatprep.mubr.msk.f32.mxu1 %vm13010_vm0, %v13009_v0 }
0x1ca5   :  { %11746 = vmatprep.subr.mxu1 %v13009_v0 }
0x1ce6   :  { %v6299_v58 = vpop.xlane.xlu1 %6298 }
0x1ce7   :  { %12379 = vrcp.f32 %v6299_v58  ;;  %v10941_v58 = vld [vmem:[#allocation17] ss:$0 sm:$0xff] }
0x1cea   :  { %v6302_v7 = vpop.xlane.xlu0 %6301 }
0x1ceb   :  { %12381 = vrcp.f32 %v6302_v7  ;;  %v6305_v59 = vpop.xlane.xlu1 %6304 }
0x1cec   :  { %12383 = vrcp.f32 %v6305_v59 }
0x1cee   :  { %v6308_v60 = vpop.xlane.xlu0 %6307 }
0x1cef   :  { %12385 = vrcp.f32 %v6308_v60  ;;  %v6311_v37 = vpop.xlane.xlu1 %6310 }
0x1cf0   :  { %12387 = vrcp.f32 %v6311_v37 }
0x1cf2   :  { %v6314_v61 = vpop.xlane.xlu0 %6313 }
0x1cf3   :  { %12389 = vrcp.f32 %v6314_v61  ;;  %v6317_v38 = vpop.xlane.xlu1 %6316 }
0x1cf4   :  { %v12380_v62 = vpop.eup %12379  ;;  %12391 = vrcp.f32 %v6317_v38 }
0x1cf5   :  { %v6327_v63 = vmul.f32 %v12380_v62, %v12364_v8 }
0x1cf6   :  { %v6867_v18 = vpop.permute.xlu0 %6866 }
0x1cf7   :  { %11734 = vmatmul.mubr.msk.f32.vlgmr.msra.gmra.mxu0 %vm577_vm4, %v6327_v63  ;;  %v6791_v16 = vpop.permute.xlu1 %6790 }
0x1cf8   :  { %v12382_v1 = vpop.eup %12381  ;;  %11742 = vmatpush3.msra.mxu0 %v6563_v53  ;;  %11743 = vmatprep.mubr.msk.f32.mxu0 %vm13010_vm0, %v13009_v0 }
0x1cf9   :  { %v12384_v2 = vpop.eup %12383  ;;  %11751 = vmatprep.subr.mxu0 %v13009_v0  ;;  %v6328_v4 = vmul.f32 %v12382_v1, %v12366_v43 }
0x1cfa   :  { %v6329_v5 = vmul.f32 %v12384_v2, %v12368_v3 }
0x1cfb   :  { %11739 = vmatmul.mubr.msk.f32.vlgmr.msra.gmra.mxu1 %vm577_vm4, %v6328_v4 }
0x1cfc   :  { %v12386_v6 = vpop.eup %12385  ;;  %11744 = vmatmul.mubr.msk.f32.vlgmr.msra.gmra.mxu0 %vm577_vm4, %v6329_v5  ;;  %11747 = vmatpush3.msra.mxu1 %v6639_v44 }
0x1cfd   :  { %v12388_v9 = vpop.eup %12387  ;;  %11752 = vmatpush3.msra.mxu0 %v6715_v15  ;;  %11748 = vmatprep.mubr.msk.f32.mxu1 %vm13010_vm0, %v13009_v0  ;;  %v6330_v11 = vmul.f32 %v12386_v6, %v12370_v47 }
0x1cfe   :  { %11753 = vmatprep.mubr.msk.f32.mxu0 %vm13010_vm0, %v13009_v0  ;;  %11756 = vmatprep.subr.mxu1 %v13009_v0  ;;  %v6331_v14 = vmul.f32 %v12388_v9, %v12372_v48 }
0x1cff   :  { %11761 = vmatprep.subr.mxu0 %v13009_v0  ;;  %11749 = vmatmul.mubr.msk.f32.vlgmr.msra.gmra.mxu1 %vm577_vm4, %v6330_v11 }
0x1d00   :  { %v12390_v17 = vpop.eup %12389  ;;  %11754 = vmatmul.mubr.msk.f32.vlgmr.msra.gmra.mxu0 %vm577_vm4, %v6331_v14  ;;  %11757 = vmatpush3.msra.mxu1 %v6791_v16 }
0x1d01   :  { %v12392_v23 = vpop.eup %12391  ;;  %11762 = vmatpush3.msra.mxu0 %v6867_v18  ;;  %11758 = vmatprep.mubr.msk.f32.mxu1 %vm13010_vm0, %v13009_v0  ;;  %v6332_v22 = vmul.f32 %v12390_v17, %v14095_v29 }
0x1d02   :  { %11763 = vmatprep.mubr.msk.f32.mxu0 %vm13010_vm0, %v13009_v0  ;;  %v6333_v24 = vmul.f32 %v12392_v23, %v14097_v51  ;;  %11766 = vmatprep.subr.bf16.mxu1 %v13009_v0  ;;  %v12217_v23 = vld [vmem:[#allocation28 + $0x8] sm:$0xff]  }
0x1d03   :  { %11759 = vmatmul.mubr.msk.f32.vlgmr.msra.gmra.mxu1 %vm577_vm4, %v6332_v22  ;;  %11774 = vmatprep.subr.bf16.mxu0 %v13009_v0  ;;  %v12219_v22 = vld [vmem:[%s14663_s15 + $0x18] sm:$0xff]  }
0x1d04   :  { %11764 = vmatmul.mubr.msk.f32.vlgmr.msra.gmra.mxu0 %vm577_vm4, %v6333_v24  ;;  %11770 = vmatprep.mubr.msk.bf16.mxu1 %vm13010_vm0, %v13009_v0 }
0x1d05   :  { %11778 = vmatprep.mubr.msk.bf16.mxu0 %vm13010_vm0, %v13009_v0  ;;  %11767 = vmatpush3.bf16.msra.mxu1 %v12215_v30 }
0x1d06   :  { %11768 = vmatprep.subr.bf16.mxu1 %v13009_v0  ;;  %11775 = vmatpush3.bf16.msra.mxu0 %v12217_v23 }
0x1d07   :  { %11776 = vmatprep.subr.bf16.mxu0 %v13009_v0 }
0x1d09   :  { %11769 = vmatpush3.bf16.msra.mxu1 %v12216_v34  ;;  %v10945_v34 = vld [vmem:[#allocation22] ss:$0 sm:$0xff] }
0x1d0a   :  { %11782 = vmatprep.subr.bf16.mxu1 %v13009_v0 }
0x1d63   :  { %v6406_v25 = vpop.f32.mrf.mxu1 }
0x1d65   :  { %v11730_v26 = vpop.f32.mrf.mxu1 }
0x1db7   :  { %v6482_v28 = vpop.f32.mrf.mxu0 }
0x1db9   :  { %v11735_v31 = vpop.f32.mrf.mxu0 }
0x1dbb   :  { %v6558_v32 = vpop.f32.mrf.mxu1 }
0x1dbc   :  { %v6634_v33 = vpop.f32.mrf.mxu0 }
0x1dbd   :  { %v11740_v13 = vpop.f32.mrf.mxu1 }
0x1dbe   :  { %v11745_v35 = vpop.f32.mrf.mxu0 }
0x1dbf   :  { %v6710_v36 = vpop.f32.mrf.mxu1 }
0x1dc0   :  { %v6786_v39 = vpop.f32.mrf.mxu0 }
0x1dc1   :  { %v12141_v12 = vpack.i.bf16 %v6786_v39, %v6482_v28  ;;  %v11750_v40 = vpop.f32.mrf.mxu1  ;;  %v10946_v39 = vld [vmem:[#allocation23] ss:$0 sm:$0xff] }
0x1dc2   :  { %v11755_v41 = vpop.f32.mrf.mxu0 }
0x1dc3   :  { %12142 = vrot.lane.b32.xlu1 %v12141_v12, %s13016_s28  ;;  %v6862_v42 = vpop.f32.mrf.mxu1 }
0x1dc4   :  { %v12146_v8 = vpack.i.bf16 %v6862_v42, %v6558_v32  ;;  %v6938_v10 = vpop.f32.mrf.mxu0 }
0x1dc5   :  { %v12151_v43 = vpack.i.bf16 %v6938_v10, %v6634_v33  ;;  %v11760_v3 = vpop.f32.mrf.mxu1  ;;  %v12221_v10 = vld [vmem:[%s14663_s15 + $0x8] sm:$0xff]  }
0x1dc6   :  { %v11765_v45 = vpop.f32.mrf.mxu0  ;;  %12147 = vrot.lane.b32.xlu0 %v12146_v8, %s13015_s21  ;;  %v12220_v8 = vld [vmem:[%s14663_s15 + $0x10] sm:$0xff]   ;;  %v10947_v3 = vld [vmem:[#allocation29] ss:$0 sm:$0xff] }
0x1dc7   :  { %12152 = vrot.lane.b32.xlu1 %v12151_v43, %s13017_s17  ;;  %v12222_v43 = vld [vmem:[%s14663_s15] sm:$0xff]  }
0x1e35   :  { %v12143_v46 = vpop.permute.xlu1 %12142 }
0x1e36   :  { %v12145_v47 = vunpack.i.h.bf16 %v12143_v46  ;;  %v12144_v48 = vunpack.i.l.bf16 %v12143_v46 }
0x1e38   :  { %v12148_v49 = vpop.permute.xlu0 %12147  ;;  %v6969_v27 = vsel %vm577_vm4, %v6710_v36, %v12145_v47  ;;  %v6954_v52 = vsel %vm577_vm4, %v6406_v25, %v12144_v48 }
0x1e39   :  { %v12150_v50 = vunpack.i.h.bf16 %v12148_v49  ;;  %v12149_v29 = vunpack.i.l.bf16 %v12148_v49  ;;  %v12153_v51 = vpop.permute.xlu1 %12152 }
0x1e3a   :  { %v12155_v53 = vunpack.i.h.bf16 %v12153_v51  ;;  %v12154_v15 = vunpack.i.l.bf16 %v12153_v51 }
0x1e3b   :  { %v6955_v54 = vsel %vm1893_vm5, %v6954_v52, %v12149_v29  ;;  %v6970_v55 = vsel %vm1893_vm5, %v6969_v27, %v12150_v50  ;;  %v10951_v52 = vld [vmem:[#allocation31] ss:$0 sm:$0xff] }
0x1e3c   :  { %v6971_v56 = vsel %vm1895_vm6, %v6970_v55, %v12155_v53  ;;  %v6956_v57 = vsel %vm1895_vm6, %v6955_v54, %v12154_v15 }
0x1e3d   :  { %v6972_v44 = vpack.c.bf16 %v6971_v56, %v6956_v57 }
0x1e3f   :  { %11771 = vmatmul.mubr.msk.bf16.vlgmr.msra.gmra.mxu1 %vm511_vm3, %v6972_v44 }
0x1e40   :  { %11790 = vmatprep.mubr.msk.bf16.mxu1 %vm13010_vm0, %v13009_v0  ;;  %11783 = vmatpush3.bf16.msra.mxu1 %v12219_v22  ;;  %v10957_v22 = vld [vmem:[#allocation25] ss:$0 sm:$0xff] }
0x1e41   :  { %11784 = vmatprep.subr.bf16.mxu1 %v13009_v0 }
0x1e44   :  { %11785 = vmatpush3.bf16.msra.mxu1 %v12220_v8 }
0x1e45   :  { %11786 = vmatprep.subr.bf16.mxu1 %v13009_v0 }
0x1e48   :  { %11787 = vmatpush3.bf16.msra.mxu1 %v12221_v10 }
0x1e49   :  { %11788 = vmatprep.subr.bf16.mxu1 %v13009_v0 }
0x1e4c   :  { %11789 = vmatpush3.bf16.msra.mxu1 %v12222_v43 }
0x1e4d   :  { %11812 = vmatprep.subr.mxu1 %v13009_v0 }
0x1eff   :  { %v7026_v7 = vpop.f32.mrf.mxu1 }
0x1f00   :  { %v7027_v59 = vadd.f32 %v10941_v58, %v7026_v7 }
0x1f01   :  { %v11772_v60 = vpop.f32.mrf.mxu1 }
0x1f02   :  { %v7033_v37 = vadd.f32 %v7027_v59, %v13973_v20 }
0x1f03   :  { %v7029_v61 = vpop.f32.mrf.mxu1 }
0x1f04   :  { %v7030_v38 = vadd.f32 %v10941_v58, %v7029_v61  ;;  %v7037_v62 = vsel %vm511_vm3, %v7033_v37, 0.0 }
0x1f05   :  { %7038 = vadd.xlane.f32.xlu0 %v7037_v62  ;;  %v11773_v63 = vpop.f32.mrf.mxu1 }
0x1f06   :  { %v7034_v1 = vadd.f32 %v7030_v38, %v13969_v19  ;;  %v12218_v19 = vld [vmem:[#allocation28] sm:$0xff]  }
0x1f07   :  { %11777 = vmatpush3.bf16.msra.mxu0 %v12218_v19 }
0x1f08   :  { %v7040_v2 = vsel %vm511_vm3, %v7034_v1, 0.0  ;;  %11794 = vmatprep.subr.bf16.mxu0 %v13009_v0 }
0x1f09   :  { %7041 = vadd.xlane.f32.xlu1 %v7040_v2 }
0x1f8e   :  { %v7039_v4 = vpop.xlane.xlu0 %7038 }
0x1f8f   :  { %v7043_v5 = vmul.f32 0.03125, %v7039_v4 }
0x1f91   :  { %v7045_v6 = vsub.f32 %v7033_v37, %v7043_v5 }
0x1f92   :  { %v7042_v9 = vpop.xlane.xlu1 %7041 }
0x1f93   :  { %v7044_v11 = vmul.f32 0.03125, %v7042_v9  ;;  %v7047_v14 = vmul.f32 %v7045_v6, %v7045_v6  ;;  %v12224_v9 = vld [vmem:[%s14659_s10 + $0x10] sm:$0xff]  }
0x1f95   :  { %v7046_v16 = vsub.f32 %v7034_v1, %v7044_v11  ;;  %v7049_v20 = vsel %vm511_vm3, %v7047_v14, 0.0 }
0x1f96   :  { %7050 = vadd.xlane.f32.xlu0 %v7049_v20 }
0x1f97   :  { %v7048_v17 = vmul.f32 %v7046_v16, %v7046_v16 }
0x1f99   :  { %v7052_v18 = vsel %vm511_vm3, %v7048_v17, 0.0 }
0x1f9a   :  { %7053 = vadd.xlane.f32.xlu0 %v7052_v18 }
0x201f   :  { %v7051_v24 = vpop.xlane.xlu0 %7050 }
0x2020   :  { %v7055_v25 = vmul.f32 0.03125, %v7051_v24 }
0x2022   :  { %v7057_v26 = vadd.f32 1e-05, %v7055_v25 }
0x2023   :  { %v7054_v28 = vpop.xlane.xlu0 %7053 }
0x2024   :  { %12393 = vrsqrt.f32 %v7057_v26  ;;  %v7056_v30 = vmul.f32 0.03125, %v7054_v28  ;;  %v10958_v28 = vld [vmem:[#allocation26] ss:$0 sm:$0xff] }
0x2026   :  { %v7058_v31 = vadd.f32 1e-05, %v7056_v30 }
0x2028   :  { %12395 = vrsqrt.f32 %v7058_v31 }
0x2031   :  { %v12394_v32 = vpop.eup %12393 }
0x2032   :  { %v7061_v33 = vmul.f32 %v12394_v32, %v7045_v6  ;;  %v12223_v6 = vld [vmem:[%s14659_s10 + $0x18] sm:$0xff]  }
0x2034   :  { %v7067_v36 = vmul.f32 %v10945_v34, %v7061_v33 }
0x2035   :  { %v12396_v13 = vpop.eup %12395 }
0x2036   :  { %v7062_v35 = vmul.f32 %v12396_v13, %v7046_v16  ;;  %v7073_v40 = vadd.f32 %v10946_v39, %v7067_v36 }
0x2038   :  { %v7068_v12 = vmul.f32 %v10945_v34, %v7062_v35  ;;  %v10963_v34 = vld [vmem:[#allocation7 + $0x1] ss:$0 sm:$0xff] }
0x203a   :  { %v7074_v41 = vadd.f32 %v10946_v39, %v7068_v12 }
0x203c   :  { %v7089_v42 = vpack.c.bf16 %v7074_v41, %v7073_v40 }
0x203e   :  { %11779 = vmatmul.mubr.msk.bf16.vlgmr.msra.gmra.mxu0 %vm511_vm3, %v7089_v42 }
0x203f   :  { %11798 = vmatprep.mubr.msk.bf16.mxu0 %vm13010_vm0, %v13009_v0  ;;  %11795 = vmatpush3.bf16.msra.mxu0 %v12223_v6 }
0x2040   :  { %11796 = vmatprep.subr.bf16.mxu0 %v13009_v0 }
0x2043   :  { %11797 = vmatpush3.bf16.msra.mxu0 %v12224_v9 }
0x2044   :  { %11802 = vmatprep.subr.mxu0 %v13009_v0 }
0x20fe   :  { %v7143_v45 = vpop.f32.mrf.mxu0 }
0x20ff   :  { %v7144_v47 = vadd.f32 %v10947_v3, %v7143_v45 }
0x2100   :  { %v11780_v46 = vpop.f32.mrf.mxu0 }
0x2101   :  { %v7150_v29 = vmax.f32 %v7144_v47, 0.0 }
0x2102   :  { %v7146_v48 = vpop.f32.mrf.mxu0 }
0x2103   :  { %v7147_v49 = vadd.f32 %v10947_v3, %v7146_v48 }
0x2104   :  { %v11781_v50 = vpop.f32.mrf.mxu0 }
0x2105   :  { %v7151_v51 = vmax.f32 %v7147_v49, 0.0 }
0x2107   :  { %v7152_v27 = vpack.c.bf16 %v7151_v51, %v7150_v29 }
0x2109   :  { %11791 = vmatmul.mubr.msk.bf16.vlgmr.msra.gmra.mxu1 %vm2122_vm7, %v7152_v27 }
0x210a   :  { %11814 = vmatprep.mubr.msk.f32.mxu1 %vm13010_vm0, %v13009_v0 }
0x21c9   :  { %v7218_v53 = vpop.f32.mrf.mxu1 }
0x21ca   :  { %v7219_v15 = vadd.f32 %v10951_v52, %v7218_v53 }
0x21cb   :  { %v11792_v54 = vpop.f32.mrf.mxu1 }
0x21cc   :  { %v7225_v55 = vadd.f32 %v7219_v15, %v7073_v40 }
0x21cd   :  { %v7221_v56 = vpop.f32.mrf.mxu1 }
0x21ce   :  { %v7222_v57 = vadd.f32 %v10951_v52, %v7221_v56  ;;  %v7229_v44 = vsel %vm511_vm3, %v7225_v55, 0.0 }
0x21cf   :  { %7230 = vadd.xlane.f32.xlu1 %v7229_v44  ;;  %v11793_v58 = vpop.f32.mrf.mxu1 }
0x21d0   :  { %v7226_v7 = vadd.f32 %v7222_v57, %v7074_v41 }
0x21d2   :  { %v7232_v59 = vsel %vm511_vm3, %v7226_v7, 0.0 }
0x21d3   :  { %7233 = vadd.xlane.f32.xlu0 %v7232_v59 }
0x2258   :  { %v7231_v60 = vpop.xlane.xlu1 %7230 }
0x2259   :  { %v7235_v37 = vmul.f32 0.03125, %v7231_v60 }
0x225b   :  { %v7237_v61 = vsub.f32 %v7225_v55, %v7235_v37 }
0x225c   :  { %v7234_v38 = vpop.xlane.xlu0 %7233 }
0x225d   :  { %v7236_v62 = vmul.f32 0.03125, %v7234_v38  ;;  %v7239_v63 = vmul.f32 %v7237_v61, %v7237_v61 }
0x225f   :  { %v7238_v1 = vsub.f32 %v7226_v7, %v7236_v62  ;;  %v7241_v2 = vsel %vm511_vm3, %v7239_v63, 0.0 }
0x2260   :  { %7242 = vadd.xlane.f32.xlu1 %v7241_v2 }
0x2261   :  { %v7240_v4 = vmul.f32 %v7238_v1, %v7238_v1 }
0x2263   :  { %v7244_v5 = vsel %vm511_vm3, %v7240_v4, 0.0 }
0x2264   :  { %7245 = vadd.xlane.f32.xlu0 %v7244_v5 }
0x22e9   :  { %v7243_v11 = vpop.xlane.xlu1 %7242 }
0x22ea   :  { %v7247_v14 = vmul.f32 0.03125, %v7243_v11 }
0x22ec   :  { %v7249_v16 = vadd.f32 1e-05, %v7247_v14 }
0x22ed   :  { %v7246_v20 = vpop.xlane.xlu0 %7245 }
0x22ee   :  { %12397 = vrsqrt.f32 %v7249_v16  ;;  %v7248_v17 = vmul.f32 0.03125, %v7246_v20 }
0x22f0   :  { %v7250_v18 = vadd.f32 1e-05, %v7248_v17 }
0x22f2   :  { %12399 = vrsqrt.f32 %v7250_v18 }
0x22fb   :  { %v12398_v23 = vpop.eup %12397 }
0x22fc   :  { %v7253_v19 = vmul.f32 %v12398_v23, %v7237_v61 }
0x22fe   :  { %v7259_v26 = vmul.f32 %v10957_v22, %v7253_v19 }
0x22ff   :  { %v12400_v24 = vpop.eup %12399 }
0x2300   :  { %v7254_v25 = vmul.f32 %v12400_v24, %v7238_v1  ;;  %v14184_v31 = vadd.f32 %v10958_v28, %v7259_v26 }
0x2302   :  { %v7260_v30 = vmul.f32 %v10957_v22, %v7254_v25 }
0x2304   :  { %v14186_v32 = vadd.f32 %v10958_v28, %v7260_v30 }
0x2306   :  { %v7273_v33 = vpack.c.bf16 %v14186_v32, %v14184_v31 }
0x2308   :  { %11799 = vmatmul.mubr.msk.bf16.vlgmr.msra.gmra.mxu0 %vm511_vm3, %v7273_v33 }
0x2309   :  { %11804 = vmatprep.mubr.msk.f32.mxu0 %vm13010_vm0, %v13009_v0 }
0x23c8   :  { %v7327_v13 = vpop.f32.mrf.mxu0 }
0x23c9   :  { %v14193_v35 = vadd.f32 %v10963_v34, %v7327_v13 }
0x23ca   :  { %v11800_v36 = vpop.f32.mrf.mxu0 }
0x23cb   :  { %7343 = vrot.lane.b32.xlu0 %v14193_v35, %s13013_s23  ;;  %7341 = vrot.lane.b32.xlu1 %v14193_v35, %s13012_s22 }
0x23cc   :  { %v7330_v39 = vpop.f32.mrf.mxu0 }
0x23cd   :  { %v14199_v12 = vadd.f32 %v10963_v34, %v7330_v39 }
0x23ce   :  { %v11801_v40 = vpop.f32.mrf.mxu0 }
0x23cf   :  { %7345 = vrot.lane.b32.xlu1 %v14193_v35, %s13011_s18  ;;  %7350 = vrot.lane.b32.xlu0 %v14199_v12, %s13013_s23 }
0x23d3   :  { %7354 = vrot.lane.b32.xlu0 %v14193_v35, %s13014_s20  ;;  %7348 = vrot.lane.b32.xlu1 %v14199_v12, %s13012_s22 }
0x23d7   :  { %7352 = vrot.lane.b32.xlu1 %v14199_v12, %s13011_s18 }
0x243d   :  { %v14211_v41 = vpop.permute.xlu0 %7343  ;;  %v14213_v42 = vpop.permute.xlu1 %7341 }
0x243e   :  { %7506 = vrot.lane.b32.xlu0 %v14211_v41, %s13014_s20  ;;  %7430 = vrot.lane.b32.xlu1 %v14213_v42, %s13014_s20 }
0x2441   :  { %v14219_v8 = vpop.permute.xlu1 %7345  ;;  %v14221_v10 = vpop.permute.xlu0 %7350 }
0x2442   :  { %7658 = vrot.lane.b32.xlu0 %v14199_v12, %s13014_s20  ;;  %7582 = vrot.lane.b32.xlu1 %v14219_v8, %s13014_s20 }
0x2445   :  { %v7355_v43 = vpop.permute.xlu0 %7354  ;;  %v14227_v3 = vpop.permute.xlu1 %7348 }
0x2446   :  { %7810 = vrot.lane.b32.xlu0 %v14221_v10, %s13014_s20  ;;  %11803 = vmatpush3.xpose.msk.msra.mxu0 %vm577_vm4, %v7355_v43 }
0x2447   :  { %7734 = vrot.lane.b32.xlu1 %v14227_v3, %s13014_s20  ;;  %11807 = vmatprep.subr.mxu0 %v13009_v0 }
0x2449   :  { %11805 = vmatmul.mubr.msk.f32.vlgmr.msra.gmra.mxu0 %vm577_vm4, %v14193_v35  ;;  %v14237_v45 = vpop.permute.xlu1 %7352 }
0x244a   :  { %11809 = vmatprep.mubr.msk.f32.mxu0 %vm13010_vm0, %v13009_v0 }
0x244b   :  { %7886 = vrot.lane.b32.xlu1 %v14237_v45, %s13014_s20 }
0x24b0   :  { %v7507_v46 = vpop.permute.xlu0 %7506  ;;  %v7431_v47 = vpop.permute.xlu1 %7430 }
0x24b1   :  { %11808 = vmatpush3.xpose.msk.msra.mxu0 %vm577_vm4, %v7431_v47  ;;  %11813 = vmatpush3.xpose.msk.msra.mxu1 %vm577_vm4, %v7507_v46 }
0x24b2   :  { %11822 = vmatprep.subr.mxu1 %v13009_v0  ;;  %11817 = vmatprep.subr.mxu0 %v13009_v0 }
0x24b4   :  { %11815 = vmatmul.mubr.msk.f32.vlgmr.msra.gmra.mxu1 %vm577_vm4, %v14211_v41  ;;  %v7659_v48 = vpop.permute.xlu0 %7658  ;;  %11810 = vmatmul.mubr.msk.f32.vlgmr.msra.gmra.mxu0 %vm577_vm4, %v14213_v42  ;;  %v7583_v49 = vpop.permute.xlu1 %7582 }
0x24b5   :  { %11818 = vmatpush3.xpose.msk.msra.mxu0 %vm577_vm4, %v7583_v49  ;;  %11823 = vmatpush3.xpose.msk.msra.mxu1 %vm577_vm4, %v7659_v48 }
0x24b6   :  { %11819 = vmatprep.mubr.msk.f32.mxu0 %vm13010_vm0, %v13009_v0  ;;  %11824 = vmatprep.mubr.msk.f32.mxu1 %vm13010_vm0, %v13009_v0 }
0x24b7   :  { %11832 = vmatprep.subr.mxu1 %v13009_v0  ;;  %11827 = vmatprep.subr.mxu0 %v13009_v0 }
0x24b8   :  { %11825 = vmatmul.mubr.msk.f32.vlgmr.msra.gmra.mxu1 %vm577_vm4, %v14199_v12  ;;  %v7811_v50 = vpop.permute.xlu0 %7810  ;;  %11820 = vmatmul.mubr.msk.f32.vlgmr.msra.gmra.mxu0 %vm577_vm4, %v14219_v8 }
0x24b9   :  { %v7735_v29 = vpop.permute.xlu1 %7734  ;;  %11833 = vmatpush3.xpose.msk.msra.mxu1 %vm577_vm4, %v7811_v50  ;;  %11829 = vmatprep.mubr.msk.f32.mxu0 %vm13010_vm0, %v13009_v0 }
0x24ba   :  { %11828 = vmatpush3.xpose.msk.msra.mxu0 %vm577_vm4, %v7735_v29  ;;  %11834 = vmatprep.mubr.msk.f32.mxu1 %vm13010_vm0, %v13009_v0 }
0x24bb   :  { %11837 = vmatprep.subr.mxu0 %v13009_v0  ;;  %11842 = vmatprep.subr.mxu1 %v13009_v0 }
0x24bc   :  { %11835 = vmatmul.mubr.msk.f32.vlgmr.msra.gmra.mxu1 %vm577_vm4, %v14221_v10 }
0x24bd   :  { %11830 = vmatmul.mubr.msk.f32.vlgmr.msra.gmra.mxu0 %vm577_vm4, %v14227_v3  ;;  %v7887_v51 = vpop.permute.xlu1 %7886  ;;  %11844 = vmatprep.mubr.msk.f32.mxu1 %vm13010_vm0, %v13009_v0 }
0x24be   :  { %11838 = vmatpush3.xpose.msk.msra.mxu0 %vm577_vm4, %v7887_v51  ;;  %11839 = vmatprep.mubr.msk.f32.mxu0 %vm13010_vm0, %v13009_v0 }
0x24bf   :  { %11847 = vmatprep.subr.mxu0 %v13009_v0 }
0x24c1   :  { %11840 = vmatmul.mubr.msk.f32.vlgmr.msra.gmra.mxu0 %vm577_vm4, %v14237_v45 }
0x24c2   :  { %11849 = vmatprep.mubr.msk.f32.mxu0 %vm13010_vm0, %v13009_v0 }
0x2509   :  { %v7426_v27 = vpop.f32.mrf.mxu0 }
0x250a   :  { %v7962_v52 = vsel %vm577_vm4, %v7426_v27, -inf }
0x250b   :  { %7963 = vmax.xlane.f32.xlu0 %v7962_v52  ;;  %v11806_v53 = vpop.f32.mrf.mxu0 }
0x2574   :  { %v7502_v15 = vpop.f32.mrf.mxu0  ;;  %v7578_v54 = vpop.f32.mrf.mxu1 }
0x2575   :  { %v7968_v55 = vsel %vm577_vm4, %v7578_v54, -inf  ;;  %v7965_v56 = vsel %vm577_vm4, %v7502_v15, -inf }
0x2576   :  { %v11816_v57 = vpop.f32.mrf.mxu1  ;;  %7969 = vmax.xlane.f32.xlu0 %v7968_v55  ;;  %7966 = vmax.xlane.f32.xlu1 %v7965_v56  ;;  %v11811_v44 = vpop.f32.mrf.mxu0 }
0x2578   :  { %v7654_v58 = vpop.f32.mrf.mxu0  ;;  %v7730_v7 = vpop.f32.mrf.mxu1 }
0x2579   :  { %v7974_v59 = vsel %vm577_vm4, %v7730_v7, -inf  ;;  %v7971_v60 = vsel %vm577_vm4, %v7654_v58, -inf }
0x257a   :  { %v11826_v37 = vpop.f32.mrf.mxu1  ;;  %7975 = vmax.xlane.f32.xlu1 %v7974_v59  ;;  %7972 = vmax.xlane.f32.xlu0 %v7971_v60  ;;  %v11821_v61 = vpop.f32.mrf.mxu0 }
0x257c   :  { %v7882_v38 = vpop.f32.mrf.mxu1 }
0x257d   :  { %v7806_v62 = vpop.f32.mrf.mxu0  ;;  %v7980_v63 = vsel %vm577_vm4, %v7882_v38, -inf }
0x257e   :  { %v11836_v1 = vpop.f32.mrf.mxu1  ;;  %7981 = vmax.xlane.f32.xlu1 %v7980_v63  ;;  %v7977_v2 = vsel %vm577_vm4, %v7806_v62, -inf }
0x257f   :  { %7978 = vmax.xlane.f32.xlu0 %v7977_v2  ;;  %v11831_v4 = vpop.f32.mrf.mxu0 }
0x2581   :  { %v7958_v5 = vpop.f32.mrf.mxu0 }
0x2582   :  { %v7983_v6 = vsel %vm577_vm4, %v7958_v5, -inf }
0x2583   :  { %7984 = vmax.xlane.f32.xlu0 %v7983_v6  ;;  %v11841_v9 = vpop.f32.mrf.mxu0 }
0x258f   :  { %8050 = vrot.lane.b32.xlu1 %v14193_v35, %s12999_s29 }
0x2593   :  { %8202 = vrot.lane.b32.xlu1 %v14211_v41, %s12999_s29 }
0x2594   :  { %v7964_v11 = vpop.xlane.xlu0 %7963 }
0x2595   :  { %v7986_v14 = vsub.f32 %v7426_v27, %v7964_v11 }
0x2597   :  { %8278 = vrot.lane.b32.xlu1 %v14219_v8, %s12999_s29  ;;  %v7994_v16 = vmul.f32 1.442695, %v7986_v14 }
0x2599   :  { %8126 = vrot.lane.b32.xlu0 %v14213_v42, %s12999_s29  ;;  %12401 = vpow2.f32 %v7994_v16 }
0x259b   :  { %8430 = vrot.lane.b32.xlu1 %v14227_v3, %s12999_s29 }
0x259d   :  { %8354 = vrot.lane.b32.xlu0 %v14199_v12, %s12999_s29 }
0x25a6   :  { %v14305_v20 = vpop.eup %12401 }
0x25a7   :  { %v8010_v17 = vsel %vm577_vm4, %v14305_v20, 0.0 }
0x25bf   :  { %8011 = vadd.xlane.f32.xlu1 %v8010_v17 }
0x25ff   :  { %v7970_v18 = vpop.xlane.xlu0 %7969  ;;  %v7967_v23 = vpop.xlane.xlu1 %7966 }
0x2600   :  { %v7988_v19 = vsub.f32 %v7578_v54, %v7970_v18  ;;  %v7987_v22 = vsub.f32 %v7502_v15, %v7967_v23 }
0x2602   :  { %v7998_v24 = vmul.f32 1.442695, %v7988_v19  ;;  %v7996_v25 = vmul.f32 1.442695, %v7987_v22 }
0x2603   :  { %v7976_v26 = vpop.xlane.xlu1 %7975  ;;  %v7973_v28 = vpop.xlane.xlu0 %7972 }
0x2604   :  { %12403 = vpow2.f32 %v7998_v24  ;;  %v7990_v30 = vsub.f32 %v7730_v7, %v7976_v26  ;;  %v7989_v33 = vsub.f32 %v7654_v58, %v7973_v28 }
0x2605   :  { %12405 = vpow2.f32 %v7996_v25 }
0x2606   :  { %v8002_v34 = vmul.f32 1.442695, %v7990_v30  ;;  %v8000_v13 = vmul.f32 1.442695, %v7989_v33 }
0x2607   :  { %v7982_v35 = vpop.xlane.xlu1 %7981 }
0x2608   :  { %12407 = vpow2.f32 %v8002_v34  ;;  %v7992_v36 = vsub.f32 %v7882_v38, %v7982_v35  ;;  %v7979_v39 = vpop.xlane.xlu0 %7978  ;;  %v12225_v34 = vld [vmem:[%s14660_s30 + $0x18] sm:$0xff]  }
0x2609   :  { %12409 = vpow2.f32 %v8000_v13  ;;  %v7991_v12 = vsub.f32 %v7806_v62, %v7979_v39 }
0x260a   :  { %v8006_v40 = vmul.f32 1.442695, %v7992_v36 }
0x260b   :  { %v8004_v41 = vmul.f32 1.442695, %v7991_v12  ;;  %v8051_v42 = vpop.permute.xlu1 %8050  ;;  %v12226_v12 = vld [vmem:[%s14660_s30 + $0x10] sm:$0xff]  }
0x260c   :  { %12411 = vpow2.f32 %v8006_v40  ;;  %v7985_v8 = vpop.xlane.xlu0 %7984  ;;  %11843 = vmatpush3.msra.mxu1 %v8051_v42 }
0x260d   :  { %12413 = vpow2.f32 %v8004_v41  ;;  %v7993_v43 = vsub.f32 %v7958_v5, %v7985_v8  ;;  %11852 = vmatprep.subr.mxu1 %v13009_v0 }
0x260f   :  { %v8008_v3 = vmul.f32 1.442695, %v7993_v43  ;;  %v8203_v44 = vpop.permute.xlu1 %8202 }
0x2610   :  { %v8127_v46 = vpop.permute.xlu0 %8126 }
0x2611   :  { %v12404_v47 = vpop.eup %12403  ;;  %12415 = vpow2.f32 %v8008_v3  ;;  %11848 = vmatpush3.msra.mxu0 %v8127_v46 }
0x2612   :  { %v12406_v48 = vpop.eup %12405  ;;  %v8016_v49 = vsel %vm577_vm4, %v12404_v47, 0.0  ;;  %11857 = vmatprep.subr.mxu0 %v13009_v0 }
0x2613   :  { %8017 = vadd.xlane.f32.xlu1 %v8016_v49  ;;  %v8013_v50 = vsel %vm577_vm4, %v12406_v48, 0.0  ;;  %v8279_v58 = vpop.permute.xlu1 %8278 }
0x2614   :  { %8014 = vadd.xlane.f32.xlu0 %v8013_v50 }
0x2615   :  { %v12408_v29 = vpop.eup %12407 }
0x2616   :  { %v12410_v51 = vpop.eup %12409  ;;  %v8022_v27 = vsel %vm577_vm4, %v12408_v29, 0.0 }
0x2617   :  { %8023 = vadd.xlane.f32.xlu1 %v8022_v27  ;;  %v8019_v52 = vsel %vm577_vm4, %v12410_v51, 0.0  ;;  %v8431_v7 = vpop.permute.xlu1 %8430 }
0x2618   :  { %8020 = vadd.xlane.f32.xlu0 %v8019_v52 }
0x2619   :  { %v12412_v53 = vpop.eup %12411 }
0x261a   :  { %v12414_v15 = vpop.eup %12413  ;;  %v8028_v54 = vsel %vm577_vm4, %v12412_v53, 0.0 }
0x261b   :  { %8029 = vadd.xlane.f32.xlu1 %v8028_v54  ;;  %v8025_v55 = vsel %vm577_vm4, %v12414_v15, 0.0 }
0x261c   :  { %8026 = vadd.xlane.f32.xlu0 %v8025_v55 }
0x261e   :  { %v14317_v56 = vpop.eup %12415 }
0x261f   :  { %v8031_v57 = vsel %vm577_vm4, %v14317_v56, 0.0 }
0x2620   :  { %8032 = vadd.xlane.f32.xlu0 %v8031_v57 }
0x262c   :  { %8582 = vrot.lane.b32.xlu1 %v14237_v45, %s12999_s29  ;;  %v8355_v45 = vpop.permute.xlu0 %8354 }
0x2636   :  { %8506 = vrot.lane.b32.xlu0 %v14221_v10, %s12999_s29 }
0x2648   :  { %v8012_v59 = vpop.xlane.xlu1 %8011 }
0x2649   :  { %12417 = vrcp.f32 %v8012_v59 }
0x2656   :  { %v12418_v60 = vpop.eup %12417 }
0x2657   :  { %v8042_v37 = vmul.f32 %v12418_v60, %v14305_v20 }
0x2659   :  { %11845 = vmatmul.mubr.msk.f32.vlgmr.msra.gmra.mxu1 %vm577_vm4, %v8042_v37 }
0x265a   :  { %11853 = vmatpush3.msra.mxu1 %v8203_v44  ;;  %11854 = vmatprep.mubr.msk.f32.mxu1 %vm13010_vm0, %v13009_v0 }
0x265b   :  { %11862 = vmatprep.subr.mxu1 %v13009_v0 }
0x269c   :  { %v8018_v61 = vpop.xlane.xlu1 %8017 }
0x269d   :  { %12419 = vrcp.f32 %v8018_v61  ;;  %v8015_v10 = vpop.xlane.xlu0 %8014 }
0x269e   :  { %12421 = vrcp.f32 %v8015_v10  ;;  %v12228_v10 = vld [vmem:[#allocation13 + $0x10] sm:$0xff]  }
0x26a0   :  { %v8024_v38 = vpop.xlane.xlu1 %8023 }
0x26a1   :  { %12423 = vrcp.f32 %v8024_v38  ;;  %v8021_v62 = vpop.xlane.xlu0 %8020  ;;  %v10995_v38 = vld [vmem:[#allocation8 + $0x1] ss:$0 sm:$0xff] }
0x26a2   :  { %12425 = vrcp.f32 %v8021_v62 }
0x26a4   :  { %v8030_v63 = vpop.xlane.xlu1 %8029 }
0x26a5   :  { %12427 = vrcp.f32 %v8030_v63  ;;  %v8027_v1 = vpop.xlane.xlu0 %8026 }
0x26a6   :  { %12429 = vrcp.f32 %v8027_v1 }
0x26a8   :  { %v8583_v24 = vpop.permute.xlu1 %8582 }
0x26a9   :  { %v8033_v2 = vpop.xlane.xlu0 %8032 }
0x26aa   :  { %v12420_v4 = vpop.eup %12419  ;;  %12431 = vrcp.f32 %v8033_v2 }
0x26ab   :  { %v12422_v5 = vpop.eup %12421  ;;  %v8044_v6 = vmul.f32 %v12420_v4, %v12404_v47 }
0x26ac   :  { %v8043_v9 = vmul.f32 %v12422_v5, %v12406_v48 }
0x26ad   :  { %11855 = vmatmul.mubr.msk.f32.vlgmr.msra.gmra.mxu1 %vm577_vm4, %v8044_v6  ;;  %v8507_v17 = vpop.permute.xlu0 %8506 }
0x26ae   :  { %v12424_v11 = vpop.eup %12423  ;;  %11850 = vmatmul.mubr.msk.f32.vlgmr.msra.gmra.mxu0 %vm577_vm4, %v8043_v9  ;;  %11863 = vmatpush3.msra.mxu1 %v8355_v45  ;;  %v12227_v45 = vld [vmem:[#allocation13 + $0x18] sm:$0xff]  }
0x26af   :  { %v12426_v14 = vpop.eup %12425  ;;  %11858 = vmatpush3.msra.mxu0 %v8279_v58  ;;  %11859 = vmatprep.mubr.msk.f32.mxu0 %vm13010_vm0, %v13009_v0  ;;  %v8046_v16 = vmul.f32 %v12424_v11, %v12408_v29 }
0x26b0   :  { %v8045_v20 = vmul.f32 %v12426_v14, %v12410_v51  ;;  %11864 = vmatprep.mubr.msk.f32.mxu1 %vm13010_vm0, %v13009_v0  ;;  %11867 = vmatprep.subr.mxu0 %v13009_v0 }
0x26b1   :  { %11872 = vmatprep.subr.mxu1 %v13009_v0  ;;  %11865 = vmatmul.mubr.msk.f32.vlgmr.msra.gmra.mxu1 %vm577_vm4, %v8046_v16 }
0x26b2   :  { %v12428_v18 = vpop.eup %12427  ;;  %11860 = vmatmul.mubr.msk.f32.vlgmr.msra.gmra.mxu0 %vm577_vm4, %v8045_v20  ;;  %11873 = vmatpush3.msra.mxu1 %v8507_v17 }
0x26b3   :  { %v12430_v23 = vpop.eup %12429  ;;  %11868 = vmatpush3.msra.mxu0 %v8431_v7  ;;  %11869 = vmatprep.mubr.msk.f32.mxu0 %vm13010_vm0, %v13009_v0  ;;  %v8048_v19 = vmul.f32 %v12428_v18, %v12412_v53 }
0x26b4   :  { %v8047_v22 = vmul.f32 %v12430_v23, %v12414_v15  ;;  %11874 = vmatprep.mubr.msk.f32.mxu1 %vm13010_vm0, %v13009_v0  ;;  %11877 = vmatprep.subr.mxu0 %v13009_v0 }
0x26b5   :  { %11875 = vmatmul.mubr.msk.f32.vlgmr.msra.gmra.mxu1 %vm577_vm4, %v8048_v19  ;;  %11882 = vmatprep.subr.bf16.mxu1 %v13009_v0 }
0x26b6   :  { %11870 = vmatmul.mubr.msk.f32.vlgmr.msra.gmra.mxu0 %vm577_vm4, %v8047_v22  ;;  %11886 = vmatprep.mubr.msk.bf16.mxu1 %vm13010_vm0, %v13009_v0 }
0x26b7   :  { %v12432_v25 = vpop.eup %12431  ;;  %11878 = vmatpush3.msra.mxu0 %v8583_v24  ;;  %11879 = vmatprep.mubr.msk.f32.mxu0 %vm13010_vm0, %v13009_v0 }
0x26b8   :  { %v8049_v26 = vmul.f32 %v12432_v25, %v14317_v56  ;;  %11890 = vmatprep.subr.bf16.mxu0 %v13009_v0  ;;  %11883 = vmatpush3.bf16.msra.mxu1 %v12225_v34 }
0x26b9   :  { %11884 = vmatprep.subr.bf16.mxu1 %v13009_v0 }
0x26ba   :  { %11880 = vmatmul.mubr.msk.f32.vlgmr.msra.gmra.mxu0 %vm577_vm4, %v8049_v26 }
0x26bb   :  { %11894 = vmatprep.mubr.msk.bf16.mxu0 %vm13010_vm0, %v13009_v0 }
0x26bc   :  { %11885 = vmatpush3.bf16.msra.mxu1 %v12226_v12 }
0x26bd   :  { %11898 = vmatprep.subr.bf16.mxu1 %v13009_v0 }
0x2719   :  { %v8122_v28 = vpop.f32.mrf.mxu1 }
0x271b   :  { %v11846_v30 = vpop.f32.mrf.mxu1 }
0x271c   :  { %v11005_v30 = vld [vmem:[#allocation14 + $0x1] ss:$0 sm:$0xff] }
0x276d   :  { %v8274_v33 = vpop.f32.mrf.mxu1 }
0x276e   :  { %v8198_v13 = vpop.f32.mrf.mxu0 }
0x276f   :  { %v11856_v35 = vpop.f32.mrf.mxu1 }
0x2770   :  { %v11851_v36 = vpop.f32.mrf.mxu0  ;;  %v12230_v35 = vld [vmem:[#allocation10 + $0x10] sm:$0xff]  }
0x2771   :  { %v8426_v39 = vpop.f32.mrf.mxu1 }
0x2772   :  { %v8350_v40 = vpop.f32.mrf.mxu0 }
0x2773   :  { %v11866_v41 = vpop.f32.mrf.mxu1 }
0x2774   :  { %v11861_v42 = vpop.f32.mrf.mxu0 }
0x2775   :  { %v8578_v8 = vpop.f32.mrf.mxu1 }
0x2776   :  { %v8502_v43 = vpop.f32.mrf.mxu0  ;;  %v12161_v3 = vpack.i.bf16 %v8578_v8, %v8274_v33 }
0x2777   :  { %v12156_v46 = vpack.i.bf16 %v8502_v43, %v8198_v13  ;;  %v11876_v47 = vpop.f32.mrf.mxu1  ;;  %v12229_v13 = vld [vmem:[#allocation10 + $0x18] sm:$0xff]  }
0x2778   :  { %v11871_v48 = vpop.f32.mrf.mxu0  ;;  %12162 = vrot.lane.b32.xlu1 %v12161_v3, %s13015_s21  ;;  %11891 = vmatpush3.bf16.msra.mxu0 %v12229_v13 }
0x2779   :  { %12157 = vrot.lane.b32.xlu0 %v12156_v46, %s13016_s28  ;;  %11892 = vmatprep.subr.bf16.mxu0 %v13009_v0  ;;  %v10999_v46 = vld [vmem:[#allocation19 + $0x1] ss:$0 sm:$0xff] }
0x277a   :  { %v8654_v49 = vpop.f32.mrf.mxu0 }
0x277b   :  { %v12166_v50 = vpack.i.bf16 %v8654_v49, %v8350_v40 }
0x277c   :  { %v11881_v29 = vpop.f32.mrf.mxu0  ;;  %11893 = vmatpush3.bf16.msra.mxu0 %v12230_v35 }
0x277d   :  { %12167 = vrot.lane.b32.xlu0 %v12166_v50, %s13017_s17  ;;  %11906 = vmatprep.subr.mxu0 %v13009_v0  ;;  %v11000_v50 = vld [vmem:[#allocation20 + $0x1] ss:$0 sm:$0xff] }
0x27ea   :  { %v12163_v51 = vpop.permute.xlu1 %12162 }
0x27eb   :  { %v12158_v27 = vpop.permute.xlu0 %12157  ;;  %v12165_v15 = vunpack.i.h.bf16 %v12163_v51  ;;  %v12164_v54 = vunpack.i.l.bf16 %v12163_v51 }
0x27ec   :  { %v12160_v52 = vunpack.i.h.bf16 %v12158_v27  ;;  %v12159_v53 = vunpack.i.l.bf16 %v12158_v27 }
0x27ee   :  { %v8685_v55 = vsel %vm577_vm4, %v8426_v39, %v12160_v52  ;;  %v8670_v56 = vsel %vm577_vm4, %v8122_v28, %v12159_v53  ;;  %v11001_v53 = vld [vmem:[#allocation11 + $0x1] ss:$0 sm:$0xff] }
0x27ef   :  { %v12168_v57 = vpop.permute.xlu0 %12167  ;;  %v8671_v7 = vsel %vm1893_vm5, %v8670_v56, %v12164_v54  ;;  %v8686_v59 = vsel %vm1893_vm5, %v8685_v55, %v12165_v15 }
0x27f0   :  { %v12170_v44 = vunpack.i.h.bf16 %v12168_v57  ;;  %v12169_v58 = vunpack.i.l.bf16 %v12168_v57 }
0x27f2   :  { %v8687_v60 = vsel %vm1895_vm6, %v8686_v59, %v12170_v44  ;;  %v8672_v37 = vsel %vm1895_vm6, %v8671_v7, %v12169_v58 }
0x27f3   :  { %v8688_v61 = vpack.c.bf16 %v8687_v60, %v8672_v37 }
0x27f5   :  { %11887 = vmatmul.mubr.msk.bf16.vlgmr.msra.gmra.mxu1 %vm511_vm3, %v8688_v61 }
0x27f6   :  { %11899 = vmatpush3.bf16.msra.mxu1 %v12227_v45  ;;  %11902 = vmatprep.mubr.msk.bf16.mxu1 %vm13010_vm0, %v13009_v0 }
0x27f7   :  { %11900 = vmatprep.subr.bf16.mxu1 %v13009_v0 }
0x27fa   :  { %11901 = vmatpush3.bf16.msra.mxu1 %v12228_v10 }
0x27fb   :  { %11916 = vmatprep.subr.mxu1 %v13009_v0 }
0x27fd   :  { %11903 = vmatmul.mubr.msk.bf16.vlgmr.msra.gmra.mxu1 %vm511_vm3, %v13967_v21 }
0x27fe   :  { %11918 = vmatprep.mubr.msk.f32.mxu1 %vm13010_vm0, %v13009_v0 }
0x28b5   :  { %v8742_v62 = vpop.f32.mrf.mxu1 }
0x28b6   :  { %v8743_v63 = vadd.f32 %v10995_v38, %v8742_v62 }
0x28b7   :  { %v11888_v1 = vpop.f32.mrf.mxu1 }
0x28b8   :  { %v8749_v2 = vadd.f32 %v8743_v63, %v14184_v31 }
0x28b9   :  { %v8745_v4 = vpop.f32.mrf.mxu1 }
0x28ba   :  { %v8746_v5 = vadd.f32 %v10995_v38, %v8745_v4  ;;  %v8753_v6 = vsel %vm511_vm3, %v8749_v2, 0.0 }
0x28bb   :  { %8754 = vadd.xlane.f32.xlu1 %v8753_v6  ;;  %v11889_v9 = vpop.f32.mrf.mxu1 }
0x28bc   :  { %v8750_v11 = vadd.f32 %v8746_v5, %v14186_v32 }
0x28bd   :  { %v8914_v14 = vpop.f32.mrf.mxu1 }
0x28be   :  { %v8756_v21 = vsel %vm511_vm3, %v8750_v11, 0.0  ;;  %v14385_v33 = vadd.f32 %v11005_v30, %v8914_v14 }
0x28bf   :  { %8757 = vadd.xlane.f32.xlu0 %v8756_v21  ;;  %v11904_v16 = vpop.f32.mrf.mxu1 }
0x28c1   :  { %v8917_v20 = vpop.f32.mrf.mxu1 }
0x28c2   :  { %v14391_v34 = vadd.f32 %v11005_v30, %v8917_v20 }
0x28c3   :  { %v11905_v17 = vpop.f32.mrf.mxu1 }
0x2944   :  { %v8755_v18 = vpop.xlane.xlu1 %8754 }
0x2945   :  { %v8759_v23 = vmul.f32 0.03125, %v8755_v18 }
0x2947   :  { %v8761_v19 = vsub.f32 %v8749_v2, %v8759_v23 }
0x2948   :  { %v8758_v22 = vpop.xlane.xlu0 %8757 }
0x2949   :  { %v8760_v31 = vmul.f32 0.03125, %v8758_v22  ;;  %v8763_v24 = vmul.f32 %v8761_v19, %v8761_v19 }
0x294b   :  { %v8762_v25 = vsub.f32 %v8750_v11, %v8760_v31  ;;  %v8765_v26 = vsel %vm511_vm3, %v8763_v24, 0.0 }
0x294c   :  { %8766 = vadd.xlane.f32.xlu0 %v8765_v26 }
0x294d   :  { %v8764_v28 = vmul.f32 %v8762_v25, %v8762_v25 }
0x294f   :  { %v8768_v32 = vsel %vm511_vm3, %v8764_v28, 0.0 }
0x2950   :  { %8769 = vadd.xlane.f32.xlu1 %v8768_v32 }
0x2961   :  { %8944 = vrot.lane.b32.xlu1 %v14385_v33, %s13013_s23 }
0x2962   :  { %8942 = vrot.lane.b32.xlu0 %v14385_v33, %s13012_s22 }
0x2965   :  { %8949 = vrot.lane.b32.xlu1 %v14391_v34, %s13012_s22 }
0x2966   :  { %8946 = vrot.lane.b32.xlu0 %v14385_v33, %s13011_s18 }
0x296a   :  { %8953 = vrot.lane.b32.xlu0 %v14391_v34, %s13011_s18 }
0x29d5   :  { %v8767_v36 = vpop.xlane.xlu0 %8766 }
0x29d6   :  { %v8771_v39 = vmul.f32 0.03125, %v8767_v36 }
0x29d8   :  { %v8773_v12 = vadd.f32 1e-05, %v8771_v39 }
0x29d9   :  { %v8770_v40 = vpop.xlane.xlu1 %8769  ;;  %v14420_v56 = vpop.permute.xlu0 %8942 }
0x29da   :  { %12433 = vrsqrt.f32 %v8773_v12  ;;  %v8772_v41 = vmul.f32 0.03125, %v8770_v40 }
0x29dc   :  { %v8774_v42 = vadd.f32 1e-05, %v8772_v41 }
0x29dd   :  { %v14401_v8 = vpop.permute.xlu1 %8944  ;;  %v14434_v7 = vpop.permute.xlu0 %8946 }
0x29de   :  { %12435 = vrsqrt.f32 %v8774_v42  ;;  %11917 = vmatpush3.xpose.msk.msra.mxu1 %vm577_vm4, %v14401_v8 }
0x29df   :  { %11926 = vmatprep.subr.mxu1 %v13009_v0 }
0x29e1   :  { %v14436_v59 = vpop.permute.xlu0 %8953  ;;  %v14438_v60 = vpop.permute.xlu1 %8949 }
0x29e7   :  { %v12434_v43 = vpop.eup %12433 }
0x29e8   :  { %v8777_v3 = vmul.f32 %v12434_v43, %v8761_v19 }
0x29ea   :  { %v8783_v48 = vmul.f32 %v10999_v46, %v8777_v3 }
0x29eb   :  { %v12436_v47 = vpop.eup %12435 }
0x29ec   :  { %v8778_v49 = vmul.f32 %v12436_v47, %v8762_v25  ;;  %v14406_v51 = vadd.f32 %v11000_v50, %v8783_v48 }
0x29ee   :  { %v8784_v29 = vmul.f32 %v10999_v46, %v8778_v49 }
0x29f0   :  { %v14408_v27 = vadd.f32 %v11000_v50, %v8784_v29 }
0x29f2   :  { %v8797_v52 = vpack.c.bf16 %v14408_v27, %v14406_v51 }
0x29f4   :  { %11895 = vmatmul.mubr.msk.bf16.vlgmr.msra.gmra.mxu0 %vm511_vm3, %v8797_v52 }
0x29f5   :  { %11907 = vmatpush3.xpose.msk.msra.mxu0 %vm577_vm4, %v14385_v33  ;;  %11908 = vmatprep.mubr.msk.f32.mxu0 %vm13010_vm0, %v13009_v0 }
0x29f6   :  { %11911 = vmatprep.subr.mxu0 %v13009_v0 }
0x2ab4   :  { %v8851_v15 = vpop.f32.mrf.mxu0 }
0x2ab5   :  { %v8852_v54 = vadd.f32 %v11001_v53, %v8851_v15 }
0x2ab6   :  { %v11896_v55 = vpop.f32.mrf.mxu0 }
0x2ab7   :  { %8932 = vrot.lane.b32.xlu0 %v8852_v54, %s13011_s18  ;;  %8928 = vrot.lane.b32.xlu1 %v8852_v54, %s13012_s22 }
0x2ab8   :  { %11909 = vmatmul.mubr.msk.f32.vlgmr.msra.gmra.mxu0 %vm577_vm4, %v8852_v54  ;;  %v8854_v57 = vpop.f32.mrf.mxu0 }
0x2ab9   :  { %11912 = vmatpush3.xpose.msk.msra.mxu0 %vm577_vm4, %v14420_v56  ;;  %v8855_v44 = vadd.f32 %v11001_v53, %v8854_v57  ;;  %11913 = vmatprep.mubr.msk.f32.mxu0 %vm13010_vm0, %v13009_v0 }
0x2aba   :  { %v11897_v58 = vpop.f32.mrf.mxu0  ;;  %11921 = vmatprep.subr.mxu0 %v13009_v0 }
0x2abb   :  { %8930 = vrot.lane.b32.xlu1 %v8852_v54, %s13013_s23  ;;  %8935 = vrot.lane.b32.xlu0 %v8855_v44, %s13012_s22 }
0x2abf   :  { %8951 = vrot.lane.b32.xlu1 %v14391_v34, %s13013_s23  ;;  %8939 = vrot.lane.b32.xlu0 %v8855_v44, %s13011_s18 }
0x2ac3   :  { %8937 = vrot.lane.b32.xlu1 %v8855_v44, %s13013_s23 }
0x2b29   :  { %v8933_v37 = vpop.permute.xlu0 %8932  ;;  %v8929_v45 = vpop.permute.xlu1 %8928 }
0x2b2a   :  { %11914 = vmatmul.mubr.msk.f32.vlgmr.msra.gmra.mxu0 %vm577_vm4, %v8929_v45 }
0x2b2b   :  { %11922 = vmatpush3.xpose.msk.msra.mxu0 %vm577_vm4, %v14434_v7  ;;  %11923 = vmatprep.mubr.msk.f32.mxu0 %vm13010_vm0, %v13009_v0 }
0x2b2c   :  { %11931 = vmatprep.subr.mxu0 %v13009_v0 }
0x2b2d   :  { %v8931_v61 = vpop.permute.xlu1 %8930  ;;  %v8936_v10 = vpop.permute.xlu0 %8935 }
0x2b2e   :  { %11919 = vmatmul.mubr.msk.f32.vlgmr.msra.gmra.mxu1 %vm577_vm4, %v8931_v61  ;;  %11924 = vmatmul.mubr.msk.f32.vlgmr.msra.gmra.mxu0 %vm577_vm4, %v8933_v37 }
0x2b2f   :  { %11927 = vmatpush3.xpose.msk.msra.mxu1 %vm577_vm4, %v14391_v34  ;;  %11932 = vmatpush3.xpose.msk.msra.mxu0 %vm577_vm4, %v14438_v60 }
0x2b30   :  { %11928 = vmatprep.mubr.msk.f32.mxu1 %vm13010_vm0, %v13009_v0  ;;  %11936 = vmatprep.subr.mxu1 %v13009_v0 }
0x2b31   :  { %v14455_v38 = vpop.permute.xlu1 %8951  ;;  %11933 = vmatprep.mubr.msk.f32.mxu0 %vm13010_vm0, %v13009_v0  ;;  %11941 = vmatprep.subr.mxu0 %v13009_v0  ;;  %v8940_v62 = vpop.permute.xlu0 %8939 }
0x2b32   :  { %11929 = vmatmul.mubr.msk.f32.vlgmr.msra.gmra.mxu1 %vm577_vm4, %v8855_v44  ;;  %11934 = vmatmul.mubr.msk.f32.vlgmr.msra.gmra.mxu0 %vm577_vm4, %v8936_v10 }
0x2b33   :  { %11937 = vmatpush3.xpose.msk.msra.mxu1 %vm577_vm4, %v14455_v38  ;;  %11942 = vmatpush3.xpose.msk.msra.mxu0 %vm577_vm4, %v14436_v59 }
0x2b34   :  { %11938 = vmatprep.mubr.msk.f32.mxu1 %vm13010_vm0, %v13009_v0  ;;  %11943 = vmatprep.mubr.msk.f32.mxu0 %vm13010_vm0, %v13009_v0 }
0x2b35   :  { %v8938_v63 = vpop.permute.xlu1 %8937  ;;  %11946 = vmatprep.subr.mxu1 %v13009_v0  ;;  %11951 = vmatprep.subr.mxu0 %v13009_v0 }
0x2b36   :  { %11939 = vmatmul.mubr.msk.f32.vlgmr.msra.gmra.mxu1 %vm577_vm4, %v8938_v63  ;;  %11944 = vmatmul.mubr.msk.f32.vlgmr.msra.gmra.mxu0 %vm577_vm4, %v8940_v62 }
0x2b37   :  { %11948 = vmatprep.mubr.msk.f32.mxu1 %vm13010_vm0, %v13009_v0  ;;  %11953 = vmatprep.mubr.msk.f32.mxu0 %vm13010_vm0, %v13009_v0 }
0x2b78   :  { %v9025_v1 = vpop.f32.mrf.mxu0 }
0x2b79   :  { %v9547_v2 = vsel %vm577_vm4, %v9025_v1, -inf }
0x2b7a   :  { %9548 = vmax.xlane.f32.xlu1 %v9547_v2  ;;  %v11910_v4 = vpop.f32.mrf.mxu0 }
0x2bea   :  { %v9099_v5 = vpop.f32.mrf.mxu0 }
0x2beb   :  { %v9550_v6 = vsel %vm577_vm4, %v9099_v5, -inf }
0x2bec   :  { %9551 = vmax.xlane.f32.xlu0 %v9550_v6  ;;  %v11915_v9 = vpop.f32.mrf.mxu0 }
0x2bee   :  { %v9173_v11 = vpop.f32.mrf.mxu1  ;;  %v9247_v14 = vpop.f32.mrf.mxu0 }
0x2bef   :  { %v9553_v21 = vsel %vm577_vm4, %v9173_v11, -inf  ;;  %v9556_v16 = vsel %vm577_vm4, %v9247_v14, -inf }
0x2bf0   :  { %v11920_v20 = vpop.f32.mrf.mxu1  ;;  %9554 = vmax.xlane.f32.xlu0 %v9553_v21  ;;  %9557 = vmax.xlane.f32.xlu1 %v9556_v16  ;;  %v11925_v17 = vpop.f32.mrf.mxu0 }
0x2bf2   :  { %v9321_v18 = vpop.f32.mrf.mxu1  ;;  %v9395_v23 = vpop.f32.mrf.mxu0 }
0x2bf3   :  { %v9559_v19 = vsel %vm577_vm4, %v9321_v18, -inf  ;;  %v9562_v22 = vsel %vm577_vm4, %v9395_v23, -inf }
0x2bf4   :  { %v11930_v31 = vpop.f32.mrf.mxu1  ;;  %9560 = vmax.xlane.f32.xlu0 %v9559_v19  ;;  %9563 = vmax.xlane.f32.xlu1 %v9562_v22  ;;  %v11935_v24 = vpop.f32.mrf.mxu0 }
0x2bf6   :  { %v9469_v25 = vpop.f32.mrf.mxu1  ;;  %v9543_v26 = vpop.f32.mrf.mxu0 }
0x2bf7   :  { %v9565_v28 = vsel %vm577_vm4, %v9469_v25, -inf  ;;  %v9568_v32 = vsel %vm577_vm4, %v9543_v26, -inf }
0x2bf8   :  { %v11940_v30 = vpop.f32.mrf.mxu1  ;;  %9566 = vmax.xlane.f32.xlu0 %v9565_v28  ;;  %9569 = vmax.xlane.f32.xlu1 %v9568_v32  ;;  %v11945_v13 = vpop.f32.mrf.mxu0 }
0x2c03   :  { %v9549_v35 = vpop.xlane.xlu1 %9548 }
0x2c04   :  { %v9571_v36 = vsub.f32 %v9025_v1, %v9549_v35 }
0x2c06   :  { %v9579_v39 = vmul.f32 1.442695, %v9571_v36 }
0x2c08   :  { %12437 = vpow2.f32 %v9579_v39 }
0x2c09   :  { %9711 = vrot.lane.b32.xlu1 %v14420_v56, %s13014_s20 }
0x2c0d   :  { %9787 = vrot.lane.b32.xlu1 %v14401_v8, %s13014_s20 }
0x2c0e   :  { %9635 = vrot.lane.b32.xlu0 %v14385_v33, %s13014_s20 }
0x2c11   :  { %9939 = vrot.lane.b32.xlu1 %v14391_v34, %s13014_s20 }
0x2c12   :  { %9863 = vrot.lane.b32.xlu0 %v14434_v7, %s13014_s20 }
0x2c15   :  { %v14498_v12 = vpop.eup %12437 }
0x2c16   :  { %10015 = vrot.lane.b32.xlu0 %v14438_v60, %s13014_s20  ;;  %v9595_v40 = vsel %vm577_vm4, %v14498_v12, 0.0 }
0x2c35   :  { %9596 = vadd.xlane.f32.xlu0 %v9595_v40 }
0x2c75   :  { %v9552_v33 = vpop.xlane.xlu0 %9551 }
0x2c76   :  { %v9572_v41 = vsub.f32 %v9099_v5, %v9552_v33 }
0x2c78   :  { %v9581_v42 = vmul.f32 1.442695, %v9572_v41 }
0x2c79   :  { %v9555_v34 = vpop.xlane.xlu0 %9554  ;;  %v9558_v8 = vpop.xlane.xlu1 %9557 }
0x2c7a   :  { %12439 = vpow2.f32 %v9581_v42  ;;  %v9573_v43 = vsub.f32 %v9173_v11, %v9555_v34  ;;  %v9574_v3 = vsub.f32 %v9247_v14, %v9558_v8 }
0x2c7c   :  { %v9583_v46 = vmul.f32 1.442695, %v9573_v43  ;;  %v9585_v47 = vmul.f32 1.442695, %v9574_v3 }
0x2c7d   :  { %v9561_v48 = vpop.xlane.xlu0 %9560  ;;  %v9564_v49 = vpop.xlane.xlu1 %9563 }
0x2c7e   :  { %12441 = vpow2.f32 %v9583_v46  ;;  %v9575_v50 = vsub.f32 %v9321_v18, %v9561_v48  ;;  %v9576_v29 = vsub.f32 %v9395_v23, %v9564_v49  ;;  %v12231_v48 = vld [vmem:[#allocation16 + $0x18] sm:$0xff]  }
0x2c7f   :  { %12443 = vpow2.f32 %v9585_v47 }
0x2c80   :  { %v9587_v52 = vmul.f32 1.442695, %v9575_v50  ;;  %v9589_v53 = vmul.f32 1.442695, %v9576_v29 }
0x2c81   :  { %v9567_v15 = vpop.xlane.xlu0 %9566  ;;  %v9570_v54 = vpop.xlane.xlu1 %9569 }
0x2c82   :  { %12445 = vpow2.f32 %v9587_v52  ;;  %v9577_v55 = vsub.f32 %v9469_v25, %v9567_v15  ;;  %v9578_v56 = vsub.f32 %v9543_v26, %v9570_v54  ;;  %v12232_v52 = vld [vmem:[#allocation16 + $0x10] sm:$0xff]  }
0x2c83   :  { %12447 = vpow2.f32 %v9589_v53 }
0x2c84   :  { %v9591_v57 = vmul.f32 1.442695, %v9577_v55  ;;  %v9593_v44 = vmul.f32 1.442695, %v9578_v56 }
0x2c85   :  { %v9636_v58 = vpop.permute.xlu0 %9635  ;;  %v9712_v7 = vpop.permute.xlu1 %9711 }
0x2c86   :  { %12449 = vpow2.f32 %v9591_v57  ;;  %11947 = vmatpush3.msra.mxu1 %v9636_v58  ;;  %11952 = vmatpush3.msra.mxu0 %v9712_v7 }
0x2c87   :  { %v12440_v60 = vpop.eup %12439  ;;  %12451 = vpow2.f32 %v9593_v44  ;;  %11956 = vmatprep.subr.mxu1 %v13009_v0  ;;  %11961 = vmatprep.subr.mxu0 %v13009_v0 }
0x2c88   :  { %v9598_v37 = vsel %vm577_vm4, %v12440_v60, 0.0 }
0x2c89   :  { %9599 = vadd.xlane.f32.xlu1 %v9598_v37  ;;  %v9864_v14 = vpop.permute.xlu0 %9863  ;;  %v9788_v18 = vpop.permute.xlu1 %9787 }
0x2c8b   :  { %v12442_v45 = vpop.eup %12441 }
0x2c8c   :  { %v12444_v61 = vpop.eup %12443  ;;  %v9601_v10 = vsel %vm577_vm4, %v12442_v45, 0.0 }
0x2c8d   :  { %9602 = vadd.xlane.f32.xlu0 %v9601_v10  ;;  %v9604_v62 = vsel %vm577_vm4, %v12444_v61, 0.0  ;;  %v10016_v21 = vpop.permute.xlu0 %10015 }
0x2c8e   :  { %9605 = vadd.xlane.f32.xlu1 %v9604_v62 }
0x2c8f   :  { %v12446_v63 = vpop.eup %12445 }
0x2c90   :  { %v12448_v1 = vpop.eup %12447  ;;  %v9607_v2 = vsel %vm577_vm4, %v12446_v63, 0.0 }
0x2c91   :  { %9608 = vadd.xlane.f32.xlu0 %v9607_v2  ;;  %v9610_v4 = vsel %vm577_vm4, %v12448_v1, 0.0 }
0x2c92   :  { %9611 = vadd.xlane.f32.xlu1 %v9610_v4 }
0x2c93   :  { %v14509_v5 = vpop.eup %12449 }
0x2c94   :  { %v14511_v6 = vpop.eup %12451  ;;  %v9613_v9 = vsel %vm577_vm4, %v14509_v5, 0.0 }
0x2c95   :  { %9614 = vadd.xlane.f32.xlu0 %v9613_v9  ;;  %v9616_v11 = vsel %vm577_vm4, %v14511_v6, 0.0 }
0x2c96   :  { %9617 = vadd.xlane.f32.xlu1 %v9616_v11 }
0x2ca7   :  { %10091 = vrot.lane.b32.xlu1 %v14455_v38, %s13014_s20  ;;  %v9940_v38 = vpop.permute.xlu1 %9939 }
0x2cab   :  { %10167 = vrot.lane.b32.xlu0 %v14436_v59, %s13014_s20 }
0x2cbe   :  { %v9597_v16 = vpop.xlane.xlu0 %9596 }
0x2cbf   :  { %12453 = vrcp.f32 %v9597_v16 }
0x2ccc   :  { %v12454_v20 = vpop.eup %12453 }
0x2ccd   :  { %v9627_v17 = vmul.f32 %v12454_v20, %v14498_v12 }
0x2ccf   :  { %11949 = vmatmul.mubr.msk.f32.vlgmr.msra.gmra.mxu1 %vm577_vm4, %v9627_v17 }
0x2cd0   :  { %11957 = vmatpush3.msra.mxu1 %v9788_v18  ;;  %11958 = vmatprep.mubr.msk.f32.mxu1 %vm13010_vm0, %v13009_v0 }
0x2cd1   :  { %11966 = vmatprep.subr.mxu1 %v13009_v0 }
0x2d12   :  { %v9600_v23 = vpop.xlane.xlu1 %9599 }
0x2d13   :  { %12455 = vrcp.f32 %v9600_v23 }
0x2d16   :  { %v9603_v59 = vpop.xlane.xlu0 %9602 }
0x2d17   :  { %12457 = vrcp.f32 %v9603_v59  ;;  %v9606_v19 = vpop.xlane.xlu1 %9605 }
0x2d18   :  { %12459 = vrcp.f32 %v9606_v19 }
0x2d1a   :  { %v9609_v22 = vpop.xlane.xlu0 %9608 }
0x2d1b   :  { %12461 = vrcp.f32 %v9609_v22  ;;  %v9612_v31 = vpop.xlane.xlu1 %9611 }
0x2d1c   :  { %12463 = vrcp.f32 %v9612_v31 }
0x2d1e   :  { %v9615_v24 = vpop.xlane.xlu0 %9614 }
0x2d1f   :  { %12465 = vrcp.f32 %v9615_v24  ;;  %v9618_v25 = vpop.xlane.xlu1 %9617 }
0x2d20   :  { %v12456_v26 = vpop.eup %12455  ;;  %12467 = vrcp.f32 %v9618_v25 }
0x2d21   :  { %v9628_v28 = vmul.f32 %v12456_v26, %v12440_v60 }
0x2d22   :  { %v10168_v42 = vpop.permute.xlu0 %10167 }
0x2d23   :  { %11954 = vmatmul.mubr.msk.f32.vlgmr.msra.gmra.mxu0 %vm577_vm4, %v9628_v28  ;;  %v10092_v33 = vpop.permute.xlu1 %10091 }
0x2d24   :  { %v12458_v32 = vpop.eup %12457  ;;  %11962 = vmatpush3.msra.mxu0 %v9864_v14  ;;  %11963 = vmatprep.mubr.msk.f32.mxu0 %vm13010_vm0, %v13009_v0 }
0x2d25   :  { %v12460_v30 = vpop.eup %12459  ;;  %v9629_v13 = vmul.f32 %v12458_v32, %v12442_v45  ;;  %11971 = vmatprep.subr.mxu0 %v13009_v0 }
0x2d26   :  { %v9630_v35 = vmul.f32 %v12460_v30, %v12444_v61 }
0x2d27   :  { %11959 = vmatmul.mubr.msk.f32.vlgmr.msra.gmra.mxu1 %vm577_vm4, %v9629_v13 }
0x2d28   :  { %v12462_v36 = vpop.eup %12461  ;;  %11964 = vmatmul.mubr.msk.f32.vlgmr.msra.gmra.mxu0 %vm577_vm4, %v9630_v35  ;;  %11967 = vmatpush3.msra.mxu1 %v9940_v38  ;;  %v11033_v38 = vld [vmem:[#allocation17 + $0x1] ss:$0 sm:$0xff] }
0x2d29   :  { %v12464_v39 = vpop.eup %12463  ;;  %v9631_v12 = vmul.f32 %v12462_v36, %v12446_v63  ;;  %11972 = vmatpush3.msra.mxu0 %v10016_v21  ;;  %11968 = vmatprep.mubr.msk.f32.mxu1 %vm13010_vm0, %v13009_v0 }
0x2d2a   :  { %v9632_v40 = vmul.f32 %v12464_v39, %v12448_v1  ;;  %11973 = vmatprep.mubr.msk.f32.mxu0 %vm13010_vm0, %v13009_v0  ;;  %11976 = vmatprep.subr.mxu1 %v13009_v0 }
0x2d2b   :  { %11981 = vmatprep.subr.mxu0 %v13009_v0  ;;  %11969 = vmatmul.mubr.msk.f32.vlgmr.msra.gmra.mxu1 %vm577_vm4, %v9631_v12 }
0x2d2c   :  { %v12466_v41 = vpop.eup %12465  ;;  %11974 = vmatmul.mubr.msk.f32.vlgmr.msra.gmra.mxu0 %vm577_vm4, %v9632_v40  ;;  %11977 = vmatpush3.msra.mxu1 %v10092_v33 }
0x2d2d   :  { %v12468_v34 = vpop.eup %12467  ;;  %v9633_v8 = vmul.f32 %v12466_v41, %v14509_v5  ;;  %11982 = vmatpush3.msra.mxu0 %v10168_v42  ;;  %11978 = vmatprep.mubr.msk.f32.mxu1 %vm13010_vm0, %v13009_v0  ;;  %v12233_v42 = vld [vmem:[#allocation28 + $0x18] sm:$0xff]  }
0x2d2e   :  { %v9634_v43 = vmul.f32 %v12468_v34, %v14511_v6  ;;  %11983 = vmatprep.mubr.msk.f32.mxu0 %vm13010_vm0, %v13009_v0  ;;  %11986 = vmatprep.subr.bf16.mxu1 %v13009_v0  ;;  %v12235_v34 = vld [vmem:[%s14663_s15 + $0x38] sm:$0xff]  }
0x2d2f   :  { %11979 = vmatmul.mubr.msk.f32.vlgmr.msra.gmra.mxu1 %vm577_vm4, %v9633_v8  ;;  %11994 = vmatprep.subr.bf16.mxu0 %v13009_v0 }
0x2d30   :  { %11984 = vmatmul.mubr.msk.f32.vlgmr.msra.gmra.mxu0 %vm577_vm4, %v9634_v43  ;;  %11990 = vmatprep.mubr.msk.bf16.mxu1 %vm13010_vm0, %v13009_v0 }
0x2d31   :  { %11998 = vmatprep.mubr.msk.bf16.mxu0 %vm13010_vm0, %v13009_v0  ;;  %11987 = vmatpush3.bf16.msra.mxu1 %v12231_v48 }
0x2d32   :  { %11988 = vmatprep.subr.bf16.mxu1 %v13009_v0  ;;  %11995 = vmatpush3.bf16.msra.mxu0 %v12233_v42  ;;  %v11058_v42 = vld [vmem:[#allocation26 + $0x1] ss:$0 sm:$0xff] }
0x2d33   :  { %11996 = vmatprep.subr.bf16.mxu0 %v13009_v0 }
0x2d35   :  { %11989 = vmatpush3.bf16.msra.mxu1 %v12232_v52 }
0x2d36   :  { %12002 = vmatprep.subr.bf16.mxu1 %v13009_v0 }
0x2d8f   :  { %v9707_v3 = vpop.f32.mrf.mxu1 }
0x2d91   :  { %v11950_v46 = vpop.f32.mrf.mxu1 }
0x2de3   :  { %v9783_v47 = vpop.f32.mrf.mxu0 }
0x2de5   :  { %v11955_v49 = vpop.f32.mrf.mxu0 }
0x2de7   :  { %v9859_v50 = vpop.f32.mrf.mxu1 }
0x2de8   :  { %v9935_v29 = vpop.f32.mrf.mxu0 }
0x2de9   :  { %v11960_v53 = vpop.f32.mrf.mxu1 }
0x2dea   :  { %v11965_v15 = vpop.f32.mrf.mxu0 }
0x2deb   :  { %v10011_v54 = vpop.f32.mrf.mxu1 }
0x2dec   :  { %v10087_v55 = vpop.f32.mrf.mxu0 }
0x2ded   :  { %v12171_v56 = vpack.i.bf16 %v10087_v55, %v9783_v47  ;;  %v11970_v57 = vpop.f32.mrf.mxu1 }
0x2dee   :  { %v11975_v44 = vpop.f32.mrf.mxu0 }
0x2def   :  { %12172 = vrot.lane.b32.xlu1 %v12171_v56, %s13016_s28  ;;  %v10163_v58 = vpop.f32.mrf.mxu1 }
0x2df0   :  { %v12176_v7 = vpack.i.bf16 %v10163_v58, %v9859_v50  ;;  %v10239_v60 = vpop.f32.mrf.mxu0  ;;  %v12236_v58 = vld [vmem:[%s14663_s15 + $0x30] sm:$0xff]  }
0x2df1   :  { %v12181_v37 = vpack.i.bf16 %v10239_v60, %v9935_v29  ;;  %v11980_v45 = vpop.f32.mrf.mxu1  ;;  %v11037_v29 = vld [vmem:[#allocation22 + $0x1] ss:$0 sm:$0xff]  ;;  %v12238_v60 = vld [vmem:[%s14663_s15 + $0x20] sm:$0xff]  }
0x2df2   :  { %v11985_v61 = vpop.f32.mrf.mxu0  ;;  %12177 = vrot.lane.b32.xlu0 %v12176_v7, %s13015_s21  ;;  %v12237_v7 = vld [vmem:[%s14663_s15 + $0x28] sm:$0xff]  }
0x2df3   :  { %12182 = vrot.lane.b32.xlu1 %v12181_v37, %s13017_s17  ;;  %v11047_v37 = vld [vmem:[#allocation29 + $0x1] ss:$0 sm:$0xff] }
0x2e61   :  { %v12173_v10 = vpop.permute.xlu1 %12172 }
0x2e62   :  { %v12175_v62 = vunpack.i.h.bf16 %v12173_v10  ;;  %v12174_v63 = vunpack.i.l.bf16 %v12173_v10 }
0x2e64   :  { %v12178_v1 = vpop.permute.xlu0 %12177  ;;  %v10270_v6 = vsel %vm577_vm4, %v10011_v54, %v12175_v62  ;;  %v10255_v9 = vsel %vm577_vm4, %v9707_v3, %v12174_v63  ;;  %v11038_v54 = vld [vmem:[#allocation23 + $0x1] ss:$0 sm:$0xff] }
0x2e65   :  { %v12180_v2 = vunpack.i.h.bf16 %v12178_v1  ;;  %v12179_v4 = vunpack.i.l.bf16 %v12178_v1  ;;  %v12183_v5 = vpop.permute.xlu1 %12182 }
0x2e66   :  { %v12185_v11 = vunpack.i.h.bf16 %v12183_v5  ;;  %v12184_v14 = vunpack.i.l.bf16 %v12183_v5 }
0x2e67   :  { %v10256_v21 = vsel %vm1893_vm5, %v10255_v9, %v12179_v4  ;;  %v10271_v16 = vsel %vm1893_vm5, %v10270_v6, %v12180_v2  ;;  %v11051_v6 = vld [vmem:[#allocation31 + $0x1] ss:$0 sm:$0xff] }
0x2e68   :  { %v10272_v20 = vsel %vm1895_vm6, %v10271_v16, %v12185_v11  ;;  %v10257_v17 = vsel %vm1895_vm6, %v10256_v21, %v12184_v14 }
0x2e69   :  { %v10273_v18 = vpack.c.bf16 %v10272_v20, %v10257_v17 }
0x2e6b   :  { %11991 = vmatmul.mubr.msk.bf16.vlgmr.msra.gmra.mxu1 %vm511_vm3, %v10273_v18 }
0x2e6c   :  { %12010 = vmatprep.mubr.msk.bf16.mxu1 %vm13010_vm0, %v13009_v0  ;;  %12003 = vmatpush3.bf16.msra.mxu1 %v12235_v34 }
0x2e6d   :  { %12004 = vmatprep.subr.bf16.mxu1 %v13009_v0 }
0x2e70   :  { %12005 = vmatpush3.bf16.msra.mxu1 %v12236_v58  ;;  %v12240_v58 = vld [vmem:[%s13222_s13] sm:$0xff]  }
0x2e71   :  { %12006 = vmatprep.subr.bf16.mxu1 %v13009_v0 }
0x2e74   :  { %12007 = vmatpush3.bf16.msra.mxu1 %v12237_v7 }
0x2e75   :  { %12008 = vmatprep.subr.bf16.mxu1 %v13009_v0 }
0x2e78   :  { %12009 = vmatpush3.bf16.msra.mxu1 %v12238_v60 }
0x2f2b   :  { %v10327_v23 = vpop.f32.mrf.mxu1 }
0x2f2c   :  { %v10328_v59 = vadd.f32 %v11033_v38, %v10327_v23 }
0x2f2d   :  { %v11992_v19 = vpop.f32.mrf.mxu1 }
0x2f2e   :  { %v10334_v22 = vadd.f32 %v10328_v59, %v14406_v51 }
0x2f2f   :  { %v10330_v31 = vpop.f32.mrf.mxu1 }
0x2f30   :  { %v10331_v24 = vadd.f32 %v11033_v38, %v10330_v31  ;;  %v10338_v25 = vsel %vm511_vm3, %v10334_v22, 0.0 }
0x2f31   :  { %10339 = vadd.xlane.f32.xlu0 %v10338_v25  ;;  %v11993_v26 = vpop.f32.mrf.mxu1 }
0x2f32   :  { %v10335_v28 = vadd.f32 %v10331_v24, %v14408_v27  ;;  %v12234_v27 = vld [vmem:[#allocation28 + $0x10] sm:$0xff]  }
0x2f33   :  { %11997 = vmatpush3.bf16.msra.mxu0 %v12234_v27 }
0x2f34   :  { %v10341_v32 = vsel %vm511_vm3, %v10335_v28, 0.0  ;;  %12014 = vmatprep.subr.bf16.mxu0 %v13009_v0 }
0x2f35   :  { %10342 = vadd.xlane.f32.xlu1 %v10341_v32 }
0x2fba   :  { %v10340_v30 = vpop.xlane.xlu0 %10339 }
0x2fbb   :  { %v10344_v13 = vmul.f32 0.03125, %v10340_v30 }
0x2fbd   :  { %v10346_v35 = vsub.f32 %v10334_v22, %v10344_v13 }
0x2fbe   :  { %v10343_v36 = vpop.xlane.xlu1 %10342 }
0x2fbf   :  { %v10345_v39 = vmul.f32 0.03125, %v10343_v36  ;;  %v10348_v12 = vmul.f32 %v10346_v35, %v10346_v35 }
0x2fc1   :  { %v10347_v40 = vsub.f32 %v10335_v28, %v10345_v39  ;;  %v10350_v51 = vsel %vm511_vm3, %v10348_v12, 0.0 }
0x2fc2   :  { %10351 = vadd.xlane.f32.xlu0 %v10350_v51 }
0x2fc3   :  { %v10349_v33 = vmul.f32 %v10347_v40, %v10347_v40 }
0x2fc5   :  { %v10353_v41 = vsel %vm511_vm3, %v10349_v33, 0.0  ;;  %v11057_v33 = vld [vmem:[#allocation25 + $0x1] ss:$0 sm:$0xff] }
0x2fc6   :  { %10354 = vadd.xlane.f32.xlu0 %v10353_v41 }
0x304b   :  { %v10352_v8 = vpop.xlane.xlu0 %10351 }
0x304c   :  { %v10356_v43 = vmul.f32 0.03125, %v10352_v8 }
0x304e   :  { %v10358_v3 = vadd.f32 1e-05, %v10356_v43 }
0x304f   :  { %v10355_v46 = vpop.xlane.xlu0 %10354 }
0x3050   :  { %12469 = vrsqrt.f32 %v10358_v3  ;;  %v10357_v47 = vmul.f32 0.03125, %v10355_v46 }
0x3052   :  { %v10359_v48 = vadd.f32 1e-05, %v10357_v47 }
0x3054   :  { %12471 = vrsqrt.f32 %v10359_v48 }
0x305d   :  { %v12470_v49 = vpop.eup %12469 }
0x305e   :  { %v10362_v50 = vmul.f32 %v12470_v49, %v10346_v35 }
0x3060   :  { %v10368_v53 = vmul.f32 %v11037_v29, %v10362_v50 }
0x3061   :  { %v12472_v52 = vpop.eup %12471 }
0x3062   :  { %v10363_v15 = vmul.f32 %v12472_v52, %v10347_v40  ;;  %v10374_v56 = vadd.f32 %v11038_v54, %v10368_v53 }
0x3064   :  { %v10369_v55 = vmul.f32 %v11037_v29, %v10363_v15 }
0x3066   :  { %v10375_v57 = vadd.f32 %v11038_v54, %v10369_v55 }
0x3068   :  { %v10392_v44 = vpack.c.bf16 %v10375_v57, %v10374_v56 }
0x306a   :  { %11999 = vmatmul.mubr.msk.bf16.vlgmr.msra.gmra.mxu0 %vm511_vm3, %v10392_v44  ;;  %v12239_v44 = vld [vmem:[%s13222_s13 + $0x8] sm:$0xff]   ;;  %s13018_s13 = smov [#allocation35]  }
0x306b   :  { %12018 = vmatprep.mubr.msk.bf16.mxu0 %vm13010_vm0, %v13009_v0  ;;  %12015 = vmatpush3.bf16.msra.mxu0 %v12239_v44  ;;  %s10697_s29 = sshll.u32 %s13018_s13, 4  ;;  %s10698_s29 = int_to_ptr.vmem [resolvable:$true] %s10697_s29 }
0x306c   :  { %12016 = vmatprep.subr.bf16.mxu0 %v13009_v0  ;;  %s12901_s0 = scalar_lea.vmem %s10698_s29, 32  ;;  %p12906_p8 = scmp.lt.s32.totalorder %s10698_s29, %s10698_s29 }
0x306d   :  { %p12902_p7 = scmp.ne.s32.totalorder %s10698_s29, %s12901_s0  ;;  %p12907_p9 = scmp.lt.s32.totalorder %s12901_s0, %s12901_s0 }
0x306f   :  { %12017 = vmatpush3.bf16.msra.mxu0 %v12240_v58  ;;  %p12908_p10 = por %p12907_p9, %p12906_p8 }
0x3071   :  { %p12909_p11 = pnand %p12908_p10, %p12902_p7 }
0x312a   :  { %v10446_v45 = vpop.f32.mrf.mxu0 }
0x312b   :  { %v10447_v10 = vadd.f32 %v11047_v37, %v10446_v45 }
0x312c   :  { %v12000_v61 = vpop.f32.mrf.mxu0 }
0x312d   :  { %v10453_v2 = vmax.f32 %v10447_v10, 0.0 }
0x312e   :  { %v10449_v62 = vpop.f32.mrf.mxu0 }
0x312f   :  { %v10450_v63 = vadd.f32 %v11047_v37, %v10449_v62 }
0x3130   :  { %v12001_v1 = vpop.f32.mrf.mxu0 }
0x3131   :  { %v10454_v4 = vmax.f32 %v10450_v63, 0.0  ;;  %v11059_v63 = vld [vmem:[#allocation32] ss:$0 sm:$0xff] }
0x3133   :  { %v10455_v5 = vpack.c.bf16 %v10454_v4, %v10453_v2 }
0x3135   :  { %12011 = vmatmul.mubr.msk.bf16.vlgmr.msra.gmra.mxu1 %vm2122_vm7, %v10455_v5  ;;  %v11060_v5 = vld [vmem:[#allocation34] ss:$0 sm:$0xff] }
0x31f5   :  { %v10521_v9 = vpop.f32.mrf.mxu1 }
0x31f6   :  { %v10522_v11 = vadd.f32 %v11051_v6, %v10521_v9 }
0x31f7   :  { %v12012_v14 = vpop.f32.mrf.mxu1 }
0x31f8   :  { %v10528_v21 = vadd.f32 %v10522_v11, %v10374_v56 }
0x31f9   :  { %v10524_v16 = vpop.f32.mrf.mxu1 }
0x31fa   :  { %v10525_v20 = vadd.f32 %v11051_v6, %v10524_v16  ;;  %v10532_v17 = vsel %vm511_vm3, %v10528_v21, 0.0 }
0x31fb   :  { %10533 = vadd.xlane.f32.xlu1 %v10532_v17  ;;  %v12013_v18 = vpop.f32.mrf.mxu1  ;;  %v11061_v17 = vld [vmem:[%s13227_s25] ss:$0 sm:$0xff] }
0x31fc   :  { %v10529_v38 = vadd.f32 %v10525_v20, %v10375_v57 }
0x31fe   :  { %v10535_v23 = vsel %vm511_vm3, %v10529_v38, 0.0 }
0x31ff   :  { %10536 = vadd.xlane.f32.xlu0 %v10535_v23 }
0x3284   :  { %v10534_v59 = vpop.xlane.xlu1 %10533 }
0x3285   :  { %v10538_v19 = vmul.f32 0.03125, %v10534_v59 }
0x3287   :  { %v10540_v22 = vsub.f32 %v10528_v21, %v10538_v19 }
0x3288   :  { %v10537_v31 = vpop.xlane.xlu0 %10536 }
0x3289   :  { %v10539_v24 = vmul.f32 0.03125, %v10537_v31  ;;  %v10542_v25 = vmul.f32 %v10540_v22, %v10540_v22 }
0x328b   :  { %v10541_v26 = vsub.f32 %v10529_v38, %v10539_v24  ;;  %v10544_v28 = vsel %vm511_vm3, %v10542_v25, 0.0 }
0x328c   :  { %10545 = vadd.xlane.f32.xlu1 %v10544_v28 }
0x328d   :  { %v10543_v32 = vmul.f32 %v10541_v26, %v10541_v26 }
0x328f   :  { %v10547_v30 = vsel %vm511_vm3, %v10543_v32, 0.0 }
0x3290   :  { %10548 = vadd.xlane.f32.xlu0 %v10547_v30 }
0x3315   :  { %v10546_v13 = vpop.xlane.xlu1 %10545 }
0x3316   :  { %v10550_v35 = vmul.f32 0.03125, %v10546_v13 }
0x3318   :  { %v10552_v36 = vadd.f32 1e-05, %v10550_v35 }
0x3319   :  { %v10549_v39 = vpop.xlane.xlu0 %10548 }
0x331a   :  { %12473 = vrsqrt.f32 %v10552_v36  ;;  %v10551_v12 = vmul.f32 0.03125, %v10549_v39 }
0x331c   :  { %v10553_v40 = vadd.f32 1e-05, %v10551_v12 }
0x331e   :  { %12475 = vrsqrt.f32 %v10553_v40 }
0x3327   :  { %v12474_v51 = vpop.eup %12473 }
0x3328   :  { %v10556_v41 = vmul.f32 %v12474_v51, %v10540_v22 }
0x332a   :  { %v10562_v27 = vmul.f32 %v11057_v33, %v10556_v41 }
0x332b   :  { %v12476_v34 = vpop.eup %12475 }
0x332c   :  { %v10568_v8 = vadd.f32 %v11058_v42, %v10562_v27  ;;  %v10557_v43 = vmul.f32 %v12476_v34, %v10541_v26 }
0x332e   :  { %v10572_v3 = vsel %vm511_vm3, %v10568_v8, 0.0  ;;  %v10563_v46 = vmul.f32 %v11057_v33, %v10557_v43 }
0x332f   :  { %10573 = vadd.xlane.f32.xlu1 %v10572_v3 }
0x3330   :  { %v10569_v47 = vadd.f32 %v11058_v42, %v10563_v46 }
0x3332   :  { %v10575_v48 = vsel %vm511_vm3, %v10569_v47, 0.0 }
0x3333   :  { %10576 = vadd.xlane.f32.xlu0 %v10575_v48 }
0x33b8   :  { %v10574_v49 = vpop.xlane.xlu1 %10573 }
0x33b9   :  { %v10578_v50 = vmul.f32 0.03125, %v10574_v49 }
0x33bb   :  { %v10580_v29 = vsub.f32 %v10568_v8, %v10578_v50 }
0x33bc   :  { %v10577_v52 = vpop.xlane.xlu0 %10576 }
0x33bd   :  { %v10579_v53 = vmul.f32 0.03125, %v10577_v52  ;;  %v10582_v15 = vmul.f32 %v10580_v29, %v10580_v29 }
0x33bf   :  { %v10581_v54 = vsub.f32 %v10569_v47, %v10579_v53  ;;  %v10584_v55 = vsel %vm511_vm3, %v10582_v15, 0.0 }
0x33c0   :  { %10585 = vadd.xlane.f32.xlu1 %v10584_v55 }
0x33c1   :  { %v10583_v56 = vmul.f32 %v10581_v54, %v10581_v54 }
0x33c3   :  { %v10587_v57 = vsel %vm511_vm3, %v10583_v56, 0.0 }
0x33c4   :  { %10588 = vadd.xlane.f32.xlu0 %v10587_v57 }
0x3449   :  { %v10586_v7 = vpop.xlane.xlu1 %10585 }
0x344a   :  { %v10590_v60 = vmul.f32 0.03125, %v10586_v7 }
0x344c   :  { %v10592_v37 = vadd.f32 1e-05, %v10590_v60 }
0x344d   :  { %v10589_v45 = vpop.xlane.xlu0 %10588 }
0x344e   :  { %12477 = vrsqrt.f32 %v10592_v37  ;;  %v10591_v61 = vmul.f32 0.03125, %v10589_v45 }
0x3450   :  { %v10593_v10 = vadd.f32 1e-05, %v10591_v61 }
0x3452   :  { %12479 = vrsqrt.f32 %v10593_v10 }
0x345b   :  { %v12478_v62 = vpop.eup %12477 }
0x345c   :  { %v10596_v1 = vmul.f32 %v12478_v62, %v10580_v29 }
0x345e   :  { %v10604_v2 = vmul.f32 %v11059_v63, %v10596_v1 }
0x345f   :  { %v12480_v4 = vpop.eup %12479 }
0x3460   :  { %v10597_v6 = vmul.f32 %v12480_v4, %v10581_v54  ;;  %v10612_v9 = vadd.f32 %v11060_v5, %v10604_v2 }
0x3462   :  { %v10605_v11 = vmul.f32 %v11059_v63, %v10597_v6  ;;  %v10615_v14 = vrot.slane %v10612_v9, 7 }
0x3464   :  { %v10613_v0 = vadd.f32 %v11060_v5, %v10605_v11 }
0x3466   :  { %v10618_v21 = vrot.slane %v10613_v0, 6 }
0x3468   :  { %v10621_v16 = vsel %vm10620_vm8, %v10615_v14, %v10618_v21 }
0x3469   :  { %v10627_v20 = vpack.c.bf16 %v10621_v16, %v10621_v16 }
0x346b   :  { %12019 = vmatmul.mubr.msk.bf16.vlgmr.msra.gmra.mxu0 %vm511_vm3, %v10627_v20 }
0x352b   :  { %v10683_v18 = vpop.f32.mrf.mxu0 }
0x352c   :  { %v10684_v38 = vadd.f32 %v11061_v17, %v10683_v18 }
0x352d   :  { %v12020_v23 = vpop.f32.mrf.mxu0 }
0x352e   :  { %10690 = vst.msk [vmem:[#allocation35] sm:$0x3] %vm10689_vm9, %v10684_v38 }
0x352f   :  { %v10686_v59 = vpop.f32.mrf.mxu0 }
0x3530   :  { %12912 = shalt.err (!%p12909_p11)
}
0x3531   :  { %10700 = dma.vmem_to_hbm [thread:$0]  %s10698_s29, 32, %s13232_s8, [#allocation4]   ;;  %v12021_v19 = vpop.f32.mrf.mxu0 }
0x3532   :  { %12943 = dma.done.wait [#allocation4], 32  }
0x3533   :  { %12944 = vsyncadd [#allocation4], 4294967264 }
0x3534   :  { %10704 = vsyncpa [#allocation3], 1 }
0x3535   :  { %10705 = vsyncpa [#allocation6], 1 }
0x3536   :  { %10706 = vsyncpa [#allocation9], 1 }
0x3537   :  { %10707 = vsyncpa [#allocation12], 1 }
0x3538   :  { %10708 = vsyncpa [#allocation15], 1 }
0x3539   :  { %10709 = vsyncpa [#allocation18], 1 }
0x353a   :  { %10710 = vsyncpa [#allocation21], 1 }
0x353b   :  { %10711 = vsyncpa [#allocation24], 1 }
0x353c   :  { %10712 = vsyncpa [#allocation27], 1 }
0x353d   :  { %10713 = vsyncpa [#allocation30], 1 }
0x353e   :  { %10714 = vsyncpa [#allocation33], 1 }
0x353f   :  { %10715 = vsyncpa [#allocation4], 1 }

</bundles_post_ra>
